<compile_context>
chip_gen: v5e
topology: v5e:2x2
jax: 0.10.0
libtpu: 0.0.40
codegen_flags: <defaults>
</compile_context>

<pallas_src>
import functools

import jax
import jax.numpy as jnp
from jax.experimental import pallas as pl
from jax.experimental.pallas import tpu as pltpu


# ----------------------------------------------------------------------------
# Pallas kernel: one grid step == Bt windows (rows flattened to (Bt*N, C)).
# ----------------------------------------------------------------------------
def _window_msa_kernel(x_ref, wq_ref, wk_ref, wv_ref, bq_ref, bk_ref, bv_ref,
                       relb_ref, *rest, num_heads, block_windows, n_tokens,
                       has_mask):
    if has_mask:
        mask_ref, wproj_ref, bproj_ref, o_ref = rest
    else:
        wproj_ref, bproj_ref, o_ref = rest

    Bt, N = block_windows, n_tokens
    x = x_ref[...]                                  # (Bt*N, C) bf16
    M, C = x.shape

    if has_mask:
        shift_mask = mask_ref[...]                  # (Bt, N, N) f32, resident

    acc = jnp.zeros((M, C), jnp.float32)

    # Static head loop: back-to-back MXU matmuls. Head split is done purely via
    # the leading axis of the (H, C, d) / (H, d, C) weights -- no lane slicing,
    # no lane-axis concatenate.
    for h in range(num_heads):
        q = jnp.dot(x, wq_ref[h], preferred_element_type=jnp.float32) + bq_ref[h]
        k = jnp.dot(x, wk_ref[h], preferred_element_type=jnp.float32) + bk_ref[h]
        v = jnp.dot(x, wv_ref[h], preferred_element_type=jnp.float32) + bv_ref[h]

        q3 = q.reshape(Bt, N, -1).astype(jnp.bfloat16)   # leading-dim split only
        k3 = k.reshape(Bt, N, -1).astype(jnp.bfloat16)
        v3 = v.reshape(Bt, N, -1).astype(jnp.bfloat16)

        # (Bt, N, N) attention logits, fp32 accumulation on the MXU.
        s = jnp.einsum("bnd,bmd->bnm", q3, k3,
                       preferred_element_type=jnp.float32)
        s = s + relb_ref[h]                         # (N, N) rel-pos bias, broadcast
        if has_mask:
            s = s + shift_mask                      # (Bt, N, N) shift mask

        # numerically stable softmax (fp32); reciprocal on the EUP.
        s = s - jnp.max(s, axis=-1, keepdims=True)
        p = jnp.exp(s)
        p = p * pl.reciprocal(jnp.sum(p, axis=-1, keepdims=True), approx=True)

        o = jnp.einsum("bnm,bmd->bnd", p.astype(jnp.bfloat16), v3,
                       preferred_element_type=jnp.float32)    # (Bt, N, d)

        # Per-head slice of the output projection, accumulated:
        #   concat_h(o_h) @ Wproj  ==  sum_h  o_h @ Wproj[h*d:(h+1)*d, :]
        acc = acc + jnp.dot(o.reshape(M, -1).astype(jnp.bfloat16), wproj_ref[h],
                            preferred_element_type=jnp.float32)

    o_ref[...] = (acc + bproj_ref[...]).astype(o_ref.dtype)


# ----------------------------------------------------------------------------
# Wrapper: parameter prep, rel-pos-bias gather, block-size selection.
# ----------------------------------------------------------------------------
def _double_step_seq(step1, len1, step2, len2):
    seq1 = jnp.arange(0, step1 * len1, step1)
    seq2 = jnp.arange(0, step2 * len2, step2)
    return (seq1[:, None] + seq2[None, :]).reshape(1, -1)


def _pick_block_windows(B, N, nW=None, target_rows=1024):
    """Largest Bt that divides B, is a multiple of nW (static per-block mask
    pattern), keeps Bt*N rows modest (v7x VMEM), satisfies the sublane rule,
    and leaves >= 2 grid steps so both v7x TensorCores get work."""
    base = 1 if nW is None else nW
    assert B % base == 0
    best = None
    for k in range(1, B // base + 1):
        if (B // base) % k:
            continue
        bt = base * k
        if bt * N > target_rows:
            continue
        if (bt * N) % 8:
            continue
        if B // bt < 2 and best is not None:
            continue
        best = bt
    return best if best is not None else B


def window_msa_forward(x, params, *, num_heads, window_size, mask=None,
                       block_windows=None):
    """Pallas implementation of WindowMSA.forward.

    x:      (B, N, C) with N == window_size[0] * window_size[1]
    params: dict with wqkv (C,3C), bqkv (3C,), wproj (C,C), bproj (C,),
            rel_pos_bias_table ((2Wh-1)*(2Ww-1), H)
    mask:   optional (nW, N, N); B must be a multiple of nW.
    """
    B, N, C = x.shape
    Wh, Ww = window_size
    assert N == Wh * Ww
    H = num_heads
    d = C // H
    scale = d ** (-0.5)

    nW = None if mask is None else mask.shape[0]
    if mask is not None:
        assert B % nW == 0
    Bt = block_windows or _pick_block_windows(B, N, nW)
    assert B % Bt == 0
    if mask is not None:
        assert Bt % nW == 0

    # relative position index (same construction as the PyTorch module)
    rel_index_coords = _double_step_seq(2 * Ww - 1, Wh, 1, Ww)
    rel_position_index = jnp.flip(rel_index_coords + rel_index_coords.T, axis=1)
    rel_bias = params["rel_pos_bias_table"][rel_position_index.reshape(-1)]
    rel_bias = rel_bias.reshape(N, N, H).transpose(2, 0, 1).astype(jnp.float32)  # (H,N,N)

    # Head-major weight layout (prepared once, outside the kernel).
    # qkv Linear output columns are ordered [3, H, d] (matches the torch reshape).
    wqkv = params["wqkv"].astype(jnp.float32)            # (C, 3C)
    bqkv = params["bqkv"].astype(jnp.float32)            # (3C,)
    wq, wk, wv = wqkv[:, :C], wqkv[:, C:2 * C], wqkv[:, 2 * C:]
    bq, bk, bv = bqkv[:C], bqkv[C:2 * C], bqkv[2 * C:]

    def per_head_w(w):                                   # (C, H*d) -> (H, C, d)
        return w.reshape(C, H, d).transpose(1, 0, 2)

    wq_h = (per_head_w(wq) * scale).astype(jnp.bfloat16)   # scale folded into Q
    wk_h = per_head_w(wk).astype(jnp.bfloat16)
    wv_h = per_head_w(wv).astype(jnp.bfloat16)
    bq_h = (bq.reshape(H, 1, d) * scale).astype(jnp.float32)
    bk_h = bk.reshape(H, 1, d).astype(jnp.float32)
    bv_h = bv.reshape(H, 1, d).astype(jnp.float32)

    wproj_h = params["wproj"].astype(jnp.float32).reshape(H, d, C).astype(jnp.bfloat16)
    bproj = params["bproj"].reshape(1, C).astype(jnp.float32)

    # Lane-dense 2D in/out slabs; bf16 MXU inputs (fp32 accumulation in-kernel).
    x2d = x.reshape(B * N, C).astype(jnp.bfloat16)

    inputs = [x2d, wq_h, wk_h, wv_h, bq_h, bk_h, bv_h, rel_bias]
    in_specs = [
        pl.BlockSpec((Bt * N, C), lambda b: (b, 0)),        # x block
        pl.BlockSpec((H, C, d), lambda b: (0, 0, 0)),       # resident per-head Wq
        pl.BlockSpec((H, C, d), lambda b: (0, 0, 0)),       # Wk
        pl.BlockSpec((H, C, d), lambda b: (0, 0, 0)),       # Wv
        pl.BlockSpec((H, 1, d), lambda b: (0, 0, 0)),       # bq (scaled)
        pl.BlockSpec((H, 1, d), lambda b: (0, 0, 0)),       # bk
        pl.BlockSpec((H, 1, d), lambda b: (0, 0, 0)),       # bv
        pl.BlockSpec((H, N, N), lambda b: (0, 0, 0)),       # rel-pos bias (un-broadcast)
    ]
    has_mask = mask is not None
    if has_mask:
        # Small (Bt, N, N) mask tile; valid because Bt % nW == 0 so within a block
        # window i always uses mask[i % nW].  No O(B) broadcast in HBM.
        mask_block = jnp.tile(mask.astype(jnp.float32), (Bt // nW, 1, 1))
        inputs.append(mask_block)
        in_specs.append(pl.BlockSpec((Bt, N, N), lambda b: (0, 0, 0)))
    inputs += [wproj_h, bproj]
    in_specs += [
        pl.BlockSpec((H, d, C), lambda b: (0, 0, 0)),       # per-head rows of Wproj
        pl.BlockSpec((1, C), lambda b: (0, 0)),             # bproj
    ]

    kernel = functools.partial(_window_msa_kernel, num_heads=H, block_windows=Bt,
                               n_tokens=N, has_mask=has_mask)

    out2d = pl.pallas_call(
        kernel,
        out_shape=jax.ShapeDtypeStruct((B * N, C), x.dtype),
        grid_spec=pltpu.PrefetchScalarGridSpec(
            num_scalar_prefetch=0,
            grid=(B // Bt,),
            in_specs=in_specs,
            out_specs=pl.BlockSpec((Bt * N, C), lambda b: (b, 0)),
        ),
        compiler_params=pltpu.CompilerParams(
            dimension_semantics=("parallel",),
            vmem_limit_bytes=48 * 1024 * 1024,   # safe on v5e/v6e/v7x
        ),
    )(*inputs)

    return out2d.reshape(B, N, C)


# ----------------------------------------------------------------------------
# Pure-JAX fp32 reference (mirrors the PyTorch forward) for a correctness check.
# ----------------------------------------------------------------------------
def window_msa_reference(x, params, *, num_heads, window_size, mask=None):
    B, N, C = x.shape
    Wh, Ww = window_size
    head_dim = C // num_heads
    scale = head_dim ** (-0.5)

    qkv = x @ params["wqkv"] + params["bqkv"]
    qkv = qkv.reshape(B, N, 3, num_heads, head_dim).transpose(2, 0, 3, 1, 4)
    q, k, v = qkv[0], qkv[1], qkv[2]
    q = q * scale
    attn = jnp.einsum("bhnd,bhmd->bhnm", q, k)

    rel_index_coords = _double_step_seq(2 * Ww - 1, Wh, 1, Ww)
    rel_position_index = jnp.flip(rel_index_coords + rel_index_coords.T, axis=1)
    rel_bias = params["rel_pos_bias_table"][rel_position_index.reshape(-1)]
    rel_bias = rel_bias.reshape(N, N, num_heads).transpose(2, 0, 1)
    attn = attn + rel_bias[None]

    if mask is not None:
        nW = mask.shape[0]
        attn = attn.reshape(B // nW, nW, num_heads, N, N) + mask[None, :, None]
        attn = attn.reshape(-1, num_heads, N, N)

    attn = jax.nn.softmax(attn, axis=-1)
    out = jnp.einsum("bhnm,bhmd->bhnd", attn, v)
    out = out.transpose(0, 2, 1, 3).reshape(B, N, C)
    return out @ params["wproj"] + params["bproj"]


# ----------------------------------------------------------------------------
if __name__ == "__main__":
    embed_dims = 32
    num_heads = 4
    window_size = (8, 8)
    Wh, Ww = window_size
    N = Wh * Ww
    B = 8            # number of windows
    nW = 2           # shift-mask windows (B % nW == 0)

    key = jax.random.PRNGKey(0)
    ks = jax.random.split(key, 8)

    params = {
        "wqkv": 0.05 * jax.random.normal(ks[0], (embed_dims, 3 * embed_dims), jnp.float32),
        "bqkv": 0.05 * jax.random.normal(ks[1], (3 * embed_dims,), jnp.float32),
        "wproj": 0.05 * jax.random.normal(ks[2], (embed_dims, embed_dims), jnp.float32),
        "bproj": 0.05 * jax.random.normal(ks[3], (embed_dims,), jnp.float32),
        "rel_pos_bias_table": 0.02 * jax.random.normal(
            ks[4], ((2 * Wh - 1) * (2 * Ww - 1), num_heads), jnp.float32),
    }
    # TODO(synk): attn_drop / proj_drop have rate 0.0 in this config -> identity, omitted.

    x = jax.random.normal(ks[5], (B, N, embed_dims), jnp.float32)
    mask = jax.random.normal(ks[6], (nW, N, N), jnp.float32)

    # masked path (exercises full forward semantics)
    out = window_msa_forward(x, params, num_heads=num_heads,
                             window_size=window_size, mask=mask)
    out = jax.block_until_ready(out)
    ref = window_msa_reference(x, params, num_heads=num_heads,
                               window_size=window_size, mask=mask)
    assert out.shape == (B, N, embed_dims)
    # bf16 MXU inputs + approx reciprocal -> loosened tolerance vs fp32 reference.
    assert jnp.allclose(out, ref, atol=5e-2, rtol=5e-2), float(jnp.max(jnp.abs(out - ref)))

    # mask=None path
    out2 = jax.block_until_ready(
        window_msa_forward(x, params, num_heads=num_heads, window_size=window_size))
    ref2 = window_msa_reference(x, params, num_heads=num_heads, window_size=window_size)
    assert jnp.allclose(out2, ref2, atol=5e-2, rtol=5e-2), float(jnp.max(jnp.abs(out2 - ref2)))

    print("KERNEL_OK")
</pallas_src>

<mosaic_0001>
module attributes {stable_mosaic.version = 11 : i64} {
  func.func @_window_msa_kernel(%arg0: i32, %arg1: memref<256x32xbf16, #tpu.memory_space<vmem>>, %arg2: memref<4x32x8xbf16, #tpu.memory_space<vmem>>, %arg3: memref<4x32x8xbf16, #tpu.memory_space<vmem>>, %arg4: memref<4x32x8xbf16, #tpu.memory_space<vmem>>, %arg5: memref<4x1x8xf32, #tpu.memory_space<vmem>>, %arg6: memref<4x1x8xf32, #tpu.memory_space<vmem>>, %arg7: memref<4x1x8xf32, #tpu.memory_space<vmem>>, %arg8: memref<4x64x64xf32, #tpu.memory_space<vmem>>, %arg9: memref<4x64x64xf32, #tpu.memory_space<vmem>>, %arg10: memref<4x8x32xbf16, #tpu.memory_space<vmem>>, %arg11: memref<1x32xf32, #tpu.memory_space<vmem>>, %arg12: memref<256x32xf32, #tpu.memory_space<vmem>>) attributes {dimension_semantics = [#tpu.dimension_semantics<parallel>], iteration_bounds = array<i64: 2>, scalar_prefetch = 0 : i64, scratch_operands = 0 : i64, tpu.core_type = #tpu.core_type<tc>, window_params = [{transform_indices = @transform_0, window_bounds = array<i64: 256, 32>}, {pipeline_mode = #tpu.pipeline_mode<synchronous>, transform_indices = @transform_1, window_bounds = array<i64: 4, 32, 8>}, {pipeline_mode = #tpu.pipeline_mode<synchronous>, transform_indices = @transform_2, window_bounds = array<i64: 4, 32, 8>}, {pipeline_mode = #tpu.pipeline_mode<synchronous>, transform_indices = @transform_3, window_bounds = array<i64: 4, 32, 8>}, {pipeline_mode = #tpu.pipeline_mode<synchronous>, transform_indices = @transform_4, window_bounds = array<i64: 4, 1, 8>}, {pipeline_mode = #tpu.pipeline_mode<synchronous>, transform_indices = @transform_5, window_bounds = array<i64: 4, 1, 8>}, {pipeline_mode = #tpu.pipeline_mode<synchronous>, transform_indices = @transform_6, window_bounds = array<i64: 4, 1, 8>}, {pipeline_mode = #tpu.pipeline_mode<synchronous>, transform_indices = @transform_7, window_bounds = array<i64: 4, 64, 64>}, {pipeline_mode = #tpu.pipeline_mode<synchronous>, transform_indices = @transform_8, window_bounds = array<i64: 4, 64, 64>}, {pipeline_mode = #tpu.pipeline_mode<synchronous>, transform_indices = @transform_9, window_bounds = array<i64: 4, 8, 32>}, {pipeline_mode = #tpu.pipeline_mode<synchronous>, transform_indices = @transform_10, window_bounds = array<i64: 1, 32>}, {transform_indices = @transform_11, window_bounds = array<i64: 256, 32>}]} {
    %c0 = arith.constant 0 : index
    %c0_0 = arith.constant 0 : index
    %0 = vector.load %arg1[%c0, %c0_0] : memref<256x32xbf16, #tpu.memory_space<vmem>>, vector<256x32xbf16>
    %c0_1 = arith.constant 0 : index
    %c0_2 = arith.constant 0 : index
    %c0_3 = arith.constant 0 : index
    %1 = vector.load %arg9[%c0_1, %c0_2, %c0_3] : memref<4x64x64xf32, #tpu.memory_space<vmem>>, vector<4x64x64xf32>
    %cst = arith.constant 0.000000e+00 : f32
    %2 = vector.broadcast %cst : f32 to vector<256x32xf32>
    %c0_4 = arith.constant 0 : index
    %c0_5 = arith.constant 0 : index
    %c0_6 = arith.constant 0 : index
    %3 = vector.load %arg2[%c0_4, %c0_5, %c0_6] : memref<4x32x8xbf16, #tpu.memory_space<vmem>>, vector<1x32x8xbf16>
    %4 = vector.shape_cast %3 : vector<1x32x8xbf16> to vector<32x8xbf16>
    %cst_7 = arith.constant dense<0.000000e+00> : vector<256x8xf32>
    %5 = tpu.matmul %0, %4, %cst_7 {dimension_numbers = #tpu.dot_dimension_numbers<[1], [0], [0], [1], [0, 0, 1, 1], [], []>} : vector<256x32xbf16>, vector<32x8xbf16>, vector<256x8xf32> -> vector<256x8xf32>
    %c0_8 = arith.constant 0 : index
    %c0_9 = arith.constant 0 : index
    %c0_10 = arith.constant 0 : index
    %6 = vector.load %arg5[%c0_8, %c0_9, %c0_10] : memref<4x1x8xf32, #tpu.memory_space<vmem>>, vector<1x1x8xf32>
    %7 = vector.shape_cast %6 : vector<1x1x8xf32> to vector<1x8xf32>
    %8 = vector.broadcast %7 : vector<1x8xf32> to vector<256x8xf32>
    %9 = arith.addf %5, %8 : vector<256x8xf32>
    %c0_11 = arith.constant 0 : index
    %c0_12 = arith.constant 0 : index
    %c0_13 = arith.constant 0 : index
    %10 = vector.load %arg3[%c0_11, %c0_12, %c0_13] : memref<4x32x8xbf16, #tpu.memory_space<vmem>>, vector<1x32x8xbf16>
    %11 = vector.shape_cast %10 : vector<1x32x8xbf16> to vector<32x8xbf16>
    %cst_14 = arith.constant dense<0.000000e+00> : vector<256x8xf32>
    %12 = tpu.matmul %0, %11, %cst_14 {dimension_numbers = #tpu.dot_dimension_numbers<[1], [0], [0], [1], [0, 0, 1, 1], [], []>} : vector<256x32xbf16>, vector<32x8xbf16>, vector<256x8xf32> -> vector<256x8xf32>
    %c0_15 = arith.constant 0 : index
    %c0_16 = arith.constant 0 : index
    %c0_17 = arith.constant 0 : index
    %13 = vector.load %arg6[%c0_15, %c0_16, %c0_17] : memref<4x1x8xf32, #tpu.memory_space<vmem>>, vector<1x1x8xf32>
    %14 = vector.shape_cast %13 : vector<1x1x8xf32> to vector<1x8xf32>
    %15 = vector.broadcast %14 : vector<1x8xf32> to vector<256x8xf32>
    %16 = arith.addf %12, %15 : vector<256x8xf32>
    %c0_18 = arith.constant 0 : index
    %c0_19 = arith.constant 0 : index
    %c0_20 = arith.constant 0 : index
    %17 = vector.load %arg4[%c0_18, %c0_19, %c0_20] : memref<4x32x8xbf16, #tpu.memory_space<vmem>>, vector<1x32x8xbf16>
    %18 = vector.shape_cast %17 : vector<1x32x8xbf16> to vector<32x8xbf16>
    %cst_21 = arith.constant dense<0.000000e+00> : vector<256x8xf32>
    %19 = tpu.matmul %0, %18, %cst_21 {dimension_numbers = #tpu.dot_dimension_numbers<[1], [0], [0], [1], [0, 0, 1, 1], [], []>} : vector<256x32xbf16>, vector<32x8xbf16>, vector<256x8xf32> -> vector<256x8xf32>
    %c0_22 = arith.constant 0 : index
    %c0_23 = arith.constant 0 : index
    %c0_24 = arith.constant 0 : index
    %20 = vector.load %arg7[%c0_22, %c0_23, %c0_24] : memref<4x1x8xf32, #tpu.memory_space<vmem>>, vector<1x1x8xf32>
    %21 = vector.shape_cast %20 : vector<1x1x8xf32> to vector<1x8xf32>
    %22 = vector.broadcast %21 : vector<1x8xf32> to vector<256x8xf32>
    %23 = arith.addf %19, %22 : vector<256x8xf32>
    %24 = vector.shape_cast %9 : vector<256x8xf32> to vector<4x64x8xf32>
    %25 = arith.truncf %24 : vector<4x64x8xf32> to vector<4x64x8xbf16>
    %26 = vector.shape_cast %16 : vector<256x8xf32> to vector<4x64x8xf32>
    %27 = arith.truncf %26 : vector<4x64x8xf32> to vector<4x64x8xbf16>
    %28 = vector.shape_cast %23 : vector<256x8xf32> to vector<4x64x8xf32>
    %29 = arith.truncf %28 : vector<4x64x8xf32> to vector<4x64x8xbf16>
    "tpu.trace_start"() <{level = 10 : i32, message = "bnd,bmd->bnm"}> : () -> ()
    %cst_25 = arith.constant dense<0.000000e+00> : vector<4x64x64xf32>
    %30 = tpu.matmul %25, %27, %cst_25 {dimension_numbers = #tpu.dot_dimension_numbers<[2], [2], [1], [1], [0, 0, 0, 1, 1, 1], [0], [0]>} : vector<4x64x8xbf16>, vector<4x64x8xbf16>, vector<4x64x64xf32> -> vector<4x64x64xf32>
    "tpu.trace_stop"() : () -> ()
    %c0_26 = arith.constant 0 : index
    %c0_27 = arith.constant 0 : index
    %c0_28 = arith.constant 0 : index
    %31 = vector.load %arg8[%c0_26, %c0_27, %c0_28] : memref<4x64x64xf32, #tpu.memory_space<vmem>>, vector<1x64x64xf32>
    %32 = vector.shape_cast %31 : vector<1x64x64xf32> to vector<64x64xf32>
    %33 = vector.shape_cast %32 : vector<64x64xf32> to vector<1x64x64xf32>
    %34 = vector.broadcast %33 : vector<1x64x64xf32> to vector<4x64x64xf32>
    %35 = arith.addf %30, %34 : vector<4x64x64xf32>
    %36 = arith.addf %35, %1 : vector<4x64x64xf32>
    %cst_29 = arith.constant dense<0xFF800000> : vector<4x64xf32>
    %37 = vector.multi_reduction <maximumf>, %36, %cst_29 [2] : vector<4x64x64xf32> to vector<4x64xf32>
    %38 = vector.shape_cast %37 : vector<4x64xf32> to vector<4x64x1xf32>
    %39 = vector.broadcast %38 : vector<4x64x1xf32> to vector<4x64x64xf32>
    %40 = arith.subf %36, %39 : vector<4x64x64xf32>
    %41 = math.exp %40 : vector<4x64x64xf32>
    %cst_30 = arith.constant dense<0.000000e+00> : vector<4x64xf32>
    %42 = vector.multi_reduction <add>, %41, %cst_30 [2] : vector<4x64x64xf32> to vector<4x64xf32>
    %43 = vector.shape_cast %42 : vector<4x64xf32> to vector<4x64x1xf32>
    %44 = tpu.reciprocal %43 {approx = true} : vector<4x64x1xf32> -> vector<4x64x1xf32>
    %45 = vector.broadcast %44 : vector<4x64x1xf32> to vector<4x64x64xf32>
    %46 = arith.mulf %41, %45 : vector<4x64x64xf32>
    %47 = arith.truncf %46 : vector<4x64x64xf32> to vector<4x64x64xbf16>
    "tpu.trace_start"() <{level = 10 : i32, message = "bnm,bmd->bnd"}> : () -> ()
    %cst_31 = arith.constant dense<0.000000e+00> : vector<4x64x8xf32>
    %48 = tpu.matmul %47, %29, %cst_31 {dimension_numbers = #tpu.dot_dimension_numbers<[2], [1], [1], [2], [0, 0, 0, 1, 1, 2], [0], [0]>} : vector<4x64x64xbf16>, vector<4x64x8xbf16>, vector<4x64x8xf32> -> vector<4x64x8xf32>
    "tpu.trace_stop"() : () -> ()
    %49 = vector.shape_cast %48 : vector<4x64x8xf32> to vector<256x8xf32>
    %50 = arith.truncf %49 : vector<256x8xf32> to vector<256x8xbf16>
    %c0_32 = arith.constant 0 : index
    %c0_33 = arith.constant 0 : index
    %c0_34 = arith.constant 0 : index
    %51 = vector.load %arg10[%c0_32, %c0_33, %c0_34] : memref<4x8x32xbf16, #tpu.memory_space<vmem>>, vector<1x8x32xbf16>
    %52 = vector.shape_cast %51 : vector<1x8x32xbf16> to vector<8x32xbf16>
    %cst_35 = arith.constant dense<0.000000e+00> : vector<256x32xf32>
    %53 = tpu.matmul %50, %52, %cst_35 {dimension_numbers = #tpu.dot_dimension_numbers<[1], [0], [0], [1], [0, 0, 1, 1], [], []>} : vector<256x8xbf16>, vector<8x32xbf16>, vector<256x32xf32> -> vector<256x32xf32>
    %54 = arith.addf %2, %53 : vector<256x32xf32>
    %c1 = arith.constant 1 : index
    %c0_36 = arith.constant 0 : index
    %c0_37 = arith.constant 0 : index
    %55 = vector.load %arg2[%c1, %c0_36, %c0_37] : memref<4x32x8xbf16, #tpu.memory_space<vmem>>, vector<1x32x8xbf16>
    %56 = vector.shape_cast %55 : vector<1x32x8xbf16> to vector<32x8xbf16>
    %cst_38 = arith.constant dense<0.000000e+00> : vector<256x8xf32>
    %57 = tpu.matmul %0, %56, %cst_38 {dimension_numbers = #tpu.dot_dimension_numbers<[1], [0], [0], [1], [0, 0, 1, 1], [], []>} : vector<256x32xbf16>, vector<32x8xbf16>, vector<256x8xf32> -> vector<256x8xf32>
    %c1_39 = arith.constant 1 : index
    %c0_40 = arith.constant 0 : index
    %c0_41 = arith.constant 0 : index
    %58 = vector.load %arg5[%c1_39, %c0_40, %c0_41] : memref<4x1x8xf32, #tpu.memory_space<vmem>>, vector<1x1x8xf32>
    %59 = vector.shape_cast %58 : vector<1x1x8xf32> to vector<1x8xf32>
    %60 = vector.broadcast %59 : vector<1x8xf32> to vector<256x8xf32>
    %61 = arith.addf %57, %60 : vector<256x8xf32>
    %c1_42 = arith.constant 1 : index
    %c0_43 = arith.constant 0 : index
    %c0_44 = arith.constant 0 : index
    %62 = vector.load %arg3[%c1_42, %c0_43, %c0_44] : memref<4x32x8xbf16, #tpu.memory_space<vmem>>, vector<1x32x8xbf16>
    %63 = vector.shape_cast %62 : vector<1x32x8xbf16> to vector<32x8xbf16>
    %cst_45 = arith.constant dense<0.000000e+00> : vector<256x8xf32>
    %64 = tpu.matmul %0, %63, %cst_45 {dimension_numbers = #tpu.dot_dimension_numbers<[1], [0], [0], [1], [0, 0, 1, 1], [], []>} : vector<256x32xbf16>, vector<32x8xbf16>, vector<256x8xf32> -> vector<256x8xf32>
    %c1_46 = arith.constant 1 : index
    %c0_47 = arith.constant 0 : index
    %c0_48 = arith.constant 0 : index
    %65 = vector.load %arg6[%c1_46, %c0_47, %c0_48] : memref<4x1x8xf32, #tpu.memory_space<vmem>>, vector<1x1x8xf32>
    %66 = vector.shape_cast %65 : vector<1x1x8xf32> to vector<1x8xf32>
    %67 = vector.broadcast %66 : vector<1x8xf32> to vector<256x8xf32>
    %68 = arith.addf %64, %67 : vector<256x8xf32>
    %c1_49 = arith.constant 1 : index
    %c0_50 = arith.constant 0 : index
    %c0_51 = arith.constant 0 : index
    %69 = vector.load %arg4[%c1_49, %c0_50, %c0_51] : memref<4x32x8xbf16, #tpu.memory_space<vmem>>, vector<1x32x8xbf16>
    %70 = vector.shape_cast %69 : vector<1x32x8xbf16> to vector<32x8xbf16>
    %cst_52 = arith.constant dense<0.000000e+00> : vector<256x8xf32>
    %71 = tpu.matmul %0, %70, %cst_52 {dimension_numbers = #tpu.dot_dimension_numbers<[1], [0], [0], [1], [0, 0, 1, 1], [], []>} : vector<256x32xbf16>, vector<32x8xbf16>, vector<256x8xf32> -> vector<256x8xf32>
    %c1_53 = arith.constant 1 : index
    %c0_54 = arith.constant 0 : index
    %c0_55 = arith.constant 0 : index
    %72 = vector.load %arg7[%c1_53, %c0_54, %c0_55] : memref<4x1x8xf32, #tpu.memory_space<vmem>>, vector<1x1x8xf32>
    %73 = vector.shape_cast %72 : vector<1x1x8xf32> to vector<1x8xf32>
    %74 = vector.broadcast %73 : vector<1x8xf32> to vector<256x8xf32>
    %75 = arith.addf %71, %74 : vector<256x8xf32>
    %76 = vector.shape_cast %61 : vector<256x8xf32> to vector<4x64x8xf32>
    %77 = arith.truncf %76 : vector<4x64x8xf32> to vector<4x64x8xbf16>
    %78 = vector.shape_cast %68 : vector<256x8xf32> to vector<4x64x8xf32>
    %79 = arith.truncf %78 : vector<4x64x8xf32> to vector<4x64x8xbf16>
    %80 = vector.shape_cast %75 : vector<256x8xf32> to vector<4x64x8xf32>
    %81 = arith.truncf %80 : vector<4x64x8xf32> to vector<4x64x8xbf16>
    "tpu.trace_start"() <{level = 10 : i32, message = "bnd,bmd->bnm"}> : () -> ()
    %cst_56 = arith.constant dense<0.000000e+00> : vector<4x64x64xf32>
    %82 = tpu.matmul %77, %79, %cst_56 {dimension_numbers = #tpu.dot_dimension_numbers<[2], [2], [1], [1], [0, 0, 0, 1, 1, 1], [0], [0]>} : vector<4x64x8xbf16>, vector<4x64x8xbf16>, vector<4x64x64xf32> -> vector<4x64x64xf32>
    "tpu.trace_stop"() : () -> ()
    %c1_57 = arith.constant 1 : index
    %c0_58 = arith.constant 0 : index
    %c0_59 = arith.constant 0 : index
    %83 = vector.load %arg8[%c1_57, %c0_58, %c0_59] : memref<4x64x64xf32, #tpu.memory_space<vmem>>, vector<1x64x64xf32>
    %84 = vector.shape_cast %83 : vector<1x64x64xf32> to vector<64x64xf32>
    %85 = vector.shape_cast %84 : vector<64x64xf32> to vector<1x64x64xf32>
    %86 = vector.broadcast %85 : vector<1x64x64xf32> to vector<4x64x64xf32>
    %87 = arith.addf %82, %86 : vector<4x64x64xf32>
    %88 = arith.addf %87, %1 : vector<4x64x64xf32>
    %cst_60 = arith.constant dense<0xFF800000> : vector<4x64xf32>
    %89 = vector.multi_reduction <maximumf>, %88, %cst_60 [2] : vector<4x64x64xf32> to vector<4x64xf32>
    %90 = vector.shape_cast %89 : vector<4x64xf32> to vector<4x64x1xf32>
    %91 = vector.broadcast %90 : vector<4x64x1xf32> to vector<4x64x64xf32>
    %92 = arith.subf %88, %91 : vector<4x64x64xf32>
    %93 = math.exp %92 : vector<4x64x64xf32>
    %cst_61 = arith.constant dense<0.000000e+00> : vector<4x64xf32>
    %94 = vector.multi_reduction <add>, %93, %cst_61 [2] : vector<4x64x64xf32> to vector<4x64xf32>
    %95 = vector.shape_cast %94 : vector<4x64xf32> to vector<4x64x1xf32>
    %96 = tpu.reciprocal %95 {approx = true} : vector<4x64x1xf32> -> vector<4x64x1xf32>
    %97 = vector.broadcast %96 : vector<4x64x1xf32> to vector<4x64x64xf32>
    %98 = arith.mulf %93, %97 : vector<4x64x64xf32>
    %99 = arith.truncf %98 : vector<4x64x64xf32> to vector<4x64x64xbf16>
    "tpu.trace_start"() <{level = 10 : i32, message = "bnm,bmd->bnd"}> : () -> ()
    %cst_62 = arith.constant dense<0.000000e+00> : vector<4x64x8xf32>
    %100 = tpu.matmul %99, %81, %cst_62 {dimension_numbers = #tpu.dot_dimension_numbers<[2], [1], [1], [2], [0, 0, 0, 1, 1, 2], [0], [0]>} : vector<4x64x64xbf16>, vector<4x64x8xbf16>, vector<4x64x8xf32> -> vector<4x64x8xf32>
    "tpu.trace_stop"() : () -> ()
    %101 = vector.shape_cast %100 : vector<4x64x8xf32> to vector<256x8xf32>
    %102 = arith.truncf %101 : vector<256x8xf32> to vector<256x8xbf16>
    %c1_63 = arith.constant 1 : index
    %c0_64 = arith.constant 0 : index
    %c0_65 = arith.constant 0 : index
    %103 = vector.load %arg10[%c1_63, %c0_64, %c0_65] : memref<4x8x32xbf16, #tpu.memory_space<vmem>>, vector<1x8x32xbf16>
    %104 = vector.shape_cast %103 : vector<1x8x32xbf16> to vector<8x32xbf16>
    %cst_66 = arith.constant dense<0.000000e+00> : vector<256x32xf32>
    %105 = tpu.matmul %102, %104, %cst_66 {dimension_numbers = #tpu.dot_dimension_numbers<[1], [0], [0], [1], [0, 0, 1, 1], [], []>} : vector<256x8xbf16>, vector<8x32xbf16>, vector<256x32xf32> -> vector<256x32xf32>
    %106 = arith.addf %54, %105 : vector<256x32xf32>
    %c2 = arith.constant 2 : index
    %c0_67 = arith.constant 0 : index
    %c0_68 = arith.constant 0 : index
    %107 = vector.load %arg2[%c2, %c0_67, %c0_68] : memref<4x32x8xbf16, #tpu.memory_space<vmem>>, vector<1x32x8xbf16>
    %108 = vector.shape_cast %107 : vector<1x32x8xbf16> to vector<32x8xbf16>
    %cst_69 = arith.constant dense<0.000000e+00> : vector<256x8xf32>
    %109 = tpu.matmul %0, %108, %cst_69 {dimension_numbers = #tpu.dot_dimension_numbers<[1], [0], [0], [1], [0, 0, 1, 1], [], []>} : vector<256x32xbf16>, vector<32x8xbf16>, vector<256x8xf32> -> vector<256x8xf32>
    %c2_70 = arith.constant 2 : index
    %c0_71 = arith.constant 0 : index
    %c0_72 = arith.constant 0 : index
    %110 = vector.load %arg5[%c2_70, %c0_71, %c0_72] : memref<4x1x8xf32, #tpu.memory_space<vmem>>, vector<1x1x8xf32>
    %111 = vector.shape_cast %110 : vector<1x1x8xf32> to vector<1x8xf32>
    %112 = vector.broadcast %111 : vector<1x8xf32> to vector<256x8xf32>
    %113 = arith.addf %109, %112 : vector<256x8xf32>
    %c2_73 = arith.constant 2 : index
    %c0_74 = arith.constant 0 : index
    %c0_75 = arith.constant 0 : index
    %114 = vector.load %arg3[%c2_73, %c0_74, %c0_75] : memref<4x32x8xbf16, #tpu.memory_space<vmem>>, vector<1x32x8xbf16>
    %115 = vector.shape_cast %114 : vector<1x32x8xbf16> to vector<32x8xbf16>
    %cst_76 = arith.constant dense<0.000000e+00> : vector<256x8xf32>
    %116 = tpu.matmul %0, %115, %cst_76 {dimension_numbers = #tpu.dot_dimension_numbers<[1], [0], [0], [1], [0, 0, 1, 1], [], []>} : vector<256x32xbf16>, vector<32x8xbf16>, vector<256x8xf32> -> vector<256x8xf32>
    %c2_77 = arith.constant 2 : index
    %c0_78 = arith.constant 0 : index
    %c0_79 = arith.constant 0 : index
    %117 = vector.load %arg6[%c2_77, %c0_78, %c0_79] : memref<4x1x8xf32, #tpu.memory_space<vmem>>, vector<1x1x8xf32>
    %118 = vector.shape_cast %117 : vector<1x1x8xf32> to vector<1x8xf32>
    %119 = vector.broadcast %118 : vector<1x8xf32> to vector<256x8xf32>
    %120 = arith.addf %116, %119 : vector<256x8xf32>
    %c2_80 = arith.constant 2 : index
    %c0_81 = arith.constant 0 : index
    %c0_82 = arith.constant 0 : index
    %121 = vector.load %arg4[%c2_80, %c0_81, %c0_82] : memref<4x32x8xbf16, #tpu.memory_space<vmem>>, vector<1x32x8xbf16>
    %122 = vector.shape_cast %121 : vector<1x32x8xbf16> to vector<32x8xbf16>
    %cst_83 = arith.constant dense<0.000000e+00> : vector<256x8xf32>
    %123 = tpu.matmul %0, %122, %cst_83 {dimension_numbers = #tpu.dot_dimension_numbers<[1], [0], [0], [1], [0, 0, 1, 1], [], []>} : vector<256x32xbf16>, vector<32x8xbf16>, vector<256x8xf32> -> vector<256x8xf32>
    %c2_84 = arith.constant 2 : index
    %c0_85 = arith.constant 0 : index
    %c0_86 = arith.constant 0 : index
    %124 = vector.load %arg7[%c2_84, %c0_85, %c0_86] : memref<4x1x8xf32, #tpu.memory_space<vmem>>, vector<1x1x8xf32>
    %125 = vector.shape_cast %124 : vector<1x1x8xf32> to vector<1x8xf32>
    %126 = vector.broadcast %125 : vector<1x8xf32> to vector<256x8xf32>
    %127 = arith.addf %123, %126 : vector<256x8xf32>
    %128 = vector.shape_cast %113 : vector<256x8xf32> to vector<4x64x8xf32>
    %129 = arith.truncf %128 : vector<4x64x8xf32> to vector<4x64x8xbf16>
    %130 = vector.shape_cast %120 : vector<256x8xf32> to vector<4x64x8xf32>
    %131 = arith.truncf %130 : vector<4x64x8xf32> to vector<4x64x8xbf16>
    %132 = vector.shape_cast %127 : vector<256x8xf32> to vector<4x64x8xf32>
    %133 = arith.truncf %132 : vector<4x64x8xf32> to vector<4x64x8xbf16>
    "tpu.trace_start"() <{level = 10 : i32, message = "bnd,bmd->bnm"}> : () -> ()
    %cst_87 = arith.constant dense<0.000000e+00> : vector<4x64x64xf32>
    %134 = tpu.matmul %129, %131, %cst_87 {dimension_numbers = #tpu.dot_dimension_numbers<[2], [2], [1], [1], [0, 0, 0, 1, 1, 1], [0], [0]>} : vector<4x64x8xbf16>, vector<4x64x8xbf16>, vector<4x64x64xf32> -> vector<4x64x64xf32>
    "tpu.trace_stop"() : () -> ()
    %c2_88 = arith.constant 2 : index
    %c0_89 = arith.constant 0 : index
    %c0_90 = arith.constant 0 : index
    %135 = vector.load %arg8[%c2_88, %c0_89, %c0_90] : memref<4x64x64xf32, #tpu.memory_space<vmem>>, vector<1x64x64xf32>
    %136 = vector.shape_cast %135 : vector<1x64x64xf32> to vector<64x64xf32>
    %137 = vector.shape_cast %136 : vector<64x64xf32> to vector<1x64x64xf32>
    %138 = vector.broadcast %137 : vector<1x64x64xf32> to vector<4x64x64xf32>
    %139 = arith.addf %134, %138 : vector<4x64x64xf32>
    %140 = arith.addf %139, %1 : vector<4x64x64xf32>
    %cst_91 = arith.constant dense<0xFF800000> : vector<4x64xf32>
    %141 = vector.multi_reduction <maximumf>, %140, %cst_91 [2] : vector<4x64x64xf32> to vector<4x64xf32>
    %142 = vector.shape_cast %141 : vector<4x64xf32> to vector<4x64x1xf32>
    %143 = vector.broadcast %142 : vector<4x64x1xf32> to vector<4x64x64xf32>
    %144 = arith.subf %140, %143 : vector<4x64x64xf32>
    %145 = math.exp %144 : vector<4x64x64xf32>
    %cst_92 = arith.constant dense<0.000000e+00> : vector<4x64xf32>
    %146 = vector.multi_reduction <add>, %145, %cst_92 [2] : vector<4x64x64xf32> to vector<4x64xf32>
    %147 = vector.shape_cast %146 : vector<4x64xf32> to vector<4x64x1xf32>
    %148 = tpu.reciprocal %147 {approx = true} : vector<4x64x1xf32> -> vector<4x64x1xf32>
    %149 = vector.broadcast %148 : vector<4x64x1xf32> to vector<4x64x64xf32>
    %150 = arith.mulf %145, %149 : vector<4x64x64xf32>
    %151 = arith.truncf %150 : vector<4x64x64xf32> to vector<4x64x64xbf16>
    "tpu.trace_start"() <{level = 10 : i32, message = "bnm,bmd->bnd"}> : () -> ()
    %cst_93 = arith.constant dense<0.000000e+00> : vector<4x64x8xf32>
    %152 = tpu.matmul %151, %133, %cst_93 {dimension_numbers = #tpu.dot_dimension_numbers<[2], [1], [1], [2], [0, 0, 0, 1, 1, 2], [0], [0]>} : vector<4x64x64xbf16>, vector<4x64x8xbf16>, vector<4x64x8xf32> -> vector<4x64x8xf32>
    "tpu.trace_stop"() : () -> ()
    %153 = vector.shape_cast %152 : vector<4x64x8xf32> to vector<256x8xf32>
    %154 = arith.truncf %153 : vector<256x8xf32> to vector<256x8xbf16>
    %c2_94 = arith.constant 2 : index
    %c0_95 = arith.constant 0 : index
    %c0_96 = arith.constant 0 : index
    %155 = vector.load %arg10[%c2_94, %c0_95, %c0_96] : memref<4x8x32xbf16, #tpu.memory_space<vmem>>, vector<1x8x32xbf16>
    %156 = vector.shape_cast %155 : vector<1x8x32xbf16> to vector<8x32xbf16>
    %cst_97 = arith.constant dense<0.000000e+00> : vector<256x32xf32>
    %157 = tpu.matmul %154, %156, %cst_97 {dimension_numbers = #tpu.dot_dimension_numbers<[1], [0], [0], [1], [0, 0, 1, 1], [], []>} : vector<256x8xbf16>, vector<8x32xbf16>, vector<256x32xf32> -> vector<256x32xf32>
    %158 = arith.addf %106, %157 : vector<256x32xf32>
    %c3 = arith.constant 3 : index
    %c0_98 = arith.constant 0 : index
    %c0_99 = arith.constant 0 : index
    %159 = vector.load %arg2[%c3, %c0_98, %c0_99] : memref<4x32x8xbf16, #tpu.memory_space<vmem>>, vector<1x32x8xbf16>
    %160 = vector.shape_cast %159 : vector<1x32x8xbf16> to vector<32x8xbf16>
    %cst_100 = arith.constant dense<0.000000e+00> : vector<256x8xf32>
    %161 = tpu.matmul %0, %160, %cst_100 {dimension_numbers = #tpu.dot_dimension_numbers<[1], [0], [0], [1], [0, 0, 1, 1], [], []>} : vector<256x32xbf16>, vector<32x8xbf16>, vector<256x8xf32> -> vector<256x8xf32>
    %c3_101 = arith.constant 3 : index
    %c0_102 = arith.constant 0 : index
    %c0_103 = arith.constant 0 : index
    %162 = vector.load %arg5[%c3_101, %c0_102, %c0_103] : memref<4x1x8xf32, #tpu.memory_space<vmem>>, vector<1x1x8xf32>
    %163 = vector.shape_cast %162 : vector<1x1x8xf32> to vector<1x8xf32>
    %164 = vector.broadcast %163 : vector<1x8xf32> to vector<256x8xf32>
    %165 = arith.addf %161, %164 : vector<256x8xf32>
    %c3_104 = arith.constant 3 : index
    %c0_105 = arith.constant 0 : index
    %c0_106 = arith.constant 0 : index
    %166 = vector.load %arg3[%c3_104, %c0_105, %c0_106] : memref<4x32x8xbf16, #tpu.memory_space<vmem>>, vector<1x32x8xbf16>
    %167 = vector.shape_cast %166 : vector<1x32x8xbf16> to vector<32x8xbf16>
    %cst_107 = arith.constant dense<0.000000e+00> : vector<256x8xf32>
    %168 = tpu.matmul %0, %167, %cst_107 {dimension_numbers = #tpu.dot_dimension_numbers<[1], [0], [0], [1], [0, 0, 1, 1], [], []>} : vector<256x32xbf16>, vector<32x8xbf16>, vector<256x8xf32> -> vector<256x8xf32>
    %c3_108 = arith.constant 3 : index
    %c0_109 = arith.constant 0 : index
    %c0_110 = arith.constant 0 : index
    %169 = vector.load %arg6[%c3_108, %c0_109, %c0_110] : memref<4x1x8xf32, #tpu.memory_space<vmem>>, vector<1x1x8xf32>
    %170 = vector.shape_cast %169 : vector<1x1x8xf32> to vector<1x8xf32>
    %171 = vector.broadcast %170 : vector<1x8xf32> to vector<256x8xf32>
    %172 = arith.addf %168, %171 : vector<256x8xf32>
    %c3_111 = arith.constant 3 : index
    %c0_112 = arith.constant 0 : index
    %c0_113 = arith.constant 0 : index
    %173 = vector.load %arg4[%c3_111, %c0_112, %c0_113] : memref<4x32x8xbf16, #tpu.memory_space<vmem>>, vector<1x32x8xbf16>
    %174 = vector.shape_cast %173 : vector<1x32x8xbf16> to vector<32x8xbf16>
    %cst_114 = arith.constant dense<0.000000e+00> : vector<256x8xf32>
    %175 = tpu.matmul %0, %174, %cst_114 {dimension_numbers = #tpu.dot_dimension_numbers<[1], [0], [0], [1], [0, 0, 1, 1], [], []>} : vector<256x32xbf16>, vector<32x8xbf16>, vector<256x8xf32> -> vector<256x8xf32>
    %c3_115 = arith.constant 3 : index
    %c0_116 = arith.constant 0 : index
    %c0_117 = arith.constant 0 : index
    %176 = vector.load %arg7[%c3_115, %c0_116, %c0_117] : memref<4x1x8xf32, #tpu.memory_space<vmem>>, vector<1x1x8xf32>
    %177 = vector.shape_cast %176 : vector<1x1x8xf32> to vector<1x8xf32>
    %178 = vector.broadcast %177 : vector<1x8xf32> to vector<256x8xf32>
    %179 = arith.addf %175, %178 : vector<256x8xf32>
    %180 = vector.shape_cast %165 : vector<256x8xf32> to vector<4x64x8xf32>
    %181 = arith.truncf %180 : vector<4x64x8xf32> to vector<4x64x8xbf16>
    %182 = vector.shape_cast %172 : vector<256x8xf32> to vector<4x64x8xf32>
    %183 = arith.truncf %182 : vector<4x64x8xf32> to vector<4x64x8xbf16>
    %184 = vector.shape_cast %179 : vector<256x8xf32> to vector<4x64x8xf32>
    %185 = arith.truncf %184 : vector<4x64x8xf32> to vector<4x64x8xbf16>
    "tpu.trace_start"() <{level = 10 : i32, message = "bnd,bmd->bnm"}> : () -> ()
    %cst_118 = arith.constant dense<0.000000e+00> : vector<4x64x64xf32>
    %186 = tpu.matmul %181, %183, %cst_118 {dimension_numbers = #tpu.dot_dimension_numbers<[2], [2], [1], [1], [0, 0, 0, 1, 1, 1], [0], [0]>} : vector<4x64x8xbf16>, vector<4x64x8xbf16>, vector<4x64x64xf32> -> vector<4x64x64xf32>
    "tpu.trace_stop"() : () -> ()
    %c3_119 = arith.constant 3 : index
    %c0_120 = arith.constant 0 : index
    %c0_121 = arith.constant 0 : index
    %187 = vector.load %arg8[%c3_119, %c0_120, %c0_121] : memref<4x64x64xf32, #tpu.memory_space<vmem>>, vector<1x64x64xf32>
    %188 = vector.shape_cast %187 : vector<1x64x64xf32> to vector<64x64xf32>
    %189 = vector.shape_cast %188 : vector<64x64xf32> to vector<1x64x64xf32>
    %190 = vector.broadcast %189 : vector<1x64x64xf32> to vector<4x64x64xf32>
    %191 = arith.addf %186, %190 : vector<4x64x64xf32>
    %192 = arith.addf %191, %1 : vector<4x64x64xf32>
    %cst_122 = arith.constant dense<0xFF800000> : vector<4x64xf32>
    %193 = vector.multi_reduction <maximumf>, %192, %cst_122 [2] : vector<4x64x64xf32> to vector<4x64xf32>
    %194 = vector.shape_cast %193 : vector<4x64xf32> to vector<4x64x1xf32>
    %195 = vector.broadcast %194 : vector<4x64x1xf32> to vector<4x64x64xf32>
    %196 = arith.subf %192, %195 : vector<4x64x64xf32>
    %197 = math.exp %196 : vector<4x64x64xf32>
    %cst_123 = arith.constant dense<0.000000e+00> : vector<4x64xf32>
    %198 = vector.multi_reduction <add>, %197, %cst_123 [2] : vector<4x64x64xf32> to vector<4x64xf32>
    %199 = vector.shape_cast %198 : vector<4x64xf32> to vector<4x64x1xf32>
    %200 = tpu.reciprocal %199 {approx = true} : vector<4x64x1xf32> -> vector<4x64x1xf32>
    %201 = vector.broadcast %200 : vector<4x64x1xf32> to vector<4x64x64xf32>
    %202 = arith.mulf %197, %201 : vector<4x64x64xf32>
    %203 = arith.truncf %202 : vector<4x64x64xf32> to vector<4x64x64xbf16>
    "tpu.trace_start"() <{level = 10 : i32, message = "bnm,bmd->bnd"}> : () -> ()
    %cst_124 = arith.constant dense<0.000000e+00> : vector<4x64x8xf32>
    %204 = tpu.matmul %203, %185, %cst_124 {dimension_numbers = #tpu.dot_dimension_numbers<[2], [1], [1], [2], [0, 0, 0, 1, 1, 2], [0], [0]>} : vector<4x64x64xbf16>, vector<4x64x8xbf16>, vector<4x64x8xf32> -> vector<4x64x8xf32>
    "tpu.trace_stop"() : () -> ()
    %205 = vector.shape_cast %204 : vector<4x64x8xf32> to vector<256x8xf32>
    %206 = arith.truncf %205 : vector<256x8xf32> to vector<256x8xbf16>
    %c3_125 = arith.constant 3 : index
    %c0_126 = arith.constant 0 : index
    %c0_127 = arith.constant 0 : index
    %207 = vector.load %arg10[%c3_125, %c0_126, %c0_127] : memref<4x8x32xbf16, #tpu.memory_space<vmem>>, vector<1x8x32xbf16>
    %208 = vector.shape_cast %207 : vector<1x8x32xbf16> to vector<8x32xbf16>
    %cst_128 = arith.constant dense<0.000000e+00> : vector<256x32xf32>
    %209 = tpu.matmul %206, %208, %cst_128 {dimension_numbers = #tpu.dot_dimension_numbers<[1], [0], [0], [1], [0, 0, 1, 1], [], []>} : vector<256x8xbf16>, vector<8x32xbf16>, vector<256x32xf32> -> vector<256x32xf32>
    %210 = arith.addf %158, %209 : vector<256x32xf32>
    %c0_129 = arith.constant 0 : index
    %c0_130 = arith.constant 0 : index
    %211 = vector.load %arg11[%c0_129, %c0_130] : memref<1x32xf32, #tpu.memory_space<vmem>>, vector<1x32xf32>
    %212 = vector.broadcast %211 : vector<1x32xf32> to vector<256x32xf32>
    %213 = arith.addf %210, %212 : vector<256x32xf32>
    %c0_131 = arith.constant 0 : index
    %c0_132 = arith.constant 0 : index
    %214 = vector.load %arg12[%c0_131, %c0_132] : memref<256x32xf32, #tpu.memory_space<vmem>>, vector<256x32xf32>
    tpu.vector_store %arg12[%c0_131, %c0_132], %213 {strides = array<i32>} : memref<256x32xf32, #tpu.memory_space<vmem>>, vector<256x32xf32>,
    return
  }
  func.func @transform_0(%arg0: i32) -> (i32, i32) {
    %c0_i32 = arith.constant 0 : i32
    %c0_i32_0 = arith.constant 0 : i32
    return %arg0, %c0_i32 : i32, i32
  }
  func.func @transform_1(%arg0: i32) -> (i32, i32, i32) {
    %c0_i32 = arith.constant 0 : i32
    %c0_i32_0 = arith.constant 0 : i32
    %c0_i32_1 = arith.constant 0 : i32
    %c0_i32_2 = arith.constant 0 : i32
    return %c0_i32, %c0_i32_0, %c0_i32_1 : i32, i32, i32
  }
  func.func @transform_2(%arg0: i32) -> (i32, i32, i32) {
    %c0_i32 = arith.constant 0 : i32
    %c0_i32_0 = arith.constant 0 : i32
    %c0_i32_1 = arith.constant 0 : i32
    %c0_i32_2 = arith.constant 0 : i32
    return %c0_i32, %c0_i32_0, %c0_i32_1 : i32, i32, i32
  }
  func.func @transform_3(%arg0: i32) -> (i32, i32, i32) {
    %c0_i32 = arith.constant 0 : i32
    %c0_i32_0 = arith.constant 0 : i32
    %c0_i32_1 = arith.constant 0 : i32
    %c0_i32_2 = arith.constant 0 : i32
    return %c0_i32, %c0_i32_0, %c0_i32_1 : i32, i32, i32
  }
  func.func @transform_4(%arg0: i32) -> (i32, i32, i32) {
    %c0_i32 = arith.constant 0 : i32
    %c0_i32_0 = arith.constant 0 : i32
    %c0_i32_1 = arith.constant 0 : i32
    %c0_i32_2 = arith.constant 0 : i32
    return %c0_i32, %c0_i32_0, %c0_i32_1 : i32, i32, i32
  }
  func.func @transform_5(%arg0: i32) -> (i32, i32, i32) {
    %c0_i32 = arith.constant 0 : i32
    %c0_i32_0 = arith.constant 0 : i32
    %c0_i32_1 = arith.constant 0 : i32
    %c0_i32_2 = arith.constant 0 : i32
    return %c0_i32, %c0_i32_0, %c0_i32_1 : i32, i32, i32
  }
  func.func @transform_6(%arg0: i32) -> (i32, i32, i32) {
    %c0_i32 = arith.constant 0 : i32
    %c0_i32_0 = arith.constant 0 : i32
    %c0_i32_1 = arith.constant 0 : i32
    %c0_i32_2 = arith.constant 0 : i32
    return %c0_i32, %c0_i32_0, %c0_i32_1 : i32, i32, i32
  }
  func.func @transform_7(%arg0: i32) -> (i32, i32, i32) {
    %c0_i32 = arith.constant 0 : i32
    %c0_i32_0 = arith.constant 0 : i32
    %c0_i32_1 = arith.constant 0 : i32
    %c0_i32_2 = arith.constant 0 : i32
    return %c0_i32, %c0_i32_0, %c0_i32_1 : i32, i32, i32
  }
  func.func @transform_8(%arg0: i32) -> (i32, i32, i32) {
    %c0_i32 = arith.constant 0 : i32
    %c0_i32_0 = arith.constant 0 : i32
    %c0_i32_1 = arith.constant 0 : i32
    %c0_i32_2 = arith.constant 0 : i32
    return %c0_i32, %c0_i32_0, %c0_i32_1 : i32, i32, i32
  }
  func.func @transform_9(%arg0: i32) -> (i32, i32, i32) {
    %c0_i32 = arith.constant 0 : i32
    %c0_i32_0 = arith.constant 0 : i32
    %c0_i32_1 = arith.constant 0 : i32
    %c0_i32_2 = arith.constant 0 : i32
    return %c0_i32, %c0_i32_0, %c0_i32_1 : i32, i32, i32
  }
  func.func @transform_10(%arg0: i32) -> (i32, i32) {
    %c0_i32 = arith.constant 0 : i32
    %c0_i32_0 = arith.constant 0 : i32
    %c0_i32_1 = arith.constant 0 : i32
    return %c0_i32, %c0_i32_0 : i32, i32
  }
  func.func @transform_11(%arg0: i32) -> (i32, i32) {
    %c0_i32 = arith.constant 0 : i32
    %c0_i32_0 = arith.constant 0 : i32
    return %arg0, %c0_i32 : i32, i32
  }
}

</mosaic_0001>

<bundles_post_ra>
// kernel: tpu_custom_call.1
= control target key start
LH: loop header
LB: loop body
LE: loop exit
PB: predicated region body
PF: predicated region fallthrough
CT: control target
= control target key end

     0   :  { %16 = vsyncpa [#allocation3], 0  ;;  %s9213_s17 = smov 0   ;;  %s13339_s0 = inlined_call_operand.vmem [shape: bf16[512,32], index: 0, kind: input, shape index: {}]   ;;  %s13340_s1 = inlined_call_operand.vmem [shape: bf16[4,32,8], index: 1, kind: input, shape index: {}]   ;;  %s13341_s2 = inlined_call_operand.vmem [shape: bf16[4,32,8], index: 2, kind: input, shape index: {}]   ;;  %s13342_s3 = inlined_call_operand.vmem [shape: bf16[4,32,8], index: 3, kind: input, shape index: {}]   ;;  %s13343_s4 = inlined_call_operand.vmem [shape: f32[4,1,8], index: 4, kind: input, shape index: {}]   ;;  %s13344_s5 = inlined_call_operand.vmem [shape: f32[4,1,8], index: 5, kind: input, shape index: {}]   ;;  %s13345_s6 = inlined_call_operand.vmem [shape: f32[4,1,8], index: 6, kind: input, shape index: {}]   ;;  %s13346_s7 = inlined_call_operand.vmem [shape: f32[4,64,64], index: 7, kind: input, shape index: {}]   ;;  %s13347_s8 = inlined_call_operand.hbm [shape: f32[4,64,64], index: 8, kind: input, shape index: {}]   ;;  %s13348_s9 = inlined_call_operand.vmem [shape: bf16[4,8,32], index: 9, kind: input, shape index: {}]   ;;  %s13349_s10 = inlined_call_operand.vmem [shape: f32[1,32], index: 10, kind: input, shape index: {}]   ;;  %s13350_s11 = inlined_call_operand.vmem [shape: f32[512,32], index: 11, kind: output, shape index: {}]  }
   0x1 LB: > { %s321_s20 = sshll.u32 %s13347_s8, 4  ;;  %s7692_s21 = sadd.s32 4294967295, %s9148_s17   ;;  %s9148_s17 = sphi %s9213_s17, %s22_s17   ;;  %s322_s20 = int_to_ptr.hbm [resolvable:$true] %s321_s20 }
   0x2   : > { %p7694_p0 = scmp.ge.s32.totalorder %s9148_s17, 1  ;;  %p289_p1 = scmp.lt.s32.totalorder %s9148_s17, 3 }
   0x3   : > { %p8383_p2 = scmp.eq.s32.totalorder %s7692_s21, 0  ;;  %s9150_s22 = smov [#allocation2]  }
   0x4   : > { %p290_p3 = pnand %p7694_p0, %p289_p1  ;;  %s323_s23 = sshll.u32 %s9150_s22, 4  ;;  %s324_s23 = int_to_ptr.vmem [resolvable:$true] %s323_s23 }
   0x5   : > { %s9151_s24 = smov 128   ;;  %s9152_s25 = smov 8  }
   0x6   : > { %p8379_p4 = pneg %p290_p3  ;;  %354 = sbr.rel (%p290_p3) target bundleno = 4292 (0x10c4), region = 64 }
   0x8   : > { %p8380_p5 = pnand %p8383_p2, %p8379_p4 }
   0xa   : > { %8382 = dma.hbm_to_vmem [thread:$0]  (!%p8380_p5), %s322_s20, 4096, %s324_s23, [#allocation3], %s9151_s24, %s9151_s24, %s9152_s25  }
   0xb   : > { %9143 = dma.done.wait (%p8383_p2), [#allocation3], 4096  }
   0xc   : > { %9145 = vsyncadd (%p8383_p2), [#allocation3], 4294963200  ;;  %s7699_s26 = sshll.u32 %s7692_s21, 5  ;;  %v8338_v0 = vld [vmem:[%s13340_s1 + $0x8] sm:$0xff]  ;;  %v8337_v1 = vld [vmem:[%s13340_s1] sm:$0xff]  ;;  %vm572_vm0 = vcmask 261120  }
   0xd   : > { %p396_p6 = scmp.lt.s32.totalorder %s7699_s26, 63  ;;  %8361 = vmatpush.bf16.msra.mxu1 %v8338_v0  ;;  %627 = vmatpush.bf16.msra.mxu0 %v8338_v0  ;;  %v8340_v5 = vld [vmem:[%s13341_s2 + $0x8] sm:$0xff]  ;;  %v8339_v7 = vld [vmem:[%s13341_s2] sm:$0xff]  ;;  %vm1072_vm1 = vcmask 64512   ;;  %vm1437_vm2 = vcmask 523264   ;;  %vm3811_vm3 = vcmask 1043456  }
   0xe   : > { %8363 = vmatpush.bf16.msra.mxu3 %v8338_v0  ;;  %8362 = vmatpush.bf16.msra.mxu2 %v8338_v0  ;;  %v9303_v15 = vld [vmem:[%s13343_s4] ss:$0 sm:$0xff] }
   0xf   : > { %s13572_s26 = smov (!%p396_p6, %s7699_s26), 63  ;;  %v9358_v61 = vld [vmem:[%s13344_s5] ss:$0 sm:$0xff] }
  0x10   : > { %s7700_s27 = sshll.u32 %s13572_s26, 2 }
  0x11   : > { %s9233_s13 = scalar_lea.vmem %s13339_s0, %s7700_s27  ;;  %8364 = vmatpush.bf16.msra.mxu1 %v8337_v1  ;;  %628 = vmatpush.bf16.msra.mxu0 %v8337_v1  ;;  %s7702_s27 = sshll.u32 %s13572_s26, 3 }
  0x12   : > { %v9239_v2 = vld [vmem:[%s9233_s13 + $0x28] sm:$0xff]  ;;  %8366 = vmatpush.bf16.msra.mxu3 %v8337_v1  ;;  %8365 = vmatpush.bf16.msra.mxu2 %v8337_v1  ;;  %v9244_v3 = vld [vmem:[%s9233_s13 + $0x30] sm:$0xff]  ;;  %v9249_v4 = vld [vmem:[%s9233_s13 + $0x38] sm:$0xff]  ;;  %s13128_s14 = scalar_lea.vmem %s13350_s11, %s7702_s27 }
  0x13   : > { %v9257_v6 = vld [vmem:[%s9233_s13] sm:$0xff]  ;;  %v9270_v9 = vld [vmem:[%s9233_s13 + $0x8] sm:$0xff]  ;;  %v9280_v11 = vld [vmem:[%s9233_s13 + $0x10] sm:$0xff] }
  0x14   : > { %7780 = vmatmul.msk.bf16.vlgmr.msra.gmra.mxu1 %vm572_vm0, %v9239_v2  ;;  %7775 = vmatmul.msk.bf16.vlgmr.msra.gmra.mxu0 %vm572_vm0, %v9257_v6  ;;  %v9265_v8 = vld [vmem:[%s9233_s13 + $0x40] sm:$0xff]  ;;  %v9275_v10 = vld [vmem:[%s9233_s13 + $0x48] sm:$0xff]  ;;  %v9287_v12 = vld [vmem:[%s9233_s13 + $0x18] sm:$0xff] }
  0x15   : > { %736 = vmatpush.bf16.msrb.mxu1 %v8340_v5  ;;  %v9294_v13 = vld [vmem:[%s9233_s13 + $0x20] sm:$0xff]  ;;  %v9361_v62 = vld [vmem:[%s9233_s13 + $0x50] sm:$0xff] }
  0x16   : > { %7785 = vmatmul.msk.bf16.vlgmr.msra.gmra.mxu2 %vm572_vm0, %v9361_v62 }
  0x19   : > { %737 = vmatpush.bf16.msrb.mxu1 %v8339_v7 }
  0x24   : > { %7781 = vmatmul.msk.bf16.gmra.mxu1 %vm572_vm0, %v9244_v3  ;;  %7776 = vmatmul.msk.bf16.gmra.mxu0 %vm572_vm0, %v9270_v9 }
  0x34   : > { %7782 = vmatmul.msk.bf16.gmra.mxu1 %vm572_vm0, %v9249_v4  ;;  %7777 = vmatmul.msk.bf16.gmra.mxu0 %vm572_vm0, %v9280_v11 }
  0x44   : > { %7783 = vmatmul.msk.bf16.gmra.mxu1 %vm572_vm0, %v9265_v8  ;;  %7778 = vmatmul.msk.bf16.gmra.mxu0 %vm572_vm0, %v9287_v12 }
  0x54   : > { %7784 = vmatmul.msk.bf16.gmra.mxu1 %vm572_vm0, %v9275_v10  ;;  %7779 = vmatmul.msk.bf16.gmra.mxu0 %vm572_vm0, %v9294_v13 }
  0x64   : > { %7799 = vmatmul.msk.bf16.vlgmr.msrb.gmra.mxu1 %vm572_vm0, %v9257_v6 }
  0x74   : > { %7800 = vmatmul.msk.bf16.gmra.mxu1 %vm572_vm0, %v9270_v9 }
  0x84   : > { %7801 = vmatmul.msk.bf16.gmra.mxu1 %vm572_vm0, %v9280_v11 }
  0x91   : > { %v655_v14 = vpop.f32.mrf.mxu1 }
  0x92   : > { %v656_v16 = vadd.f32 %v9303_v15, %v655_v14 }
  0x94   : > { %7802 = vmatmul.msk.bf16.gmra.mxu1 %vm572_vm0, %v9287_v12  ;;  %v938_v18 = vpack.c.bf16 %v656_v16, %v656_v16 }
  0x96   : > { %v9309_v21 = vunpack.c.l.b16 %v938_v18 }
  0x99   : > { %v657_v17 = vpop.f32.mrf.mxu1 }
  0x9a   : > { %v658_v19 = vadd.f32 %v9303_v15, %v657_v17 }
  0x9c   : > { %v939_v20 = vpack.c.bf16 %v658_v19, %v658_v19  ;;  %v9376_v19 = vld [vmem:[%s9233_s13 + $0x58] sm:$0xff] }
  0x9d   : > { %7786 = vmatmul.msk.bf16.gmra.mxu2 %vm572_vm0, %v9376_v19 }
  0x9e   : > { %v9311_v22 = vunpack.c.l.b16 %v939_v20  ;;  %v9383_v20 = vld [vmem:[%s9233_s13 + $0x70] sm:$0xff] }
  0x9f   : > { %7789 = vmatmul.msk.bf16.vlgmr.msra.gmra.mxu3 %vm572_vm0, %v9383_v20 }
  0xa0   : > { %v1143_v23 = vpack.c.b16 %v9311_v22, %v9309_v21 }
  0xa1   : > { %v660_v24 = vpop.f32.mrf.mxu1 }
  0xa2   : > { %v661_v25 = vadd.f32 %v9303_v15, %v660_v24 }
  0xa4   : > { %7803 = vmatmul.msk.bf16.gmra.mxu1 %vm572_vm0, %v9294_v13  ;;  %v940_v27 = vpack.c.bf16 %v661_v25, %v661_v25 }
  0xa6   : > { %v9319_v30 = vunpack.c.l.b16 %v940_v27  ;;  %v9395_v27 = vld [vmem:[%s9233_s13 + $0x78] sm:$0xff] }
  0xa9   : > { %v662_v26 = vpop.f32.mrf.mxu1 }
  0xaa   : > { %v663_v28 = vadd.f32 %v9303_v15, %v662_v26  ;;  %v9388_v26 = vld [vmem:[%s9233_s13 + $0x60] sm:$0xff] }
  0xac   : > { %v941_v29 = vpack.c.bf16 %v663_v28, %v663_v28 }
  0xad   : > { %7787 = vmatmul.msk.bf16.gmra.mxu2 %vm572_vm0, %v9388_v26 }
  0xae   : > { %v9321_v31 = vunpack.c.l.b16 %v941_v29 }
  0xaf   : > { %7790 = vmatmul.msk.bf16.gmra.mxu3 %vm572_vm0, %v9395_v27 }
  0xb0   : > { %v1144_v32 = vpack.c.b16 %v9321_v31, %v9319_v30 }
  0xb1   : > { %v665_v33 = vpop.f32.mrf.mxu1 }
  0xb2   : > { %v666_v34 = vadd.f32 %v9303_v15, %v665_v33  ;;  %v9400_v33 = vld [vmem:[%s9233_s13 + $0x68] sm:$0xff] }
  0xb4   : > { %7804 = vmatmul.msk.bf16.gmra.mxu1 %vm572_vm0, %v9239_v2  ;;  %v942_v36 = vpack.c.bf16 %v666_v34, %v666_v34 }
  0xb6   : > { %v9329_v39 = vunpack.c.l.b16 %v942_v36 }
  0xb9   : > { %v667_v35 = vpop.f32.mrf.mxu1 }
  0xba   : > { %v668_v37 = vadd.f32 %v9303_v15, %v667_v35  ;;  %v630_v35 = vpop.f32.mrf.mxu0 }
  0xbc   : > { %v943_v38 = vpack.c.bf16 %v668_v37, %v668_v37 }
  0xbd   : > { %7788 = vmatmul.msk.bf16.gmra.mxu2 %vm572_vm0, %v9400_v33 }
  0xbe   : > { %v9331_v40 = vunpack.c.l.b16 %v943_v38 }
  0xc0   : > { %v1145_v41 = vpack.c.b16 %v9331_v40, %v9329_v39 }
  0xc1   : > { %v670_v42 = vpop.f32.mrf.mxu1 }
  0xc2   : > { %v671_v43 = vadd.f32 %v9303_v15, %v670_v42 }
  0xc4   : > { %7805 = vmatmul.msk.bf16.gmra.mxu1 %vm572_vm0, %v9244_v3  ;;  %v944_v45 = vpack.c.bf16 %v671_v43, %v671_v43 }
  0xc6   : > { %v9339_v48 = vunpack.c.l.b16 %v944_v45 }
  0xc9   : > { %v672_v44 = vpop.f32.mrf.mxu1 }
  0xca   : > { %v673_v46 = vadd.f32 %v9303_v15, %v672_v44 }
  0xcc   : > { %v945_v47 = vpack.c.bf16 %v673_v46, %v673_v46 }
  0xce   : > { %v9341_v49 = vunpack.c.l.b16 %v945_v47 }
  0xd0   : > { %v1235_v50 = vpack.c.b16 %v9341_v49, %v9339_v48 }
  0xd1   : > { %v675_v51 = vpop.f32.mrf.mxu1 }
  0xd2   : > { %v676_v52 = vadd.f32 %v9303_v15, %v675_v51 }
  0xd4   : > { %7806 = vmatmul.msk.bf16.gmra.mxu1 %vm572_vm0, %v9249_v4  ;;  %v946_v54 = vpack.c.bf16 %v676_v52, %v676_v52 }
  0xd6   : > { %v9349_v57 = vunpack.c.l.b16 %v946_v54  ;;  %v632_v54 = vpop.f32.mrf.mxu0 }
  0xd9   : > { %v677_v53 = vpop.f32.mrf.mxu1 }
  0xda   : > { %v678_v55 = vadd.f32 %v9303_v15, %v677_v53 }
  0xdc   : > { %v947_v56 = vpack.c.bf16 %v678_v55, %v678_v55 }
  0xde   : > { %v9351_v58 = vunpack.c.l.b16 %v947_v56 }
  0xe0   : > { %v1236_v59 = vpack.c.b16 %v9351_v58, %v9349_v57  ;;  %v8342_v58 = vld [vmem:[%s13342_s3 + $0x8] sm:$0xff] }
  0xe1   : > { %v739_v60 = vpop.f32.mrf.mxu1  ;;  %845 = vmatpush.bf16.msrb.mxu2 %v8342_v58 }
  0xe2   : > { %v740_v63 = vadd.f32 %v9358_v61, %v739_v60 }
  0xe4   : > { %7807 = vmatmul.msk.bf16.gmra.mxu1 %vm572_vm0, %v9265_v8  ;;  %v960_v1 = vpack.c.bf16 %v740_v63, %v740_v63 }
  0xe6   : > { %v9369_v14 = vunpack.c.l.b16 %v960_v1 }
  0xe9   : > { %v741_v0 = vpop.f32.mrf.mxu1 }
  0xea   : > { %v742_v5 = vadd.f32 %v9358_v61, %v741_v0 }
  0xec   : > { %v961_v7 = vpack.c.bf16 %v742_v5, %v742_v5 }
  0xee   : > { %v9371_v16 = vunpack.c.l.b16 %v961_v7 }
  0xf0   : > { %v1068_v17 = vpack.c.b16 %v9371_v16, %v9369_v14 }
  0xf1   : > { %v744_v18 = vpop.f32.mrf.mxu1 }
  0xf2   : > { %v745_v63 = vadd.f32 %v9358_v61, %v744_v18  ;;  %v631_v18 = vadd.f32 %v9303_v15, %v630_v35 }
  0xf4   : > { %7808 = vmatmul.msk.bf16.gmra.mxu1 %vm572_vm0, %v9275_v10  ;;  %v962_v7 = vpack.c.bf16 %v745_v63, %v745_v63 }
  0xf9   : > { %v746_v24 = vpop.f32.mrf.mxu1 }
  0xfa   : > { %v747_v55 = vadd.f32 %v9358_v61, %v746_v24  ;;  %v635_v24 = vpop.f32.mrf.mxu0 }
  0xfb   : > { %v636_v35 = vadd.f32 %v9303_v15, %v635_v24 }
  0xfc   : > { %v963_v1 = vpack.c.bf16 %v747_v55, %v747_v55 }
  0xfe   : > { %v1063_v16 = vunpack.c.l.b16 %v963_v1 }
 0x101   : > { %v749_v25 = vpop.f32.mrf.mxu1 }
 0x102   : > { %v750_v43 = vadd.f32 %v9358_v61, %v749_v25 }
 0x104   : > { %7809 = vmatmul.msk.bf16.gmra.mxu1 %vm572_vm0, %v9361_v62  ;;  %v964_v51 = vpack.c.bf16 %v750_v43, %v750_v43 }
 0x106   : > { %v1064_v0 = vunpack.c.l.b16 %v964_v51 }
 0x109   : > { %v751_v28 = vpop.f32.mrf.mxu1 }
 0x10a   : > { %v752_v37 = vadd.f32 %v9358_v61, %v751_v28  ;;  %v1062_v28 = vunpack.c.l.b16 %v962_v7 }
 0x10c   : > { %v965_v45 = vpack.c.bf16 %v752_v37, %v752_v37  ;;  %v633_v37 = vadd.f32 %v9303_v15, %v632_v54 }
 0x10e   : > { %v1065_v56 = vunpack.c.l.b16 %v965_v45  ;;  %v929_v43 = vpack.c.bf16 %v633_v37, %v633_v37  ;;  %v1086_v45 = vsel %vm1072_vm1, %v1068_v17, 0 }
 0x110   : > { %v1070_v5 = vpack.c.b16 %v1065_v56, %v1064_v0  ;;  %v930_v56 = vpack.c.bf16 %v636_v35, %v636_v35 }
 0x111   : > { %v754_v29 = vpop.f32.mrf.mxu1 }
 0x112   : > { %v755_v34 = vadd.f32 %v9358_v61, %v754_v29  ;;  %v1092_v25 = vsel %vm1072_vm1, %v1070_v5, 0  ;;  %v1069_v29 = vpack.c.b16 %v1063_v16, %v1062_v28  ;;  %v1042_v17 = vunpack.c.l.b16 %v930_v56 }
 0x114   : > { %7810 = vmatmul.msk.bf16.gmra.mxu1 %vm572_vm0, %v9376_v19  ;;  %v966_v38 = vpack.c.bf16 %v755_v34, %v755_v34 }
 0x116   : > { %v1066_v46 = vunpack.c.l.b16 %v966_v38  ;;  %v637_v38 = vpop.f32.mrf.mxu0 }
 0x117   : > { %v638_v54 = vadd.f32 %v9303_v15, %v637_v38 }
 0x119   : > { %v756_v36 = vpop.f32.mrf.mxu1 }
 0x11a   : > { %v757_v42 = vadd.f32 %v9358_v61, %v756_v36  ;;  %v1089_v36 = vsel %vm1072_vm1, %v1069_v29, 0 }
 0x11c   : > { %v967_v44 = vpack.c.bf16 %v757_v42, %v757_v42  ;;  %v928_v42 = vpack.c.bf16 %v631_v18, %v631_v18 }
 0x11e   : > { %v1067_v47 = vunpack.c.l.b16 %v967_v44  ;;  %v640_v51 = vpop.f32.mrf.mxu0 }
 0x120   : > { %v1071_v52 = vpack.c.b16 %v1067_v47, %v1066_v46  ;;  %v1040_v46 = vunpack.c.l.b16 %v928_v42  ;;  %v1041_v47 = vunpack.c.l.b16 %v929_v43 }
 0x121   : > { %v9410_v53 = vpop.f32.mrf.mxu1 }
 0x122   : > { %v1095_v60 = vsel %vm1072_vm1, %v1071_v52, 0  ;;  %v1048_v52 = vpack.c.b16 %v1041_v47, %v1040_v46  ;;  %v9468_v21 = vpop.f32.mrf.mxu3 }
 0x123   : > { %1101 = vmatpush.bf16.xpose.msrb.mxu3 %v1095_v60  ;;  %v931_v60 = vpack.c.bf16 %v638_v54, %v638_v54 }
 0x124   : > { %7811 = vmatmul.msk.bf16.gmra.mxu1 %vm572_vm0, %v9388_v26 }
 0x125   : > { %v1043_v1 = vunpack.c.l.b16 %v931_v60 }
 0x126   : > { %v642_v0 = vpop.f32.mrf.mxu0 }
 0x127   : > { %v1049_v5 = vpack.c.b16 %v1043_v1, %v1042_v17  ;;  %v643_v24 = vadd.f32 %v9303_v15, %v642_v0 }
 0x129   : > { %v9417_v14 = vpop.f32.mrf.mxu1 }
 0x12b   : > { %1102 = vmatpush.bf16.xpose.msrb.mxu3 %v1092_v25  ;;  %v641_v25 = vadd.f32 %v9303_v15, %v640_v51 }
 0x12d   : > { %v932_v29 = vpack.c.bf16 %v641_v25, %v641_v25 }
 0x12e   : > { %v645_v16 = vpop.f32.mrf.mxu0 }
 0x12f   : > { %v646_v25 = vadd.f32 %v9303_v15, %v645_v16 }
 0x131   : > { %v764_v34 = vpop.f32.mrf.mxu1 }
 0x133   : > { %1103 = vmatpush.bf16.xpose.msrb.mxu3 %v1089_v36  ;;  %v933_v36 = vpack.c.bf16 %v643_v24, %v643_v24 }
 0x134   : > { %7812 = vmatmul.msk.bf16.gmra.mxu1 %vm572_vm0, %v9400_v33 }
 0x135   : > { %v1045_v46 = vunpack.c.l.b16 %v933_v36 }
 0x136   : > { %v647_v51 = vpop.f32.mrf.mxu0 }
 0x137   : > { %v648_v24 = vadd.f32 %v9303_v15, %v647_v51 }
 0x139   : > { %v766_v44 = vpop.f32.mrf.mxu1 }
 0x13a   : > { %v767_v1 = vadd.f32 %v9358_v61, %v766_v44 }
 0x13b   : > { %1104 = vmatpush.bf16.xpose.msrb.mxu3 %v1086_v45  ;;  %v1044_v45 = vunpack.c.l.b16 %v932_v29 }
 0x13d   : > { %v1050_v0 = vpack.c.b16 %v1045_v46, %v1044_v45 }
 0x13e   : > { %v650_v36 = vpop.f32.mrf.mxu0 }
 0x141   : > { %v769_v55 = vpop.f32.mrf.mxu1 }
 0x142   : > { %7839 = vmatmul.msk.bf16.vlgmr.msrb.gmra.mxu3 %vm1072_vm1, %v1048_v52  ;;  %v770_v43 = vadd.f32 %v9358_v61, %v769_v55  ;;  %v765_v55 = vadd.f32 %v9358_v61, %v764_v34  ;;  %v760_v34 = vadd.f32 %v9358_v61, %v9410_v53 }
 0x144   : > { %7813 = vmatmul.msk.bf16.gmra.mxu1 %vm572_vm0, %v9383_v20  ;;  %v972_v56 = vpack.c.bf16 %v770_v43, %v770_v43 }
 0x149   : > { %v771_v63 = vpop.f32.mrf.mxu1 }
 0x14a   : > { %v772_v37 = vadd.f32 %v9358_v61, %v771_v63 }
 0x14c   : > { %v973_v52 = vpack.c.bf16 %v772_v37, %v772_v37  ;;  %v934_v37 = vpack.c.bf16 %v646_v25, %v646_v25 }
 0x14e   : > { %v1159_v63 = vunpack.c.l.b16 %v973_v52  ;;  %v1046_v46 = vunpack.c.l.b16 %v934_v37 }
 0x151   : > { %v774_v7 = vpop.f32.mrf.mxu1 }
 0x152   : > { %7840 = vmatmul.msk.bf16.gmra.mxu3 %vm1072_vm1, %v1049_v5  ;;  %v775_v28 = vadd.f32 %v9358_v61, %v774_v7  ;;  %v1158_v7 = vunpack.c.l.b16 %v972_v56  ;;  %v652_v56 = vpop.f32.mrf.mxu0 }
 0x153   : > { %v653_v53 = vadd.f32 %v9303_v15, %v652_v56 }
 0x154   : > { %7814 = vmatmul.msk.bf16.gmra.mxu1 %vm572_vm0, %v9395_v27  ;;  %v974_v38 = vpack.c.bf16 %v775_v28, %v775_v28  ;;  %v971_v28 = vpack.c.bf16 %v767_v1, %v767_v1  ;;  %v1164_v29 = vpack.c.b16 %v1159_v63, %v1158_v7  ;;  %v651_v63 = vadd.f32 %v9303_v15, %v650_v36 }
 0x155   : > { %v937_v7 = vpack.c.bf16 %v653_v53, %v653_v53 }
 0x156   : > { %v1160_v35 = vunpack.c.l.b16 %v974_v38  ;;  %v935_v38 = vpack.c.bf16 %v648_v24, %v648_v24  ;;  %v1157_v43 = vunpack.c.l.b16 %v971_v28  ;;  %v1185_v45 = vsel %vm1072_vm1, %v1164_v29, 0 }
 0x157   : > { %v1135_v29 = vunpack.c.l.b16 %v937_v7 }
 0x159   : > { %v776_v18 = vpop.f32.mrf.mxu1 }
 0x15a   : > { %v777_v42 = vadd.f32 %v9358_v61, %v776_v18  ;;  %v970_v18 = vpack.c.bf16 %v765_v55, %v765_v55  ;;  %v936_v55 = vpack.c.bf16 %v651_v63, %v651_v63 }
 0x15c   : > { %v975_v47 = vpack.c.bf16 %v777_v42, %v777_v42  ;;  %v762_v42 = vadd.f32 %v9358_v61, %v9417_v14  ;;  %v1156_v16 = vunpack.c.l.b16 %v970_v18  ;;  %v1134_v28 = vunpack.c.l.b16 %v936_v55 }
 0x15e   : > { %v1161_v54 = vunpack.c.l.b16 %v975_v47  ;;  %v1047_v47 = vunpack.c.l.b16 %v935_v38  ;;  %v969_v51 = vpack.c.bf16 %v762_v42, %v762_v42  ;;  %v1163_v52 = vpack.c.b16 %v1157_v43, %v1156_v16 }
 0x15f   : > { %v1142_v18 = vpack.c.b16 %v1135_v29, %v1134_v28  ;;  %v9482_v29 = vpop.f32.mrf.mxu3 }
 0x160   : > { %v1165_v60 = vpack.c.b16 %v1161_v54, %v1160_v35  ;;  %v968_v35 = vpack.c.bf16 %v760_v34, %v760_v34  ;;  %v1051_v54 = vpack.c.b16 %v1047_v47, %v1046_v46  ;;  %v1182_v14 = vsel %vm1072_vm1, %v1163_v52, 0 }
 0x161   : > { %v9440_v17 = vpop.f32.mrf.mxu1 }
 0x162   : > { %7841 = vmatmul.msk.bf16.gmra.mxu3 %vm1072_vm1, %v1050_v0  ;;  %v1188_v5 = vsel %vm1072_vm1, %v1165_v60, 0  ;;  %v1155_v0 = vunpack.c.l.b16 %v969_v51  ;;  %v1154_v1 = vunpack.c.l.b16 %v968_v35  ;;  %v780_v55 = vadd.f32 %v9358_v61, %v9440_v17 }
 0x163   : > { %1194 = vmatpush.bf16.xpose.msra.mxu3 %v1188_v5 }
 0x164   : > { %v1162_v5 = vpack.c.b16 %v1155_v0, %v1154_v1  ;;  %v976_v31 = vpack.c.bf16 %v780_v55, %v780_v55 }
 0x166   : > { %v1179_v24 = vsel %vm1072_vm1, %v1162_v5, 0 }
 0x167   : > { %v9491_v17 = vpop.f32.mrf.mxu3 }
 0x169   : > { %v781_v44 = vpop.f32.mrf.mxu1 }
 0x16a   : > { %v782_v7 = vadd.f32 %v9358_v61, %v781_v44 }
 0x16b   : > { %1195 = vmatpush.bf16.xpose.msra.mxu3 %v1185_v45 }
 0x171   : > { %v784_v60 = vpop.f32.mrf.mxu1 }
 0x172   : > { %7842 = vmatmul.msk.bf16.gmra.mxu3 %vm1072_vm1, %v1051_v54  ;;  %v785_v56 = vadd.f32 %v9358_v61, %v784_v60 }
 0x173   : > { %1196 = vmatpush.bf16.xpose.msra.mxu3 %v1182_v14 }
 0x174   : > { %v978_v53 = vpack.c.bf16 %v785_v56, %v785_v56 }
 0x179   : > { %v786_v25 = vpop.f32.mrf.mxu1 }
 0x17a   : > { %v787_v22 = vadd.f32 %v9358_v61, %v786_v25  ;;  %v1249_v25 = vunpack.c.l.b16 %v978_v53 }
 0x17b   : > { %1197 = vmatpush.bf16.xpose.msra.mxu3 %v1179_v24 }
 0x17c   : > { %v979_v5 = vpack.c.bf16 %v787_v22, %v787_v22 }
 0x17e   : > { %v1250_v24 = vunpack.c.l.b16 %v979_v5 }
 0x181   : > { %v789_v37 = vpop.f32.mrf.mxu1 }
 0x182   : > { %7843 = vmatmul.msk.bf16.vlgmr.msra.gmra.mxu3 %vm1072_vm1, %v1142_v18  ;;  %v790_v43 = vadd.f32 %v9358_v61, %v789_v37  ;;  %v1256_v18 = vpack.c.b16 %v1250_v24, %v1249_v25  ;;  %v1247_v37 = vunpack.c.l.b16 %v976_v31  ;;  %v8341_v31 = vld [vmem:[%s13342_s3] sm:$0xff] }
 0x183   : > { %846 = vmatpush.bf16.msrb.mxu2 %v8341_v31 }
 0x184   : > { %v980_v47 = vpack.c.bf16 %v790_v43, %v790_v43 }
 0x186   : > { %7823 = vmatmul.msk.bf16.vlgmr.msrb.gmra.mxu2 %vm572_vm0, %v9257_v6 }
 0x189   : > { %v791_v38 = vpop.f32.mrf.mxu1 }
 0x18a   : > { %v792_v45 = vadd.f32 %v9358_v61, %v791_v38 }
 0x18c   : > { %v981_v51 = vpack.c.bf16 %v792_v45, %v792_v45 }
 0x18e   : > { %v1252_v0 = vunpack.c.l.b16 %v981_v51 }
 0x191   : > { %v794_v42 = vpop.f32.mrf.mxu1 }
 0x192   : > { %7844 = vmatmul.msk.bf16.gmra.mxu3 %vm1072_vm1, %v1143_v23  ;;  %v795_v36 = vadd.f32 %v9358_v61, %v794_v42  ;;  %v1251_v23 = vunpack.c.l.b16 %v980_v47  ;;  %v1275_v42 = vsel %vm1072_vm1, %v1256_v18, 0 }
 0x194   : > { %v982_v34 = vpack.c.bf16 %v795_v36, %v795_v36  ;;  %v1257_v60 = vpack.c.b16 %v1252_v0, %v1251_v23 }
 0x196   : > { %v1253_v52 = vunpack.c.l.b16 %v982_v34  ;;  %v1278_v28 = vsel %vm1072_vm1, %v1257_v60, 0  ;;  %v680_v34 = vpop.f32.mrf.mxu2  ;;  %7824 = vmatmul.msk.bf16.gmra.mxu2 %vm572_vm0, %v9270_v9 }
 0x199   : > { %v796_v16 = vpop.f32.mrf.mxu1 }
 0x19a   : > { %v797_v46 = vadd.f32 %v9358_v61, %v796_v16  ;;  %v9494_v16 = vpop.f32.mrf.mxu3 }
 0x19c   : > { %v983_v35 = vpack.c.bf16 %v797_v46, %v797_v46 }
 0x19e   : > { %v1254_v54 = vunpack.c.l.b16 %v983_v35  ;;  %v682_v39 = vpop.f32.mrf.mxu2  ;;  %v681_v35 = vadd.f32 %v9303_v15, %v680_v34 }
 0x1a0   : > { %v1258_v14 = vpack.c.b16 %v1254_v54, %v1253_v52  ;;  %v683_v54 = vadd.f32 %v9303_v15, %v682_v39 }
 0x1a1   : > { %v9471_v1 = vpop.f32.mrf.mxu1 }
 0x1a2   : > { %7845 = vmatmul.msk.bf16.gmra.mxu3 %vm1072_vm1, %v1144_v32  ;;  %v1281_v63 = vsel %vm1072_vm1, %v1258_v14, 0  ;;  %v977_v32 = vpack.c.bf16 %v782_v7, %v782_v7  ;;  %v949_v56 = vpack.c.bf16 %v683_v54, %v683_v54 }
 0x1a3   : > { %1287 = vmatpush.bf16.xpose.msrb.mxu3 %v1281_v63 }
 0x1a4   : > { %v1248_v38 = vunpack.c.l.b16 %v977_v32  ;;  %v1232_v5 = vunpack.c.l.b16 %v949_v56 }
 0x1a6   : > { %v1255_v44 = vpack.c.b16 %v1248_v38, %v1247_v37  ;;  %v685_v51 = vpop.f32.mrf.mxu2  ;;  %7825 = vmatmul.msk.bf16.gmra.mxu2 %vm572_vm0, %v9280_v11  ;;  %v9570_v11 = vld [vmem:[%s13346_s7 + $0x8] sm:$0xff] }
 0x1a8   : > { %v1272_v43 = vsel %vm1072_vm1, %v1255_v44, 0 }
 0x1a9   : > { %v9484_v30 = vpop.f32.mrf.mxu1 }
 0x1aa   : > { %v802_v54 = vadd.f32 %v9358_v61, %v9484_v30 }
 0x1ab   : > { %1288 = vmatpush.bf16.xpose.msrb.mxu3 %v1278_v28 }
 0x1ae   : > { %v687_v22 = vpop.f32.mrf.mxu2 }
 0x1b1   : > { %v804_v36 = vpop.f32.mrf.mxu1 }
 0x1b2   : > { %7846 = vmatmul.msk.bf16.gmra.mxu3 %vm1072_vm1, %v1145_v41  ;;  %v805_v32 = vadd.f32 %v9358_v61, %v804_v36 }
 0x1b3   : > { %1289 = vmatpush.bf16.xpose.msrb.mxu3 %v1275_v42 }
 0x1b4   : > { %v986_v36 = vpack.c.bf16 %v805_v32, %v805_v32 }
 0x1b6   : > { %v690_v44 = vpop.f32.mrf.mxu2  ;;  %7826 = vmatmul.msk.bf16.gmra.mxu2 %vm572_vm0, %v9287_v12 }
 0x1b9   : > { %v806_v45 = vpop.f32.mrf.mxu1 }
 0x1ba   : > { %v807_v18 = vadd.f32 %v9358_v61, %v806_v45 }
 0x1bb   : > { %1290 = vmatpush.bf16.xpose.msrb.mxu3 %v1272_v43  ;;  %v686_v43 = vadd.f32 %v9303_v15, %v685_v51  ;;  %v800_v51 = vadd.f32 %v9358_v61, %v9471_v1 }
 0x1bc   : > { %v987_v39 = vpack.c.bf16 %v807_v18, %v807_v18 }
 0x1be   : > { %v692_v6 = vpop.f32.mrf.mxu2 }
 0x1bf   : > { %v693_v30 = vadd.f32 %v9303_v15, %v692_v6  ;;  %v701_v6 = vadd.f32 %v9303_v15, %v9468_v21 }
 0x1c1   : > { %v809_v46 = vpop.f32.mrf.mxu1 }
 0x1c2   : > { %7847 = vmatmul.msk.bf16.vlgmr.msrb.gmra.mxu3 %vm1072_vm1, %v1235_v50  ;;  %v948_v50 = vpack.c.bf16 %v681_v35, %v681_v35  ;;  %v810_v23 = vadd.f32 %v9358_v61, %v809_v46  ;;  %v688_v46 = vadd.f32 %v9303_v15, %v687_v22 }
 0x1c4   : > { %v1231_v53 = vunpack.c.l.b16 %v948_v50  ;;  %v951_v35 = vpack.c.bf16 %v688_v46, %v688_v46  ;;  %v1343_v50 = vunpack.c.l.b16 %v987_v39 }
 0x1c5   : > { %v9500_v40 = vpop.f32.mrf.mxu3 }
 0x1c6   : > { %v1237_v24 = vpack.c.b16 %v1232_v5, %v1231_v53  ;;  %7827 = vmatmul.msk.bf16.gmra.mxu2 %vm572_vm0, %v9294_v13 }
 0x1c9   : > { %v811_v41 = vpop.f32.mrf.mxu1 }
 0x1ca   : > { %v812_v0 = vadd.f32 %v9358_v61, %v811_v41 }
 0x1cc   : > { %v989_v60 = vpack.c.bf16 %v812_v0, %v812_v0  ;;  %v984_v0 = vpack.c.bf16 %v800_v51, %v800_v51 }
 0x1cd   : > { %v9502_v47 = vpop.f32.mrf.mxu3 }
 0x1ce   : > { %v1345_v38 = vunpack.c.l.b16 %v989_v60 }
 0x1d1   : > { %v814_v52 = vpop.f32.mrf.mxu1 }
 0x1d2   : > { %7848 = vmatmul.msk.bf16.gmra.mxu3 %vm1072_vm1, %v1236_v59  ;;  %v815_v48 = vadd.f32 %v9358_v61, %v814_v52  ;;  %v988_v59 = vpack.c.bf16 %v810_v23, %v810_v23  ;;  %v950_v52 = vpack.c.bf16 %v686_v43, %v686_v43  ;;  %v1234_v23 = vunpack.c.l.b16 %v951_v35 }
 0x1d4   : > { %v990_v14 = vpack.c.bf16 %v815_v48, %v815_v48  ;;  %v1344_v37 = vunpack.c.l.b16 %v988_v59  ;;  %v1342_v48 = vunpack.c.l.b16 %v986_v36  ;;  %v1233_v22 = vunpack.c.l.b16 %v950_v52 }
 0x1d5   : > { %v9511_v49 = vpop.f32.mrf.mxu3 }
 0x1d6   : > { %v1346_v55 = vunpack.c.l.b16 %v990_v14  ;;  %v1350_v45 = vpack.c.b16 %v1345_v38, %v1344_v37  ;;  %v985_v14 = vpack.c.bf16 %v802_v54, %v802_v54  ;;  %v1238_v5 = vpack.c.b16 %v1234_v23, %v1233_v22  ;;  %7828 = vmatmul.msk.bf16.gmra.mxu2 %vm572_vm0, %v9239_v2 }
 0x1d8   : > { %v1371_v56 = vsel %vm1072_vm1, %v1350_v45, 0  ;;  %v1341_v58 = vunpack.c.l.b16 %v985_v14  ;;  %v9587_v14 = vld [vmem:[%s13346_s7 + $0x10] sm:$0xff] }
 0x1d9   : > { %v816_v63 = vpop.f32.mrf.mxu1 }
 0x1da   : > { %v817_v57 = vadd.f32 %v9358_v61, %v816_v63  ;;  %v1349_v63 = vpack.c.b16 %v1343_v50, %v1342_v48  ;;  %v691_v61 = vadd.f32 %v9303_v15, %v690_v44  ;;  %v9560_v44 = vld [vmem:[%s13346_s7] sm:$0xff]  ;;  %v449_v48 = vld [vmem:[#allocation2 + $0x48] sm:$0xff] }
 0x1dc   : > { %v991_v7 = vpack.c.bf16 %v817_v57, %v817_v57  ;;  %v1340_v57 = vunpack.c.l.b16 %v984_v0  ;;  %v1368_v1 = vsel %vm1072_vm1, %v1349_v63, 0  ;;  %v703_v0 = vadd.f32 %v9303_v15, %v9482_v29  ;;  %v9597_v29 = vld [vmem:[%s13346_s7 + $0x18] sm:$0xff] }
 0x1dd   : > { %v9519_v25 = vpop.f32.mrf.mxu3 }
 0x1de   : > { %v1347_v28 = vunpack.c.l.b16 %v991_v7  ;;  %v1348_v59 = vpack.c.b16 %v1341_v58, %v1340_v57  ;;  %v952_v7 = vpack.c.bf16 %v691_v61, %v691_v61  ;;  %v956_v58 = vpack.c.bf16 %v701_v6, %v701_v6 }
 0x1e0   : > { %v1351_v42 = vpack.c.b16 %v1347_v28, %v1346_v55  ;;  %v695_v55 = vpop.f32.mrf.mxu2  ;;  %v1365_v28 = vsel %vm1072_vm1, %v1348_v59, 0  ;;  %v1320_v31 = vunpack.c.l.b16 %v952_v7  ;;  %v1324_v21 = vunpack.c.l.b16 %v956_v58 }
 0x1e2   : > { %7849 = vmatmul.msk.bf16.gmra.mxu3 %vm1072_vm1, %v1237_v24  ;;  %v1374_v34 = vsel %vm1072_vm1, %v1351_v42, 0  ;;  %v953_v24 = vpack.c.bf16 %v693_v30, %v693_v30  ;;  %v696_v42 = vadd.f32 %v9303_v15, %v695_v55  ;;  %v451_v55 = vld [vmem:[#allocation2 + $0x58] sm:$0xff] }
 0x1e3   : > { %1380 = vmatpush.bf16.xpose.msra.mxu3 %v1374_v34  ;;  %v448_v34 = vld [vmem:[#allocation2 + $0x40] sm:$0xff] }
 0x1e4   : > { %v1321_v32 = vunpack.c.l.b16 %v953_v24  ;;  %v954_v46 = vpack.c.bf16 %v696_v42, %v696_v42 }
 0x1e5   : > { %v9532_v41 = vpop.f32.mrf.mxu3 }
 0x1e6   : > { %v1328_v37 = vpack.c.b16 %v1321_v32, %v1320_v31  ;;  %v1322_v52 = vunpack.c.l.b16 %v954_v46  ;;  %v706_v32 = vadd.f32 %v9303_v15, %v9491_v17  ;;  %7829 = vmatmul.msk.bf16.gmra.mxu2 %vm572_vm0, %v9244_v3 }
 0x1e8   : > { %v697_v38 = vpop.f32.mrf.mxu2 }
 0x1e9   : > { %v698_v9 = vadd.f32 %v9303_v15, %v697_v38  ;;  %v9614_v38 = vld [vmem:[%s13346_s7 + $0x20] sm:$0xff] }
 0x1eb   : > { %1381 = vmatpush.bf16.xpose.msra.mxu3 %v1371_v56  ;;  %v955_v39 = vpack.c.bf16 %v698_v9, %v698_v9  ;;  %v452_v9 = vld [vmem:[#allocation2 + $0x60] sm:$0xff] }
 0x1ed   : > { %v9539_v53 = vpop.f32.mrf.mxu3  ;;  %v1323_v35 = vunpack.c.l.b16 %v955_v39 }
 0x1ef   : > { %v1329_v50 = vpack.c.b16 %v1323_v35, %v1322_v52  ;;  %v453_v52 = vld [vmem:[#allocation2 + $0x68] sm:$0xff] }
 0x1f2   : > { %7850 = vmatmul.msk.bf16.gmra.mxu3 %vm1072_vm1, %v1238_v5  ;;  %v450_v5 = vld [vmem:[#allocation2 + $0x50] sm:$0xff] }
 0x1f3   : > { %1382 = vmatpush.bf16.xpose.msra.mxu3 %v1368_v1  ;;  %v957_v1 = vpack.c.bf16 %v703_v0, %v703_v0 }
 0x1f5   : > { %v9547_v60 = vpop.f32.mrf.mxu3  ;;  %v1325_v30 = vunpack.c.l.b16 %v957_v1 }
 0x1f6   : > { %7830 = vmatmul.msk.bf16.gmra.mxu2 %vm572_vm0, %v9249_v4 }
 0x1f7   : > { %v1330_v24 = vpack.c.b16 %v1325_v30, %v1324_v21  ;;  %v1107_v21 = vadd.f32 %v9500_v40, %v9560_v44  ;;  %v440_v30 = vld [vmem:[#allocation2] sm:$0xff]  ;;  %v1109_v40 = vadd.f32 %v9502_v47, %v9570_v11 }
 0x1fb   : > { %1383 = vmatpush.bf16.xpose.msra.mxu3 %v1365_v28 }
 0x1fd   : > { %v9550_v18 = vpop.f32.mrf.mxu3 }
 0x202   : > { %7851 = vmatmul.msk.bf16.vlgmr.msra.gmra.mxu3 %vm1072_vm1, %v1328_v37  ;;  %v708_v37 = vadd.f32 %v9303_v15, %v9494_v16  ;;  %v9624_v15 = vld [vmem:[%s13346_s7 + $0x28] sm:$0xff] }
 0x204   : > { %v959_v46 = vpack.c.bf16 %v708_v37, %v708_v37 }
 0x205   : > { %v1199_v43 = vpop.f32.mrf.mxu3 }
 0x206   : > { %v1200_v36 = vadd.f32 %v1199_v43, %v9560_v44  ;;  %v1327_v39 = vunpack.c.l.b16 %v959_v46  ;;  %7831 = vmatmul.msk.bf16.gmra.mxu2 %vm572_vm0, %v9265_v8  ;;  %v1112_v46 = vadd.f32 %v9511_v49, %v9587_v14 }
 0x208   : > { %v9563_v45 = vadd.f32 %v1200_v36, %v448_v34  ;;  %v958_v34 = vpack.c.bf16 %v706_v32, %v706_v32 }
 0x20a   : > { %v1462_v51 = vsel %vm1437_vm2, %v9563_v45, -inf  ;;  %v1326_v17 = vunpack.c.l.b16 %v958_v34 }
 0x20b   : > { %1463 = vmax.xlane.f32.xlu0 %v1462_v51 }
 0x20c   : > { %v1331_v51 = vpack.c.b16 %v1327_v39, %v1326_v17  ;;  %v442_v39 = vld [vmem:[#allocation2 + $0x10] sm:$0xff] }
 0x20d   : > { %v1201_v54 = vpop.f32.mrf.mxu3 }
 0x20e   : > { %v1202_v56 = vadd.f32 %v1201_v54, %v9570_v11 }
 0x210   : > { %v9573_v22 = vadd.f32 %v1202_v56, %v449_v48 }
 0x212   : > { %7852 = vmatmul.msk.bf16.gmra.mxu3 %vm1072_vm1, %v1329_v50  ;;  %v1465_v23 = vsel %vm1437_vm2, %v9573_v22, -inf  ;;  %v9640_v50 = vpop.f32.mrf.mxu2 }
 0x213   : > { %1466 = vmax.xlane.f32.xlu0 %v1465_v23 }
 0x215   : > { %v1204_v63 = vpop.f32.mrf.mxu3 }
 0x216   : > { %v1205_v57 = vadd.f32 %v1204_v63, %v9587_v14  ;;  %7832 = vmatmul.msk.bf16.gmra.mxu2 %vm572_vm0, %v9275_v10 }
 0x218   : > { %v9590_v61 = vadd.f32 %v1205_v57, %v450_v5 }
 0x21a   : > { %v1468_v12 = vsel %vm1437_vm2, %v9590_v61, -inf  ;;  %v9642_v56 = vpop.f32.mrf.mxu2 }
 0x21b   : > { %1469 = vmax.xlane.f32.xlu1 %v1468_v12 }
 0x21d   : > { %v1206_v59 = vpop.f32.mrf.mxu3 }
 0x21e   : > { %v1207_v7 = vadd.f32 %v1206_v59, %v9597_v29 }
 0x220   : > { %v9600_v28 = vadd.f32 %v1207_v7, %v451_v55  ;;  %v9671_v55 = vadd.f32 %v1107_v21, %v440_v30 }
 0x222   : > { %7853 = vmatmul.msk.bf16.gmra.mxu3 %vm1072_vm1, %v1330_v24  ;;  %v1471_v31 = vsel %vm1437_vm2, %v9600_v28, -inf  ;;  %v9646_v23 = vpop.f32.mrf.mxu2  ;;  %v1438_v37 = vsel %vm1437_vm2, %v9671_v55, -inf }
 0x223   : > { %1472 = vmax.xlane.f32.xlu1 %v1471_v31 }
 0x225   : > { %v1209_v42 = vpop.f32.mrf.mxu3 }
 0x226   : > { %v1210_v43 = vadd.f32 %v1209_v42, %v9614_v38  ;;  %7833 = vmatmul.msk.bf16.gmra.mxu2 %vm572_vm0, %v9361_v62 }
 0x228   : > { %v9617_v36 = vadd.f32 %v1210_v43, %v452_v9 }
 0x22a   : > { %v1474_v13 = vsel %vm1437_vm2, %v9617_v36, -inf  ;;  %v9648_v2 = vpop.f32.mrf.mxu2 }
 0x22b   : > { %1475 = vmax.xlane.f32.xlu2 %v1474_v13 }
 0x22d   : > { %v1211_v16 = vpop.f32.mrf.mxu3 }
 0x22e   : > { %v1212_v35 = vadd.f32 %v1211_v16, %v9624_v15  ;;  %v9699_v16 = vadd.f32 %v1112_v46, %v442_v39 }
 0x230   : > { %v9627_v54 = vadd.f32 %v1212_v35, %v453_v52 }
 0x232   : > { %7854 = vmatmul.msk.bf16.gmra.mxu3 %vm1072_vm1, %v1331_v51  ;;  %v1477_v48 = vsel %vm1437_vm2, %v9627_v54, -inf  ;;  %v9653_v8 = vpop.f32.mrf.mxu2 }
 0x233   : > { %1478 = vmax.xlane.f32.xlu2 %v1477_v48  ;;  %v1114_v48 = vadd.f32 %v9519_v25, %v9597_v29 }
 0x236   : > { %7834 = vmatmul.msk.bf16.gmra.mxu2 %vm572_vm0, %v9376_v19  ;;  %v441_v19 = vld [vmem:[#allocation2 + $0x8] sm:$0xff] }
 0x237   : > { %v9684_v9 = vadd.f32 %v1109_v40, %v441_v19 }
 0x239   : > { %v1441_v17 = vsel %vm1437_vm2, %v9684_v9, -inf }
 0x246   : > { %7835 = vmatmul.msk.bf16.gmra.mxu2 %vm572_vm0, %v9388_v26  ;;  %v1444_v26 = vsel %vm1437_vm2, %v9699_v16, -inf }
 0x256   : > { %7836 = vmatmul.msk.bf16.gmra.mxu2 %vm572_vm0, %v9400_v33  ;;  %v9743_v33 = vld [vmem:[%s13345_s6] ss:$0 sm:$0xff] }
 0x27e   : > { %v1464_v6 = vpop.xlane.xlu0 %1463 }
 0x27f   : > { %v1542_v3 = vsub.f32 %v9563_v45, %v1464_v6  ;;  %v9660_v45 = vpop.f32.mrf.mxu2  ;;  %v1119_v6 = vadd.f32 %v9539_v53, %v9624_v15  ;;  %7837 = vmatmul.msk.bf16.gmra.mxu2 %vm572_vm0, %v9383_v20 }
 0x281   : > { %v1582_v0 = vmul.f32 1.442695, %v1542_v3 }
 0x283   : > { %8409 = vpow2.f32 %v1582_v0  ;;  %v443_v0 = vld [vmem:[#allocation2 + $0x18] sm:$0xff] }
 0x286   : > { %v1467_v4 = vpop.xlane.xlu0 %1466 }
 0x287   : > { %v1543_v63 = vsub.f32 %v9573_v22, %v1467_v4  ;;  %v9673_v7 = vpop.f32.mrf.mxu2  ;;  %v9712_v4 = vadd.f32 %v1114_v48, %v443_v0 }
 0x289   : > { %v9656_v5 = vpop.eup %8409  ;;  %v1584_v10 = vmul.f32 1.442695, %v1543_v63  ;;  %v1447_v53 = vsel %vm1437_vm2, %v9712_v4, -inf }
 0x28a   : > { %v1654_v57 = vsel %vm1437_vm2, %v9656_v5, 0.0 }
 0x28b   : > { %8411 = vpow2.f32 %v1584_v10  ;;  %1655 = vadd.xlane.f32.xlu0 %v1654_v57 }
 0x28e   : > { %v1470_v58 = vpop.xlane.xlu1 %1469 }
 0x28f   : > { %v1544_v1 = vsub.f32 %v9590_v61, %v1470_v58 }
 0x291   : > { %v9663_v12 = vpop.eup %8411  ;;  %v1586_v62 = vmul.f32 1.442695, %v1544_v1  ;;  %v1117_v1 = vadd.f32 %v9532_v41, %v9614_v38 }
 0x292   : > { %v1657_v22 = vsel %vm1437_vm2, %v9663_v12, 0.0 }
 0x293   : > { %8413 = vpow2.f32 %v1586_v62  ;;  %1658 = vadd.xlane.f32.xlu1 %v1657_v22  ;;  %v444_v62 = vld [vmem:[#allocation2 + $0x20] sm:$0xff] }
 0x294   : > { %v9728_v22 = vadd.f32 %v1117_v1, %v444_v62 }
 0x296   : > { %v1473_v59 = vpop.xlane.xlu1 %1472  ;;  %v1450_v30 = vsel %vm1437_vm2, %v9728_v22, -inf }
 0x297   : > { %v1545_v61 = vsub.f32 %v9600_v28, %v1473_v59  ;;  %v9686_v28 = vpop.f32.mrf.mxu2  ;;  %7838 = vmatmul.msk.bf16.gmra.mxu2 %vm572_vm0, %v9395_v27 }
 0x299   : > { %v9676_v24 = vpop.eup %8413  ;;  %v1588_v31 = vmul.f32 1.442695, %v1545_v61  ;;  %v9732_v61 = vpop.f32.mrf.mxu3 }
 0x29a   : > { %v1660_v32 = vsel %vm1437_vm2, %v9676_v24, 0.0 }
 0x29b   : > { %8415 = vpow2.f32 %v1588_v31  ;;  %1661 = vadd.xlane.f32.xlu2 %v1660_v32  ;;  %1439 = vmax.xlane.f32.xlu1 %v1438_v37 }
 0x29e   : > { %v1476_v42 = vpop.xlane.xlu2 %1475 }
 0x29f   : > { %v1546_v43 = vsub.f32 %v9617_v36, %v1476_v42  ;;  %v868_v52 = vpop.f32.mrf.mxu2 }
 0x2a1   : > { %v9689_v34 = vpop.eup %8415  ;;  %v1590_v47 = vmul.f32 1.442695, %v1546_v43  ;;  %v9736_v31 = vpop.f32.mrf.mxu3 }
 0x2a2   : > { %v1663_v13 = vsel %vm1437_vm2, %v9689_v34, 0.0 }
 0x2a3   : > { %8417 = vpow2.f32 %v1590_v47  ;;  %1664 = vadd.xlane.f32.xlu0 %v1663_v13  ;;  %1442 = vmax.xlane.f32.xlu2 %v1441_v17 }
 0x2a6   : > { %v1479_v36 = vpop.xlane.xlu2 %1478 }
 0x2a7   : > { %v1547_v35 = vsub.f32 %v9627_v54, %v1479_v36  ;;  %v445_v54 = vld [vmem:[#allocation2 + $0x28] sm:$0xff]  ;;  %v870_v10 = vpop.f32.mrf.mxu2 }
 0x2a8   : > { %v9714_v63 = vadd.f32 %v1119_v6, %v445_v54  ;;  %v869_v6 = vadd.f32 %v9743_v33, %v868_v52 }
 0x2a9   : > { %v9702_v49 = vpop.eup %8417  ;;  %v1592_v51 = vmul.f32 1.442695, %v1547_v35  ;;  %v9745_v37 = vpop.f32.mrf.mxu3 }
 0x2aa   : > { %v1666_v3 = vsel %vm1437_vm2, %v9702_v49, 0.0  ;;  %v1453_v57 = vsel %vm1437_vm2, %v9714_v63, -inf }
 0x2ab   : > { %8419 = vpow2.f32 %v1592_v51  ;;  %1667 = vadd.xlane.f32.xlu0 %v1666_v3  ;;  %1445 = vmax.xlane.f32.xlu2 %v1444_v26  ;;  %v871_v3 = vadd.f32 %v9743_v33, %v870_v10 }
 0x2ad   : > { %v1001_v1 = vpack.c.bf16 %v871_v3, %v871_v3 }
 0x2af   : > { %v873_v21 = vpop.f32.mrf.mxu2  ;;  %v1936_v10 = vunpack.c.l.b16 %v1001_v1 }
 0x2b0   : > { %v874_v39 = vadd.f32 %v9743_v33, %v873_v21 }
 0x2b1   : > { %v9716_v25 = vpop.eup %8419  ;;  %v9751_v13 = vpop.f32.mrf.mxu3 }
 0x2b2   : > { %v1669_v58 = vsel %vm1437_vm2, %v9716_v25, 0.0  ;;  %v1002_v0 = vpack.c.bf16 %v874_v39, %v874_v39 }
 0x2b3   : > { %1448 = vmax.xlane.f32.xlu0 %v1447_v53  ;;  %1454 = vmax.xlane.f32.xlu2 %v1453_v57 }
 0x2b4   : > { %1670 = vadd.xlane.f32.xlu1 %v1669_v58  ;;  %v1000_v58 = vpack.c.bf16 %v869_v6, %v869_v6  ;;  %v1937_v62 = vunpack.c.l.b16 %v1002_v0 }
 0x2b6   : > { %v1935_v52 = vunpack.c.l.b16 %v1000_v58 }
 0x2b7   : > { %v875_v59 = vpop.f32.mrf.mxu2 }
 0x2b8   : > { %v876_v36 = vadd.f32 %v9743_v33, %v875_v59 }
 0x2b9   : > { %v9762_v59 = vpop.f32.mrf.mxu3 }
 0x2ba   : > { %v1003_v54 = vpack.c.bf16 %v876_v36, %v876_v36 }
 0x2bc   : > { %1451 = vmax.xlane.f32.xlu1 %v1450_v30  ;;  %v1938_v21 = vunpack.c.l.b16 %v1003_v54 }
 0x2bf   : > { %v878_v41 = vpop.f32.mrf.mxu2 }
 0x2c0   : > { %v879_v20 = vadd.f32 %v9743_v33, %v878_v41  ;;  %v9765_v41 = vpack.c.b16 %v1938_v21, %v1937_v62 }
 0x2c2   : > { %v1004_v35 = vpack.c.bf16 %v879_v20, %v879_v20  ;;  %v866_v20 = vadd.f32 %v9743_v33, %v9686_v28  ;;  %v856_v28 = vadd.f32 %v9743_v33, %v9648_v2 }
 0x2c4   : > { %v1939_v53 = vunpack.c.l.b16 %v1004_v35 }
 0x2c7   : > { %v880_v40 = vpop.f32.mrf.mxu2 }
 0x2c8   : > { %v881_v43 = vadd.f32 %v9743_v33, %v880_v40  ;;  %v9768_v40 = vpack.c.b16 %v1936_v10, %v1935_v52 }
 0x2ca   : > { %v1005_v51 = vpack.c.bf16 %v881_v43, %v881_v43  ;;  %v9779_v43 = vpop.f32.mrf.mxu3 }
 0x2cc   : > { %v1940_v57 = vunpack.c.l.b16 %v1005_v51 }
 0x2ce   : > { %v9760_v30 = vpack.c.b16 %v1940_v57, %v1939_v53 }
 0x2cf   : > { %v883_v32 = vpop.f32.mrf.mxu2 }
 0x2d0   : > { %v884_v19 = vadd.f32 %v9743_v33, %v883_v32  ;;  %v859_v32 = vadd.f32 %v9743_v33, %v9653_v8  ;;  %v849_v8 = vadd.f32 %v9743_v33, %v9640_v50  ;;  %v995_v50 = vpack.c.bf16 %v856_v28, %v856_v28 }
 0x2d2   : > { %v1006_v42 = vpack.c.bf16 %v884_v19, %v884_v19  ;;  %v861_v19 = vadd.f32 %v9743_v33, %v9660_v45  ;;  %v851_v45 = vadd.f32 %v9743_v33, %v9642_v56  ;;  %v9789_v6 = vpop.f32.mrf.mxu3  ;;  %v992_v3 = vpack.c.bf16 %v849_v8, %v849_v8 }
 0x2d3   : > { %v1853_v2 = vunpack.c.l.b16 %v995_v50 }
 0x2d4   : > { %v1941_v27 = vunpack.c.l.b16 %v1006_v42  ;;  %v864_v42 = vadd.f32 %v9743_v33, %v9673_v7  ;;  %v854_v7 = vadd.f32 %v9743_v33, %v9646_v23  ;;  %v993_v0 = vpack.c.bf16 %v851_v45, %v851_v45 }
 0x2d5   : > { %v1850_v56 = vunpack.c.l.b16 %v992_v3 }
 0x2d6   : > { %v994_v54 = vpack.c.bf16 %v854_v7, %v854_v7  ;;  %v1851_v23 = vunpack.c.l.b16 %v993_v0 }
 0x2d7   : > { %v885_v47 = vpop.f32.mrf.mxu2 }
 0x2d8   : > { %v886_v46 = vadd.f32 %v9743_v33, %v885_v47  ;;  %v996_v47 = vpack.c.bf16 %v859_v32, %v859_v32  ;;  %v1852_v58 = vunpack.c.l.b16 %v994_v54  ;;  %v1858_v52 = vpack.c.b16 %v1851_v23, %v1850_v56 }
 0x2da   : > { %v1007_v17 = vpack.c.bf16 %v886_v46, %v886_v46  ;;  %v997_v46 = vpack.c.bf16 %v861_v19, %v861_v19  ;;  %v1854_v39 = vunpack.c.l.b16 %v996_v47  ;;  %v1859_v21 = vpack.c.b16 %v1853_v2, %v1852_v58  ;;  %v9791_v10 = vpop.f32.mrf.mxu3 }
 0x2dc   : > { %v1942_v48 = vunpack.c.l.b16 %v1007_v17  ;;  %v999_v17 = vpack.c.bf16 %v866_v20, %v866_v20  ;;  %v1855_v36 = vunpack.c.l.b16 %v997_v46 }
 0x2de   : > { %v9757_v26 = vpack.c.b16 %v1942_v48, %v1941_v27  ;;  %v998_v27 = vpack.c.bf16 %v864_v42, %v864_v42  ;;  %v1857_v51 = vunpack.c.l.b16 %v999_v17  ;;  %v1860_v57 = vpack.c.b16 %v1855_v36, %v1854_v39 }
 0x2e0   : > { %1967 = vmatpush.bf16.msra.mxu1 %v9757_v26  ;;  %v1856_v35 = vunpack.c.l.b16 %v998_v27 }
 0x2e2   : > { %v1861_v53 = vpack.c.b16 %v1857_v51, %v1856_v35 }
 0x2e4   : > { %1968 = vmatpush.bf16.msra.mxu1 %v9760_v30  ;;  %1882 = vmatpush.bf16.msrb.mxu0 %v1861_v53 }
 0x2e5   : > { %8367 = vmatpush.bf16.msrb.mxu3 %v1861_v53 }
 0x2e8   : > { %1969 = vmatpush.bf16.msra.mxu1 %v9765_v41  ;;  %1883 = vmatpush.bf16.msrb.mxu0 %v1860_v57 }
 0x2e9   : > { %8368 = vmatpush.bf16.msrb.mxu3 %v1860_v57 }
 0x2ec   : > { %1970 = vmatpush.bf16.msra.mxu1 %v9768_v40  ;;  %1884 = vmatpush.bf16.msrb.mxu0 %v1859_v21 }
 0x2ed   : > { %8369 = vmatpush.bf16.msrb.mxu3 %v1859_v21 }
 0x2f0   : > { %1885 = vmatpush.bf16.msrb.mxu0 %v1858_v52 }
 0x2f1   : > { %8370 = vmatpush.bf16.msrb.mxu3 %v1858_v52 }
 0x2f5   : > { %8371 = vmatpush.bf16.msra.mxu3 %v9757_v26 }
 0x2f9   : > { %8372 = vmatpush.bf16.msra.mxu3 %v9760_v30 }
 0x2fd   : > { %8373 = vmatpush.bf16.msra.mxu3 %v9765_v41 }
 0x2fe   : > { %v1656_v48 = vpop.xlane.xlu0 %1655 }
 0x2ff   : > { %8421 = vrcp.f32 %v1656_v48 }
 0x301   : > { %8374 = vmatpush.bf16.msra.mxu3 %v9768_v40 }
 0x305   : > { %v8422_v62 = vpop.eup %8421 }
 0x306   : > { %v1659_v1 = vpop.xlane.xlu1 %1658  ;;  %v1766_v32 = vmul.f32 %v8422_v62, %v9656_v5  ;;  %v9797_v5 = vpop.f32.mrf.mxu3 }
 0x307   : > { %8423 = vrcp.f32 %v1659_v1 }
 0x308   : > { %v1798_v42 = vpack.c.bf16 %v1766_v32, %v1766_v32 }
 0x30a   : > { %v1915_v45 = vunpack.c.l.b16 %v1798_v42 }
 0x30d   : > { %v8424_v19 = vpop.eup %8423 }
 0x30e   : > { %v1767_v20 = vmul.f32 %v8424_v19, %v9663_v12  ;;  %v1662_v47 = vpop.xlane.xlu2 %1661  ;;  %v1440_v46 = vpop.xlane.xlu1 %1439 }
 0x30f   : > { %v1534_v27 = vsub.f32 %v9671_v55, %v1440_v46  ;;  %8425 = vrcp.f32 %v1662_v47  ;;  %v9809_v3 = vpop.f32.mrf.mxu3 }
 0x310   : > { %v1799_v17 = vpack.c.bf16 %v1767_v20, %v1767_v20 }
 0x311   : > { %v1566_v8 = vmul.f32 1.442695, %v1534_v27 }
 0x312   : > { %v1916_v7 = vunpack.c.l.b16 %v1799_v17 }
 0x313   : > { %8427 = vpow2.f32 %v1566_v8 }
 0x314   : > { %v1923_v28 = vpack.c.b16 %v1916_v7, %v1915_v45 }
 0x315   : > { %v8426_v36 = vpop.eup %8425 }
 0x316   : > { %7859 = vmatmul.msk.bf16.vlgmr.msra.gmra.mxu1 %vm1437_vm2, %v1923_v28  ;;  %v1665_v12 = vpop.xlane.xlu0 %1664  ;;  %v1443_v39 = vpop.xlane.xlu2 %1442  ;;  %v1768_v51 = vmul.f32 %v8426_v36, %v9676_v24 }
 0x317   : > { %8429 = vrcp.f32 %v1665_v12  ;;  %v1535_v55 = vsub.f32 %v9684_v9, %v1443_v39  ;;  %v1385_v52 = vpop.f32.mrf.mxu3 }
 0x318   : > { %v1800_v0 = vpack.c.bf16 %v1768_v51, %v1768_v51  ;;  %v446_v51 = vld [vmem:[#allocation2 + $0x30] sm:$0xff] }
 0x319   : > { %v9803_v26 = vpop.eup %8427  ;;  %v1568_v35 = vmul.f32 1.442695, %v1535_v55 }
 0x31a   : > { %v1630_v48 = vsel %vm1437_vm2, %v9803_v26, 0.0  ;;  %v1917_v23 = vunpack.c.l.b16 %v1800_v0 }
 0x31b   : > { %8431 = vpow2.f32 %v1568_v35  ;;  %1631 = vadd.xlane.f32.xlu0 %v1630_v48  ;;  %v454_v48 = vld [vmem:[#allocation2 + $0x70] sm:$0xff] }
 0x31d   : > { %v8430_v30 = vpop.eup %8429 }
 0x31e   : > { %v1769_v9 = vmul.f32 %v8430_v30, %v9689_v34  ;;  %v1668_v54 = vpop.xlane.xlu0 %1667  ;;  %v1446_v41 = vpop.xlane.xlu2 %1445 }
 0x31f   : > { %v1536_v50 = vsub.f32 %v9699_v16, %v1446_v41  ;;  %8433 = vrcp.f32 %v1668_v54  ;;  %v1387_v12 = vpop.f32.mrf.mxu3 }
 0x320   : > { %v1801_v53 = vpack.c.bf16 %v1769_v9, %v1769_v9  ;;  %v1388_v9 = vadd.f32 %v1387_v12, %v9570_v11 }
 0x321   : > { %v9813_v57 = vpop.eup %8431  ;;  %v1570_v24 = vmul.f32 1.442695, %v1536_v50 }
 0x322   : > { %v1633_v56 = vsel %vm1437_vm2, %v9813_v57, 0.0  ;;  %v1918_v40 = vunpack.c.l.b16 %v1801_v53  ;;  %v465_v53 = vld [vmem:[#allocation2 + $0xc8] sm:$0xff] }
 0x323   : > { %8435 = vpow2.f32 %v1570_v24  ;;  %1634 = vadd.xlane.f32.xlu1 %v1633_v56 }
 0x324   : > { %v1924_v58 = vpack.c.b16 %v1918_v40, %v1917_v23  ;;  %v455_v40 = vld [vmem:[#allocation2 + $0x78] sm:$0xff] }
 0x325   : > { %v8434_v21 = vpop.eup %8433 }
 0x326   : > { %7860 = vmatmul.msk.bf16.gmra.mxu1 %vm1437_vm2, %v1924_v58  ;;  %v1449_v34 = vpop.xlane.xlu0 %1448  ;;  %v1455_v2 = vpop.xlane.xlu2 %1454  ;;  %v1770_v47 = vmul.f32 %v8434_v21, %v9702_v49  ;;  %v466_v21 = vld [vmem:[#allocation2 + $0xd0] sm:$0xff] }
 0x327   : > { %v1537_v1 = vsub.f32 %v9712_v4, %v1449_v34  ;;  %v1539_v16 = vsub.f32 %v9714_v63, %v1455_v2  ;;  %v1671_v62 = vpop.xlane.xlu1 %1670  ;;  %v9828_v4 = vld [vmem:[%s13346_s7 + $0x30] sm:$0xff]  ;;  %v1390_v58 = vpop.f32.mrf.mxu3  ;;  %v447_v34 = vld [vmem:[#allocation2 + $0x38] sm:$0xff] }
 0x328   : > { %8437 = vrcp.f32 %v1671_v62  ;;  %v1802_v63 = vpack.c.bf16 %v1770_v47, %v1770_v47  ;;  %v1122_v49 = vadd.f32 %v9547_v60, %v9828_v4  ;;  %v1215_v55 = vadd.f32 %v9732_v61, %v9828_v4  ;;  %v9852_v61 = vld [vmem:[%s13346_s7 + $0x38] sm:$0xff] }
 0x329   : > { %v9820_v32 = vpop.eup %8435  ;;  %v1572_v19 = vmul.f32 1.442695, %v1537_v1  ;;  %v1576_v42 = vmul.f32 1.442695, %v1539_v16  ;;  %v1217_v41 = vadd.f32 %v9736_v31, %v9852_v61  ;;  %v1124_v24 = vadd.f32 %v9550_v18, %v9852_v61 }
 0x32a   : > { %v1636_v20 = vsel %vm1437_vm2, %v9820_v32, 0.0  ;;  %v9844_v60 = vadd.f32 %v1122_v49, %v446_v51  ;;  %v9847_v0 = vadd.f32 %v1215_v55, %v454_v48  ;;  %v9867_v31 = vadd.f32 %v1388_v9, %v465_v53  ;;  %v8345_v51 = vld [vmem:[%s13341_s2 + $0x10] sm:$0xff]  ;;  %v9906_v9 = vld [vmem:[%s9233_s13] sm:$0xff] }
 0x32b   : > { %8439 = vpow2.f32 %v1572_v19  ;;  %1637 = vadd.xlane.f32.xlu2 %v1636_v20  ;;  %v9869_v2 = vadd.f32 %v1217_v41, %v455_v40  ;;  %v9871_v1 = vadd.f32 %v1124_v24, %v447_v34  ;;  %v1391_v18 = vadd.f32 %v1390_v58, %v9587_v14 }
 0x32c   : > { %8441 = vpow2.f32 %v1576_v42  ;;  %v1456_v50 = vsel %vm1437_vm2, %v9844_v60, -inf  ;;  %v1480_v56 = vsel %vm1437_vm2, %v9847_v0, -inf  ;;  %v1386_v16 = vadd.f32 %v1385_v52, %v9560_v44  ;;  %v464_v42 = vld [vmem:[#allocation2 + $0xc0] sm:$0xff] }
 0x32d   : > { %v1513_v62 = vsel %vm1437_vm2, %v9867_v31, -inf  ;;  %v1483_v19 = vsel %vm1437_vm2, %v9869_v2, -inf  ;;  %v1459_v20 = vsel %vm1437_vm2, %v9871_v1, -inf  ;;  %v9881_v47 = vadd.f32 %v1391_v18, %v466_v21 }
 0x32e   : > { %v8438_v46 = vpop.eup %8437 }
 0x32f   : > { %v1771_v27 = vmul.f32 %v8438_v46, %v9716_v25  ;;  %v1452_v17 = vpop.xlane.xlu1 %1451  ;;  %v9883_v46 = vadd.f32 %v1386_v16, %v464_v42  ;;  %v1516_v52 = vsel %vm1437_vm2, %v9881_v47, -inf }
 0x330   : > { %v1538_v8 = vsub.f32 %v9728_v22, %v1452_v17  ;;  %v1919_v22 = vunpack.c.l.b16 %v1802_v63  ;;  %v1392_v63 = vpop.f32.mrf.mxu3 }
 0x331   : > { %v9832_v45 = vpop.eup %8439  ;;  %v1803_v7 = vpack.c.bf16 %v1771_v27, %v1771_v27  ;;  %v1393_v27 = vadd.f32 %v1392_v63, %v9597_v29  ;;  %v1510_v17 = vsel %vm1437_vm2, %v9883_v46, -inf }
 0x332   : > { %v9834_v28 = vpop.eup %8441  ;;  %v1574_v39 = vmul.f32 1.442695, %v1538_v8  ;;  %v1639_v36 = vsel %vm1437_vm2, %v9832_v45, 0.0  ;;  %v467_v8 = vld [vmem:[#allocation2 + $0xd8] sm:$0xff] }
 0x333   : > { %v1645_v25 = vsel %vm1437_vm2, %v9834_v28, 0.0  ;;  %1640 = vadd.xlane.f32.xlu0 %v1639_v36  ;;  %v1920_v35 = vunpack.c.l.b16 %v1803_v7  ;;  %v9890_v7 = vadd.f32 %v1393_v27, %v467_v8  ;;  %v468_v36 = vld [vmem:[#allocation2 + $0xe0] sm:$0xff] }
 0x334   : > { %8443 = vpow2.f32 %v1574_v39  ;;  %1646 = vadd.xlane.f32.xlu2 %v1645_v25 }
 0x335   : > { %v1925_v30 = vpack.c.b16 %v1920_v35, %v1919_v22  ;;  %v1519_v12 = vsel %vm1437_vm2, %v9890_v7, -inf  ;;  %v8346_v35 = vld [vmem:[%s13341_s2 + $0x18] sm:$0xff] }
 0x336   : > { %2318 = vmatpush.bf16.msrb.mxu1 %v8346_v35 }
 0x337   : > { %7861 = vmatmul.msk.bf16.gmra.mxu1 %vm1437_vm2, %v1925_v30 }
 0x338   : > { %v1395_v49 = vpop.f32.mrf.mxu3 }
 0x339   : > { %v1396_v39 = vadd.f32 %v1395_v49, %v9614_v38 }
 0x33a   : > { %v9855_v54 = vpop.eup %8443  ;;  %2319 = vmatpush.bf16.msrb.mxu1 %v8345_v51 }
 0x33b   : > { %1457 = vmax.xlane.f32.xlu0 %v1456_v50  ;;  %v1642_v23 = vsel %vm1437_vm2, %v9855_v54, 0.0  ;;  %v9895_v55 = vadd.f32 %v1396_v39, %v468_v36 }
 0x33c   : > { %1481 = vmax.xlane.f32.xlu2 %v1480_v56  ;;  %1643 = vadd.xlane.f32.xlu1 %v1642_v23 }
 0x33d   : > { %v1522_v25 = vsel %vm1437_vm2, %v9895_v55, -inf }
 0x343   : > { %1484 = vmax.xlane.f32.xlu0 %v1483_v19 }
 0x344   : > { %1514 = vmax.xlane.f32.xlu2 %v1513_v62  ;;  %1460 = vmax.xlane.f32.xlu1 %v1459_v20  ;;  %v9914_v62 = vld [vmem:[%s9233_s13 + $0x8] sm:$0xff] }
 0x347   : > { %7913 = vmatmul.msk.bf16.vlgmr.msrb.gmra.mxu1 %vm572_vm0, %v9906_v9 }
 0x34b   : > { %1517 = vmax.xlane.f32.xlu0 %v1516_v52 }
 0x34c   : > { %1511 = vmax.xlane.f32.xlu1 %v1510_v17 }
 0x354   : > { %1520 = vmax.xlane.f32.xlu1 %v1519_v12  ;;  %v1397_v12 = vpop.f32.mrf.mxu3 }
 0x357   : > { %7914 = vmatmul.msk.bf16.gmra.mxu1 %vm572_vm0, %v9914_v62 }
 0x35c   : > { %1523 = vmax.xlane.f32.xlu1 %v1522_v25 }
 0x38e   : > { %v1632_v22 = vpop.xlane.xlu0 %1631 }
 0x38f   : > { %8445 = vrcp.f32 %v1632_v22 }
 0x395   : > { %v8446_v30 = vpop.eup %8445 }
 0x396   : > { %v1635_v48 = vpop.xlane.xlu1 %1634  ;;  %v1758_v41 = vmul.f32 %v8446_v30, %v9803_v26 }
 0x397   : > { %8447 = vrcp.f32 %v1635_v48 }
 0x398   : > { %v1790_v53 = vpack.c.bf16 %v1758_v41, %v1758_v41 }
 0x39a   : > { %v1830_v40 = vunpack.c.l.b16 %v1790_v53  ;;  %v1398_v53 = vadd.f32 %v1397_v12, %v9624_v15 }
 0x39d   : > { %v8448_v50 = vpop.eup %8447 }
 0x39e   : > { %v1759_v24 = vmul.f32 %v8448_v50, %v9813_v57  ;;  %v1638_v56 = vpop.xlane.xlu2 %1637  ;;  %v9930_v50 = vld [vmem:[%s9233_s13 + $0x10] sm:$0xff] }
 0x39f   : > { %8449 = vrcp.f32 %v1638_v56  ;;  %7915 = vmatmul.msk.bf16.gmra.mxu1 %vm572_vm0, %v9930_v50 }
 0x3a0   : > { %v1791_v23 = vpack.c.bf16 %v1759_v24, %v1759_v24 }
 0x3a2   : > { %v1831_v58 = vunpack.c.l.b16 %v1791_v23 }
 0x3a4   : > { %v1838_v34 = vpack.c.b16 %v1831_v58, %v1830_v40  ;;  %v1400_v58 = vpop.f32.mrf.mxu3 }
 0x3a5   : > { %v8450_v16 = vpop.eup %8449 }
 0x3a6   : > { %v1641_v18 = vpop.xlane.xlu0 %1640  ;;  %7855 = vmatmul.msk.bf16.vlgmr.msrb.gmra.mxu0 %vm1437_vm2, %v1838_v34  ;;  %v1760_v21 = vmul.f32 %v8450_v16, %v9820_v32  ;;  %v9921_v32 = vpop.f32.mrf.mxu2 }
 0x3a7   : > { %8451 = vrcp.f32 %v1641_v18  ;;  %v1647_v26 = vpop.xlane.xlu2 %1646 }
 0x3a8   : > { %v1792_v20 = vpack.c.bf16 %v1760_v21, %v1760_v21 }
 0x3aa   : > { %v1832_v8 = vunpack.c.l.b16 %v1792_v20 }
 0x3ad   : > { %v8452_v57 = vpop.eup %8451 }
 0x3ae   : > { %v1458_v19 = vpop.xlane.xlu0 %1457  ;;  %v1761_v42 = vmul.f32 %v8452_v57, %v9832_v45  ;;  %v9939_v40 = vpop.f32.mrf.mxu2 }
 0x3af   : > { %v1540_v63 = vsub.f32 %v9844_v60, %v1458_v19  ;;  %v1644_v52 = vpop.xlane.xlu1 %1643  ;;  %v1482_v39 = vpop.xlane.xlu2 %1481  ;;  %v1401_v19 = vadd.f32 %v1400_v58, %v9828_v4 }
 0x3b0   : > { %8453 = vrcp.f32 %v1644_v52  ;;  %v1793_v27 = vpack.c.bf16 %v1761_v42, %v1761_v42 }
 0x3b1   : > { %8455 = vrcp.f32 %v1647_v26  ;;  %v1578_v17 = vmul.f32 1.442695, %v1540_v63 }
 0x3b2   : > { %v1833_v49 = vunpack.c.l.b16 %v1793_v27 }
 0x3b3   : > { %8457 = vpow2.f32 %v1578_v17  ;;  %v456_v17 = vld [vmem:[#allocation2 + $0x80] sm:$0xff] }
 0x3b4   : > { %v1839_v36 = vpack.c.b16 %v1833_v49, %v1832_v8 }
 0x3b6   : > { %v8454_v25 = vpop.eup %8453  ;;  %v1485_v22 = vpop.xlane.xlu0 %1484  ;;  %7856 = vmatmul.msk.bf16.gmra.mxu0 %vm1437_vm2, %v1839_v36 }
 0x3b7   : > { %v8456_v45 = vpop.eup %8455  ;;  %v1549_v60 = vsub.f32 %v9869_v2, %v1485_v22  ;;  %v1461_v35 = vpop.xlane.xlu1 %1460  ;;  %v1762_v48 = vmul.f32 %v8454_v25, %v9855_v54  ;;  %v469_v54 = vld [vmem:[#allocation2 + $0xe8] sm:$0xff] }
 0x3b8   : > { %v1541_v51 = vsub.f32 %v9871_v1, %v1461_v35  ;;  %v1763_v2 = vmul.f32 %v8456_v45, %v9834_v28  ;;  %v1548_v1 = vsub.f32 %v9847_v0, %v1482_v39  ;;  %v1515_v34 = vpop.xlane.xlu2 %1514  ;;  %v9941_v18 = vadd.f32 %v1398_v53, %v469_v54  ;;  %v9957_v8 = vpop.f32.mrf.mxu2  ;;  %v471_v53 = vld [vmem:[#allocation2 + $0xf8] sm:$0xff]  ;;  %v457_v54 = vld [vmem:[#allocation2 + $0x88] sm:$0xff] }
 0x3b9   : > { %v9927_v30 = vpop.eup %8457  ;;  %v1596_v41 = vmul.f32 1.442695, %v1549_v60  ;;  %v1794_v23 = vpack.c.bf16 %v1762_v48, %v1762_v48  ;;  %v1293_v28 = vadd.f32 %v9745_v37, %v9560_v44  ;;  %v1559_v0 = vsub.f32 %v9867_v31, %v1515_v34  ;;  %v470_v44 = vld [vmem:[#allocation2 + $0xf0] sm:$0xff]  ;;  %v1402_v25 = vpop.f32.mrf.mxu3  ;;  %v9968_v60 = vld [vmem:[%s9233_s13 + $0x18] sm:$0xff] }
 0x3ba   : > { %v1580_v24 = vmul.f32 1.442695, %v1541_v51  ;;  %v1648_v56 = vsel %vm1437_vm2, %v9927_v30, 0.0  ;;  %v1795_v16 = vpack.c.bf16 %v1763_v2, %v1763_v2  ;;  %v1594_v26 = vmul.f32 1.442695, %v1548_v1  ;;  %7916 = vmatmul.msk.bf16.gmra.mxu1 %vm572_vm0, %v9968_v60 }
 0x3bb   : > { %8459 = vpow2.f32 %v1596_v41  ;;  %1649 = vadd.xlane.f32.xlu2 %v1648_v56  ;;  %v1834_v21 = vunpack.c.l.b16 %v1794_v23  ;;  %v1525_v20 = vsel %vm1437_vm2, %v9941_v18, -inf  ;;  %v1616_v49 = vmul.f32 1.442695, %v1559_v0 }
 0x3bc   : > { %8461 = vpow2.f32 %v1580_v24  ;;  %v1835_v52 = vunpack.c.l.b16 %v1795_v16  ;;  %v9960_v39 = vadd.f32 %v1293_v28, %v456_v17  ;;  %v9962_v36 = vadd.f32 %v1401_v19, %v470_v44 }
 0x3bd   : > { %8463 = vpow2.f32 %v1594_v26  ;;  %v1403_v35 = vadd.f32 %v1402_v25, %v9852_v61 }
 0x3be   : > { %v1840_v31 = vpack.c.b16 %v1835_v52, %v1834_v21  ;;  %v1518_v12 = vpop.xlane.xlu0 %1517  ;;  %8465 = vpow2.f32 %v1616_v49  ;;  %v1486_v51 = vsel %vm1437_vm2, %v9960_v39, -inf  ;;  %v1528_v48 = vsel %vm1437_vm2, %v9962_v36, -inf  ;;  %v458_v21 = vld [vmem:[#allocation2 + $0x90] sm:$0xff] }
 0x3bf   : > { %v1512_v42 = vpop.xlane.xlu1 %1511  ;;  %v1560_v45 = vsub.f32 %v9881_v47, %v1518_v12  ;;  %v1295_v47 = vadd.f32 %v9751_v13, %v9570_v11  ;;  %v9984_v23 = vadd.f32 %v1403_v35, %v471_v53  ;;  %v1298_v11 = vadd.f32 %v9762_v59, %v9587_v14  ;;  %v10021_v12 = vpop.f32.mrf.mxu1 }
 0x3c0   : > { %v1558_v41 = vsub.f32 %v9883_v46, %v1512_v42  ;;  %v9982_v2 = vpop.f32.mrf.mxu2  ;;  %v1305_v52 = vadd.f32 %v9791_v10, %v9624_v15  ;;  %13355 = vst [vmem:[#allocation5_spill] sm:$0xff] %v10021_v12  ;;  %v459_v15 = vld [vmem:[#allocation2 + $0x98] sm:$0xff] }
 0x3c1   : > { %v9943_v57 = vpop.eup %8459  ;;  %v1618_v1 = vmul.f32 1.442695, %v1560_v45  ;;  %v9988_v34 = vadd.f32 %v1295_v47, %v457_v54  ;;  %v1531_v13 = vsel %vm1437_vm2, %v9984_v23, -inf  ;;  %v9999_v42 = vadd.f32 %v1298_v11, %v458_v21 }
 0x3c2   : > { %v1675_v63 = vsel %vm1437_vm2, %v9943_v57, 0.0  ;;  %v9953_v27 = vpop.eup %8461  ;;  %v1614_v46 = vmul.f32 1.442695, %v1558_v41  ;;  %v1303_v41 = vadd.f32 %v9789_v6, %v9614_v38  ;;  %v10051_v6 = vld [vmem:[%s9233_s13 + $0x28] sm:$0xff] }
 0x3c3   : > { %1526 = vmax.xlane.f32.xlu2 %v1525_v20  ;;  %1676 = vadd.xlane.f32.xlu1 %v1675_v63  ;;  %v1651_v37 = vsel %vm1437_vm2, %v9953_v27, 0.0  ;;  %v9964_v22 = vpop.eup %8463  ;;  %8467 = vpow2.f32 %v1618_v1  ;;  %v1489_v28 = vsel %vm1437_vm2, %v9988_v34, -inf  ;;  %v10007_v63 = vld [vmem:[%s9233_s13 + $0x20] sm:$0xff]  ;;  %v1492_v17 = vsel %vm1437_vm2, %v9999_v42, -inf }
 0x3c4   : > { %1652 = vadd.xlane.f32.xlu0 %v1651_v37  ;;  %v1672_v56 = vsel %vm1437_vm2, %v9964_v22, 0.0  ;;  %v9986_v58 = vpop.eup %8465  ;;  %8469 = vpow2.f32 %v1614_v46  ;;  %v461_v37 = vld [vmem:[#allocation2 + $0xa8] sm:$0xff] }
 0x3c5   : > { %v1705_v26 = vsel %vm1437_vm2, %v9986_v58, 0.0  ;;  %v10023_v10 = vadd.f32 %v1305_v52, %v461_v37  ;;  %v889_v37 = vadd.f32 %v9743_v33, %v9921_v32 }
 0x3c6   : > { %7857 = vmatmul.msk.bf16.gmra.mxu0 %vm1437_vm2, %v1840_v31 }
 0x3c7   : > { %v1521_v24 = vpop.xlane.xlu1 %1520 }
 0x3c8   : > { %v1561_v16 = vsub.f32 %v9890_v7, %v1521_v24  ;;  %v898_v0 = vpop.f32.mrf.mxu2  ;;  %v460_v24 = vld [vmem:[#allocation2 + $0xa0] sm:$0xff] }
 0x3c9   : > { %v10001_v14 = vpop.eup %8467  ;;  %v10046_v54 = vadd.f32 %v1303_v41, %v460_v24  ;;  %v899_v46 = vadd.f32 %v9743_v33, %v898_v0 }
 0x3ca   : > { %v1620_v19 = vmul.f32 1.442695, %v1561_v16  ;;  %v10003_v59 = vpop.eup %8469  ;;  %7917 = vmatmul.msk.bf16.gmra.mxu1 %vm572_vm0, %v10007_v63  ;;  %v1708_v44 = vsel %vm1437_vm2, %v10001_v14, 0.0  ;;  %v1310_v16 = vadd.f32 %v9809_v3, %v9852_v61  ;;  %v896_v3 = vadd.f32 %v9743_v33, %v9982_v2 }
 0x3cb   : > { %1487 = vmax.xlane.f32.xlu2 %v1486_v51  ;;  %1529 = vmax.xlane.f32.xlu1 %v1528_v48  ;;  %v1702_v31 = vsel %vm1437_vm2, %v10003_v59, 0.0  ;;  %v1308_v51 = vadd.f32 %v9797_v5, %v9828_v4  ;;  %v462_v48 = vld [vmem:[#allocation2 + $0xb0] sm:$0xff]  ;;  %v1498_v0 = vsel %vm1437_vm2, %v10046_v54, -inf  ;;  %v1012_v61 = vpack.c.bf16 %v899_v46, %v899_v46 }
 0x3cc   : > { %1673 = vadd.xlane.f32.xlu0 %v1672_v56  ;;  %8471 = vpow2.f32 %v1620_v19  ;;  %v10043_v56 = vpop.f32.mrf.mxu1 }
 0x3cd   : > { %v10039_v5 = vadd.f32 %v1308_v51, %v462_v48  ;;  %13356 = vst [vmem:[#allocation6_spill] sm:$0xff] %v10043_v56  ;;  %v2024_v2 = vunpack.c.l.b16 %v1012_v61  ;;  %v10101_v61 = vld [vmem:[%s9233_s13 + $0x40] sm:$0xff] }
 0x3cf   : > { %v1524_v7 = vpop.xlane.xlu1 %1523  ;;  %v1504_v11 = vsel %vm1437_vm2, %v10039_v5, -inf }
 0x3d0   : > { %v1562_v20 = vsub.f32 %v9895_v55, %v1524_v7  ;;  %v1300_v55 = vadd.f32 %v9779_v43, %v9597_v29  ;;  %v900_v49 = vpop.f32.mrf.mxu2  ;;  %v1501_v29 = vsel %vm1437_vm2, %v10023_v10, -inf }
 0x3d1   : > { %v901_v38 = vadd.f32 %v9743_v33, %v900_v49  ;;  %v1011_v49 = vpack.c.bf16 %v896_v3, %v896_v3 }
 0x3d2   : > { %v1622_v25 = vmul.f32 1.442695, %v1562_v20  ;;  %v10025_v45 = vpop.eup %8471  ;;  %v10027_v35 = vadd.f32 %v1300_v55, %v459_v15 }
 0x3d3   : > { %1532 = vmax.xlane.f32.xlu2 %v1531_v13  ;;  %1706 = vadd.xlane.f32.xlu1 %v1705_v26  ;;  %v1711_v43 = vsel %vm1437_vm2, %v10025_v45, 0.0  ;;  %v463_v26 = vld [vmem:[#allocation2 + $0xb8] sm:$0xff]  ;;  %v1013_v7 = vpack.c.bf16 %v901_v38, %v901_v38 }
 0x3d4   : > { %1490 = vmax.xlane.f32.xlu0 %v1489_v28  ;;  %8473 = vpow2.f32 %v1622_v25  ;;  %v1495_v53 = vsel %vm1437_vm2, %v10027_v35, -inf  ;;  %v894_v28 = vadd.f32 %v9743_v33, %v9957_v8  ;;  %v10068_v52 = vadd.f32 %v1310_v16, %v463_v26 }
 0x3d5   : > { %v891_v8 = vadd.f32 %v9743_v33, %v9939_v40  ;;  %v2025_v25 = vunpack.c.l.b16 %v1013_v7 }
 0x3d6   : > { %v1010_v55 = vpack.c.bf16 %v894_v28, %v894_v28  ;;  %v1507_v51 = vsel %vm1437_vm2, %v10068_v52, -inf }
 0x3d7   : > { %v1009_v32 = vpack.c.bf16 %v891_v8, %v891_v8  ;;  %v2030_v40 = vpack.c.b16 %v2025_v25, %v2024_v2 }
 0x3d8   : > { %v903_v47 = vpop.f32.mrf.mxu2  ;;  %v2022_v41 = vunpack.c.l.b16 %v1010_v55  ;;  %v8343_v55 = vld [vmem:[%s13340_s1 + $0x10] sm:$0xff] }
 0x3d9   : > { %v904_v1 = vadd.f32 %v9743_v33, %v903_v47  ;;  %v2021_v24 = vunpack.c.l.b16 %v1009_v32 }
 0x3da   : > { %v10041_v4 = vpop.eup %8473  ;;  %7918 = vmatmul.msk.bf16.gmra.mxu1 %vm572_vm0, %v10051_v6 }
 0x3db   : > { %1493 = vmax.xlane.f32.xlu2 %v1492_v17  ;;  %1709 = vadd.xlane.f32.xlu1 %v1708_v44  ;;  %v1714_v13 = vsel %vm1437_vm2, %v10041_v4, 0.0  ;;  %v1014_v21 = vpack.c.bf16 %v904_v1, %v904_v1  ;;  %v10081_v1 = vld [vmem:[%s9233_s13 + $0x30] sm:$0xff] }
 0x3dc   : > { %1703 = vadd.xlane.f32.xlu0 %v1702_v31  ;;  %v10074_v31 = vpop.f32.mrf.mxu1 }
 0x3dd   : > { %v2026_v17 = vunpack.c.l.b16 %v1014_v21  ;;  %13357 = vst [vmem:[#allocation7_spill] sm:$0xff] %v10074_v31  ;;  %v10092_v21 = vld [vmem:[%s9233_s13 + $0x38] sm:$0xff] }
 0x3e0   : > { %v905_v19 = vpop.f32.mrf.mxu2 }
 0x3e1   : > { %v906_v20 = vadd.f32 %v9743_v33, %v905_v19 }
 0x3e3   : > { %1502 = vmax.xlane.f32.xlu1 %v1501_v29  ;;  %1712 = vadd.xlane.f32.xlu2 %v1711_v43  ;;  %v1015_v44 = vpack.c.bf16 %v906_v20, %v906_v20  ;;  %v1008_v43 = vpack.c.bf16 %v889_v37, %v889_v37  ;;  %v8344_v37 = vld [vmem:[%s13340_s1 + $0x18] sm:$0xff] }
 0x3e4   : > { %1496 = vmax.xlane.f32.xlu0 %v1495_v53  ;;  %v2023_v53 = vunpack.c.l.b16 %v1011_v49  ;;  %v10085_v38 = vpop.f32.mrf.mxu1  ;;  %2207 = vmatpush.bf16.msra.mxu0 %v8344_v37 }
 0x3e5   : > { %v2027_v15 = vunpack.c.l.b16 %v1015_v44  ;;  %v2020_v47 = vunpack.c.l.b16 %v1008_v43  ;;  %13358 = vst [vmem:[#allocation8_spill] sm:$0xff] %v10085_v38  ;;  %v10110_v44 = vld [vmem:[%s9233_s13 + $0x48] sm:$0xff] }
 0x3e6   : > { %v2029_v46 = vpack.c.b16 %v2023_v53, %v2022_v41 }
 0x3e7   : > { %v2031_v29 = vpack.c.b16 %v2027_v15, %v2026_v17 }
 0x3e8   : > { %v10078_v48 = vpop.f32.mrf.mxu2  ;;  %2208 = vmatpush.bf16.msra.mxu0 %v8343_v55 }
 0x3e9   : > { %2052 = vmatpush.bf16.msra.mxu2 %v2031_v29 }
 0x3ea   : > { %7919 = vmatmul.msk.bf16.gmra.mxu1 %vm572_vm0, %v10081_v1 }
 0x3eb   : > { %1505 = vmax.xlane.f32.xlu1 %v1504_v11  ;;  %1715 = vadd.xlane.f32.xlu2 %v1714_v13  ;;  %v2028_v11 = vpack.c.b16 %v2021_v24, %v2020_v47  ;;  %v10130_v24 = vld [vmem:[%s9233_s13 + $0x50] sm:$0xff] }
 0x3ec   : > { %1499 = vmax.xlane.f32.xlu0 %v1498_v0  ;;  %v10089_v26 = vpop.f32.mrf.mxu1  ;;  %7884 = vmatmul.msk.bf16.vlgmr.msra.gmra.mxu0 %vm572_vm0, %v9906_v9 }
 0x3ed   : > { %2053 = vmatpush.bf16.msra.mxu2 %v2030_v40  ;;  %13359 = vst [vmem:[#allocation9_spill] sm:$0xff] %v10089_v26 }
 0x3f0   : > { %v10087_v16 = vpop.f32.mrf.mxu2 }
 0x3f1   : > { %2054 = vmatpush.bf16.msra.mxu2 %v2029_v46 }
 0x3f3   : > { %1508 = vmax.xlane.f32.xlu2 %v1507_v51 }
 0x3f4   : > { %v10096_v0 = vpop.f32.mrf.mxu1 }
 0x3f5   : > { %2055 = vmatpush.bf16.msra.mxu2 %v2028_v11  ;;  %13360 = vst [vmem:[#allocation10_spill] sm:$0xff] %v10096_v0 }
 0x3f8   : > { %v913_v13 = vpop.f32.mrf.mxu2 }
 0x3fa   : > { %7920 = vmatmul.msk.bf16.gmra.mxu1 %vm572_vm0, %v10092_v21 }
 0x3fc   : > { %v10098_v3 = vpop.f32.mrf.mxu1  ;;  %7885 = vmatmul.msk.bf16.gmra.mxu0 %vm572_vm0, %v9914_v62  ;;  %v10157_v62 = vld [vmem:[%s13344_s5 + $0x1] ss:$0 sm:$0xff] }
 0x400   : > { %v915_v28 = vpop.f32.mrf.mxu2 }
 0x404   : > { %v10105_v7 = vpop.f32.mrf.mxu1 }
 0x408   : > { %v918_v19 = vpop.f32.mrf.mxu2 }
 0x409   : > { %v919_v9 = vadd.f32 %v9743_v33, %v918_v19 }
 0x40a   : > { %7921 = vmatmul.msk.bf16.gmra.mxu1 %vm572_vm0, %v10101_v61 }
 0x40c   : > { %v10107_v17 = vpop.f32.mrf.mxu1  ;;  %7886 = vmatmul.msk.bf16.gmra.mxu0 %vm572_vm0, %v9930_v50 }
 0x410   : > { %v920_v20 = vpop.f32.mrf.mxu2 }
 0x411   : > { %v921_v46 = vadd.f32 %v9743_v33, %v920_v20 }
 0x413   : > { %v1021_v20 = vpack.c.bf16 %v921_v46, %v921_v46 }
 0x414   : > { %v10120_v2 = vpop.f32.mrf.mxu1 }
 0x418   : > { %v923_v8 = vpop.f32.mrf.mxu2 }
 0x419   : > { %v924_v41 = vadd.f32 %v9743_v33, %v923_v8  ;;  %v914_v8 = vadd.f32 %v9743_v33, %v913_v13 }
 0x41a   : > { %7922 = vmatmul.msk.bf16.gmra.mxu1 %vm572_vm0, %v10110_v44 }
 0x41b   : > { %v1022_v11 = vpack.c.bf16 %v924_v41, %v924_v41 }
 0x41c   : > { %v10125_v43 = vpop.f32.mrf.mxu1  ;;  %7887 = vmatmul.msk.bf16.gmra.mxu0 %vm572_vm0, %v9968_v60 }
 0x420   : > { %v925_v25 = vpop.f32.mrf.mxu2 }
 0x421   : > { %v926_v47 = vadd.f32 %v9743_v33, %v925_v25  ;;  %v916_v25 = vadd.f32 %v9743_v33, %v915_v28 }
 0x423   : > { %v1023_v37 = vpack.c.bf16 %v926_v47, %v926_v47  ;;  %v1019_v46 = vpack.c.bf16 %v916_v25, %v916_v25 }
 0x424   : > { %v10141_v19 = vpop.f32.mrf.mxu1 }
 0x425   : > { %v2112_v38 = vunpack.c.l.b16 %v1023_v37 }
 0x42a   : > { %7923 = vmatmul.msk.bf16.gmra.mxu1 %vm572_vm0, %v10130_v24 }
 0x42c   : > { %7888 = vmatmul.msk.bf16.gmra.mxu0 %vm572_vm0, %v10007_v63 }
 0x42e   : > { %v1650_v49 = vpop.xlane.xlu2 %1649 }
 0x42f   : > { %8475 = vrcp.f32 %v1650_v49 }
 0x435   : > { %v8476_v53 = vpop.eup %8475 }
 0x436   : > { %v1527_v15 = vpop.xlane.xlu2 %1526  ;;  %v1677_v51 = vpop.xlane.xlu1 %1676 }
 0x437   : > { %v1563_v29 = vsub.f32 %v9941_v18, %v1527_v15  ;;  %v1653_v32 = vpop.xlane.xlu0 %1652  ;;  %v1764_v18 = vmul.f32 %v8476_v53, %v9927_v30  ;;  %v2111_v53 = vunpack.c.l.b16 %v1022_v11  ;;  %v2110_v11 = vunpack.c.l.b16 %v1021_v20 }
 0x438   : > { %8477 = vrcp.f32 %v1653_v32 }
 0x439   : > { %v1624_v40 = vmul.f32 1.442695, %v1563_v29  ;;  %v1020_v29 = vpack.c.bf16 %v919_v9, %v919_v9  ;;  %v1018_v9 = vpack.c.bf16 %v914_v8, %v914_v8  ;;  %v2116_v37 = vpack.c.b16 %v2112_v38, %v2111_v53  ;;  %v2336_v8 = vpop.f32.mrf.mxu1  ;;  %v10165_v53 = vld [vmem:[%s9233_s13 + $0x58] sm:$0xff] }
 0x43a   : > { %7924 = vmatmul.msk.bf16.gmra.mxu1 %vm572_vm0, %v10165_v53 }
 0x43b   : > { %8479 = vpow2.f32 %v1624_v40  ;;  %v1796_v40 = vpack.c.bf16 %v1764_v18, %v1764_v18  ;;  %v2107_v25 = vunpack.c.l.b16 %v1018_v9 }
 0x43c   : > { %7889 = vmatmul.msk.bf16.gmra.mxu0 %vm572_vm0, %v10051_v6 }
 0x43d   : > { %v1836_v18 = vunpack.c.l.b16 %v1796_v40  ;;  %v2108_v40 = vunpack.c.l.b16 %v1019_v46  ;;  %v2334_v46 = vadd.f32 %v10157_v62, %v10141_v19 }
 0x43e   : > { %v1488_v55 = vpop.xlane.xlu2 %1487  ;;  %v1530_v49 = vpop.xlane.xlu1 %1529 }
 0x43f   : > { %v8478_v15 = vpop.eup %8477  ;;  %v1550_v32 = vsub.f32 %v9960_v39, %v1488_v55  ;;  %v1564_v0 = vsub.f32 %v9962_v36, %v1530_v49  ;;  %v1674_v41 = vpop.xlane.xlu0 %1673  ;;  %v911_v36 = vadd.f32 %v9743_v33, %v10087_v16 }
 0x440   : > { %v1765_v30 = vmul.f32 %v8478_v15, %v9953_v27  ;;  %8481 = vrcp.f32 %v1674_v41  ;;  %v909_v27 = vadd.f32 %v9743_v33, %v10078_v48 }
 0x441   : > { %v10144_v47 = vpop.eup %8479  ;;  %v1598_v13 = vmul.f32 1.442695, %v1550_v32  ;;  %v1626_v26 = vmul.f32 1.442695, %v1564_v0  ;;  %8483 = vrcp.f32 %v1677_v51  ;;  %v2109_v51 = vunpack.c.l.b16 %v1020_v29 }
 0x442   : > { %v1797_v28 = vpack.c.bf16 %v1765_v30, %v1765_v30  ;;  %v1717_v39 = vsel %vm1437_vm2, %v10144_v47, 0.0  ;;  %v1016_v32 = vpack.c.bf16 %v909_v27, %v909_v27 }
 0x443   : > { %8485 = vpow2.f32 %v1598_v13  ;;  %1718 = vadd.xlane.f32.xlu0 %v1717_v39  ;;  %v2115_v41 = vpack.c.b16 %v2110_v11, %v2109_v51  ;;  %v2337_v39 = vadd.f32 %v10157_v62, %v2336_v8 }
 0x444   : > { %v1837_v0 = vunpack.c.l.b16 %v1797_v28  ;;  %8487 = vpow2.f32 %v1626_v26  ;;  %v1017_v26 = vpack.c.bf16 %v911_v36, %v911_v36  ;;  %v2105_v36 = vunpack.c.l.b16 %v1016_v32 }
 0x446   : > { %v1841_v55 = vpack.c.b16 %v1837_v0, %v1836_v18  ;;  %v1533_v48 = vpop.xlane.xlu2 %1532  ;;  %v1707_v49 = vpop.xlane.xlu1 %1706  ;;  %v2106_v9 = vunpack.c.l.b16 %v1017_v26  ;;  %v2114_v0 = vpack.c.b16 %v2108_v40, %v2107_v25 }
 0x447   : > { %v8482_v33 = vpop.eup %8481  ;;  %v1565_v16 = vsub.f32 %v9984_v23, %v1533_v48  ;;  %v1491_v38 = vpop.xlane.xlu0 %1490  ;;  %v2322_v48 = vadd.f32 %v10157_v62, %v10098_v3 }
 0x448   : > { %v8484_v15 = vpop.eup %8483  ;;  %7858 = vmatmul.msk.bf16.vlgmr.msrb.gmra.mxu3 %vm1437_vm2, %v1841_v55  ;;  %v1551_v20 = vsub.f32 %v9988_v34, %v1491_v38  ;;  %v1772_v13 = vmul.f32 %v8482_v33, %v9964_v22  ;;  %v2332_v22 = vadd.f32 %v10157_v62, %v10125_v43  ;;  %v2550_v55 = vpack.c.bf16 %v2337_v39, %v2337_v39 }
 0x449   : > { %v10161_v29 = vpop.eup %8485  ;;  %v1628_v30 = vmul.f32 1.442695, %v1565_v16  ;;  %2137 = vmatpush.bf16.msrb.mxu3 %v2116_v37  ;;  %v1773_v18 = vmul.f32 %v8484_v15, %v9943_v57  ;;  %v2324_v57 = vadd.f32 %v10157_v62, %v10105_v7  ;;  %v2338_v16 = vpop.f32.mrf.mxu1  ;;  %v2113_v15 = vpack.c.b16 %v2106_v9, %v2105_v36 }
 0x44a   : > { %v10169_v23 = vpop.eup %8487  ;;  %v1678_v28 = vsel %vm1437_vm2, %v10161_v29, 0.0  ;;  %v1600_v27 = vmul.f32 1.442695, %v1551_v20  ;;  %v1804_v51 = vpack.c.bf16 %v1772_v13, %v1772_v13  ;;  %v2339_v19 = vadd.f32 %v10157_v62, %v2338_v16 }
 0x44b   : > { %8489 = vpow2.f32 %v1628_v30  ;;  %1679 = vadd.xlane.f32.xlu0 %v1678_v28  ;;  %v1720_v34 = vsel %vm1437_vm2, %v10169_v23, 0.0  ;;  %v1805_v43 = vpack.c.bf16 %v1773_v18, %v1773_v18  ;;  %v2548_v25 = vpack.c.bf16 %v2332_v22, %v2332_v22 }
 0x44c   : > { %1721 = vadd.xlane.f32.xlu2 %v1720_v34  ;;  %8491 = vpow2.f32 %v1600_v27  ;;  %v2549_v38 = vpack.c.bf16 %v2334_v46, %v2334_v46  ;;  %v1921_v3 = vunpack.c.l.b16 %v1804_v51  ;;  %v2651_v40 = vunpack.c.l.b16 %v2550_v55  ;;  %7890 = vmatmul.msk.bf16.gmra.mxu0 %vm572_vm0, %v10081_v1 }
 0x44d   : > { %2138 = vmatpush.bf16.msrb.mxu3 %v2115_v41  ;;  %8493 = vrcp.f32 %v1707_v49  ;;  %v2544_v30 = vpack.c.bf16 %v2322_v48, %v2322_v48  ;;  %v1922_v20 = vunpack.c.l.b16 %v1805_v43  ;;  %v2545_v41 = vpack.c.bf16 %v2324_v57, %v2324_v57 }
 0x44e   : > { %v1494_v11 = vpop.xlane.xlu2 %1493  ;;  %v10182_v37 = vpop.xlane.xlu1 %1709  ;;  %v2327_v39 = vadd.f32 %v10157_v62, %v10107_v17  ;;  %v2329_v27 = vadd.f32 %v10157_v62, %v10120_v2  ;;  %v2649_v36 = vunpack.c.l.b16 %v2548_v25  ;;  %v2650_v22 = vunpack.c.l.b16 %v2549_v38 }
 0x44f   : > { %v1552_v33 = vsub.f32 %v9999_v42, %v1494_v11  ;;  %v1704_v8 = vpop.xlane.xlu0 %1703  ;;  %v2551_v42 = vpack.c.bf16 %v2339_v19, %v2339_v19  ;;  %v1926_v34 = vpack.c.b16 %v1922_v20, %v1921_v3  ;;  %v10207_v55 = vunpack.c.l.b16 %v2544_v30 }
 0x450   : > { %8495 = vrcp.f32 %v1704_v8  ;;  %v10209_v17 = vunpack.c.l.b16 %v2545_v41  ;;  %v10217_v8 = vld [vmem:[%s9233_s13 + $0x60] sm:$0xff] }
 0x451   : > { %v10190_v32 = vpop.eup %8489  ;;  %v1602_v26 = vmul.f32 1.442695, %v1552_v33  ;;  %2139 = vmatpush.bf16.msrb.mxu3 %v2114_v0  ;;  %v2652_v28 = vunpack.c.l.b16 %v2551_v42  ;;  %v10205_v11 = vpop.f32.mrf.mxu1  ;;  %v2546_v33 = vpack.c.bf16 %v2327_v39, %v2327_v39  ;;  %7925 = vmatmul.msk.bf16.gmra.mxu1 %vm572_vm0, %v10217_v8 }
 0x452   : > { %v1723_v7 = vsel %vm1437_vm2, %v10190_v32, 0.0  ;;  %v10196_v49 = vpop.eup %8491 }
 0x453   : > { %8497 = vpow2.f32 %v1602_v26  ;;  %1724 = vadd.xlane.f32.xlu0 %v1723_v7  ;;  %v1681_v13 = vsel %vm1437_vm2, %v10196_v49, 0.0  ;;  %v8494_v50 = vpop.eup %8493  ;;  %v2656_v0 = vpack.c.b16 %v2652_v28, %v2651_v40  ;;  %v2655_v26 = vpack.c.b16 %v2650_v22, %v2649_v36 }
 0x454   : > { %1682 = vadd.xlane.f32.xlu1 %v1681_v13  ;;  %v1783_v38 = vmul.f32 %v8494_v50, %v9986_v58  ;;  %v2647_v3 = vunpack.c.l.b16 %v2546_v33 }
 0x455   : > { %2140 = vmatpush.bf16.msrb.mxu3 %v2113_v15  ;;  %v2679_v48 = vsel %vm1072_vm1, %v2656_v0, 0 }
 0x456   : > { %v1713_v9 = vpop.xlane.xlu2 %1712  ;;  %v1503_v18 = vpop.xlane.xlu1 %1502  ;;  %v1815_v13 = vpack.c.bf16 %v1783_v38, %v1783_v38 }
 0x457   : > { %v8496_v46 = vpop.eup %8495  ;;  %v1555_v51 = vsub.f32 %v10023_v10, %v1503_v18  ;;  %v1497_v2 = vpop.xlane.xlu0 %1496  ;;  %v2547_v10 = vpack.c.bf16 %v2329_v27, %v2329_v27 }
 0x458   : > { %7862 = vmatmul.msk.bf16.vlgmr.msra.gmra.mxu3 %vm1437_vm2, %v1926_v34  ;;  %v1553_v16 = vsub.f32 %v10027_v35, %v1497_v2  ;;  %v1782_v15 = vmul.f32 %v8496_v46, %v10003_v59  ;;  %v2653_v35 = vpack.c.b16 %v10209_v17, %v10207_v55  ;;  %v2676_v59 = vsel %vm1072_vm1, %v2655_v26, 0 }
 0x459   : > { %v10213_v57 = vpop.eup %8497  ;;  %v1608_v43 = vmul.f32 1.442695, %v1555_v51  ;;  %2685 = vmatpush.bf16.xpose.msra.mxu3 %v2679_v48  ;;  %v2648_v7 = vunpack.c.l.b16 %v2547_v10  ;;  %v10231_v41 = vpop.f32.mrf.mxu1  ;;  %v2086_v22 = vunpack.c.l.b16 %v1815_v13  ;;  %v10251_v48 = vld [vmem:[%s9233_s13 + $0x68] sm:$0xff] }
 0x45a   : > { %v1684_v19 = vsel %vm1437_vm2, %v10213_v57, 0.0  ;;  %v1604_v25 = vmul.f32 1.442695, %v1553_v16  ;;  %v1814_v40 = vpack.c.bf16 %v1782_v15, %v1782_v15 }
 0x45b   : > { %8499 = vpow2.f32 %v1608_v43 }
 0x45c   : > { %8501 = vpow2.f32 %v1604_v25  ;;  %1685 = vadd.xlane.f32.xlu1 %v1684_v19  ;;  %v2085_v50 = vunpack.c.l.b16 %v1814_v40  ;;  %v2670_v19 = vsel %vm1072_vm1, %v2653_v35, 0  ;;  %v10274_v35 = vld [vmem:[%s9233_s13 + $0x70] sm:$0xff]  ;;  %7891 = vmatmul.msk.bf16.gmra.mxu0 %vm572_vm0, %v10092_v21 }
 0x45d   : > { %8503 = vrcp.f32 %v1713_v9 }
 0x45e   : > { %v10227_v42 = vpop.xlane.xlu2 %1715  ;;  %v1506_v30 = vpop.xlane.xlu1 %1505  ;;  %8505 = vrcp.f32 %v10182_v37  ;;  %v2093_v37 = vpack.c.b16 %v2086_v22, %v2085_v50 }
 0x45f   : > { %v1556_v20 = vsub.f32 %v10039_v5, %v1506_v30  ;;  %v1500_v28 = vpop.xlane.xlu0 %1499  ;;  %v2654_v5 = vpack.c.b16 %v2648_v7, %v2647_v3  ;;  %v10270_v7 = vpop.f32.mrf.mxu0 }
 0x460   : > { %v1554_v39 = vsub.f32 %v10046_v54, %v1500_v28  ;;  %v10285_v28 = vld [vmem:[%s9233_s13 + $0x78] sm:$0xff] }
 0x461   : > { %v10233_v58 = vpop.eup %8499  ;;  %v1610_v27 = vmul.f32 1.442695, %v1556_v20  ;;  %2686 = vmatpush.bf16.xpose.msra.mxu3 %v2676_v59  ;;  %v2673_v0 = vsel %vm1072_vm1, %v2654_v5, 0  ;;  %v2346_v51 = vpop.f32.mrf.mxu1  ;;  %7926 = vmatmul.msk.bf16.gmra.mxu1 %vm572_vm0, %v10251_v48 }
 0x462   : > { %v1693_v34 = vsel %vm1437_vm2, %v10233_v58, 0.0  ;;  %v10241_v36 = vpop.eup %8501  ;;  %v1606_v18 = vmul.f32 1.442695, %v1554_v39 }
 0x463   : > { %8507 = vpow2.f32 %v1610_v27  ;;  %v1687_v54 = vsel %vm1437_vm2, %v10241_v36, 0.0  ;;  %v8504_v46 = vpop.eup %8503 }
 0x464   : > { %8509 = vpow2.f32 %v1606_v18  ;;  %1688 = vadd.xlane.f32.xlu2 %v1687_v54  ;;  %1694 = vadd.xlane.f32.xlu1 %v1693_v34  ;;  %v8506_v55 = vpop.eup %8505  ;;  %v1785_v33 = vmul.f32 %v8504_v46, %v10025_v45 }
 0x466   : > { %v1509_v9 = vpop.xlane.xlu2 %1508  ;;  %v1817_v15 = vpack.c.bf16 %v1785_v33, %v1785_v33 }
 0x467   : > { %v1557_v60 = vsub.f32 %v10068_v52, %v1509_v9  ;;  %v1784_v52 = vmul.f32 %v8506_v55, %v10001_v14  ;;  %v10278_v59 = vpop.f32.mrf.mxu0 }
 0x468   : > { %7867 = vmatmul.msk.bf16.vlgmr.msrb.gmra.mxu3 %vm1437_vm2, %v2093_v37  ;;  %v2088_v3 = vunpack.c.l.b16 %v1817_v15 }
 0x469   : > { %v10248_v17 = vpop.eup %8507  ;;  %v1612_v2 = vmul.f32 1.442695, %v1557_v60  ;;  %2687 = vmatpush.bf16.xpose.msra.mxu3 %v2673_v0  ;;  %v2348_v26 = vpop.f32.mrf.mxu1  ;;  %v1816_v25 = vpack.c.bf16 %v1784_v52, %v1784_v52 }
 0x46a   : > { %v1696_v16 = vsel %vm1437_vm2, %v10248_v17, 0.0  ;;  %v10258_v43 = vpop.eup %8509  ;;  %v2349_v33 = vadd.f32 %v10157_v62, %v2348_v26 }
 0x46b   : > { %8511 = vpow2.f32 %v1612_v2  ;;  %v1690_v10 = vsel %vm1437_vm2, %v10258_v43, 0.0  ;;  %v2087_v14 = vunpack.c.l.b16 %v1816_v25  ;;  %v2347_v2 = vadd.f32 %v10157_v62, %v2346_v51 }
 0x46c   : > { %1691 = vadd.xlane.f32.xlu0 %v1690_v10  ;;  %1697 = vadd.xlane.f32.xlu2 %v1696_v16  ;;  %v2555_v15 = vpack.c.bf16 %v2349_v33, %v2349_v33  ;;  %v2344_v51 = vadd.f32 %v10157_v62, %v10231_v41  ;;  %8513 = vrcp.f32 %v10227_v42 }
 0x46d   : > { %v2094_v40 = vpack.c.b16 %v2088_v3, %v2087_v14  ;;  %v2554_v1 = vpack.c.bf16 %v2347_v2, %v2347_v2  ;;  %v2342_v3 = vadd.f32 %v10157_v62, %v10205_v11  ;;  %7892 = vmatmul.msk.bf16.gmra.mxu0 %vm572_vm0, %v10101_v61 }
 0x46e   : > { %v2741_v26 = vunpack.c.l.b16 %v2555_v15 }
 0x46f   : > { %v10282_v13 = vpop.f32.mrf.mxu0  ;;  %v2740_v14 = vunpack.c.l.b16 %v2554_v1 }
 0x471   : > { %v10264_v45 = vpop.eup %8511  ;;  %2688 = vmatpush.bf16.xpose.msra.mxu3 %v2670_v19  ;;  %v2351_v30 = vpop.f32.mrf.mxu1  ;;  %7927 = vmatmul.msk.bf16.gmra.mxu1 %vm572_vm0, %v10274_v35 }
 0x472   : > { %v1699_v38 = vsel %vm1437_vm2, %v10264_v45, 0.0  ;;  %v2352_v5 = vadd.f32 %v10157_v62, %v2351_v30  ;;  %v2553_v30 = vpack.c.bf16 %v2344_v51, %v2344_v51 }
 0x474   : > { %1700 = vadd.xlane.f32.xlu0 %v1699_v38  ;;  %v2556_v9 = vpack.c.bf16 %v2352_v5, %v2352_v5  ;;  %v2739_v11 = vunpack.c.l.b16 %v2553_v30 }
 0x476   : > { %v2742_v16 = vunpack.c.l.b16 %v2556_v9 }
 0x477   : > { %v10295_v54 = vpop.f32.mrf.mxu0 }
 0x478   : > { %7868 = vmatmul.msk.bf16.gmra.mxu3 %vm1437_vm2, %v2094_v40  ;;  %v2552_v40 = vpack.c.bf16 %v2342_v3, %v2342_v3 }
 0x479   : > { %v2353_v20 = vpop.f32.mrf.mxu1 }
 0x47a   : > { %v2354_v18 = vadd.f32 %v10157_v62, %v2353_v20  ;;  %v2747_v20 = vpack.c.b16 %v2741_v26, %v2740_v14 }
 0x47c   : > { %v2557_v0 = vpack.c.bf16 %v2354_v18, %v2354_v18 }
 0x47d   : > { %7893 = vmatmul.msk.bf16.gmra.mxu0 %vm572_vm0, %v10110_v44 }
 0x47e   : > { %v2743_v52 = vunpack.c.l.b16 %v2557_v0 }
 0x47f   : > { %v10302_v10 = vpop.f32.mrf.mxu0 }
 0x480   : > { %13361 = vst [vmem:[#allocation11_spill] sm:$0xff] %v10302_v10  ;;  %v2748_v19 = vpack.c.b16 %v2743_v52, %v2742_v16 }
 0x481   : > { %v2356_v63 = vpop.f32.mrf.mxu1  ;;  %7928 = vmatmul.msk.bf16.gmra.mxu1 %vm572_vm0, %v10285_v28 }
 0x482   : > { %v2357_v39 = vadd.f32 %v10157_v62, %v2356_v63  ;;  %v2769_v38 = vsel %vm1072_vm1, %v2748_v19, 0 }
 0x484   : > { %v2558_v27 = vpack.c.bf16 %v2357_v39, %v2357_v39 }
 0x486   : > { %v2744_v22 = vunpack.c.l.b16 %v2558_v27  ;;  %v2766_v27 = vsel %vm1072_vm1, %v2747_v20, 0 }
 0x487   : > { %v10313_v63 = vpop.f32.mrf.mxu0 }
 0x488   : > { %13362 = vst [vmem:[#allocation12_spill] sm:$0xff] %v10313_v63 }
 0x489   : > { %v2358_v50 = vpop.f32.mrf.mxu1 }
 0x48a   : > { %v2359_v34 = vadd.f32 %v10157_v62, %v2358_v50  ;;  %v2738_v50 = vunpack.c.l.b16 %v2552_v40 }
 0x48c   : > { %v2559_v6 = vpack.c.bf16 %v2359_v34, %v2359_v34  ;;  %v2746_v34 = vpack.c.b16 %v2739_v11, %v2738_v50 }
 0x48d   : > { %7894 = vmatmul.msk.bf16.gmra.mxu0 %vm572_vm0, %v10130_v24 }
 0x48e   : > { %v2745_v37 = vunpack.c.l.b16 %v2559_v6  ;;  %v2763_v18 = vsel %vm1072_vm1, %v2746_v34, 0 }
 0x48f   : > { %v2210_v5 = vpop.f32.mrf.mxu0 }
 0x490   : > { %v2749_v46 = vpack.c.b16 %v2745_v37, %v2744_v22  ;;  %v8514_v22 = vpop.eup %8513 }
 0x491   : > { %v10297_v60 = vpop.f32.mrf.mxu1  ;;  %v1786_v9 = vmul.f32 %v8514_v22, %v10041_v4 }
 0x492   : > { %v2772_v55 = vsel %vm1072_vm1, %v2749_v46, 0 }
 0x493   : > { %2778 = vmatpush.bf16.xpose.msrb.mxu3 %v2772_v55  ;;  %v1818_v46 = vpack.c.bf16 %v1786_v9, %v1786_v9 }
 0x495   : > { %v2089_v61 = vunpack.c.l.b16 %v1818_v46 }
 0x497   : > { %v2212_v6 = vpop.f32.mrf.mxu0 }
 0x499   : > { %v10304_v25 = vpop.f32.mrf.mxu1 }
 0x49b   : > { %2779 = vmatpush.bf16.xpose.msrb.mxu3 %v2769_v38 }
 0x49d   : > { %7895 = vmatmul.msk.bf16.gmra.mxu0 %vm572_vm0, %v10165_v53 }
 0x49f   : > { %v10326_v52 = vpop.f32.mrf.mxu0 }
 0x4a1   : > { %v10315_v39 = vpop.f32.mrf.mxu1 }
 0x4a3   : > { %2780 = vmatpush.bf16.xpose.msrb.mxu3 %v2766_v27 }
 0x4a7   : > { %v10331_v3 = vpop.f32.mrf.mxu0 }
 0x4a9   : > { %v10318_v41 = vpop.f32.mrf.mxu1 }
 0x4ab   : > { %2781 = vmatpush.bf16.xpose.msrb.mxu3 %v2763_v18 }
 0x4ad   : > { %7896 = vmatmul.msk.bf16.gmra.mxu0 %vm572_vm0, %v10217_v8 }
 0x4af   : > { %v10337_v18 = vpop.f32.mrf.mxu0 }
 0x4b1   : > { %v2371_v37 = vpop.f32.mrf.mxu1 }
 0x4b6   : > { %v1719_v21 = vpop.xlane.xlu0 %1718 }
 0x4b7   : > { %8515 = vrcp.f32 %v1719_v21 }
 0x4b9   : > { %v2373_v42 = vpop.f32.mrf.mxu1 }
 0x4bd   : > { %v8516_v0 = vpop.eup %8515  ;;  %7897 = vmatmul.msk.bf16.gmra.mxu0 %vm572_vm0, %v10251_v48 }
 0x4be   : > { %v1787_v55 = vmul.f32 %v8516_v0, %v10144_v47  ;;  %v1680_v2 = vpop.xlane.xlu0 %1679 }
 0x4bf   : > { %v1722_v33 = vpop.xlane.xlu2 %1721 }
 0x4c0   : > { %v1819_v16 = vpack.c.bf16 %v1787_v55, %v1787_v55  ;;  %8517 = vrcp.f32 %v1722_v33 }
 0x4c1   : > { %8519 = vrcp.f32 %v1680_v2  ;;  %v2376_v51 = vpop.f32.mrf.mxu1 }
 0x4c2   : > { %v2090_v1 = vunpack.c.l.b16 %v1819_v16 }
 0x4c4   : > { %v2095_v15 = vpack.c.b16 %v2090_v1, %v2089_v61 }
 0x4c6   : > { %v1725_v19 = vpop.xlane.xlu0 %1724  ;;  %7869 = vmatmul.msk.bf16.gmra.mxu3 %vm1437_vm2, %v2095_v15  ;;  %v8518_v4 = vpop.eup %8517 }
 0x4c7   : > { %8521 = vrcp.f32 %v1725_v19  ;;  %v8520_v47 = vpop.eup %8519  ;;  %v1683_v38 = vpop.xlane.xlu1 %1682  ;;  %v1788_v14 = vmul.f32 %v8518_v4, %v10169_v23  ;;  %v10344_v23 = vld [vmem:[%s13343_s4 + $0x1] ss:$0 sm:$0xff] }
 0x4c8   : > { %8523 = vrcp.f32 %v1683_v38  ;;  %v1774_v26 = vmul.f32 %v8520_v47, %v10161_v29  ;;  %v2211_v33 = vadd.f32 %v10344_v23, %v2210_v5  ;;  %v2213_v24 = vadd.f32 %v10344_v23, %v2212_v6  ;;  %v10352_v19 = vpop.f32.mrf.mxu0 }
 0x4c9   : > { %v1820_v30 = vpack.c.bf16 %v1788_v14, %v1788_v14  ;;  %v2378_v21 = vpop.f32.mrf.mxu1  ;;  %v2374_v5 = vadd.f32 %v10157_v62, %v2373_v42  ;;  %v2216_v53 = vadd.f32 %v10344_v23, %v10326_v52 }
 0x4ca   : > { %v1806_v27 = vpack.c.bf16 %v1774_v26, %v1774_v26  ;;  %v2379_v55 = vadd.f32 %v10157_v62, %v2378_v21  ;;  %v2512_v47 = vpack.c.bf16 %v2211_v33, %v2211_v33  ;;  %v2513_v38 = vpack.c.bf16 %v2213_v24, %v2213_v24 }
 0x4cb   : > { %v2091_v9 = vunpack.c.l.b16 %v1820_v30 }
 0x4cc   : > { %v2000_v29 = vunpack.c.l.b16 %v1806_v27  ;;  %v2567_v1 = vpack.c.bf16 %v2379_v55, %v2379_v55  ;;  %v2625_v30 = vunpack.c.l.b16 %v2512_v47 }
 0x4cd   : > { %v8522_v40 = vpop.eup %8521  ;;  %7898 = vmatmul.msk.bf16.gmra.mxu0 %vm572_vm0, %v10274_v35 }
 0x4ce   : > { %v1789_v44 = vmul.f32 %v8522_v40, %v10190_v32  ;;  %v8524_v20 = vpop.eup %8523  ;;  %v2838_v26 = vunpack.c.l.b16 %v2567_v1 }
 0x4cf   : > { %v1775_v11 = vmul.f32 %v8524_v20, %v10196_v49  ;;  %v1686_v34 = vpop.xlane.xlu1 %1685  ;;  %v2377_v49 = vadd.f32 %v10157_v62, %v2376_v51  ;;  %v2372_v51 = vadd.f32 %v10157_v62, %v2371_v37 }
 0x4d0   : > { %v1821_v50 = vpack.c.bf16 %v1789_v44, %v1789_v44  ;;  %8525 = vrcp.f32 %v1686_v34  ;;  %v2626_v44 = vunpack.c.l.b16 %v2513_v38  ;;  %v2565_v34 = vpack.c.bf16 %v2374_v5, %v2374_v5 }
 0x4d1   : > { %v1807_v22 = vpack.c.bf16 %v1775_v11, %v1775_v11  ;;  %v2566_v61 = vpack.c.bf16 %v2377_v49, %v2377_v49  ;;  %v10354_v4 = vpop.f32.mrf.mxu1  ;;  %v2564_v20 = vpack.c.bf16 %v2372_v51, %v2372_v51  ;;  %v2362_v38 = vadd.f32 %v10157_v62, %v10297_v60 }
 0x4d2   : > { %v2092_v0 = vunpack.c.l.b16 %v1821_v50  ;;  %v2364_v51 = vadd.f32 %v10157_v62, %v10304_v25  ;;  %v2514_v5 = vpack.c.bf16 %v2216_v53, %v2216_v53 }
 0x4d3   : > { %v2001_v32 = vunpack.c.l.b16 %v1807_v22  ;;  %v2837_v6 = vunpack.c.l.b16 %v2566_v61 }
 0x4d4   : > { %v2096_v46 = vpack.c.b16 %v2092_v0, %v2091_v9  ;;  %v10360_v9 = vpop.f32.mrf.mxu0  ;;  %v2369_v0 = vadd.f32 %v10157_v62, %v10318_v41  ;;  %v2218_v41 = vadd.f32 %v10344_v23, %v10331_v3 }
 0x4d5   : > { %v2008_v2 = vpack.c.b16 %v2001_v32, %v2000_v29  ;;  %v2842_v22 = vpack.c.b16 %v2838_v26, %v2837_v6  ;;  %v2835_v29 = vunpack.c.l.b16 %v2564_v20  ;;  %v2836_v32 = vunpack.c.l.b16 %v2565_v34 }
 0x4d6   : > { %7870 = vmatmul.msk.bf16.gmra.mxu3 %vm1437_vm2, %v2096_v46  ;;  %v8526_v15 = vpop.eup %8525  ;;  %v2563_v24 = vpack.c.bf16 %v2369_v0, %v2369_v0  ;;  %v2515_v6 = vpack.c.bf16 %v2218_v41, %v2218_v41  ;;  %v2561_v20 = vpack.c.bf16 %v2364_v51, %v2364_v51 }
 0x4d7   : > { %v1689_v16 = vpop.xlane.xlu2 %1688  ;;  %7863 = vmatmul.msk.bf16.vlgmr.msra.gmra.mxu2 %vm1437_vm2, %v2008_v2  ;;  %v1776_v14 = vmul.f32 %v8526_v15, %v10213_v57  ;;  %v1695_v11 = vpop.xlane.xlu1 %1694  ;;  %v2367_v57 = vadd.f32 %v10157_v62, %v10315_v39  ;;  %v2865_v55 = vsel %vm1072_vm1, %v2842_v22, 0 }
 0x4d8   : > { %8527 = vrcp.f32 %v1689_v16  ;;  %v2841_v16 = vpack.c.b16 %v2836_v32, %v2835_v29  ;;  %v2628_v60 = vunpack.c.l.b16 %v2515_v6  ;;  %v2832_v22 = vunpack.c.l.b16 %v2561_v20 }
 0x4d9   : > { %v1808_v27 = vpack.c.bf16 %v1776_v14, %v1776_v14  ;;  %v10362_v37 = vpop.f32.mrf.mxu1  ;;  %v2562_v39 = vpack.c.bf16 %v2367_v57, %v2367_v57  ;;  %v2834_v14 = vunpack.c.l.b16 %v2563_v24  ;;  %v2221_v32 = vadd.f32 %v10344_v23, %v10337_v18 }
 0x4da   : > { %v2862_v26 = vsel %vm1072_vm1, %v2841_v16, 0 }
 0x4db   : > { %v2002_v46 = vunpack.c.l.b16 %v1808_v27  ;;  %v2833_v52 = vunpack.c.l.b16 %v2562_v39  ;;  %v2627_v27 = vunpack.c.l.b16 %v2514_v5  ;;  %v10400_v39 = vpop.f32.mrf.mxu3  ;;  %v2516_v53 = vpack.c.bf16 %v2221_v32, %v2221_v32 }
 0x4dc   : > { %v10377_v1 = vpop.f32.mrf.mxu0  ;;  %13363 = vst [vmem:[#allocation13_spill] sm:$0xff] %v10400_v39  ;;  %v2226_v5 = vadd.f32 %v10344_v23, %v10360_v9 }
 0x4dd   : > { %v2634_v57 = vpack.c.b16 %v2628_v60, %v2627_v27  ;;  %v2228_v6 = vadd.f32 %v10344_v23, %v10377_v1  ;;  %7899 = vmatmul.msk.bf16.gmra.mxu0 %vm572_vm0, %v10285_v28 }
 0x4de   : > { %v8528_v40 = vpop.eup %8527 }
 0x4df   : > { %v1777_v50 = vmul.f32 %v8528_v40, %v10241_v36  ;;  %v1692_v21 = vpop.xlane.xlu0 %1691  ;;  %v2633_v36 = vpack.c.b16 %v2626_v44, %v2625_v30  ;;  %v2560_v44 = vpack.c.bf16 %v2362_v38, %v2362_v38 }
 0x4e0   : > { %8529 = vrcp.f32 %v1692_v21 }
 0x4e1   : > { %v1809_v42 = vpack.c.bf16 %v1777_v50, %v1777_v50  ;;  %8531 = vrcp.f32 %v1695_v11  ;;  %v10379_v15 = vpop.f32.mrf.mxu1  ;;  %v1698_v50 = vpop.xlane.xlu2 %1697  ;;  %v2840_v11 = vpack.c.b16 %v2834_v14, %v2833_v52 }
 0x4e3   : > { %v2003_v49 = vunpack.c.l.b16 %v1809_v42  ;;  %v2859_v0 = vsel %vm1072_vm1, %v2840_v11, 0 }
 0x4e4   : > { %v2230_v25 = vpop.f32.mrf.mxu0 }
 0x4e5   : > { %v2009_v2 = vpack.c.b16 %v2003_v49, %v2002_v46  ;;  %v2223_v46 = vadd.f32 %v10344_v23, %v10352_v19  ;;  %v2629_v19 = vunpack.c.l.b16 %v2516_v53  ;;  %v2231_v11 = vadd.f32 %v10344_v23, %v2230_v25 }
 0x4e6   : > { %7966 = vmatmul.msk.bf16.vlgmr.msra.gmra.mxu3 %vm1072_vm1, %v2633_v36  ;;  %v8530_v33 = vpop.eup %8529 }
 0x4e7   : > { %2871 = vmatpush.bf16.xpose.msra.mxu3 %v2865_v55  ;;  %7864 = vmatmul.msk.bf16.gmra.mxu2 %vm1437_vm2, %v2009_v2  ;;  %v8532_v61 = vpop.eup %8531  ;;  %v1778_v47 = vmul.f32 %v8530_v33, %v10258_v43  ;;  %v1701_v30 = vpop.xlane.xlu0 %1700  ;;  %v2517_v41 = vpack.c.bf16 %v2223_v46, %v2223_v46 }
 0x4e8   : > { %v1779_v3 = vmul.f32 %v8532_v61, %v10233_v58  ;;  %8533 = vrcp.f32 %v1701_v30  ;;  %v2831_v58 = vunpack.c.l.b16 %v2560_v44  ;;  %v2518_v30 = vpack.c.bf16 %v2226_v5, %v2226_v5 }
 0x4e9   : > { %v1810_v40 = vpack.c.bf16 %v1778_v47, %v1778_v47  ;;  %v10388_v34 = vpop.f32.mrf.mxu1  ;;  %8535 = vrcp.f32 %v1698_v50  ;;  %v2630_v47 = vunpack.c.l.b16 %v2517_v41  ;;  %v2519_v44 = vpack.c.bf16 %v2228_v6, %v2228_v6 }
 0x4ea   : > { %v1811_v43 = vpack.c.bf16 %v1779_v3, %v1779_v3  ;;  %v2839_v8 = vpack.c.b16 %v2832_v22, %v2831_v58  ;;  %v10406_v3 = vpop.f32.mrf.mxu3  ;;  %v2631_v20 = vunpack.c.l.b16 %v2518_v30  ;;  %v2387_v41 = vadd.f32 %v10157_v62, %v10379_v15 }
 0x4eb   : > { %v2004_v21 = vunpack.c.l.b16 %v1810_v40  ;;  %13364 = vst [vmem:[#allocation14_spill] sm:$0xff] %v10406_v3  ;;  %v2382_v15 = vadd.f32 %v10157_v62, %v10354_v4  ;;  %v8966_v3 = vld [vmem:[#allocation2 + $0xd0] sm:$0xff] }
 0x4ec   : > { %v2005_v42 = vunpack.c.l.b16 %v1811_v43  ;;  %v2232_v55 = vpop.f32.mrf.mxu0  ;;  %v2856_v16 = vsel %vm1072_vm1, %v2839_v8, 0  ;;  %v2632_v43 = vunpack.c.l.b16 %v2519_v44 }
 0x4ee   : > { %v2010_v36 = vpack.c.b16 %v2005_v42, %v2004_v21  ;;  %v8534_v29 = vpop.eup %8533  ;;  %v2636_v9 = vpack.c.b16 %v2632_v43, %v2631_v20  ;;  %v2233_v21 = vadd.f32 %v10344_v23, %v2232_v55  ;;  %v2568_v20 = vpack.c.bf16 %v2382_v15, %v2382_v15 }
 0x4ef   : > { %2872 = vmatpush.bf16.xpose.msra.mxu3 %v2862_v26  ;;  %v8536_v49 = vpop.eup %8535  ;;  %v1781_v33 = vmul.f32 %v8534_v29, %v10264_v45  ;;  %v2635_v45 = vpack.c.b16 %v2630_v47, %v2629_v19  ;;  %v2570_v47 = vpack.c.bf16 %v2387_v41, %v2387_v41 }
 0x4f0   : > { %v1780_v24 = vmul.f32 %v8536_v49, %v10248_v17  ;;  %v2521_v35 = vpack.c.bf16 %v2233_v21, %v2233_v21 }
 0x4f1   : > { %v2391_v2 = vpop.f32.mrf.mxu1  ;;  %v1813_v18 = vpack.c.bf16 %v1781_v33, %v1781_v33 }
 0x4f2   : > { %v1812_v61 = vpack.c.bf16 %v1780_v24, %v1780_v24  ;;  %v10414_v48 = vpop.f32.mrf.mxu3  ;;  %v2719_v49 = vunpack.c.l.b16 %v2521_v35 }
 0x4f3   : > { %v2007_v52 = vunpack.c.l.b16 %v1813_v18  ;;  %13365 = vst [vmem:[#allocation15_spill] sm:$0xff] %v10414_v48 }
 0x4f4   : > { %v2235_v38 = vpop.f32.mrf.mxu0  ;;  %v2006_v14 = vunpack.c.l.b16 %v1812_v61 }
 0x4f5   : > { %v2236_v28 = vadd.f32 %v10344_v23, %v2235_v38 }
 0x4f6   : > { %7967 = vmatmul.msk.bf16.gmra.mxu3 %vm1072_vm1, %v2634_v57  ;;  %v2011_v17 = vpack.c.b16 %v2007_v52, %v2006_v14 }
 0x4f7   : > { %2873 = vmatpush.bf16.xpose.msra.mxu3 %v2859_v0  ;;  %7865 = vmatmul.msk.bf16.gmra.mxu2 %vm1437_vm2, %v2010_v36  ;;  %v2520_v0 = vpack.c.bf16 %v2231_v11, %v2231_v11  ;;  %v2392_v36 = vadd.f32 %v10157_v62, %v2391_v2  ;;  %v2389_v2 = vadd.f32 %v10157_v62, %v10388_v34 }
 0x4f8   : > { %v2384_v34 = vadd.f32 %v10157_v62, %v10362_v37  ;;  %v2522_v6 = vpack.c.bf16 %v2236_v28, %v2236_v28 }
 0x4f9   : > { %v2393_v51 = vpop.f32.mrf.mxu1  ;;  %v2718_v8 = vunpack.c.l.b16 %v2520_v0  ;;  %v2572_v33 = vpack.c.bf16 %v2392_v36, %v2392_v36 }
 0x4fa   : > { %v10425_v57 = vpop.f32.mrf.mxu3  ;;  %v2394_v29 = vadd.f32 %v10157_v62, %v2393_v51  ;;  %v2571_v51 = vpack.c.bf16 %v2389_v2, %v2389_v2  ;;  %v2569_v38 = vpack.c.bf16 %v2384_v34, %v2384_v34 }
 0x4fb   : > { %13366 = vst [vmem:[#allocation16_spill] sm:$0xff] %v10425_v57  ;;  %v2928_v18 = vunpack.c.l.b16 %v2572_v33 }
 0x4fc   : > { %v2237_v26 = vpop.f32.mrf.mxu0  ;;  %v2573_v24 = vpack.c.bf16 %v2394_v29, %v2394_v29  ;;  %v2927_v5 = vunpack.c.l.b16 %v2571_v51  ;;  %v2925_v4 = vunpack.c.l.b16 %v2569_v38 }
 0x4fd   : > { %v2238_v52 = vadd.f32 %v10344_v23, %v2237_v26  ;;  %v2720_v26 = vunpack.c.l.b16 %v2522_v6 }
 0x4fe   : > { %v2929_v61 = vunpack.c.l.b16 %v2573_v24 }
 0x4ff   : > { %2874 = vmatpush.bf16.xpose.msra.mxu3 %v2856_v16  ;;  %v2726_v16 = vpack.c.b16 %v2719_v49, %v2718_v8 }
 0x501   : > { %v2396_v40 = vpop.f32.mrf.mxu1 }
 0x502   : > { %v2397_v60 = vadd.f32 %v10157_v62, %v2396_v40  ;;  %v10431_v55 = vpop.f32.mrf.mxu3  ;;  %v2523_v40 = vpack.c.bf16 %v2238_v52, %v2238_v52 }
 0x503   : > { %13367 = vst [vmem:[#allocation17_spill] sm:$0xff] %v10431_v55 }
 0x504   : > { %v10416_v27 = vpop.f32.mrf.mxu0  ;;  %v2574_v58 = vpack.c.bf16 %v2397_v60, %v2397_v60  ;;  %v2721_v43 = vunpack.c.l.b16 %v2523_v40  ;;  %v2924_v60 = vunpack.c.l.b16 %v2568_v20  ;;  %v10480_v40 = vld [vmem:[%s13346_s7 + $0x40] sm:$0xff] }
 0x505   : > { %v2241_v11 = vadd.f32 %v10344_v23, %v10416_v27 }
 0x506   : > { %7968 = vmatmul.msk.bf16.gmra.mxu3 %vm1072_vm1, %v2635_v45  ;;  %v2930_v32 = vunpack.c.l.b16 %v2574_v58  ;;  %v2934_v45 = vpack.c.b16 %v2929_v61, %v2928_v18  ;;  %v2932_v58 = vpack.c.b16 %v2925_v4, %v2924_v60  ;;  %v8937_v60 = vld [vmem:[#allocation2] sm:$0xff] }
 0x507   : > { %7866 = vmatmul.msk.bf16.gmra.mxu2 %vm1437_vm2, %v2011_v17  ;;  %v2926_v17 = vunpack.c.l.b16 %v2570_v47  ;;  %v2524_v0 = vpack.c.bf16 %v2241_v11, %v2241_v11  ;;  %v8348_v11 = vld [vmem:[%s13342_s3 + $0x18] sm:$0xff] }
 0x508   : > { %v2955_v30 = vsel %vm1072_vm1, %v2934_v45, 0  ;;  %v2949_v35 = vsel %vm1072_vm1, %v2932_v58, 0  ;;  %2429 = vmatpush.bf16.msrb.mxu2 %v8348_v11 }
 0x509   : > { %v2398_v50 = vpop.f32.mrf.mxu1  ;;  %v2722_v29 = vunpack.c.l.b16 %v2524_v0 }
 0x50a   : > { %v2399_v1 = vadd.f32 %v10157_v62, %v2398_v50  ;;  %v10446_v44 = vpop.f32.mrf.mxu3  ;;  %v2933_v50 = vpack.c.b16 %v2927_v5, %v2926_v17 }
 0x50b   : > { %13368 = vst [vmem:[#allocation18_spill] sm:$0xff] %v10446_v44 }
 0x50c   : > { %v2575_v22 = vpack.c.bf16 %v2399_v1, %v2399_v1  ;;  %v2242_v42 = vpop.f32.mrf.mxu0  ;;  %v2727_v1 = vpack.c.b16 %v2721_v43, %v2720_v26  ;;  %v2952_v62 = vsel %vm1072_vm1, %v2933_v50, 0 }
 0x50d   : > { %v2243_v21 = vadd.f32 %v10344_v23, %v2242_v42 }
 0x50e   : > { %v2931_v46 = vunpack.c.l.b16 %v2575_v22 }
 0x50f   : > { %v2525_v36 = vpack.c.bf16 %v2243_v21, %v2243_v21 }
 0x510   : > { %v2935_v25 = vpack.c.b16 %v2931_v46, %v2930_v32 }
 0x511   : > { %v2723_v32 = vunpack.c.l.b16 %v2525_v36 }
 0x512   : > { %v2958_v19 = vsel %vm1072_vm1, %v2935_v25, 0  ;;  %v10450_v37 = vpop.f32.mrf.mxu3 }
 0x513   : > { %13369 = vst [vmem:[#allocation19_spill] sm:$0xff] %v10450_v37  ;;  %v2728_v49 = vpack.c.b16 %v2723_v32, %v2722_v29  ;;  %v8347_v32 = vld [vmem:[%s13342_s3 + $0x10] sm:$0xff] }
 0x514   : > { %v2245_v53 = vpop.f32.mrf.mxu0  ;;  %2430 = vmatpush.bf16.msrb.mxu2 %v8347_v32 }
 0x515   : > { %v2246_v33 = vadd.f32 %v10344_v23, %v2245_v53 }
 0x516   : > { %7969 = vmatmul.msk.bf16.gmra.mxu3 %vm1072_vm1, %v2636_v9 }
 0x517   : > { %v2526_v24 = vpack.c.bf16 %v2246_v33, %v2246_v33  ;;  %v10509_v33 = vld [vmem:[%s13346_s7 + $0x50] sm:$0xff] }
 0x519   : > { %v2724_v2 = vunpack.c.l.b16 %v2526_v24 }
 0x51a   : > { %v10456_v46 = vpop.f32.mrf.mxu3 }
 0x51b   : > { %13370 = vst [vmem:[#allocation20_spill] sm:$0xff] %v10456_v46 }
 0x51c   : > { %v2247_v14 = vpop.f32.mrf.mxu0 }
 0x51d   : > { %v2248_v27 = vadd.f32 %v10344_v23, %v2247_v14 }
 0x51f   : > { %v2527_v25 = vpack.c.bf16 %v2248_v27, %v2248_v27 }
 0x524   : > { %v2250_v9 = vpop.f32.mrf.mxu0 }
 0x525   : > { %v2251_v53 = vadd.f32 %v10344_v23, %v2250_v9 }
 0x526   : > { %7970 = vmatmul.msk.bf16.vlgmr.msrb.gmra.mxu3 %vm1072_vm1, %v2726_v16  ;;  %v2725_v16 = vunpack.c.l.b16 %v2527_v25 }
 0x527   : > { %2964 = vmatpush.bf16.xpose.msrb.mxu3 %v2958_v19  ;;  %v2528_v52 = vpack.c.bf16 %v2251_v53, %v2251_v53  ;;  %v8940_v53 = vld [vmem:[#allocation2 + $0x10] sm:$0xff] }
 0x528   : > { %v2729_v19 = vpack.c.b16 %v2725_v16, %v2724_v2 }
 0x529   : > { %v2811_v14 = vunpack.c.l.b16 %v2528_v52 }
 0x52c   : > { %v2252_v22 = vpop.f32.mrf.mxu0 }
 0x52d   : > { %v2253_v51 = vadd.f32 %v10344_v23, %v2252_v22 }
 0x52f   : > { %2965 = vmatpush.bf16.xpose.msrb.mxu3 %v2955_v30  ;;  %v2529_v45 = vpack.c.bf16 %v2253_v51, %v2253_v51 }
 0x531   : > { %v2812_v15 = vunpack.c.l.b16 %v2529_v45 }
 0x533   : > { %v2819_v6 = vpack.c.b16 %v2812_v15, %v2811_v14 }
 0x534   : > { %v2255_v8 = vpop.f32.mrf.mxu0 }
 0x535   : > { %v2256_v30 = vadd.f32 %v10344_v23, %v2255_v8 }
 0x536   : > { %7971 = vmatmul.msk.bf16.gmra.mxu3 %vm1072_vm1, %v2727_v1 }
 0x537   : > { %2966 = vmatpush.bf16.xpose.msrb.mxu3 %v2952_v62  ;;  %v2530_v50 = vpack.c.bf16 %v2256_v30, %v2256_v30  ;;  %v10492_v62 = vld [vmem:[%s13346_s7 + $0x48] sm:$0xff] }
 0x539   : > { %v2813_v21 = vunpack.c.l.b16 %v2530_v50  ;;  %v10534_v50 = vld [vmem:[%s13346_s7 + $0x60] sm:$0xff] }
 0x53c   : > { %v2257_v41 = vpop.f32.mrf.mxu0 }
 0x53d   : > { %v2258_v20 = vadd.f32 %v10344_v23, %v2257_v41  ;;  %v8939_v41 = vld [vmem:[%s9233_s13] sm:$0xff] }
 0x53e   : > { %7942 = vmatmul.msk.bf16.vlgmr.msrb.gmra.mxu2 %vm572_vm0, %v8939_v41 }
 0x53f   : > { %2967 = vmatpush.bf16.xpose.msrb.mxu3 %v2949_v35  ;;  %v2531_v9 = vpack.c.bf16 %v2258_v20, %v2258_v20  ;;  %v8938_v35 = vld [vmem:[#allocation2 + $0x8] sm:$0xff]  ;;  %v8941_v20 = vld [vmem:[#allocation2 + $0x18] sm:$0xff] }
 0x541   : > { %v2814_v58 = vunpack.c.l.b16 %v2531_v9 }
 0x543   : > { %v2820_v36 = vpack.c.b16 %v2814_v58, %v2813_v21  ;;  %v8942_v21 = vld [vmem:[%s9233_s13 + $0x8] sm:$0xff] }
 0x544   : > { %v2260_v47 = vpop.f32.mrf.mxu0 }
 0x545   : > { %v2261_v27 = vadd.f32 %v10344_v23, %v2260_v47  ;;  %v10523_v47 = vld [vmem:[%s13346_s7 + $0x58] sm:$0xff] }
 0x546   : > { %7972 = vmatmul.msk.bf16.gmra.mxu3 %vm1072_vm1, %v2728_v49 }
 0x547   : > { %v2532_v16 = vpack.c.bf16 %v2261_v27, %v2261_v27 }
 0x549   : > { %v10461_v42 = vpop.f32.mrf.mxu3  ;;  %v2815_v14 = vunpack.c.l.b16 %v2532_v16 }
 0x54a   : > { %13371 = vst [vmem:[#allocation21_spill] sm:$0xff] %v10461_v42 }
 0x54c   : > { %v2262_v17 = vpop.f32.mrf.mxu0 }
 0x54d   : > { %v2263_v24 = vadd.f32 %v10344_v23, %v2262_v17 }
 0x54e   : > { %7943 = vmatmul.msk.bf16.gmra.mxu2 %vm572_vm0, %v8942_v21 }
 0x551   : > { %v10463_v18 = vpop.f32.mrf.mxu3 }
 0x552   : > { %13372 = vst [vmem:[#allocation22_spill] sm:$0xff] %v10463_v18 }
 0x554   : > { %v2265_v43 = vpop.f32.mrf.mxu0 }
 0x555   : > { %v2266_v9 = vadd.f32 %v10344_v23, %v2265_v43  ;;  %v10548_v43 = vld [vmem:[%s13346_s7 + $0x68] sm:$0xff] }
 0x556   : > { %7973 = vmatmul.msk.bf16.gmra.mxu3 %vm1072_vm1, %v2729_v19  ;;  %v2533_v19 = vpack.c.bf16 %v2263_v24, %v2263_v24 }
 0x558   : > { %v2816_v15 = vunpack.c.l.b16 %v2533_v19 }
 0x559   : > { %v10470_v28 = vpop.f32.mrf.mxu3 }
 0x55a   : > { %13373 = vst [vmem:[#allocation23_spill] sm:$0xff] %v10470_v28  ;;  %v2821_v30 = vpack.c.b16 %v2816_v15, %v2815_v14 }
 0x55c   : > { %v2267_v8 = vpop.f32.mrf.mxu0 }
 0x561   : > { %v10472_v34 = vpop.f32.mrf.mxu3 }
 0x562   : > { %13374 = vst [vmem:[#allocation24_spill] sm:$0xff] %v10472_v34 }
 0x564   : > { %v2270_v45 = vpop.f32.mrf.mxu0 }
 0x566   : > { %7974 = vmatmul.msk.bf16.vlgmr.msra.gmra.mxu3 %vm1072_vm1, %v2819_v6 }
 0x569   : > { %v2690_v38 = vpop.f32.mrf.mxu3 }
 0x56a   : > { %v2691_v26 = vadd.f32 %v10480_v40, %v2690_v38 }
 0x56c   : > { %v10485_v4 = vadd.f32 %v8937_v60, %v2691_v26  ;;  %v2268_v60 = vadd.f32 %v10344_v23, %v2267_v8  ;;  %v2272_v11 = vpop.f32.mrf.mxu0 }
 0x56d   : > { %v2273_v14 = vadd.f32 %v10344_v23, %v2272_v11 }
 0x56e   : > { %v3021_v1 = vsel %vm1437_vm2, %v10485_v4, -inf }
 0x56f   : > { %3022 = vmax.xlane.f32.xlu1 %v3021_v1 }
 0x571   : > { %v2692_v22 = vpop.f32.mrf.mxu3 }
 0x572   : > { %v2693_v0 = vadd.f32 %v10492_v62, %v2692_v22  ;;  %v2534_v22 = vpack.c.bf16 %v2266_v9, %v2266_v9 }
 0x574   : > { %v10498_v29 = vadd.f32 %v8938_v35, %v2693_v0  ;;  %v2535_v0 = vpack.c.bf16 %v2268_v60, %v2268_v60  ;;  %v2817_v8 = vunpack.c.l.b16 %v2534_v22 }
 0x576   : > { %7975 = vmatmul.msk.bf16.gmra.mxu3 %vm1072_vm1, %v2820_v36  ;;  %v3024_v49 = vsel %vm1437_vm2, %v10498_v29, -inf  ;;  %v8943_v36 = vld [vmem:[#allocation2 + $0x20] sm:$0xff] }
 0x577   : > { %3025 = vmax.xlane.f32.xlu2 %v3024_v49  ;;  %v2818_v49 = vunpack.c.l.b16 %v2535_v0 }
 0x579   : > { %v2695_v25 = vpop.f32.mrf.mxu3  ;;  %v2822_v41 = vpack.c.b16 %v2818_v49, %v2817_v8 }
 0x57a   : > { %v2696_v2 = vadd.f32 %v10509_v33, %v2695_v25  ;;  %v2275_v25 = vpop.f32.mrf.mxu0 }
 0x57c   : > { %v10516_v51 = vadd.f32 %v8940_v53, %v2696_v2  ;;  %v8944_v2 = vld [vmem:[#allocation2 + $0x28] sm:$0xff]  ;;  %v10559_v53 = vld [vmem:[%s13346_s7 + $0x70] sm:$0xff] }
 0x57e   : > { %v3027_v52 = vsel %vm1437_vm2, %v10516_v51, -inf }
 0x57f   : > { %3028 = vmax.xlane.f32.xlu0 %v3027_v52  ;;  %v2271_v52 = vadd.f32 %v10344_v23, %v2270_v45  ;;  %v10573_v45 = vld [vmem:[%s13346_s7 + $0x78] sm:$0xff] }
 0x581   : > { %v2697_v17 = vpop.f32.mrf.mxu3 }
 0x582   : > { %v2698_v6 = vadd.f32 %v10523_v47, %v2697_v17  ;;  %v8945_v17 = vld [vmem:[%s9233_s13 + $0x10] sm:$0xff]  ;;  %v2277_v60 = vpop.f32.mrf.mxu0 }
 0x583   : > { %7944 = vmatmul.msk.bf16.gmra.mxu2 %vm572_vm0, %v8945_v17 }
 0x584   : > { %v10526_v38 = vadd.f32 %v8941_v20, %v2698_v6  ;;  %v2537_v20 = vpack.c.bf16 %v2273_v14, %v2273_v14  ;;  %v10587_v14 = vpop.f32.mrf.mxu2 }
 0x585   : > { %13375 = vst [vmem:[#allocation25_spill] sm:$0xff] %v10587_v14  ;;  %v8964_v14 = vld [vmem:[#allocation2 + $0xc8] sm:$0xff] }
 0x586   : > { %7976 = vmatmul.msk.bf16.gmra.mxu3 %vm1072_vm1, %v2821_v30  ;;  %v3030_v26 = vsel %vm1437_vm2, %v10526_v38, -inf  ;;  %v2536_v30 = vpack.c.bf16 %v2271_v52, %v2271_v52  ;;  %v2905_v21 = vunpack.c.l.b16 %v2537_v20 }
 0x587   : > { %3031 = vmax.xlane.f32.xlu1 %v3030_v26  ;;  %v8946_v26 = vld [vmem:[#allocation2 + $0x30] sm:$0xff] }
 0x588   : > { %v2904_v11 = vunpack.c.l.b16 %v2536_v30 }
 0x589   : > { %v2700_v1 = vpop.f32.mrf.mxu3 }
 0x58a   : > { %v2701_v58 = vadd.f32 %v10534_v50, %v2700_v1  ;;  %v2912_v0 = vpack.c.b16 %v2905_v21, %v2904_v11  ;;  %v2280_v49 = vpop.f32.mrf.mxu0 }
 0x58b   : > { %v2281_v11 = vadd.f32 %v10344_v23, %v2280_v49 }
 0x58c   : > { %v10541_v35 = vadd.f32 %v8943_v36, %v2701_v58  ;;  %v8947_v36 = vld [vmem:[#allocation2 + $0x38] sm:$0xff] }
 0x58e   : > { %v3033_v32 = vsel %vm1437_vm2, %v10541_v35, -inf }
 0x58f   : > { %3034 = vmax.xlane.f32.xlu2 %v3033_v32 }
 0x591   : > { %v2702_v27 = vpop.f32.mrf.mxu3 }
 0x592   : > { %v2703_v24 = vadd.f32 %v10548_v43, %v2702_v27  ;;  %v2276_v27 = vadd.f32 %v10344_v23, %v2275_v25  ;;  %v2282_v30 = vpop.f32.mrf.mxu0  ;;  %v8949_v25 = vld [vmem:[#allocation2 + $0x48] sm:$0xff] }
 0x593   : > { %v2283_v21 = vadd.f32 %v10344_v23, %v2282_v30 }
 0x594   : > { %v10551_v16 = vadd.f32 %v8944_v2, %v2703_v24  ;;  %v2278_v24 = vadd.f32 %v10344_v23, %v2277_v60  ;;  %v8948_v2 = vld [vmem:[%s9233_s13 + $0x18] sm:$0xff] }
 0x595   : > { %7945 = vmatmul.msk.bf16.gmra.mxu2 %vm572_vm0, %v8948_v2 }
 0x596   : > { %7977 = vmatmul.msk.bf16.gmra.mxu3 %vm1072_vm1, %v2822_v41  ;;  %v3036_v19 = vsel %vm1437_vm2, %v10551_v16, -inf  ;;  %v2539_v52 = vpack.c.bf16 %v2278_v24, %v2278_v24 }
 0x597   : > { %3037 = vmax.xlane.f32.xlu0 %v3036_v19  ;;  %v2538_v19 = vpack.c.bf16 %v2276_v27, %v2276_v27  ;;  %v2541_v27 = vpack.c.bf16 %v2283_v21, %v2283_v21 }
 0x598   : > { %v2907_v17 = vunpack.c.l.b16 %v2539_v52 }
 0x599   : > { %v2705_v15 = vpop.f32.mrf.mxu3  ;;  %v2909_v2 = vunpack.c.l.b16 %v2541_v27  ;;  %v8952_v27 = vld [vmem:[%s9233_s13 + $0x30] sm:$0xff] }
 0x59a   : > { %v2706_v6 = vadd.f32 %v10559_v53, %v2705_v15  ;;  %v2906_v15 = vunpack.c.l.b16 %v2538_v19 }
 0x59c   : > { %v10566_v9 = vadd.f32 %v8946_v26, %v2706_v6  ;;  %v2913_v26 = vpack.c.b16 %v2907_v17, %v2906_v15 }
 0x59e   : > { %v3039_v1 = vsel %vm1437_vm2, %v10566_v9, -inf }
 0x59f   : > { %3040 = vmax.xlane.f32.xlu1 %v3039_v1 }
 0x5a1   : > { %v2707_v58 = vpop.f32.mrf.mxu3 }
 0x5a2   : > { %v2708_v22 = vadd.f32 %v10573_v45, %v2707_v58 }
 0x5a4   : > { %v10576_v32 = vadd.f32 %v8947_v36, %v2708_v22  ;;  %v8950_v22 = vld [vmem:[%s9233_s13 + $0x20] sm:$0xff]  ;;  %v2285_v36 = vpop.f32.mrf.mxu0 }
 0x5a5   : > { %7946 = vmatmul.msk.bf16.gmra.mxu2 %vm572_vm0, %v8950_v22  ;;  %v2286_v17 = vadd.f32 %v10344_v23, %v2285_v36 }
 0x5a6   : > { %7978 = vmatmul.msk.bf16.vlgmr.msrb.gmra.mxu3 %vm1072_vm1, %v2912_v0  ;;  %v3042_v8 = vsel %vm1437_vm2, %v10576_v32, -inf  ;;  %v10601_v0 = vpop.f32.mrf.mxu2 }
 0x5a7   : > { %3043 = vmax.xlane.f32.xlu2 %v3042_v8  ;;  %13376 = vst [vmem:[#allocation26_spill] sm:$0xff] %v10601_v0  ;;  %v2540_v8 = vpack.c.bf16 %v2281_v11, %v2281_v11 }
 0x5a9   : > { %v10583_v41 = vpop.f32.mrf.mxu3  ;;  %v2908_v24 = vunpack.c.l.b16 %v2540_v8 }
 0x5ab   : > { %v2914_v52 = vpack.c.b16 %v2909_v2, %v2908_v24 }
 0x5ac   : > { %v2287_v49 = vpop.f32.mrf.mxu0 }
 0x5ae   : > { %v10605_v15 = vpop.f32.mrf.mxu2 }
 0x5af   : > { %13377 = vst [vmem:[#allocation27_spill] sm:$0xff] %v10605_v15 }
 0x5b1   : > { %v2785_v6 = vpop.f32.mrf.mxu3 }
 0x5b2   : > { %v2786_v20 = vadd.f32 %v10492_v62, %v2785_v6  ;;  %v2288_v6 = vadd.f32 %v10344_v23, %v2287_v49 }
 0x5b4   : > { %v10590_v1 = vadd.f32 %v8949_v25, %v2786_v20  ;;  %v8951_v20 = vld [vmem:[%s9233_s13 + $0x28] sm:$0xff]  ;;  %v2543_v25 = vpack.c.bf16 %v2288_v6, %v2288_v6 }
 0x5b5   : > { %7947 = vmatmul.msk.bf16.gmra.mxu2 %vm572_vm0, %v8951_v20  ;;  %v8953_v20 = vld [vmem:[%s9233_s13 + $0x38] sm:$0xff] }
 0x5b6   : > { %7979 = vmatmul.msk.bf16.gmra.mxu3 %vm1072_vm1, %v2913_v26  ;;  %v3048_v60 = vsel %vm1437_vm2, %v10590_v1, -inf  ;;  %v2542_v26 = vpack.c.bf16 %v2286_v17, %v2286_v17  ;;  %v2911_v21 = vunpack.c.l.b16 %v2543_v25 }
 0x5b7   : > { %3049 = vmax.xlane.f32.xlu2 %v3048_v60  ;;  %v10614_v60 = vpop.f32.mrf.mxu2 }
 0x5b8   : > { %13378 = vst [vmem:[#allocation28_spill] sm:$0xff] %v10614_v60  ;;  %v2910_v11 = vunpack.c.l.b16 %v2542_v26  ;;  %v8962_v60 = vld [vmem:[#allocation2 + $0xc0] sm:$0xff] }
 0x5b9   : > { %v10597_v58 = vpop.f32.mrf.mxu3 }
 0x5ba   : > { %v2915_v8 = vpack.c.b16 %v2911_v21, %v2910_v11 }
 0x5bf   : > { %v10619_v36 = vpop.f32.mrf.mxu2 }
 0x5c0   : > { %13379 = vst [vmem:[#allocation29_spill] sm:$0xff] %v10619_v36 }
 0x5c1   : > { %v10603_v19 = vpop.f32.mrf.mxu3 }
 0x5c5   : > { %7948 = vmatmul.msk.bf16.gmra.mxu2 %vm572_vm0, %v8952_v27 }
 0x5c6   : > { %7980 = vmatmul.msk.bf16.gmra.mxu3 %vm1072_vm1, %v2914_v52 }
 0x5c7   : > { %v10627_v52 = vpop.f32.mrf.mxu2 }
 0x5c8   : > { %13380 = vst [vmem:[#allocation30_spill] sm:$0xff] %v10627_v52 }
 0x5c9   : > { %v10610_v30 = vpop.f32.mrf.mxu3 }
 0x5cf   : > { %v10637_v21 = vpop.f32.mrf.mxu2 }
 0x5d0   : > { %13381 = vst [vmem:[#allocation31_spill] sm:$0xff] %v10637_v21 }
 0x5d1   : > { %v10616_v22 = vpop.f32.mrf.mxu3 }
 0x5d5   : > { %7949 = vmatmul.msk.bf16.gmra.mxu2 %vm572_vm0, %v8953_v20 }
 0x5d6   : > { %7981 = vmatmul.msk.bf16.gmra.mxu3 %vm1072_vm1, %v2915_v8 }
 0x5d9   : > { %v10621_v23 = vpop.f32.mrf.mxu3 }
 0x5e1   : > { %v10625_v24 = vpop.f32.mrf.mxu3 }
 0x5e2   : > { %v3023_v2 = vpop.xlane.xlu1 %3022 }
 0x5e3   : > { %v3117_v49 = vsub.f32 %v10485_v4, %v3023_v2 }
 0x5e5   : > { %v3149_v17 = vmul.f32 1.442695, %v3117_v49  ;;  %v2784_v49 = vadd.f32 %v10480_v40, %v10583_v41 }
 0x5e7   : > { %8537 = vpow2.f32 %v3149_v17  ;;  %v10649_v17 = vpop.f32.mrf.mxu2 }
 0x5e8   : > { %13382 = vst [vmem:[#allocation32_spill] sm:$0xff] %v10649_v17 }
 0x5e9   : > { %v10630_v6 = vpop.f32.mrf.mxu3 }
 0x5ea   : > { %v3026_v26 = vpop.xlane.xlu2 %3025 }
 0x5eb   : > { %v3118_v25 = vsub.f32 %v10498_v29, %v3026_v26  ;;  %v8954_v26 = vld [vmem:[%s9233_s13 + $0x40] sm:$0xff] }
 0x5ec   : > { %7950 = vmatmul.msk.bf16.gmra.mxu2 %vm572_vm0, %v8954_v26  ;;  %v2789_v26 = vadd.f32 %v10509_v33, %v10597_v58 }
 0x5ed   : > { %v10635_v11 = vpop.eup %8537  ;;  %v3151_v8 = vmul.f32 1.442695, %v3118_v25 }
 0x5ee   : > { %v3213_v27 = vsel %vm1437_vm2, %v10635_v11, 0.0 }
 0x5ef   : > { %8539 = vpow2.f32 %v3151_v8  ;;  %3214 = vadd.xlane.f32.xlu0 %v3213_v27  ;;  %v8955_v8 = vld [vmem:[#allocation2 + $0x40] sm:$0xff]  ;;  %v10660_v28 = vpop.f32.mrf.mxu2 }
 0x5f0   : > { %v10655_v27 = vadd.f32 %v8955_v8, %v2784_v49  ;;  %v8957_v8 = vld [vmem:[#allocation2 + $0x50] sm:$0xff] }
 0x5f1   : > { %v10641_v4 = vpop.f32.mrf.mxu3 }
 0x5f2   : > { %v3045_v41 = vsel %vm1437_vm2, %v10655_v27, -inf  ;;  %v3029_v34 = vpop.xlane.xlu0 %3028 }
 0x5f3   : > { %v3119_v0 = vsub.f32 %v10516_v51, %v3029_v34  ;;  %v8963_v51 = vld [vmem:[#allocation2 + $0x58] sm:$0xff] }
 0x5f5   : > { %v10643_v2 = vpop.eup %8539 }
 0x5f6   : > { %v3216_v29 = vsel %vm1437_vm2, %v10643_v2, 0.0 }
 0x5f7   : > { %3217 = vadd.xlane.f32.xlu1 %v3216_v29 }
 0x5f9   : > { %v10651_v20 = vpop.f32.mrf.mxu3 }
 0x5fa   : > { %v3032_v25 = vpop.xlane.xlu1 %3031 }
 0x5fb   : > { %v3120_v5 = vsub.f32 %v10526_v38, %v3032_v25 }
 0x5fd   : > { %v3155_v61 = vmul.f32 1.442695, %v3120_v5  ;;  %v10670_v5 = vpop.f32.mrf.mxu2 }
 0x5ff   : > { %8541 = vpow2.f32 %v3155_v61  ;;  %3046 = vmax.xlane.f32.xlu1 %v3045_v41  ;;  %v8956_v61 = vld [vmem:[%s9233_s13 + $0x48] sm:$0xff]  ;;  %v10676_v41 = vadd.f32 %v8957_v8, %v2789_v26  ;;  %v2794_v26 = vadd.f32 %v10534_v50, %v10610_v30 }
 0x600   : > { %7951 = vmatmul.msk.bf16.gmra.mxu2 %vm572_vm0, %v8956_v61 }
 0x601   : > { %v10662_v29 = vpop.f32.mrf.mxu3  ;;  %v3051_v58 = vsel %vm1437_vm2, %v10676_v41, -inf }
 0x602   : > { %v10685_v44 = vpop.xlane.xlu2 %3034 }
 0x605   : > { %v10664_v42 = vpop.eup %8541 }
 0x606   : > { %v3222_v49 = vsel %vm1437_vm2, %v10664_v42, 0.0 }
 0x607   : > { %3223 = vadd.xlane.f32.xlu1 %v3222_v49  ;;  %v10681_v49 = vpop.f32.mrf.mxu2 }
 0x609   : > { %v10672_v38 = vpop.f32.mrf.mxu3 }
 0x60a   : > { %v3038_v25 = vpop.xlane.xlu0 %3037 }
 0x60b   : > { %v3122_v18 = vsub.f32 %v10551_v16, %v3038_v25 }
 0x60d   : > { %v3159_v46 = vmul.f32 1.442695, %v3122_v18 }
 0x60f   : > { %8543 = vpow2.f32 %v3159_v46  ;;  %3052 = vmax.xlane.f32.xlu1 %v3051_v58  ;;  %v10693_v18 = vpop.f32.mrf.mxu2  ;;  %v8958_v46 = vld [vmem:[%s9233_s13 + $0x50] sm:$0xff]  ;;  %v8959_v58 = vld [vmem:[#allocation2 + $0x60] sm:$0xff] }
 0x610   : > { %7952 = vmatmul.msk.bf16.gmra.mxu2 %vm572_vm0, %v8958_v46  ;;  %v10699_v55 = vadd.f32 %v8959_v58, %v2794_v26  ;;  %v2801_v46 = vadd.f32 %v10573_v45, %v10625_v24  ;;  %v2791_v24 = vadd.f32 %v10523_v47, %v10603_v19 }
 0x611   : > { %v10683_v37 = vpop.f32.mrf.mxu3 }
 0x612   : > { %v3057_v30 = vsel %vm1437_vm2, %v10699_v55, -inf  ;;  %v10732_v19 = vadd.f32 %v8963_v51, %v2791_v24  ;;  %v8965_v51 = vld [vmem:[%s9233_s13 + $0x60] sm:$0xff] }
 0x615   : > { %v10687_v61 = vpop.eup %8543 }
 0x616   : > { %v3228_v16 = vsel %vm1437_vm2, %v10687_v61, 0.0 }
 0x617   : > { %3229 = vadd.xlane.f32.xlu1 %v3228_v16  ;;  %v2442_v16 = vpop.f32.mrf.mxu2 }
 0x619   : > { %v10695_v25 = vpop.f32.mrf.mxu3 }
 0x61a   : > { %v3044_v8 = vpop.xlane.xlu2 %3043 }
 0x61b   : > { %v3124_v17 = vsub.f32 %v10576_v32, %v3044_v8  ;;  %v8961_v8 = vld [vmem:[#allocation2 + $0x78] sm:$0xff] }
 0x61d   : > { %v3163_v21 = vmul.f32 1.442695, %v3124_v17  ;;  %v8960_v17 = vld [vmem:[%s9233_s13 + $0x58] sm:$0xff] }
 0x61f   : > { %8545 = vpow2.f32 %v3163_v21  ;;  %3058 = vmax.xlane.f32.xlu1 %v3057_v30  ;;  %v2444_v58 = vpop.f32.mrf.mxu2  ;;  %v10715_v30 = vadd.f32 %v8961_v8, %v2801_v46 }
 0x620   : > { %7953 = vmatmul.msk.bf16.gmra.mxu2 %vm572_vm0, %v8960_v17 }
 0x621   : > { %v10704_v52 = vpop.f32.mrf.mxu3  ;;  %v3066_v46 = vsel %vm1437_vm2, %v10715_v30, -inf }
 0x625   : > { %v10706_v36 = vpop.eup %8545 }
 0x626   : > { %v3234_v26 = vsel %vm1437_vm2, %v10706_v36, 0.0 }
 0x627   : > { %3235 = vadd.xlane.f32.xlu1 %v3234_v26  ;;  %v10725_v26 = vld [vmem:[%s13345_s6 + $0x1] ss:$0 sm:$0xff] }
 0x628   : > { %v2443_v48 = vadd.f32 %v10725_v26, %v2442_v16  ;;  %v2445_v31 = vadd.f32 %v10725_v26, %v2444_v58 }
 0x629   : > { %v2969_v32 = vpop.f32.mrf.mxu3 }
 0x62a   : > { %v2970_v21 = vadd.f32 %v10480_v40, %v2969_v32  ;;  %v3153_v32 = vmul.f32 1.442695, %v3119_v0  ;;  %v3054_v0 = vsel %vm1437_vm2, %v10732_v19, -inf }
 0x62c   : > { %v10717_v15 = vadd.f32 %v8962_v60, %v2970_v21  ;;  %v2447_v60 = vpop.f32.mrf.mxu2  ;;  %8547 = vpow2.f32 %v3153_v32 }
 0x62d   : > { %v2448_v8 = vadd.f32 %v10725_v26, %v2447_v60  ;;  %v2580_v60 = vpack.c.bf16 %v2443_v48, %v2443_v48  ;;  %v3121_v48 = vsub.f32 %v10541_v35, %v10685_v44  ;;  %v2435_v35 = vadd.f32 %v10725_v26, %v10670_v5 }
 0x62e   : > { %v3093_v17 = vsel %vm1437_vm2, %v10717_v15, -inf }
 0x62f   : > { %3094 = vmax.xlane.f32.xlu2 %v3093_v17  ;;  %3067 = vmax.xlane.f32.xlu1 %v3066_v46  ;;  %v2582_v46 = vpack.c.bf16 %v2448_v8, %v2448_v8  ;;  %v3437_v12 = vunpack.c.l.b16 %v2580_v60 }
 0x630   : > { %7954 = vmatmul.msk.bf16.gmra.mxu2 %vm572_vm0, %v8965_v51  ;;  %v8967_v51 = vld [vmem:[#allocation2 + $0x68] sm:$0xff] }
 0x631   : > { %v2971_v21 = vpop.f32.mrf.mxu3  ;;  %v3439_v58 = vunpack.c.l.b16 %v2582_v46 }
 0x632   : > { %v2972_v34 = vadd.f32 %v10492_v62, %v2971_v21  ;;  %v2581_v21 = vpack.c.bf16 %v2445_v31, %v2445_v31  ;;  %v10747_v56 = vpop.eup %8547  ;;  %v2796_v31 = vadd.f32 %v10548_v43, %v10616_v22  ;;  %v2433_v22 = vadd.f32 %v10725_v26, %v10660_v28 }
 0x633   : > { %v3219_v46 = vsel %vm1437_vm2, %v10747_v56, 0.0 }
 0x634   : > { %v10735_v57 = vadd.f32 %v8964_v14, %v2972_v34  ;;  %v2449_v24 = vpop.f32.mrf.mxu2  ;;  %v10763_v44 = vadd.f32 %v8967_v51, %v2796_v31  ;;  %v2576_v28 = vpack.c.bf16 %v2433_v22, %v2433_v22  ;;  %v2577_v31 = vpack.c.bf16 %v2435_v35, %v2435_v35 }
 0x635   : > { %v2450_v14 = vadd.f32 %v10725_v26, %v2449_v24 }
 0x636   : > { %v3096_v17 = vsel %vm1437_vm2, %v10735_v57, -inf }
 0x637   : > { %3055 = vmax.xlane.f32.xlu2 %v3054_v0  ;;  %3097 = vmax.xlane.f32.xlu0 %v3096_v17  ;;  %v2583_v32 = vpack.c.bf16 %v2450_v14, %v2450_v14  ;;  %v3438_v0 = vunpack.c.l.b16 %v2581_v21  ;;  %v3157_v21 = vmul.f32 1.442695, %v3121_v48 }
 0x639   : > { %v2974_v34 = vpop.f32.mrf.mxu3  ;;  %v3440_v17 = vunpack.c.l.b16 %v2583_v32  ;;  %8549 = vpow2.f32 %v3157_v21  ;;  %v3434_v21 = vunpack.c.l.b16 %v2577_v31 }
 0x63a   : > { %v2975_v16 = vadd.f32 %v10509_v33, %v2974_v34 }
 0x63b   : > { %v3444_v14 = vpack.c.b16 %v3440_v17, %v3439_v58  ;;  %v2440_v58 = vadd.f32 %v10725_v26, %v10693_v18  ;;  %v3060_v17 = vsel %vm1437_vm2, %v10763_v44, -inf }
 0x63c   : > { %v10749_v8 = vadd.f32 %v8966_v3, %v2975_v16  ;;  %v10759_v60 = vpop.f32.mrf.mxu2  ;;  %v3443_v3 = vpack.c.b16 %v3438_v0, %v3437_v12  ;;  %v2438_v16 = vadd.f32 %v10725_v26, %v10681_v49  ;;  %v8968_v12 = vld [vmem:[#allocation2 + $0xd8] sm:$0xff] }
 0x63d   : > { %3465 = vmatpush.bf16.msrb.mxu0 %v3444_v14  ;;  %v2579_v48 = vpack.c.bf16 %v2440_v58, %v2440_v58  ;;  %v8969_v14 = vld [vmem:[%s9233_s13 + $0x68] sm:$0xff] }
 0x63e   : > { %v3099_v24 = vsel %vm1437_vm2, %v10749_v8, -inf  ;;  %v2578_v5 = vpack.c.bf16 %v2438_v16, %v2438_v16  ;;  %v8970_v16 = vld [vmem:[#allocation2 + $0xe0] sm:$0xff] }
 0x63f   : > { %3100 = vmax.xlane.f32.xlu2 %v3099_v24  ;;  %3220 = vadd.xlane.f32.xlu0 %v3219_v46  ;;  %v3433_v24 = vunpack.c.l.b16 %v2576_v28  ;;  %v10783_v35 = vpop.eup %8549 }
 0x640   : > { %7955 = vmatmul.msk.bf16.gmra.mxu2 %vm572_vm0, %v8969_v14  ;;  %v3435_v22 = vunpack.c.l.b16 %v2578_v5  ;;  %v3225_v28 = vsel %vm1437_vm2, %v10783_v35, 0.0  ;;  %v8971_v14 = vld [vmem:[#allocation2 + $0xe8] sm:$0xff] }
 0x641   : > { %v2976_v34 = vpop.f32.mrf.mxu3  ;;  %3466 = vmatpush.bf16.msrb.mxu0 %v3443_v3  ;;  %v3041_v3 = vpop.xlane.xlu1 %3040 }
 0x642   : > { %v2977_v32 = vadd.f32 %v10523_v47, %v2976_v34  ;;  %v3436_v34 = vunpack.c.l.b16 %v2579_v48 }
 0x644   : > { %v10772_v0 = vadd.f32 %v8968_v12, %v2977_v32  ;;  %v10778_v18 = vpop.f32.mrf.mxu2  ;;  %v3123_v32 = vsub.f32 %v10566_v9, %v3041_v3 }
 0x646   : > { %v3102_v49 = vsel %vm1437_vm2, %v10772_v0, -inf  ;;  %v3161_v5 = vmul.f32 1.442695, %v3123_v32 }
 0x647   : > { %3061 = vmax.xlane.f32.xlu2 %v3060_v17  ;;  %3103 = vmax.xlane.f32.xlu0 %v3102_v49  ;;  %v3442_v17 = vpack.c.b16 %v3436_v34, %v3435_v22  ;;  %v3441_v49 = vpack.c.b16 %v3434_v21, %v3433_v24  ;;  %v8972_v22 = vld [vmem:[%s9233_s13 + $0x70] sm:$0xff] }
 0x648   : > { %8551 = vpow2.f32 %v3161_v5 }
 0x649   : > { %v2979_v46 = vpop.f32.mrf.mxu3  ;;  %3467 = vmatpush.bf16.msrb.mxu0 %v3442_v17 }
 0x64a   : > { %v2980_v51 = vadd.f32 %v10534_v50, %v2979_v46 }
 0x64c   : > { %v10785_v58 = vadd.f32 %v8970_v16, %v2980_v51  ;;  %v10792_v31 = vpop.f32.mrf.mxu2  ;;  %v8973_v16 = vld [vmem:[#allocation2 + $0xf0] sm:$0xff] }
 0x64d   : > { %3468 = vmatpush.bf16.msrb.mxu0 %v3441_v49  ;;  %v3050_v49 = vpop.xlane.xlu2 %3049 }
 0x64e   : > { %v3105_v12 = vsel %vm1437_vm2, %v10785_v58, -inf  ;;  %v10802_v51 = vpop.eup %8551 }
 0x64f   : > { %3106 = vmax.xlane.f32.xlu2 %v3105_v12  ;;  %3226 = vadd.xlane.f32.xlu0 %v3225_v28  ;;  %v3231_v12 = vsel %vm1437_vm2, %v10802_v51, 0.0 }
 0x650   : > { %7956 = vmatmul.msk.bf16.gmra.mxu2 %vm572_vm0, %v8972_v22 }
 0x651   : > { %v2981_v48 = vpop.f32.mrf.mxu3 }
 0x652   : > { %v2982_v46 = vadd.f32 %v10548_v43, %v2981_v48 }
 0x654   : > { %v10795_v9 = vadd.f32 %v8971_v14, %v2982_v46  ;;  %v2459_v24 = vpop.f32.mrf.mxu2  ;;  %v8974_v46 = vld [vmem:[#allocation2 + $0xf8] sm:$0xff] }
 0x656   : > { %v3108_v3 = vsel %vm1437_vm2, %v10795_v9, -inf }
 0x657   : > { %3109 = vmax.xlane.f32.xlu0 %v3108_v3  ;;  %v3126_v3 = vsub.f32 %v10590_v1, %v3050_v49 }
 0x659   : > { %v2984_v21 = vpop.f32.mrf.mxu3 }
 0x65a   : > { %v2985_v34 = vadd.f32 %v10559_v53, %v2984_v21  ;;  %v2799_v21 = vadd.f32 %v10559_v53, %v10621_v23 }
 0x65c   : > { %v10804_v43 = vadd.f32 %v8973_v16, %v2985_v34  ;;  %v2462_v28 = vpop.f32.mrf.mxu2  ;;  %v3167_v16 = vmul.f32 1.442695, %v3126_v3 }
 0x65e   : > { %v3111_v32 = vsel %vm1437_vm2, %v10804_v43, -inf }
 0x65f   : > { %3112 = vmax.xlane.f32.xlu2 %v3111_v32  ;;  %3232 = vadd.xlane.f32.xlu0 %v3231_v12  ;;  %v8975_v32 = vld [vmem:[%s9233_s13 + $0x78] sm:$0xff]  ;;  %v8976_v12 = vld [vmem:[#allocation2 + $0x70] sm:$0xff] }
 0x660   : > { %7957 = vmatmul.msk.bf16.gmra.mxu2 %vm572_vm0, %v8975_v32 }
 0x661   : > { %v2986_v17 = vpop.f32.mrf.mxu3 }
 0x662   : > { %v2987_v5 = vadd.f32 %v10573_v45, %v2986_v17  ;;  %v3215_v48 = vpop.xlane.xlu0 %3214  ;;  %v10820_v17 = vadd.f32 %v8976_v12, %v2799_v21 }
 0x663   : > { %8553 = vrcp.f32 %v3215_v48 }
 0x664   : > { %v10811_v14 = vadd.f32 %v8974_v46, %v2987_v5  ;;  %v2464_v34 = vpop.f32.mrf.mxu2  ;;  %v3063_v53 = vsel %vm1437_vm2, %v10820_v17, -inf }
 0x666   : > { %v3114_v22 = vsel %vm1437_vm2, %v10811_v14, -inf }
 0x667   : > { %3115 = vmax.xlane.f32.xlu0 %v3114_v22 }
 0x669   : > { %v8554_v5 = vpop.eup %8553 }
 0x66a   : > { %v3218_v45 = vpop.xlane.xlu1 %3217  ;;  %v3341_v1 = vmul.f32 %v8554_v5, %v10635_v11  ;;  %v2463_v5 = vadd.f32 %v10725_v26, %v2462_v28  ;;  %v2453_v28 = vadd.f32 %v10725_v26, %v10759_v60 }
 0x66b   : > { %8555 = vrcp.f32 %v3218_v45 }
 0x66c   : > { %8557 = vpow2.f32 %v3167_v16  ;;  %v2467_v23 = vpop.f32.mrf.mxu2  ;;  %v3373_v48 = vpack.c.bf16 %v3341_v1, %v3341_v1 }
 0x66d   : > { %v2468_v22 = vadd.f32 %v10725_v26, %v2467_v23 }
 0x66e   : > { %v3413_v32 = vunpack.c.l.b16 %v3373_v48  ;;  %v2458_v48 = vadd.f32 %v10725_v26, %v10792_v31  ;;  %v2584_v31 = vpack.c.bf16 %v2453_v28, %v2453_v28 }
 0x66f   : > { %3064 = vmax.xlane.f32.xlu0 %v3063_v53  ;;  %v2590_v11 = vpack.c.bf16 %v2468_v22, %v2468_v22  ;;  %v2465_v53 = vadd.f32 %v10725_v26, %v2464_v34  ;;  %v2455_v34 = vadd.f32 %v10725_v26, %v10778_v18 }
 0x671   : > { %v8556_v49 = vpop.eup %8555  ;;  %v2585_v39 = vpack.c.bf16 %v2455_v34, %v2455_v34 }
 0x672   : > { %v3342_v46 = vmul.f32 %v8556_v49, %v10643_v2  ;;  %v10826_v3 = vpop.eup %8557  ;;  %v3524_v49 = vunpack.c.l.b16 %v2590_v11 }
 0x673   : > { %v3240_v16 = vsel %vm1437_vm2, %v10826_v3, 0.0  ;;  %v3519_v63 = vunpack.c.l.b16 %v2585_v39 }
 0x674   : > { %v3374_v21 = vpack.c.bf16 %v3342_v46, %v3342_v46  ;;  %v2469_v1 = vpop.f32.mrf.mxu2  ;;  %v2460_v46 = vadd.f32 %v10725_v26, %v2459_v24 }
 0x675   : > { %v2470_v2 = vadd.f32 %v10725_v26, %v2469_v1 }
 0x676   : > { %v3414_v12 = vunpack.c.l.b16 %v3374_v21  ;;  %v2588_v21 = vpack.c.bf16 %v2463_v5, %v2463_v5  ;;  %v2587_v1 = vpack.c.bf16 %v2460_v46, %v2460_v46 }
 0x677   : > { %3241 = vadd.xlane.f32.xlu0 %v3240_v16  ;;  %v2591_v23 = vpack.c.bf16 %v2470_v2, %v2470_v2  ;;  %v2589_v16 = vpack.c.bf16 %v2465_v53, %v2465_v53 }
 0x678   : > { %v3421_v45 = vpack.c.b16 %v3414_v12, %v3413_v32  ;;  %v2586_v12 = vpack.c.bf16 %v2458_v48, %v2458_v48  ;;  %v3521_v5 = vunpack.c.l.b16 %v2587_v1  ;;  %v3047_v48 = vpop.xlane.xlu1 %3046 }
 0x679   : > { %v3525_v22 = vunpack.c.l.b16 %v2591_v23  ;;  %v3523_v11 = vunpack.c.l.b16 %v2589_v16  ;;  %v3518_v23 = vunpack.c.l.b16 %v2584_v31  ;;  %v3125_v31 = vsub.f32 %v10655_v27, %v3047_v48 }
 0x67a   : > { %7982 = vmatmul.msk.bf16.vlgmr.msrb.gmra.mxu0 %vm1437_vm2, %v3421_v45  ;;  %v3522_v45 = vunpack.c.l.b16 %v2588_v21  ;;  %v3520_v24 = vunpack.c.l.b16 %v2586_v12 }
 0x67b   : > { %v3529_v32 = vpack.c.b16 %v3525_v22, %v3524_v49  ;;  %v3526_v18 = vpack.c.b16 %v3519_v63, %v3518_v23 }
 0x67c   : > { %v10842_v2 = vpop.f32.mrf.mxu2  ;;  %v3528_v53 = vpack.c.b16 %v3523_v11, %v3522_v45  ;;  %v3527_v10 = vpack.c.b16 %v3521_v5, %v3520_v24  ;;  %v2877_v11 = vadd.f32 %v10480_v40, %v10630_v6  ;;  %v3165_v5 = vmul.f32 1.442695, %v3125_v31 }
 0x67d   : > { %3550 = vmatpush.bf16.msra.mxu1 %v3529_v32 }
 0x680   : > { %v3224_v21 = vpop.xlane.xlu1 %3223 }
 0x681   : > { %3551 = vmatpush.bf16.msra.mxu1 %v3528_v53 }
 0x684   : > { %v10844_v60 = vpop.f32.mrf.mxu2 }
 0x685   : > { %3552 = vmatpush.bf16.msra.mxu1 %v3527_v10 }
 0x688   : > { %v10847_v12 = vpop.xlane.xlu1 %3052 }
 0x689   : > { %3553 = vmatpush.bf16.msra.mxu1 %v3526_v18  ;;  %v8977_v18 = vld [vmem:[#allocation2 + $0x80] sm:$0xff] }
 0x68c   : > { %v2477_v49 = vpop.f32.mrf.mxu2 }
 0x694   : > { %v2479_v46 = vpop.f32.mrf.mxu2 }
 0x69c   : > { %v2482_v16 = vpop.f32.mrf.mxu2 }
 0x69d   : > { %v2483_v6 = vadd.f32 %v10725_v26, %v2482_v16 }
 0x69f   : > { %v2596_v16 = vpack.c.bf16 %v2483_v6, %v2483_v6 }
 0x6a2   : > { %v3095_v22 = vpop.xlane.xlu2 %3094 }
 0x6a3   : > { %v3141_v28 = vsub.f32 %v10717_v15, %v3095_v22 }
 0x6a4   : > { %v2484_v32 = vpop.f32.mrf.mxu2 }
 0x6a5   : > { %v3197_v34 = vmul.f32 1.442695, %v3141_v28 }
 0x6a7   : > { %8559 = vpow2.f32 %v3197_v34  ;;  %v2485_v34 = vadd.f32 %v10725_v26, %v2484_v32  ;;  %v2879_v32 = vadd.f32 %v10492_v62, %v10641_v4 }
 0x6a8   : > { %8561 = vrcp.f32 %v3224_v21  ;;  %v3230_v21 = vpop.xlane.xlu1 %3229 }
 0x6aa   : > { %v3056_v39 = vpop.xlane.xlu2 %3055  ;;  %v3098_v1 = vpop.xlane.xlu0 %3097 }
 0x6ab   : > { %v3142_v45 = vsub.f32 %v10735_v57, %v3098_v1  ;;  %v10857_v57 = vadd.f32 %v8977_v18, %v2877_v11  ;;  %v3128_v27 = vsub.f32 %v10732_v19, %v3056_v39 }
 0x6ac   : > { %v2487_v24 = vpop.f32.mrf.mxu2 }
 0x6ad   : > { %v10850_v10 = vpop.eup %8559  ;;  %v3199_v63 = vmul.f32 1.442695, %v3142_v45  ;;  %v2488_v40 = vadd.f32 %v10725_v26, %v2487_v24  ;;  %v3171_v31 = vmul.f32 1.442695, %v3128_v27  ;;  %v2475_v27 = vadd.f32 %v10725_v26, %v10844_v60 }
 0x6ae   : > { %v3285_v15 = vsel %vm1437_vm2, %v10850_v10, 0.0  ;;  %v8562_v22 = vpop.eup %8561 }
 0x6af   : > { %3286 = vadd.xlane.f32.xlu1 %v3285_v15  ;;  %8563 = vpow2.f32 %v3199_v63  ;;  %v3344_v45 = vmul.f32 %v8562_v22, %v10664_v42  ;;  %v3069_v63 = vsel %vm1437_vm2, %v10857_v57, -inf  ;;  %v2598_v11 = vpack.c.bf16 %v2488_v40, %v2488_v40 }
 0x6b0   : > { %v2597_v15 = vpack.c.bf16 %v2485_v34, %v2485_v34 }
 0x6b1   : > { %v3376_v24 = vpack.c.bf16 %v3344_v45, %v3344_v45  ;;  %v3609_v62 = vunpack.c.l.b16 %v2598_v11 }
 0x6b2   : > { %v3101_v53 = vpop.xlane.xlu2 %3100  ;;  %v3221_v23 = vpop.xlane.xlu0 %3220  ;;  %v3608_v45 = vunpack.c.l.b16 %v2597_v15 }
 0x6b3   : > { %v3143_v28 = vsub.f32 %v10749_v8, %v3101_v53  ;;  %8565 = vrcp.f32 %v3221_v23  ;;  %v2478_v53 = vadd.f32 %v10725_v26, %v2477_v49 }
 0x6b4   : > { %8567 = vpow2.f32 %v3165_v5  ;;  %v2489_v19 = vpop.f32.mrf.mxu2  ;;  %v2473_v5 = vadd.f32 %v10725_v26, %v10842_v2 }
 0x6b5   : > { %v3201_v48 = vmul.f32 1.442695, %v3143_v28  ;;  %v10864_v1 = vpop.eup %8563  ;;  %v2490_v42 = vadd.f32 %v10725_v26, %v2489_v19  ;;  %v2480_v28 = vadd.f32 %v10725_v26, %v2479_v46  ;;  %v2594_v11 = vpack.c.bf16 %v2478_v53, %v2478_v53  ;;  %v8978_v53 = vld [vmem:[#allocation2 + $0x88] sm:$0xff] }
 0x6b6   : > { %v3288_v8 = vsel %vm1437_vm2, %v10864_v1, 0.0  ;;  %v2592_v15 = vpack.c.bf16 %v2473_v5, %v2473_v5 }
 0x6b7   : > { %8569 = vpow2.f32 %v3201_v48  ;;  %3070 = vmax.xlane.f32.xlu1 %v3069_v63  ;;  %3289 = vadd.xlane.f32.xlu2 %v3288_v8  ;;  %v2599_v4 = vpack.c.bf16 %v2490_v42, %v2490_v42  ;;  %v3607_v48 = vunpack.c.l.b16 %v2596_v16  ;;  %v3416_v8 = vunpack.c.l.b16 %v3376_v24 }
 0x6b8   : > { %8571 = vrcp.f32 %v3230_v21  ;;  %v2595_v60 = vpack.c.bf16 %v2480_v28, %v2480_v28  ;;  %v2593_v42 = vpack.c.bf16 %v2475_v27, %v2475_v27  ;;  %v10899_v28 = vadd.f32 %v8978_v53, %v2879_v32 }
 0x6b9   : > { %v8566_v39 = vpop.eup %8565  ;;  %8573 = vpow2.f32 %v3171_v31  ;;  %v3610_v46 = vunpack.c.l.b16 %v2599_v4  ;;  %v3603_v5 = vunpack.c.l.b16 %v2592_v15 }
 0x6ba   : > { %v3343_v23 = vmul.f32 %v8566_v39, %v10747_v56  ;;  %v10878_v18 = vpop.xlane.xlu2 %3061  ;;  %v3104_v22 = vpop.xlane.xlu0 %3103  ;;  %v3606_v4 = vunpack.c.l.b16 %v2595_v60  ;;  %v3604_v27 = vunpack.c.l.b16 %v2593_v42 }
 0x6bb   : > { %v3144_v40 = vsub.f32 %v10772_v0, %v3104_v22  ;;  %v10882_v6 = vpop.eup %8567  ;;  %v10888_v56 = vpop.xlane.xlu1 %3058  ;;  %v3127_v0 = vsub.f32 %v10676_v41, %v10847_v12  ;;  %v3614_v19 = vpack.c.b16 %v3610_v46, %v3609_v62  ;;  %v3613_v41 = vpack.c.b16 %v3608_v45, %v3607_v48 }
 0x6bc   : > { %v3375_v2 = vpack.c.bf16 %v3343_v23, %v3343_v23  ;;  %v3237_v16 = vsel %vm1437_vm2, %v10882_v6, 0.0  ;;  %v10896_v31 = vpop.f32.mrf.mxu2  ;;  %v3605_v62 = vunpack.c.l.b16 %v2594_v11  ;;  %v3130_v48 = vsub.f32 %v10763_v44, %v10878_v18 }
 0x6bd   : > { %v10886_v49 = vpop.eup %8569  ;;  %v3203_v34 = vmul.f32 1.442695, %v3144_v40  ;;  %3635 = vmatpush.bf16.msra.mxu2 %v3614_v19  ;;  %v3169_v23 = vmul.f32 1.442695, %v3127_v0  ;;  %v3072_v0 = vsel %vm1437_vm2, %v10899_v28, -inf  ;;  %v3611_v11 = vpack.c.b16 %v3604_v27, %v3603_v5 }
 0x6be   : > { %v3291_v63 = vsel %vm1437_vm2, %v10886_v49, 0.0  ;;  %v3415_v21 = vunpack.c.l.b16 %v3375_v2  ;;  %v8572_v12 = vpop.eup %8571  ;;  %v3612_v18 = vpack.c.b16 %v3606_v4, %v3605_v62 }
 0x6bf   : > { %3292 = vadd.xlane.f32.xlu0 %v3291_v63  ;;  %8575 = vpow2.f32 %v3203_v34  ;;  %3238 = vadd.xlane.f32.xlu2 %v3237_v16  ;;  %v10901_v40 = vpop.eup %8573  ;;  %v3346_v32 = vmul.f32 %v8572_v12, %v10687_v61 }
 0x6c0   : > { %v3422_v39 = vpack.c.b16 %v3416_v8, %v3415_v21  ;;  %v3246_v46 = vsel %vm1437_vm2, %v10901_v40, 0.0  ;;  %v3175_v8 = vmul.f32 1.442695, %v3130_v48 }
 0x6c1   : > { %3636 = vmatpush.bf16.msra.mxu2 %v3613_v41  ;;  %v3378_v60 = vpack.c.bf16 %v3346_v32, %v3346_v32 }
 0x6c2   : > { %v3107_v22 = vpop.xlane.xlu2 %3106  ;;  %v3227_v24 = vpop.xlane.xlu0 %3226  ;;  %7983 = vmatmul.msk.bf16.gmra.mxu0 %vm1437_vm2, %v3422_v39 }
 0x6c3   : > { %v3145_v2 = vsub.f32 %v10785_v58, %v3107_v22  ;;  %8577 = vrcp.f32 %v3227_v24  ;;  %v2882_v58 = vadd.f32 %v10509_v33, %v10651_v20  ;;  %v3236_v63 = vpop.xlane.xlu1 %3235  ;;  %v8979_v20 = vld [vmem:[#allocation2 + $0x90] sm:$0xff]  ;;  %v2884_v24 = vadd.f32 %v10523_v47, %v10662_v29 }
 0x6c4   : > { %8579 = vpow2.f32 %v3169_v23  ;;  %v10917_v21 = vpop.f32.mrf.mxu2  ;;  %v3129_v23 = vsub.f32 %v10699_v55, %v10888_v56 }
 0x6c5   : > { %v3205_v34 = vmul.f32 1.442695, %v3145_v2  ;;  %v10906_v45 = vpop.eup %8575  ;;  %3637 = vmatpush.bf16.msra.mxu2 %v3612_v18  ;;  %v10921_v39 = vadd.f32 %v8979_v20, %v2882_v58 }
 0x6c6   : > { %v3294_v44 = vsel %vm1437_vm2, %v10906_v45, 0.0  ;;  %v3173_v5 = vmul.f32 1.442695, %v3129_v23 }
 0x6c7   : > { %8581 = vpow2.f32 %v3205_v34  ;;  %3247 = vadd.xlane.f32.xlu0 %v3246_v46  ;;  %3295 = vadd.xlane.f32.xlu1 %v3294_v44  ;;  %v3075_v53 = vsel %vm1437_vm2, %v10921_v39, -inf  ;;  %v8980_v34 = vld [vmem:[#allocation2 + $0x98] sm:$0xff] }
 0x6c8   : > { %3073 = vmax.xlane.f32.xlu2 %v3072_v0  ;;  %8583 = vrcp.f32 %v3236_v63  ;;  %v10943_v32 = vadd.f32 %v8980_v34, %v2884_v24 }
 0x6c9   : > { %v8578_v61 = vpop.eup %8577  ;;  %8585 = vpow2.f32 %v3175_v8  ;;  %3638 = vmatpush.bf16.msra.mxu2 %v3611_v11 }
 0x6ca   : > { %v3345_v16 = vmul.f32 %v8578_v61, %v10783_v35  ;;  %v3110_v19 = vpop.xlane.xlu0 %3109  ;;  %v10923_v15 = vpop.eup %8579  ;;  %v3078_v61 = vsel %vm1437_vm2, %v10943_v32, -inf }
 0x6cb   : > { %v3146_v33 = vsub.f32 %v10795_v9, %v3110_v19  ;;  %v3418_v9 = vunpack.c.l.b16 %v3378_v60  ;;  %v3243_v62 = vsel %vm1437_vm2, %v10923_v15, 0.0  ;;  %v3068_v56 = vpop.xlane.xlu1 %3067 }
 0x6cc   : > { %v3377_v42 = vpack.c.bf16 %v3345_v16, %v3345_v16  ;;  %v10937_v55 = vpop.f32.mrf.mxu2  ;;  %v3132_v0 = vsub.f32 %v10715_v30, %v3068_v56 }
 0x6cd   : > { %v10925_v41 = vpop.eup %8581  ;;  %v3207_v12 = vmul.f32 1.442695, %v3146_v33  ;;  %v8981_v33 = vld [vmem:[#allocation2 + $0xa0] sm:$0xff] }
 0x6ce   : > { %v3297_v35 = vsel %vm1437_vm2, %v10925_v41, 0.0  ;;  %v3417_v22 = vunpack.c.l.b16 %v3377_v42  ;;  %v8584_v2 = vpop.eup %8583 }
 0x6cf   : > { %8587 = vpow2.f32 %v3207_v12  ;;  %3298 = vadd.xlane.f32.xlu0 %v3297_v35  ;;  %3076 = vmax.xlane.f32.xlu1 %v3075_v53  ;;  %v10940_v47 = vpop.eup %8585  ;;  %v3348_v63 = vmul.f32 %v8584_v2, %v10706_v36  ;;  %v3179_v36 = vmul.f32 1.442695, %v3132_v0 }
 0x6d0   : > { %3244 = vadd.xlane.f32.xlu2 %v3243_v62  ;;  %v3423_v4 = vpack.c.b16 %v3418_v9, %v3417_v22  ;;  %v3252_v18 = vsel %vm1437_vm2, %v10940_v47, 0.0 }
 0x6d1   : > { %v3380_v11 = vpack.c.bf16 %v3348_v63, %v3348_v63  ;;  %v8984_v63 = vld [vmem:[%s13346_s7 + $0x70] sm:$0xff] }
 0x6d2   : > { %v3113_v27 = vpop.xlane.xlu2 %3112  ;;  %v3233_v48 = vpop.xlane.xlu0 %3232  ;;  %7984 = vmatmul.msk.bf16.gmra.mxu0 %vm1437_vm2, %v3423_v4  ;;  %v7998_v4 = vld [vmem:[%s13348_s9 + $0x4] sm:$0xf] }
 0x6d3   : > { %v3147_v29 = vsub.f32 %v10804_v43, %v3113_v27  ;;  %8589 = vrcp.f32 %v3233_v48  ;;  %v2887_v43 = vadd.f32 %v10534_v50, %v10672_v38  ;;  %v3420_v22 = vunpack.c.l.b16 %v3380_v11  ;;  %v8983_v27 = vld [vmem:[#allocation2 + $0xa8] sm:$0xff] }
 0x6d4   : > { %8591 = vpow2.f32 %v3173_v5  ;;  %v10957_v30 = vpop.f32.mrf.mxu2  ;;  %v3813_v56 = vsel %vm3811_vm3, %v7998_v4, 0 }
 0x6d5   : > { %v10945_v46 = vpop.eup %8587  ;;  %v3209_v58 = vmul.f32 1.442695, %v3147_v29  ;;  %v10961_v20 = vadd.f32 %v8981_v33, %v2887_v43  ;;  %3822 = vmatpush.bf16.msra.mxu0 %v3813_v56  ;;  %v8985_v43 = vld [vmem:[#allocation2 + $0xb0] sm:$0xff] }
 0x6d6   : > { %v3300_v44 = vsel %vm1437_vm2, %v10945_v46, 0.0 }
 0x6d7   : > { %8593 = vpow2.f32 %v3209_v58  ;;  %3253 = vadd.xlane.f32.xlu0 %v3252_v18  ;;  %3301 = vadd.xlane.f32.xlu1 %v3300_v44  ;;  %v3081_v9 = vsel %vm1437_vm2, %v10961_v20, -inf  ;;  %v2892_v44 = vadd.f32 %v8984_v63, %v10695_v25  ;;  %v8986_v25 = vld [vmem:[%s13346_s7 + $0x78] sm:$0xff]  ;;  %v2500_v63 = vadd.f32 %v10725_v26, %v10957_v30 }
 0x6d8   : > { %3079 = vmax.xlane.f32.xlu2 %v3078_v61  ;;  %8595 = vpow2.f32 %v3179_v36  ;;  %v2894_v11 = vadd.f32 %v8986_v25, %v10704_v52 }
 0x6d9   : > { %v8590_v8 = vpop.eup %8589  ;;  %v10999_v61 = vadd.f32 %v8985_v43, %v2892_v44  ;;  %v2493_v44 = vadd.f32 %v10725_v26, %v10896_v31  ;;  %v2603_v43 = vpack.c.bf16 %v2500_v63, %v2500_v63 }
 0x6da   : > { %v3347_v60 = vmul.f32 %v8590_v8, %v10802_v51  ;;  %v3116_v16 = vpop.xlane.xlu0 %3115  ;;  %v10963_v50 = vpop.eup %8591  ;;  %v8982_v51 = vld [vmem:[%s13346_s7 + $0x68] sm:$0xff] }
 0x6db   : > { %v3148_v19 = vsub.f32 %v10811_v14, %v3116_v16  ;;  %v2889_v14 = vadd.f32 %v8982_v51, %v10683_v37  ;;  %v3249_v24 = vsel %vm1437_vm2, %v10963_v50, 0.0 }
 0x6dc   : > { %v3379_v38 = vpack.c.bf16 %v3347_v60, %v3347_v60  ;;  %v2502_v62 = vpop.f32.mrf.mxu2  ;;  %v3087_v60 = vsel %vm1437_vm2, %v10999_v61, -inf }
 0x6dd   : > { %v10965_v42 = vpop.eup %8593  ;;  %v3211_v12 = vmul.f32 1.442695, %v3148_v19  ;;  %v10985_v48 = vadd.f32 %v8983_v27, %v2889_v14  ;;  %v8987_v19 = vld [vmem:[#allocation2 + $0xb8] sm:$0xff] }
 0x6de   : > { %v3303_v23 = vsel %vm1437_vm2, %v10965_v42, 0.0  ;;  %v3419_v35 = vunpack.c.l.b16 %v3379_v38  ;;  %v10982_v2 = vpop.eup %8595  ;;  %v11011_v33 = vadd.f32 %v8987_v19, %v2894_v11 }
 0x6df   : > { %8597 = vpow2.f32 %v3211_v12  ;;  %3304 = vadd.xlane.f32.xlu0 %v3303_v23  ;;  %3082 = vmax.xlane.f32.xlu1 %v3081_v9  ;;  %v3258_v58 = vsel %vm1437_vm2, %v10982_v2, 0.0  ;;  %v2503_v12 = vadd.f32 %v10725_v26, %v2502_v62 }
 0x6e0   : > { %3250 = vadd.xlane.f32.xlu2 %v3249_v24  ;;  %v3424_v53 = vpack.c.b16 %v3420_v22, %v3419_v35  ;;  %v3090_v22 = vsel %vm1437_vm2, %v11011_v33, -inf }
 0x6e1   : > { %v2604_v14 = vpack.c.bf16 %v2503_v12, %v2503_v12 }
 0x6e2   : > { %v3065_v37 = vpop.xlane.xlu0 %3064  ;;  %7985 = vmatmul.msk.bf16.gmra.mxu0 %vm1437_vm2, %v3424_v53 }
 0x6e3   : > { %v3131_v5 = vsub.f32 %v10820_v17, %v3065_v37  ;;  %v3084_v17 = vsel %vm1437_vm2, %v10985_v48, -inf  ;;  %v3692_v56 = vunpack.c.l.b16 %v2604_v14 }
 0x6e4   : > { %v2504_v18 = vpop.f32.mrf.mxu2 }
 0x6e5   : > { %v10987_v29 = vpop.eup %8597  ;;  %v3177_v34 = vmul.f32 1.442695, %v3131_v5  ;;  %v2505_v23 = vadd.f32 %v10725_v26, %v2504_v18 }
 0x6e6   : > { %v3306_v0 = vsel %vm1437_vm2, %v10987_v29, 0.0 }
 0x6e7   : > { %8599 = vpow2.f32 %v3177_v34  ;;  %3259 = vadd.xlane.f32.xlu0 %v3258_v58  ;;  %3307 = vadd.xlane.f32.xlu1 %v3306_v0  ;;  %v2605_v9 = vpack.c.bf16 %v2505_v23, %v2505_v23  ;;  %v2498_v58 = vadd.f32 %v10725_v26, %v10937_v55 }
 0x6e8   : > { %3085 = vmax.xlane.f32.xlu2 %v3084_v17  ;;  %v2495_v17 = vadd.f32 %v10725_v26, %v10917_v21 }
 0x6e9   : > { %v3693_v37 = vunpack.c.l.b16 %v2605_v9  ;;  %v2602_v18 = vpack.c.bf16 %v2498_v58, %v2498_v58 }
 0x6ea   : > { %v2601_v25 = vpack.c.bf16 %v2495_v17, %v2495_v17  ;;  %v3242_v12 = vpop.xlane.xlu0 %3241 }
 0x6eb   : > { %v3698_v0 = vpack.c.b16 %v3693_v37, %v3692_v56  ;;  %v3690_v11 = vunpack.c.l.b16 %v2602_v18 }
 0x6ec   : > { %v2507_v16 = vpop.f32.mrf.mxu2  ;;  %v3689_v55 = vunpack.c.l.b16 %v2601_v25 }
 0x6ed   : > { %v11001_v8 = vpop.eup %8599  ;;  %v2508_v38 = vadd.f32 %v10725_v26, %v2507_v16 }
 0x6ee   : > { %v3255_v36 = vsel %vm1437_vm2, %v11001_v8, 0.0 }
 0x6ef   : > { %3088 = vmax.xlane.f32.xlu1 %v3087_v60  ;;  %v2606_v52 = vpack.c.bf16 %v2508_v38, %v2508_v38  ;;  %v3691_v60 = vunpack.c.l.b16 %v2603_v43 }
 0x6f0   : > { %3256 = vadd.xlane.f32.xlu2 %v3255_v36  ;;  %v2600_v36 = vpack.c.bf16 %v2493_v44, %v2493_v44 }
 0x6f1   : > { %v3694_v53 = vunpack.c.l.b16 %v2606_v52  ;;  %v3697_v19 = vpack.c.b16 %v3691_v60, %v3690_v11 }
 0x6f2   : > { %v3688_v16 = vunpack.c.l.b16 %v2600_v36 }
 0x6f4   : > { %v2509_v51 = vpop.f32.mrf.mxu2  ;;  %v3696_v30 = vpack.c.b16 %v3689_v55, %v3688_v16 }
 0x6f5   : > { %v2510_v24 = vadd.f32 %v10725_v26, %v2509_v51 }
 0x6f7   : > { %v3470_v35 = vpop.f32.mrf.mxu0  ;;  %v2607_v4 = vpack.c.bf16 %v2510_v24, %v2510_v24 }
 0x6f8   : > { %3091 = vmax.xlane.f32.xlu2 %v3090_v22 }
 0x6f9   : > { %v3695_v5 = vunpack.c.l.b16 %v2607_v4 }
 0x6fb   : > { %v3699_v62 = vpack.c.b16 %v3695_v5, %v3694_v53 }
 0x6fd   : > { %3720 = vmatpush.bf16.msra.mxu3 %v3699_v62 }
 0x6ff   : > { %v3472_v27 = vpop.f32.mrf.mxu0 }
 0x700   : > { %v3745_v34 = vpack.c.bf16 %v3472_v27, %v3470_v35 }
 0x701   : > { %3721 = vmatpush.bf16.msra.mxu3 %v3698_v0 }
 0x702   : > { %7999 = vmatmul.msk.bf16.vlgmr.msra.gmra.mxu0 %vm1072_vm1, %v3745_v34 }
 0x705   : > { %3722 = vmatpush.bf16.msra.mxu3 %v3697_v19 }
 0x709   : > { %3723 = vmatpush.bf16.msra.mxu3 %v3696_v30 }
 0x722   : > { %v3287_v38 = vpop.xlane.xlu1 %3286 }
 0x723   : > { %8601 = vrcp.f32 %v3287_v38 }
 0x729   : > { %v8602_v21 = vpop.eup %8601 }
 0x72a   : > { %v3071_v31 = vpop.xlane.xlu1 %3070  ;;  %v3290_v23 = vpop.xlane.xlu2 %3289  ;;  %v3365_v22 = vmul.f32 %v8602_v21, %v10850_v10 }
 0x72b   : > { %v3133_v26 = vsub.f32 %v10857_v57, %v3071_v31  ;;  %8603 = vrcp.f32 %v3290_v23 }
 0x72c   : > { %8605 = vrcp.f32 %v3242_v12  ;;  %v3397_v14 = vpack.c.bf16 %v3365_v22, %v3365_v22 }
 0x72d   : > { %v3181_v35 = vmul.f32 1.442695, %v3133_v26 }
 0x72e   : > { %v3668_v5 = vunpack.c.l.b16 %v3397_v14 }
 0x72f   : > { %8607 = vpow2.f32 %v3181_v35 }
 0x731   : > { %v8604_v52 = vpop.eup %8603 }
 0x732   : > { %v3293_v51 = vpop.xlane.xlu0 %3292  ;;  %v3366_v9 = vmul.f32 %v8604_v52, %v10864_v1  ;;  %v3239_v24 = vpop.xlane.xlu2 %3238 }
 0x733   : > { %v8606_v53 = vpop.eup %8605  ;;  %8609 = vrcp.f32 %v3239_v24 }
 0x734   : > { %v3398_v56 = vpack.c.bf16 %v3366_v9, %v3366_v9  ;;  %8611 = vrcp.f32 %v3293_v51  ;;  %v3350_v37 = vmul.f32 %v8606_v53, %v10826_v3 }
 0x735   : > { %v11031_v4 = vpop.eup %8607 }
 0x736   : > { %v3261_v57 = vsel %vm1437_vm2, %v11031_v4, 0.0  ;;  %v3669_v10 = vunpack.c.l.b16 %v3398_v56  ;;  %v3382_v0 = vpack.c.bf16 %v3350_v37, %v3350_v37 }
 0x737   : > { %3262 = vadd.xlane.f32.xlu0 %v3261_v57 }
 0x738   : > { %v3676_v27 = vpack.c.b16 %v3669_v10, %v3668_v5  ;;  %v3499_v43 = vunpack.c.l.b16 %v3382_v0 }
 0x739   : > { %v8610_v62 = vpop.eup %8609 }
 0x73a   : > { %v3248_v34 = vpop.xlane.xlu0 %3247  ;;  %v3349_v1 = vmul.f32 %v8610_v62, %v10882_v6  ;;  %7994 = vmatmul.msk.bf16.vlgmr.msra.gmra.mxu3 %vm1437_vm2, %v3676_v27  ;;  %v3296_v63 = vpop.xlane.xlu1 %3295 }
 0x73b   : > { %v3074_v58 = vpop.xlane.xlu2 %3073  ;;  %v8612_v44 = vpop.eup %8611  ;;  %8613 = vrcp.f32 %v3296_v63 }
 0x73c   : > { %v3134_v17 = vsub.f32 %v10899_v28, %v3074_v58  ;;  %v3381_v18 = vpack.c.bf16 %v3349_v1, %v3349_v1  ;;  %8615 = vrcp.f32 %v3248_v34  ;;  %v3367_v36 = vmul.f32 %v8612_v44, %v10886_v49 }
 0x73e   : > { %v3183_v3 = vmul.f32 1.442695, %v3134_v17  ;;  %v3498_v25 = vunpack.c.l.b16 %v3381_v18  ;;  %v3399_v55 = vpack.c.bf16 %v3367_v36, %v3367_v36 }
 0x73f   : > { %v3475_v11 = vpop.f32.mrf.mxu0 }
 0x740   : > { %8617 = vpow2.f32 %v3183_v3  ;;  %v3506_v60 = vpack.c.b16 %v3499_v43, %v3498_v25  ;;  %v8351_v25 = vld [vmem:[%s13341_s2 + $0x20] sm:$0xff] }
 0x741   : > { %v8614_v16 = vpop.eup %8613 }
 0x742   : > { %v3299_v6 = vpop.xlane.xlu0 %3298  ;;  %v3368_v19 = vmul.f32 %v8614_v16, %v10906_v45  ;;  %7986 = vmatmul.msk.bf16.vlgmr.msra.gmra.mxu1 %vm1437_vm2, %v3506_v60  ;;  %v3077_v28 = vpop.xlane.xlu1 %3076  ;;  %v3670_v45 = vunpack.c.l.b16 %v3399_v55 }
 0x743   : > { %v3245_v30 = vpop.xlane.xlu2 %3244  ;;  %v8616_v38 = vpop.eup %8615  ;;  %v3135_v12 = vsub.f32 %v10921_v39, %v3077_v28 }
 0x744   : > { %8619 = vrcp.f32 %v3245_v30  ;;  %v3400_v31 = vpack.c.bf16 %v3368_v19, %v3368_v19  ;;  %v3352_v26 = vmul.f32 %v8616_v38, %v10901_v40 }
 0x745   : > { %8621 = vrcp.f32 %v3299_v6  ;;  %v3185_v49 = vmul.f32 1.442695, %v3135_v12 }
 0x746   : > { %v11043_v23 = vpop.eup %8617  ;;  %v3671_v22 = vunpack.c.l.b16 %v3400_v31  ;;  %v3384_v39 = vpack.c.bf16 %v3352_v26, %v3352_v26 }
 0x747   : > { %v3264_v21 = vsel %vm1437_vm2, %v11043_v23, 0.0  ;;  %v3477_v35 = vpop.f32.mrf.mxu0  ;;  %8623 = vpow2.f32 %v3185_v49 }
 0x748   : > { %3265 = vadd.xlane.f32.xlu1 %v3264_v21  ;;  %v3746_v52 = vpack.c.bf16 %v3477_v35, %v3475_v11  ;;  %v3677_v51 = vpack.c.b16 %v3671_v22, %v3670_v45  ;;  %v3501_v0 = vunpack.c.l.b16 %v3384_v39  ;;  %v2178_v39 = vld [vmem:[%s13348_s9] sm:$0xf] }
 0x74a   : > { %v8620_v14 = vpop.eup %8619  ;;  %v3254_v9 = vpop.xlane.xlu0 %3253  ;;  %8000 = vmatmul.msk.bf16.gmra.mxu0 %vm1072_vm1, %v3746_v52  ;;  %7995 = vmatmul.msk.bf16.gmra.mxu3 %vm1437_vm2, %v3677_v51 }
 0x74b   : > { %v3351_v24 = vmul.f32 %v8620_v14, %v10923_v15  ;;  %v3080_v53 = vpop.xlane.xlu2 %3079  ;;  %v3302_v40 = vpop.xlane.xlu1 %3301 }
 0x74c   : > { %v8622_v56 = vpop.eup %8621  ;;  %v3136_v57 = vsub.f32 %v10943_v32, %v3080_v53  ;;  %8625 = vrcp.f32 %v3302_v40 }
 0x74d   : > { %v3383_v37 = vpack.c.bf16 %v3351_v24, %v3351_v24  ;;  %v11052_v5 = vpop.eup %8623  ;;  %8627 = vrcp.f32 %v3254_v9  ;;  %v3369_v27 = vmul.f32 %v8622_v56, %v10925_v41  ;;  %v8352_v41 = vld [vmem:[%s13341_s2 + $0x28] sm:$0xff] }
 0x74e   : > { %v3187_v10 = vmul.f32 1.442695, %v3136_v57  ;;  %v3267_v34 = vsel %vm1437_vm2, %v11052_v5, 0.0  ;;  %4183 = vmatpush.bf16.msrb.mxu3 %v8352_v41 }
 0x74f   : > { %v3480_v62 = vpop.f32.mrf.mxu0  ;;  %v3500_v15 = vunpack.c.l.b16 %v3383_v37  ;;  %3268 = vadd.xlane.f32.xlu2 %v3267_v34  ;;  %v3401_v32 = vpack.c.bf16 %v3369_v27, %v3369_v27 }
 0x750   : > { %8629 = vpow2.f32 %v3187_v10 }
 0x751   : > { %v3507_v1 = vpack.c.b16 %v3501_v0, %v3500_v15  ;;  %v3672_v19 = vunpack.c.l.b16 %v3401_v32 }
 0x752   : > { %v8626_v58 = vpop.eup %8625  ;;  %v3305_v63 = vpop.xlane.xlu0 %3304  ;;  %4184 = vmatpush.bf16.msrb.mxu3 %v8351_v25 }
 0x753   : > { %v3370_v44 = vmul.f32 %v8626_v58, %v10945_v46  ;;  %7987 = vmatmul.msk.bf16.gmra.mxu1 %vm1437_vm2, %v3507_v1  ;;  %v3251_v17 = vpop.xlane.xlu2 %3250  ;;  %v3083_v18 = vpop.xlane.xlu1 %3082 }
 0x754   : > { %v8628_v3 = vpop.eup %8627  ;;  %8631 = vrcp.f32 %v3251_v17  ;;  %v3137_v43 = vsub.f32 %v10961_v20, %v3083_v18 }
 0x755   : > { %v3402_v36 = vpack.c.bf16 %v3370_v44, %v3370_v44  ;;  %8633 = vrcp.f32 %v3305_v63  ;;  %v3354_v60 = vmul.f32 %v8628_v3, %v10940_v47 }
 0x756   : > { %v11066_v11 = vpop.eup %8629  ;;  %v3189_v46 = vmul.f32 1.442695, %v3137_v43 }
 0x757   : > { %v3673_v16 = vunpack.c.l.b16 %v3402_v36  ;;  %v3482_v6 = vpop.f32.mrf.mxu0  ;;  %v3270_v55 = vsel %vm1437_vm2, %v11066_v11, 0.0  ;;  %v3386_v12 = vpack.c.bf16 %v3354_v60, %v3354_v60 }
 0x758   : > { %8635 = vpow2.f32 %v3189_v46  ;;  %v3747_v20 = vpack.c.bf16 %v3482_v6, %v3480_v62  ;;  %3271 = vadd.xlane.f32.xlu0 %v3270_v55  ;;  %v2162_v6 = vpack.c.bf16 %v10278_v59, %v10270_v7  ;;  %v11114_v55 = vld [vmem:[%s9233_s13 + $0x8] sm:$0xff]  ;;  %v13384_v7 = vld [vmem:[#allocation12_spill] sm:$0xff] }
 0x759   : > { %v3678_v30 = vpack.c.b16 %v3673_v16, %v3672_v19  ;;  %v3503_v52 = vunpack.c.l.b16 %v3386_v12  ;;  %v11106_v16 = vld [vmem:[%s9233_s13] sm:$0xff]  ;;  %v2163_v19 = vpack.c.bf16 %v10295_v54, %v10282_v13  ;;  %v13386_v12 = vld [vmem:[#allocation14_spill] sm:$0xff] }
 0x75a   : > { %v8632_v28 = vpop.eup %8631  ;;  %8001 = vmatmul.msk.bf16.gmra.mxu0 %vm1072_vm1, %v3747_v20  ;;  %v3260_v38 = vpop.xlane.xlu0 %3259  ;;  %v11122_v20 = vld [vmem:[%s9233_s13 + $0x10] sm:$0xff] }
 0x75b   : > { %v3353_v31 = vmul.f32 %v8632_v28, %v10963_v50  ;;  %v3086_v49 = vpop.xlane.xlu2 %3085  ;;  %7996 = vmatmul.msk.bf16.gmra.mxu3 %vm1437_vm2, %v3678_v30  ;;  %v3308_v47 = vpop.xlane.xlu1 %3307  ;;  %v13383_v30 = vld [vmem:[#allocation11_spill] sm:$0xff]  ;;  %v11130_v28 = vld [vmem:[%s9233_s13 + $0x18] sm:$0xff] }
 0x75c   : > { %v8634_v26 = vpop.eup %8633  ;;  %v3138_v21 = vsub.f32 %v10985_v48, %v3086_v49  ;;  %8637 = vrcp.f32 %v3308_v47  ;;  %v3953_v48 = vsel %vm3811_vm3, %v2178_v39, 0  ;;  %v2164_v59 = vpack.c.bf16 %v13384_v7, %v13383_v30  ;;  %v11138_v49 = vld [vmem:[%s9233_s13 + $0x20] sm:$0xff]  ;;  %v13392_v30 = vld [vmem:[#allocation10_spill] sm:$0xff] }
 0x75d   : > { %v3385_v35 = vpack.c.bf16 %v3353_v31, %v3353_v31  ;;  %8639 = vrcp.f32 %v3260_v38  ;;  %v3371_v51 = vmul.f32 %v8634_v26, %v10965_v42  ;;  %3962 = vmatpush.bf16.msrb.mxu1 %v3953_v48  ;;  %v13385_v38 = vld [vmem:[#allocation13_spill] sm:$0xff] }
 0x75e   : > { %v11075_v45 = vpop.eup %8635  ;;  %v3191_v22 = vmul.f32 1.442695, %v3138_v21  ;;  %v2165_v13 = vpack.c.bf16 %v13386_v12, %v13385_v38 }
 0x75f   : > { %v3502_v14 = vunpack.c.l.b16 %v3385_v35  ;;  %v3485_v9 = vpop.f32.mrf.mxu0  ;;  %v3273_v50 = vsel %vm1437_vm2, %v11075_v45, 0.0  ;;  %v3403_v40 = vpack.c.bf16 %v3371_v51, %v3371_v51 }
 0x760   : > { %8641 = vpow2.f32 %v3191_v22  ;;  %3274 = vadd.xlane.f32.xlu1 %v3273_v50  ;;  %v13387_v22 = vld [vmem:[#allocation5_spill] sm:$0xff] }
 0x761   : > { %v3508_v24 = vpack.c.b16 %v3503_v52, %v3502_v14  ;;  %v3674_v15 = vunpack.c.l.b16 %v3403_v40  ;;  %v13388_v52 = vld [vmem:[#allocation6_spill] sm:$0xff] }
 0x762   : > { %v8638_v53 = vpop.eup %8637  ;;  %v2166_v51 = vpack.c.bf16 %v13388_v52, %v13387_v22 }
 0x763   : > { %v3372_v56 = vmul.f32 %v8638_v53, %v10987_v29  ;;  %7988 = vmatmul.msk.bf16.gmra.mxu1 %vm1437_vm2, %v3508_v24  ;;  %v3257_v42 = vpop.xlane.xlu2 %3256  ;;  %v3089_v57 = vpop.xlane.xlu1 %3088 }
 0x764   : > { %v8640_v37 = vpop.eup %8639  ;;  %8643 = vrcp.f32 %v3257_v42  ;;  %v3139_v10 = vsub.f32 %v10999_v61, %v3089_v57 }
 0x765   : > { %v3404_v27 = vpack.c.bf16 %v3372_v56, %v3372_v56  ;;  %v3356_v0 = vmul.f32 %v8640_v37, %v10982_v2 }
 0x766   : > { %v11087_v62 = vpop.eup %8641  ;;  %v3193_v34 = vmul.f32 1.442695, %v3139_v10  ;;  %v11156_v10 = vld [vmem:[%s9233_s13 + $0x28] sm:$0xff] }
 0x767   : > { %v3675_v1 = vunpack.c.l.b16 %v3404_v27  ;;  %v3487_v58 = vpop.f32.mrf.mxu0  ;;  %v3276_v29 = vsel %vm1437_vm2, %v11087_v62, 0.0  ;;  %v3388_v61 = vpack.c.bf16 %v3356_v0, %v3356_v0  ;;  %v13389_v0 = vld [vmem:[#allocation7_spill] sm:$0xff] }
 0x768   : > { %8645 = vpow2.f32 %v3193_v34  ;;  %v3748_v63 = vpack.c.bf16 %v3487_v58, %v3485_v9  ;;  %3277 = vadd.xlane.f32.xlu2 %v3276_v29 }
 0x769   : > { %v3679_v32 = vpack.c.b16 %v3675_v1, %v3674_v15  ;;  %v3505_v36 = vunpack.c.l.b16 %v3388_v61  ;;  %v13390_v1 = vld [vmem:[#allocation8_spill] sm:$0xff] }
 0x76a   : > { %v8644_v44 = vpop.eup %8643  ;;  %8002 = vmatmul.msk.bf16.gmra.mxu0 %vm1072_vm1, %v3748_v63  ;;  %v2167_v58 = vpack.c.bf16 %v13390_v1, %v13389_v0 }
 0x76b   : > { %v3355_v17 = vmul.f32 %v8644_v44, %v11001_v8  ;;  %v3092_v18 = vpop.xlane.xlu2 %3091  ;;  %7997 = vmatmul.msk.bf16.gmra.mxu3 %vm1437_vm2, %v3679_v32 }
 0x76c   : > { %v3140_v2 = vsub.f32 %v11011_v33, %v3092_v18 }
 0x76d   : > { %v3387_v41 = vpack.c.bf16 %v3355_v17, %v3355_v17 }
 0x76e   : > { %v11096_v3 = vpop.eup %8645  ;;  %v3195_v43 = vmul.f32 1.442695, %v3140_v2 }
 0x76f   : > { %v3504_v25 = vunpack.c.l.b16 %v3387_v41  ;;  %v3279_v46 = vsel %vm1437_vm2, %v11096_v3, 0.0 }
 0x770   : > { %8647 = vpow2.f32 %v3195_v43  ;;  %3280 = vadd.xlane.f32.xlu0 %v3279_v46  ;;  %v11174_v46 = vld [vmem:[%s9233_s13 + $0x30] sm:$0xff] }
 0x771   : > { %v3509_v8 = vpack.c.b16 %v3505_v36, %v3504_v25 }
 0x773   : > { %7989 = vmatmul.msk.bf16.gmra.mxu1 %vm1437_vm2, %v3509_v8 }
 0x776   : > { %v11101_v60 = vpop.eup %8647 }
 0x777   : > { %v3282_v33 = vsel %vm1437_vm2, %v11101_v60, 0.0 }
 0x778   : > { %3283 = vadd.xlane.f32.xlu1 %v3282_v33 }
 0x77b   : > { %8073 = vmatmul.msk.bf16.vlgmr.msrb.gmra.mxu3 %vm572_vm0, %v11106_v16 }
 0x783   : > { %8015 = vmatmul.msk.bf16.vlgmr.msrb.gmra.mxu1 %vm1072_vm1, %v2162_v6 }
 0x78b   : > { %8074 = vmatmul.msk.bf16.gmra.mxu3 %vm572_vm0, %v11114_v55 }
 0x793   : > { %8016 = vmatmul.msk.bf16.gmra.mxu1 %vm1072_vm1, %v2163_v19  ;;  %v13391_v19 = vld [vmem:[#allocation9_spill] sm:$0xff] }
 0x794   : > { %v2168_v7 = vpack.c.bf16 %v13392_v30, %v13391_v19  ;;  %v13399_v30 = vld [vmem:[#allocation27_spill] sm:$0xff] }
 0x79b   : > { %8075 = vmatmul.msk.bf16.gmra.mxu3 %vm572_vm0, %v11122_v20 }
 0x7a3   : > { %8017 = vmatmul.msk.bf16.gmra.mxu1 %vm1072_vm1, %v2164_v59 }
 0x7aa   : > { %v3263_v54 = vpop.xlane.xlu0 %3262 }
 0x7ab   : > { %8076 = vmatmul.msk.bf16.gmra.mxu3 %vm572_vm0, %v11130_v28  ;;  %8649 = vrcp.f32 %v3263_v54  ;;  %v8350_v54 = vld [vmem:[%s13340_s1 + $0x28] sm:$0xff] }
 0x7ac   : > { %4072 = vmatpush.bf16.msrb.mxu2 %v8350_v54 }
 0x7b1   : > { %v8650_v47 = vpop.eup %8649 }
 0x7b2   : > { %v3357_v21 = vmul.f32 %v8650_v47, %v11031_v4 }
 0x7b3   : > { %8018 = vmatmul.msk.bf16.gmra.mxu1 %vm1072_vm1, %v2165_v13 }
 0x7b4   : > { %v3389_v9 = vpack.c.bf16 %v3357_v21, %v3357_v21 }
 0x7b6   : > { %v3583_v53 = vunpack.c.l.b16 %v3389_v9 }
 0x7bb   : > { %v3266_v31 = vpop.xlane.xlu1 %3265  ;;  %8077 = vmatmul.msk.bf16.gmra.mxu3 %vm572_vm0, %v11138_v49 }
 0x7bc   : > { %8651 = vrcp.f32 %v3266_v31 }
 0x7bd   : > { %v11142_v26 = vpop.f32.mrf.mxu3 }
 0x7bf   : > { %v3555_v35 = vpop.f32.mrf.mxu1 }
 0x7c2   : > { %v8652_v14 = vpop.eup %8651  ;;  %v3269_v39 = vpop.xlane.xlu2 %3268 }
 0x7c3   : > { %v3358_v50 = vmul.f32 %v8652_v14, %v11043_v23  ;;  %8019 = vmatmul.msk.bf16.gmra.mxu1 %vm1072_vm1, %v2166_v51  ;;  %8653 = vrcp.f32 %v3269_v39 }
 0x7c5   : > { %v3390_v48 = vpack.c.bf16 %v3358_v50, %v3358_v50  ;;  %v11149_v24 = vpop.f32.mrf.mxu3  ;;  %v11198_v50 = vld [vmem:[%s9233_s13 + $0x38] sm:$0xff] }
 0x7c7   : > { %v3584_v40 = vunpack.c.l.b16 %v3390_v48  ;;  %v3557_v56 = vpop.f32.mrf.mxu1 }
 0x7c8   : > { %v3749_v57 = vpack.c.bf16 %v3557_v56, %v3555_v35  ;;  %v13394_v56 = vld [vmem:[#allocation16_spill] sm:$0xff] }
 0x7c9   : > { %v3591_v42 = vpack.c.b16 %v3584_v40, %v3583_v53  ;;  %v8654_v23 = vpop.eup %8653  ;;  %v13393_v40 = vld [vmem:[#allocation15_spill] sm:$0xff] }
 0x7ca   : > { %8003 = vmatmul.msk.bf16.gmra.mxu0 %vm1072_vm1, %v3749_v57  ;;  %v3359_v34 = vmul.f32 %v8654_v23, %v11052_v5 }
 0x7cb   : > { %v3272_v37 = vpop.xlane.xlu0 %3271  ;;  %7990 = vmatmul.msk.bf16.vlgmr.msra.gmra.mxu2 %vm1437_vm2, %v3591_v42  ;;  %8078 = vmatmul.msk.bf16.gmra.mxu3 %vm572_vm0, %v11156_v10  ;;  %v2169_v42 = vpack.c.bf16 %v13394_v56, %v13393_v40 }
 0x7cc   : > { %8655 = vrcp.f32 %v3272_v37  ;;  %v3391_v63 = vpack.c.bf16 %v3359_v34, %v3359_v34 }
 0x7cd   : > { %v11160_v27 = vpop.f32.mrf.mxu3 }
 0x7ce   : > { %v3585_v18 = vunpack.c.l.b16 %v3391_v63 }
 0x7d0   : > { %v3560_v15 = vpop.f32.mrf.mxu1 }
 0x7d2   : > { %v8656_v29 = vpop.eup %8655 }
 0x7d3   : > { %v3360_v32 = vmul.f32 %v8656_v29, %v11066_v11  ;;  %8020 = vmatmul.msk.bf16.gmra.mxu1 %vm1072_vm1, %v2167_v58  ;;  %v3275_v44 = vpop.xlane.xlu1 %3274 }
 0x7d4   : > { %8657 = vrcp.f32 %v3275_v44 }
 0x7d5   : > { %v3392_v61 = vpack.c.bf16 %v3360_v32, %v3360_v32  ;;  %v11167_v17 = vpop.f32.mrf.mxu3  ;;  %v11215_v32 = vpop.f32.mrf.mxu0 }
 0x7d7   : > { %v3586_v2 = vunpack.c.l.b16 %v3392_v61 }
 0x7d8   : > { %v3562_v41 = vpop.f32.mrf.mxu1 }
 0x7d9   : > { %v3750_v43 = vpack.c.bf16 %v3562_v41, %v3560_v15  ;;  %v3592_v36 = vpack.c.b16 %v3586_v2, %v3585_v18  ;;  %v13395_v18 = vld [vmem:[#allocation25_spill] sm:$0xff]  ;;  %v13396_v2 = vld [vmem:[#allocation26_spill] sm:$0xff] }
 0x7da   : > { %v8658_v11 = vpop.eup %8657  ;;  %v2170_v41 = vpack.c.bf16 %v13396_v2, %v13395_v18 }
 0x7db   : > { %8004 = vmatmul.msk.bf16.gmra.mxu0 %vm1072_vm1, %v3750_v43  ;;  %v3278_v25 = vpop.xlane.xlu2 %3277  ;;  %7991 = vmatmul.msk.bf16.gmra.mxu2 %vm1437_vm2, %v3592_v36  ;;  %v3361_v33 = vmul.f32 %v8658_v11, %v11075_v45  ;;  %v11234_v11 = vld [vmem:[%s9233_s13 + $0x48] sm:$0xff] }
 0x7dc   : > { %8659 = vrcp.f32 %v3278_v25  ;;  %8079 = vmatmul.msk.bf16.gmra.mxu3 %vm572_vm0, %v11174_v46 }
 0x7dd   : > { %v3393_v38 = vpack.c.bf16 %v3361_v33, %v3361_v33  ;;  %v11227_v43 = vpop.f32.mrf.mxu0 }
 0x7de   : > { %v11178_v8 = vpop.f32.mrf.mxu3  ;;  %13397 = vst [vmem:[#allocation11_spill] sm:$0xff] %v11227_v43 }
 0x7df   : > { %v3587_v47 = vunpack.c.l.b16 %v3393_v38 }
 0x7e0   : > { %v3565_v6 = vpop.f32.mrf.mxu1 }
 0x7e2   : > { %v8660_v59 = vpop.eup %8659 }
 0x7e3   : > { %v3362_v12 = vmul.f32 %v8660_v59, %v11087_v62  ;;  %8021 = vmatmul.msk.bf16.gmra.mxu1 %vm1072_vm1, %v2168_v7  ;;  %v3281_v13 = vpop.xlane.xlu0 %3280  ;;  %v8349_v62 = vld [vmem:[%s13340_s1 + $0x20] sm:$0xff]  ;;  %v13400_v7 = vld [vmem:[#allocation28_spill] sm:$0xff] }
 0x7e4   : > { %8661 = vrcp.f32 %v3281_v13  ;;  %4073 = vmatpush.bf16.msrb.mxu2 %v8349_v62  ;;  %v2171_v59 = vpack.c.bf16 %v13400_v7, %v13399_v30 }
 0x7e5   : > { %v3394_v31 = vpack.c.bf16 %v3362_v12, %v3362_v12  ;;  %v11238_v33 = vpop.f32.mrf.mxu0 }
 0x7e6   : > { %v11188_v45 = vpop.f32.mrf.mxu3 }
 0x7e7   : > { %v3588_v21 = vunpack.c.l.b16 %v3394_v31 }
 0x7e8   : > { %v3567_v22 = vpop.f32.mrf.mxu1 }
 0x7e9   : > { %v3751_v52 = vpack.c.bf16 %v3567_v22, %v3565_v6  ;;  %v3593_v51 = vpack.c.b16 %v3588_v21, %v3587_v47  ;;  %v11259_v47 = vld [vmem:[%s9233_s13 + $0x50] sm:$0xff] }
 0x7ea   : > { %v8662_v9 = vpop.eup %8661 }
 0x7eb   : > { %7992 = vmatmul.msk.bf16.gmra.mxu2 %vm1437_vm2, %v3593_v51  ;;  %8005 = vmatmul.msk.bf16.gmra.mxu0 %vm1072_vm1, %v3751_v52  ;;  %v3284_v14 = vpop.xlane.xlu1 %3283  ;;  %v3363_v48 = vmul.f32 %v8662_v9, %v11096_v3  ;;  %v13403_v51 = vld [vmem:[#allocation29_spill] sm:$0xff] }
 0x7ec   : > { %8663 = vrcp.f32 %v3284_v14  ;;  %8080 = vmatmul.msk.bf16.gmra.mxu3 %vm572_vm0, %v11198_v50  ;;  %v13404_v14 = vld [vmem:[#allocation30_spill] sm:$0xff] }
 0x7ed   : > { %v3395_v37 = vpack.c.bf16 %v3363_v48, %v3363_v48  ;;  %v11245_v12 = vpop.f32.mrf.mxu0  ;;  %v2172_v9 = vpack.c.bf16 %v13404_v14, %v13403_v51 }
 0x7ee   : > { %v11202_v39 = vpop.f32.mrf.mxu3  ;;  %13401 = vst [vmem:[#allocation13_spill] sm:$0xff] %v11245_v12 }
 0x7ef   : > { %v3589_v0 = vunpack.c.l.b16 %v3395_v37  ;;  %v11283_v37 = vld [vmem:[%s9233_s13 + $0x58] sm:$0xff] }
 0x7f0   : > { %v3570_v53 = vpop.f32.mrf.mxu1 }
 0x7f2   : > { %v8664_v57 = vpop.eup %8663 }
 0x7f3   : > { %v3364_v23 = vmul.f32 %v8664_v57, %v11101_v60  ;;  %8022 = vmatmul.msk.bf16.gmra.mxu1 %vm1072_vm1, %v2169_v42  ;;  %v11218_v60 = vld [vmem:[%s9233_s13 + $0x40] sm:$0xff] }
 0x7f5   : > { %v3396_v34 = vpack.c.bf16 %v3364_v23, %v3364_v23  ;;  %v11267_v48 = vpop.f32.mrf.mxu0 }
 0x7f6   : > { %v11209_v15 = vpop.f32.mrf.mxu3 }
 0x7f7   : > { %v3590_v1 = vunpack.c.l.b16 %v3396_v34 }
 0x7f8   : > { %v3572_v3 = vpop.f32.mrf.mxu1 }
 0x7f9   : > { %v3752_v29 = vpack.c.bf16 %v3572_v3, %v3570_v53  ;;  %v3594_v63 = vpack.c.b16 %v3590_v1, %v3589_v0  ;;  %v13407_v0 = vld [vmem:[#allocation31_spill] sm:$0xff]  ;;  %v13408_v1 = vld [vmem:[#allocation32_spill] sm:$0xff] }
 0x7fa   : > { %v2173_v3 = vpack.c.bf16 %v13408_v1, %v13407_v0 }
 0x7fb   : > { %7993 = vmatmul.msk.bf16.gmra.mxu2 %vm1437_vm2, %v3594_v63  ;;  %8006 = vmatmul.msk.bf16.gmra.mxu0 %vm1072_vm1, %v3752_v29 }
 0x7fc   : > { %8081 = vmatmul.msk.bf16.gmra.mxu3 %vm572_vm0, %v11218_v60 }
 0x7fd   : > { %v11280_v57 = vpop.f32.mrf.mxu0 }
 0x7fe   : > { %v4186_v44 = vpop.f32.mrf.mxu3  ;;  %13406 = vst [vmem:[#allocation6_spill] sm:$0xff] %v11280_v57 }
 0x800   : > { %v11222_v61 = vpop.f32.mrf.mxu1 }
 0x803   : > { %8023 = vmatmul.msk.bf16.gmra.mxu1 %vm1072_vm1, %v2170_v41 }
 0x805   : > { %v11295_v18 = vpop.f32.mrf.mxu0 }
 0x806   : > { %v4188_v36 = vpop.f32.mrf.mxu3 }
 0x808   : > { %v11229_v25 = vpop.f32.mrf.mxu1 }
 0x809   : > { %13398 = vst [vmem:[#allocation12_spill] sm:$0xff] %v11229_v25  ;;  %v9027_v25 = vld [vmem:[%s9233_s13 + $0x48] sm:$0xff] }
 0x80b   : > { %8044 = vmatmul.msk.bf16.vlgmr.msrb.gmra.mxu2 %vm572_vm0, %v11106_v16  ;;  %v11252_v16 = vld [vmem:[%s13344_s5 + $0x2] ss:$0 sm:$0xff] }
 0x80c   : > { %8082 = vmatmul.msk.bf16.gmra.mxu3 %vm572_vm0, %v11234_v11  ;;  %v4187_v54 = vadd.f32 %v11252_v16, %v4186_v44  ;;  %v4189_v31 = vadd.f32 %v11252_v16, %v4188_v36 }
 0x80d   : > { %v11312_v0 = vpop.f32.mrf.mxu0 }
 0x80e   : > { %v4191_v6 = vpop.f32.mrf.mxu3  ;;  %v4409_v22 = vpack.c.bf16 %v4187_v54, %v4187_v54  ;;  %v4410_v62 = vpack.c.bf16 %v4189_v31, %v4189_v31  ;;  %13410 = vst [vmem:[#allocation8_spill] sm:$0xff] %v11312_v0 }
 0x810   : > { %v11240_v19 = vpop.f32.mrf.mxu1  ;;  %v11269_v53 = vunpack.c.l.b16 %v4409_v22  ;;  %v11271_v40 = vunpack.c.l.b16 %v4410_v62  ;;  %v11304_v22 = vld [vmem:[%s9233_s13 + $0x60] sm:$0xff] }
 0x812   : > { %v4518_v56 = vpack.c.b16 %v11271_v40, %v11269_v53 }
 0x813   : > { %8024 = vmatmul.msk.bf16.gmra.mxu1 %vm1072_vm1, %v2171_v59 }
 0x816   : > { %v4193_v38 = vpop.f32.mrf.mxu3 }
 0x817   : > { %v4194_v62 = vadd.f32 %v11252_v16, %v4193_v38 }
 0x818   : > { %v11247_v13 = vpop.f32.mrf.mxu1 }
 0x819   : > { %13402 = vst [vmem:[#allocation14_spill] sm:$0xff] %v11247_v13 }
 0x81b   : > { %8045 = vmatmul.msk.bf16.gmra.mxu2 %vm572_vm0, %v11114_v55 }
 0x81c   : > { %8083 = vmatmul.msk.bf16.gmra.mxu3 %vm572_vm0, %v11259_v47 }
 0x81e   : > { %v4196_v21 = vpop.f32.mrf.mxu3 }
 0x820   : > { %v11263_v52 = vpop.f32.mrf.mxu1 }
 0x823   : > { %8025 = vmatmul.msk.bf16.gmra.mxu1 %vm1072_vm1, %v2172_v9 }
 0x826   : > { %v4198_v55 = vpop.f32.mrf.mxu3 }
 0x827   : > { %v4199_v63 = vadd.f32 %v11252_v16, %v4198_v55 }
 0x828   : > { %v11276_v42 = vpop.f32.mrf.mxu1 }
 0x829   : > { %13405 = vst [vmem:[#allocation5_spill] sm:$0xff] %v11276_v42  ;;  %v4414_v7 = vpack.c.bf16 %v4199_v63, %v4199_v63 }
 0x82b   : > { %8046 = vmatmul.msk.bf16.gmra.mxu2 %vm572_vm0, %v11122_v20  ;;  %v4197_v20 = vadd.f32 %v11252_v16, %v4196_v21  ;;  %v4192_v21 = vadd.f32 %v11252_v16, %v4191_v6  ;;  %v4515_v14 = vunpack.c.l.b16 %v4414_v7  ;;  %v13412_v6 = vld [vmem:[#allocation18_spill] sm:$0xff] }
 0x82c   : > { %8084 = vmatmul.msk.bf16.gmra.mxu3 %vm572_vm0, %v11283_v37 }
 0x82d   : > { %v4413_v30 = vpack.c.bf16 %v4197_v20, %v4197_v20  ;;  %v4412_v20 = vpack.c.bf16 %v4194_v62, %v4194_v62 }
 0x82e   : > { %v4201_v23 = vpop.f32.mrf.mxu3 }
 0x82f   : > { %v4202_v29 = vadd.f32 %v11252_v16, %v4201_v23  ;;  %v4514_v51 = vunpack.c.l.b16 %v4413_v30 }
 0x830   : > { %v11287_v34 = vpop.f32.mrf.mxu1 }
 0x831   : > { %v4415_v44 = vpack.c.bf16 %v4202_v29, %v4202_v29  ;;  %v4411_v29 = vpack.c.bf16 %v4192_v21, %v4192_v21  ;;  %v4520_v63 = vpack.c.b16 %v4515_v14, %v4514_v51 }
 0x833   : > { %8026 = vmatmul.msk.bf16.gmra.mxu1 %vm1072_vm1, %v2173_v3  ;;  %v4516_v59 = vunpack.c.l.b16 %v4415_v44  ;;  %v4512_v38 = vunpack.c.l.b16 %v4411_v29  ;;  %v4513_v44 = vunpack.c.l.b16 %v4412_v20 }
 0x836   : > { %v4203_v2 = vpop.f32.mrf.mxu3 }
 0x837   : > { %v4204_v41 = vadd.f32 %v11252_v16, %v4203_v2  ;;  %v4541_v2 = vsel %vm1072_vm1, %v4520_v63, 0 }
 0x838   : > { %v11298_v36 = vpop.f32.mrf.mxu1 }
 0x839   : > { %13409 = vst [vmem:[#allocation7_spill] sm:$0xff] %v11298_v36  ;;  %v4416_v54 = vpack.c.bf16 %v4204_v41, %v4204_v41  ;;  %v9017_v36 = vld [vmem:[%s9233_s13 + $0x28] sm:$0xff] }
 0x83b   : > { %v4517_v31 = vunpack.c.l.b16 %v4416_v54  ;;  %8047 = vmatmul.msk.bf16.gmra.mxu2 %vm572_vm0, %v11130_v28  ;;  %v13411_v28 = vld [vmem:[#allocation17_spill] sm:$0xff]  ;;  %v4519_v54 = vpack.c.b16 %v4513_v44, %v4512_v38  ;;  %v11349_v44 = vld [vmem:[%s9233_s13 + $0x70] sm:$0xff] }
 0x83c   : > { %8085 = vmatmul.msk.bf16.gmra.mxu3 %vm572_vm0, %v11304_v22  ;;  %v2174_v3 = vpack.c.bf16 %v13412_v6, %v13411_v28 }
 0x83d   : > { %v4521_v9 = vpack.c.b16 %v4517_v31, %v4516_v59  ;;  %v11327_v31 = vld [vmem:[%s9233_s13 + $0x68] sm:$0xff]  ;;  %v4538_v21 = vsel %vm1072_vm1, %v4519_v54, 0  ;;  %v13422_v54 = vld [vmem:[#allocation21_spill] sm:$0xff] }
 0x83e   : > { %v11309_v55 = vpop.f32.mrf.mxu3 }
 0x83f   : > { %v4544_v23 = vsel %vm1072_vm1, %v4521_v9, 0 }
 0x840   : > { %v3984_v1 = vpop.f32.mrf.mxu1  ;;  %4550 = vmatpush.bf16.xpose.msra.mxu1 %v4544_v23  ;;  %v13416_v23 = vld [vmem:[#allocation19_spill] sm:$0xff] }
 0x843   : > { %8027 = vmatmul.msk.bf16.gmra.mxu1 %vm1072_vm1, %v2174_v3  ;;  %v4535_v3 = vsel %vm1072_vm1, %v4518_v56, 0 }
 0x846   : > { %v11318_v41 = vpop.f32.mrf.mxu3 }
 0x847   : > { %v3844_v30 = vpop.f32.mrf.mxu0 }
 0x848   : > { %v11320_v7 = vpop.f32.mrf.mxu1  ;;  %4551 = vmatpush.bf16.xpose.msra.mxu1 %v4541_v2  ;;  %v11322_v59 = vadd.f32 %v3984_v1, %v3844_v30  ;;  %v13417_v1 = vld [vmem:[#allocation20_spill] sm:$0xff]  ;;  %v13421_v30 = vld [vmem:[#allocation22_spill] sm:$0xff] }
 0x849   : > { %13413 = vst [vmem:[#allocation9_spill] sm:$0xff] %v11320_v7  ;;  %v2175_v28 = vpack.c.bf16 %v13417_v1, %v13416_v23 }
 0x84a   : > { %13414 = vst [vmem:[#allocation10_spill] sm:$0xff] %v11322_v59 }
 0x84b   : > { %8048 = vmatmul.msk.bf16.gmra.mxu2 %vm572_vm0, %v11138_v49 }
 0x84c   : > { %8086 = vmatmul.msk.bf16.gmra.mxu3 %vm572_vm0, %v11327_v31 }
 0x84e   : > { %v3640_v62 = vpop.f32.mrf.mxu2  ;;  %v4211_v51 = vpop.f32.mrf.mxu3 }
 0x84f   : > { %v11332_v14 = vpop.f32.mrf.mxu0 }
 0x850   : > { %13415 = vst [vmem:[#allocation15_spill] sm:$0xff] %v11332_v14  ;;  %v3989_v9 = vpop.f32.mrf.mxu1  ;;  %4552 = vmatpush.bf16.xpose.msra.mxu1 %v4538_v21  ;;  %v13423_v21 = vpack.c.bf16 %v13421_v30, %v13422_v54  ;;  %v13427_v54 = vld [vmem:[#allocation24_spill] sm:$0xff] }
 0x853   : > { %8028 = vmatmul.msk.bf16.gmra.mxu1 %vm1072_vm1, %v2175_v28 }
 0x856   : > { %v3642_v49 = vpop.f32.mrf.mxu2  ;;  %v4213_v29 = vpop.f32.mrf.mxu3 }
 0x857   : > { %v3753_v6 = vpack.c.bf16 %v3642_v49, %v3640_v62  ;;  %v11367_v49 = vld [vmem:[%s9233_s13 + $0x78] sm:$0xff] }
 0x858   : > { %v3849_v20 = vpop.f32.mrf.mxu0  ;;  %v11341_v63 = vpop.f32.mrf.mxu1  ;;  %4553 = vmatpush.bf16.xpose.msra.mxu1 %v4535_v3 }
 0x859   : > { %13418 = vst [vmem:[#allocation16_spill] sm:$0xff] %v11341_v63  ;;  %v11343_v38 = vadd.f32 %v3989_v9, %v3849_v20  ;;  %8007 = vmatmul.msk.bf16.gmra.mxu0 %vm1072_vm1, %v3753_v6 }
 0x85b   : > { %13419 = vst [vmem:[#allocation25_spill] sm:$0xff] %v11343_v38  ;;  %8049 = vmatmul.msk.bf16.gmra.mxu2 %vm572_vm0, %v11156_v10 }
 0x85c   : > { %8087 = vmatmul.msk.bf16.gmra.mxu3 %vm572_vm0, %v11349_v44 }
 0x85e   : > { %v3645_v53 = vpop.f32.mrf.mxu2 }
 0x85f   : > { %v4216_v40 = vpop.f32.mrf.mxu3 }
 0x860   : > { %v11353_v56 = vpop.f32.mrf.mxu0  ;;  %v3994_v2 = vpop.f32.mrf.mxu1 }
 0x861   : > { %13420 = vst [vmem:[#allocation26_spill] sm:$0xff] %v11353_v56 }
 0x863   : > { %8029 = vmatmul.msk.bf16.gmra.mxu1 %vm1072_vm1, %v13423_v21 }
 0x866   : > { %v3647_v62 = vpop.f32.mrf.mxu2 }
 0x867   : > { %v3754_v9 = vpack.c.bf16 %v3647_v62, %v3645_v53  ;;  %v4218_v23 = vpop.f32.mrf.mxu3 }
 0x868   : > { %v3854_v10 = vpop.f32.mrf.mxu0  ;;  %v11359_v1 = vpop.f32.mrf.mxu1 }
 0x869   : > { %13424 = vst [vmem:[#allocation27_spill] sm:$0xff] %v11359_v1  ;;  %v11361_v28 = vadd.f32 %v3994_v2, %v3854_v10  ;;  %8008 = vmatmul.msk.bf16.gmra.mxu0 %vm1072_vm1, %v3754_v9  ;;  %v13428_v2 = vld [vmem:[#allocation23_spill] sm:$0xff]  ;;  %v4219_v9 = vadd.f32 %v11252_v16, %v4218_v23  ;;  %v4212_v23 = vadd.f32 %v11252_v16, %v4211_v51 }
 0x86a   : > { %v13429_v21 = vpack.c.bf16 %v13427_v54, %v13428_v2 }
 0x86b   : > { %13425 = vst [vmem:[#allocation28_spill] sm:$0xff] %v11361_v28  ;;  %8050 = vmatmul.msk.bf16.gmra.mxu2 %vm572_vm0, %v11174_v46  ;;  %v4217_v46 = vadd.f32 %v11252_v16, %v4216_v40  ;;  %v4422_v54 = vpack.c.bf16 %v4219_v9, %v4219_v9 }
 0x86c   : > { %8088 = vmatmul.msk.bf16.gmra.mxu3 %vm572_vm0, %v11367_v49 }
 0x86e   : > { %v3650_v6 = vpop.f32.mrf.mxu2 }
 0x86f   : > { %v4221_v3 = vpop.f32.mrf.mxu3 }
 0x870   : > { %v11371_v20 = vpop.f32.mrf.mxu0  ;;  %v3999_v53 = vpop.f32.mrf.mxu1  ;;  %v4222_v30 = vadd.f32 %v11252_v16, %v4221_v3  ;;  %v4421_v3 = vpack.c.bf16 %v4217_v46, %v4217_v46 }
 0x871   : > { %13426 = vst [vmem:[#allocation29_spill] sm:$0xff] %v11371_v20 }
 0x872   : > { %v4423_v10 = vpack.c.bf16 %v4222_v30, %v4222_v30  ;;  %v4607_v30 = vunpack.c.l.b16 %v4421_v3 }
 0x873   : > { %8030 = vmatmul.msk.bf16.gmra.mxu1 %vm1072_vm1, %v13429_v21 }
 0x874   : > { %v4609_v2 = vunpack.c.l.b16 %v4423_v10 }
 0x876   : > { %v3652_v62 = vpop.f32.mrf.mxu2 }
 0x877   : > { %v3755_v58 = vpack.c.bf16 %v3652_v62, %v3650_v6  ;;  %v4223_v35 = vpop.f32.mrf.mxu3  ;;  %v4214_v6 = vadd.f32 %v11252_v16, %v4213_v29 }
 0x878   : > { %v3859_v5 = vpop.f32.mrf.mxu0  ;;  %v11380_v4 = vpop.f32.mrf.mxu1  ;;  %v4224_v1 = vadd.f32 %v11252_v16, %v4223_v35 }
 0x879   : > { %13430 = vst [vmem:[#allocation30_spill] sm:$0xff] %v11380_v4  ;;  %v11383_v20 = vadd.f32 %v3999_v53, %v3859_v5  ;;  %8009 = vmatmul.msk.bf16.gmra.mxu0 %vm1072_vm1, %v3755_v58  ;;  %v4608_v4 = vunpack.c.l.b16 %v4422_v54  ;;  %v4420_v46 = vpack.c.bf16 %v4214_v6, %v4214_v6  ;;  %v4207_v54 = vadd.f32 %v11252_v16, %v11309_v55  ;;  %v11411_v55 = vld [vmem:[%s13343_s4 + $0x2] ss:$0 sm:$0xff] }
 0x87a   : > { %v4424_v21 = vpack.c.bf16 %v4224_v1, %v4224_v1  ;;  %v4419_v1 = vpack.c.bf16 %v4212_v23, %v4212_v23 }
 0x87b   : > { %13431 = vst [vmem:[#allocation31_spill] sm:$0xff] %v11383_v20  ;;  %8051 = vmatmul.msk.bf16.gmra.mxu2 %vm572_vm0, %v11198_v50  ;;  %v4613_v9 = vpack.c.b16 %v4608_v4, %v4607_v30  ;;  %v4606_v10 = vunpack.c.l.b16 %v4420_v46  ;;  %v4417_v23 = vpack.c.bf16 %v4207_v54, %v4207_v54  ;;  %v13435_v54 = vpack.c.bf16 %v11149_v24, %v11142_v26 }
 0x87c   : > { %v4610_v40 = vunpack.c.l.b16 %v4424_v21  ;;  %v4605_v50 = vunpack.c.l.b16 %v4419_v1 }
 0x87d   : > { %v4634_v51 = vsel %vm1072_vm1, %v4613_v9, 0 }
 0x87e   : > { %v3655_v62 = vpop.f32.mrf.mxu2  ;;  %v4614_v35 = vpack.c.b16 %v4610_v40, %v4609_v2  ;;  %v4209_v2 = vadd.f32 %v11252_v16, %v11318_v41  ;;  %v4612_v4 = vpack.c.b16 %v4606_v10, %v4605_v50 }
 0x87f   : > { %v11390_v5 = vpop.f32.mrf.mxu3 }
 0x880   : > { %v11392_v53 = vpop.f32.mrf.mxu1  ;;  %v4637_v58 = vsel %vm1072_vm1, %v4614_v35, 0  ;;  %v4418_v6 = vpack.c.bf16 %v4209_v2, %v4209_v2  ;;  %v4603_v35 = vunpack.c.l.b16 %v4417_v23 }
 0x881   : > { %13432 = vst [vmem:[#allocation32_spill] sm:$0xff] %v11392_v53  ;;  %4643 = vmatpush.bf16.xpose.msra.mxu2 %v4637_v58 }
 0x882   : > { %v4604_v58 = vunpack.c.l.b16 %v4418_v6 }
 0x884   : > { %v4611_v9 = vpack.c.b16 %v4604_v58, %v4603_v35 }
 0x886   : > { %v3657_v21 = vpop.f32.mrf.mxu2 }
 0x887   : > { %v3756_v29 = vpack.c.bf16 %v3657_v21, %v3655_v62  ;;  %v11396_v3 = vpop.f32.mrf.mxu3  ;;  %v4631_v62 = vsel %vm1072_vm1, %v4612_v4, 0 }
 0x888   : > { %v11402_v40 = vpop.f32.mrf.mxu1 }
 0x889   : > { %13433 = vst [vmem:[#allocation17_spill] sm:$0xff] %v11402_v40  ;;  %8010 = vmatmul.msk.bf16.gmra.mxu0 %vm1072_vm1, %v3756_v29  ;;  %4644 = vmatpush.bf16.xpose.msra.mxu2 %v4634_v51  ;;  %v4628_v51 = vsel %vm1072_vm1, %v4611_v9, 0 }
 0x88b   : > { %8052 = vmatmul.msk.bf16.gmra.mxu2 %vm572_vm0, %v11218_v60 }
 0x88e   : > { %v4075_v30 = vpop.f32.mrf.mxu2 }
 0x88f   : > { %v4231_v41 = vpop.f32.mrf.mxu3  ;;  %v4076_v46 = vadd.f32 %v11411_v55, %v4075_v30 }
 0x890   : > { %v11413_v1 = vpop.f32.mrf.mxu1 }
 0x891   : > { %4645 = vmatpush.bf16.xpose.msra.mxu2 %v4631_v62  ;;  %13434 = vst [vmem:[#allocation18_spill] sm:$0xff] %v11413_v1  ;;  %v4377_v50 = vpack.c.bf16 %v4076_v46, %v4076_v46 }
 0x893   : > { %v4490_v2 = vunpack.c.l.b16 %v4377_v50 }
 0x896   : > { %v4077_v60 = vpop.f32.mrf.mxu2 }
 0x897   : > { %v4078_v10 = vadd.f32 %v11411_v55, %v4077_v60  ;;  %v4233_v21 = vpop.f32.mrf.mxu3 }
 0x898   : > { %v11424_v23 = vpop.f32.mrf.mxu1 }
 0x899   : > { %v4378_v29 = vpack.c.bf16 %v4078_v10, %v4078_v10  ;;  %8011 = vmatmul.msk.bf16.gmra.mxu0 %vm1072_vm1, %v13435_v54  ;;  %4646 = vmatpush.bf16.xpose.msra.mxu2 %v4628_v51  ;;  %13436 = vst [vmem:[#allocation19_spill] sm:$0xff] %v11424_v23 }
 0x89b   : > { %v4491_v4 = vunpack.c.l.b16 %v4378_v29  ;;  %8053 = vmatmul.msk.bf16.gmra.mxu2 %vm572_vm0, %v11234_v11  ;;  %v13438_v11 = vpack.c.bf16 %v11167_v17, %v11160_v27 }
 0x89d   : > { %v4498_v6 = vpack.c.b16 %v4491_v4, %v4490_v2 }
 0x89e   : > { %v4080_v30 = vpop.f32.mrf.mxu2 }
 0x89f   : > { %8126 = vmatmul.msk.bf16.vlgmr.msra.gmra.mxu1 %vm1072_vm1, %v4498_v6  ;;  %v4236_v62 = vpop.f32.mrf.mxu3  ;;  %v4081_v35 = vadd.f32 %v11411_v55, %v4080_v30 }
 0x8a0   : > { %v11428_v58 = vpop.f32.mrf.mxu1  ;;  %v4237_v27 = vadd.f32 %v11252_v16, %v4236_v62 }
 0x8a1   : > { %13437 = vst [vmem:[#allocation20_spill] sm:$0xff] %v11428_v58  ;;  %v4379_v24 = vpack.c.bf16 %v4081_v35, %v4081_v35 }
 0x8a3   : > { %v4492_v50 = vunpack.c.l.b16 %v4379_v24 }
 0x8a6   : > { %v4082_v26 = vpop.f32.mrf.mxu2 }
 0x8a7   : > { %v4083_v46 = vadd.f32 %v11411_v55, %v4082_v26  ;;  %v4238_v9 = vpop.f32.mrf.mxu3 }
 0x8a8   : > { %v11438_v2 = vpop.f32.mrf.mxu1  ;;  %v4239_v17 = vadd.f32 %v11252_v16, %v4238_v9 }
 0x8a9   : > { %v4380_v60 = vpack.c.bf16 %v4083_v46, %v4083_v46  ;;  %8012 = vmatmul.msk.bf16.gmra.mxu0 %vm1072_vm1, %v13438_v11  ;;  %13439 = vst [vmem:[#allocation22_spill] sm:$0xff] %v11438_v2  ;;  %v13440_v11 = vpack.c.bf16 %v11188_v45, %v11178_v8  ;;  %v4234_v8 = vadd.f32 %v11252_v16, %v4233_v21 }
 0x8ab   : > { %v4493_v10 = vunpack.c.l.b16 %v4380_v60  ;;  %8054 = vmatmul.msk.bf16.gmra.mxu2 %vm572_vm0, %v11259_v47 }
 0x8ad   : > { %v4499_v51 = vpack.c.b16 %v4493_v10, %v4492_v50  ;;  %v4429_v10 = vpack.c.bf16 %v4237_v27, %v4237_v27 }
 0x8ae   : > { %v4085_v29 = vpop.f32.mrf.mxu2 }
 0x8af   : > { %8127 = vmatmul.msk.bf16.gmra.mxu1 %vm1072_vm1, %v4499_v51  ;;  %v4241_v54 = vpop.f32.mrf.mxu3  ;;  %v4086_v6 = vadd.f32 %v11411_v55, %v4085_v29  ;;  %v4430_v51 = vpack.c.bf16 %v4239_v17, %v4239_v17  ;;  %v4700_v45 = vunpack.c.l.b16 %v4429_v10 }
 0x8b0   : > { %v4242_v4 = vadd.f32 %v11252_v16, %v4241_v54  ;;  %v11450_v50 = vpop.f32.mrf.mxu1 }
 0x8b1   : > { %v4381_v26 = vpack.c.bf16 %v4086_v6, %v4086_v6  ;;  %13441 = vst [vmem:[#allocation21_spill] sm:$0xff] %v11450_v50 }
 0x8b2   : > { %v4431_v35 = vpack.c.bf16 %v4242_v4, %v4242_v4 }
 0x8b3   : > { %v4494_v9 = vunpack.c.l.b16 %v4381_v26  ;;  %v4428_v26 = vpack.c.bf16 %v4234_v8, %v4234_v8 }
 0x8b4   : > { %v4702_v62 = vunpack.c.l.b16 %v4431_v35 }
 0x8b6   : > { %v4087_v30 = vpop.f32.mrf.mxu2 }
 0x8b7   : > { %v4088_v47 = vadd.f32 %v11411_v55, %v4087_v30  ;;  %v4243_v24 = vpop.f32.mrf.mxu3  ;;  %v4232_v30 = vadd.f32 %v11252_v16, %v4231_v41 }
 0x8b8   : > { %v4244_v46 = vadd.f32 %v11252_v16, %v4243_v24  ;;  %v4701_v24 = vunpack.c.l.b16 %v4430_v51 }
 0x8b9   : > { %v4382_v60 = vpack.c.bf16 %v4088_v47, %v4088_v47  ;;  %8013 = vmatmul.msk.bf16.gmra.mxu0 %vm1072_vm1, %v13440_v11  ;;  %v4427_v35 = vpack.c.bf16 %v4232_v30, %v4232_v30  ;;  %v13443_v30 = vpack.c.bf16 %v11209_v15, %v11202_v39 }
 0x8ba   : > { %v4432_v29 = vpack.c.bf16 %v4244_v46, %v4244_v46 }
 0x8bb   : > { %v4495_v54 = vunpack.c.l.b16 %v4382_v60  ;;  %8055 = vmatmul.msk.bf16.gmra.mxu2 %vm572_vm0, %v11283_v37  ;;  %v4706_v37 = vpack.c.b16 %v4701_v24, %v4700_v45  ;;  %v11461_v60 = vpop.f32.mrf.mxu1  ;;  %v4698_v41 = vunpack.c.l.b16 %v4427_v35 }
 0x8bc   : > { %v4703_v4 = vunpack.c.l.b16 %v4432_v29  ;;  %13442 = vst [vmem:[#allocation24_spill] sm:$0xff] %v11461_v60  ;;  %v4699_v29 = vunpack.c.l.b16 %v4428_v26 }
 0x8bd   : > { %v4500_v6 = vpack.c.b16 %v4495_v54, %v4494_v9  ;;  %v4727_v10 = vsel %vm1072_vm1, %v4706_v37, 0  ;;  %v4227_v54 = vadd.f32 %v11252_v16, %v11390_v5 }
 0x8be   : > { %v4090_v47 = vpop.f32.mrf.mxu2  ;;  %v4707_v11 = vpack.c.b16 %v4703_v4, %v4702_v62  ;;  %v4229_v4 = vadd.f32 %v11252_v16, %v11396_v3 }
 0x8bf   : > { %8128 = vmatmul.msk.bf16.gmra.mxu1 %vm1072_vm1, %v4500_v6  ;;  %v11457_v27 = vpop.f32.mrf.mxu3  ;;  %v4091_v46 = vadd.f32 %v11411_v55, %v4090_v47  ;;  %v4705_v47 = vpack.c.b16 %v4699_v29, %v4698_v41  ;;  %v4425_v24 = vpack.c.bf16 %v4227_v54, %v4227_v54 }
 0x8c0   : > { %v4730_v17 = vsel %vm1072_vm1, %v4707_v11, 0  ;;  %v4426_v11 = vpack.c.bf16 %v4229_v4, %v4229_v4 }
 0x8c1   : > { %4736 = vmatpush.bf16.xpose.msra.mxu3 %v4730_v17  ;;  %v4383_v51 = vpack.c.bf16 %v4091_v46, %v4091_v46  ;;  %v4724_v3 = vsel %vm1072_vm1, %v4705_v47, 0  ;;  %v4696_v15 = vunpack.c.l.b16 %v4425_v24 }
 0x8c2   : > { %v4697_v26 = vunpack.c.l.b16 %v4426_v11 }
 0x8c3   : > { %v4496_v8 = vunpack.c.l.b16 %v4383_v51  ;;  %v11477_v5 = vpop.f32.mrf.mxu1 }
 0x8c4   : > { %13444 = vst [vmem:[#allocation23_spill] sm:$0xff] %v11477_v5  ;;  %v4704_v37 = vpack.c.b16 %v4697_v26, %v4696_v15 }
 0x8c6   : > { %v4092_v21 = vpop.f32.mrf.mxu2 }
 0x8c7   : > { %v4093_v62 = vadd.f32 %v11411_v55, %v4092_v21  ;;  %v11465_v9 = vpop.f32.mrf.mxu3 }
 0x8c9   : > { %v4384_v6 = vpack.c.bf16 %v4093_v62, %v4093_v62  ;;  %8014 = vmatmul.msk.bf16.gmra.mxu0 %vm1072_vm1, %v13443_v30  ;;  %4737 = vmatpush.bf16.xpose.msra.mxu3 %v4727_v10 }
 0x8cb   : > { %v4497_v45 = vunpack.c.l.b16 %v4384_v6  ;;  %8056 = vmatmul.msk.bf16.gmra.mxu2 %vm572_vm0, %v11304_v22  ;;  %v11481_v29 = vpop.f32.mrf.mxu1  ;;  %v4721_v22 = vsel %vm1072_vm1, %v4704_v37, 0 }
 0x8cc   : > { %13445 = vst [vmem:[#allocation33_spill] sm:$0xff] %v11481_v29 }
 0x8cd   : > { %v4501_v17 = vpack.c.b16 %v4497_v45, %v4496_v8 }
 0x8ce   : > { %v4095_v35 = vpop.f32.mrf.mxu2 }
 0x8cf   : > { %8129 = vmatmul.msk.bf16.gmra.mxu1 %vm1072_vm1, %v4501_v17  ;;  %v4251_v39 = vpop.f32.mrf.mxu3 }
 0x8d1   : > { %4738 = vmatpush.bf16.xpose.msra.mxu3 %v4724_v3 }
 0x8d3   : > { %v11486_v51 = vpop.f32.mrf.mxu1 }
 0x8d4   : > { %13446 = vst [vmem:[#allocation34_spill] sm:$0xff] %v11486_v51 }
 0x8d6   : > { %v4097_v46 = vpop.f32.mrf.mxu2 }
 0x8d7   : > { %v4253_v41 = vpop.f32.mrf.mxu3 }
 0x8d9   : > { %4739 = vmatpush.bf16.xpose.msra.mxu3 %v4721_v22 }
 0x8db   : > { %8057 = vmatmul.msk.bf16.gmra.mxu2 %vm572_vm0, %v11327_v31  ;;  %v11490_v4 = vpop.f32.mrf.mxu1 }
 0x8dc   : > { %13447 = vst [vmem:[#allocation35_spill] sm:$0xff] %v11490_v4  ;;  %v4252_v4 = vadd.f32 %v11252_v16, %v4251_v39 }
 0x8de   : > { %v4100_v21 = vpop.f32.mrf.mxu2 }
 0x8df   : > { %v4256_v10 = vpop.f32.mrf.mxu3 }
 0x8e0   : > { %v4257_v31 = vadd.f32 %v11252_v16, %v4256_v10  ;;  %v4254_v10 = vadd.f32 %v11252_v16, %v4253_v41 }
 0x8e3   : > { %v11495_v8 = vpop.f32.mrf.mxu1 }
 0x8e4   : > { %13448 = vst [vmem:[#allocation36_spill] sm:$0xff] %v11495_v8 }
 0x8e6   : > { %v4102_v62 = vpop.f32.mrf.mxu2 }
 0x8e7   : > { %v4258_v54 = vpop.f32.mrf.mxu3 }
 0x8e8   : > { %v4259_v24 = vadd.f32 %v11252_v16, %v4258_v54 }
 0x8ea   : > { %v4438_v15 = vpack.c.bf16 %v4259_v24, %v4259_v24 }
 0x8eb   : > { %8058 = vmatmul.msk.bf16.gmra.mxu2 %vm572_vm0, %v11349_v44  ;;  %v4437_v44 = vpack.c.bf16 %v4257_v31, %v4257_v31  ;;  %v4096_v31 = vadd.f32 %v11411_v55, %v4095_v35  ;;  %v11510_v24 = vpop.f32.mrf.mxu1  ;;  %v4247_v35 = vadd.f32 %v11252_v16, %v11457_v27  ;;  %v4101_v27 = vadd.f32 %v11411_v55, %v4100_v21 }
 0x8ec   : > { %13449 = vst [vmem:[#allocation37_spill] sm:$0xff] %v11510_v24 }
 0x8ed   : > { %v4793_v54 = vunpack.c.l.b16 %v4437_v44 }
 0x8ee   : > { %v11492_v6 = vpop.f32.mrf.mxu2 }
 0x8ef   : > { %v4261_v30 = vpop.f32.mrf.mxu3 }
 0x8f0   : > { %v4262_v47 = vadd.f32 %v11252_v16, %v4261_v30  ;;  %v4098_v30 = vadd.f32 %v11411_v55, %v4097_v46 }
 0x8f2   : > { %v4439_v11 = vpack.c.bf16 %v4262_v47, %v4262_v47  ;;  %v4794_v47 = vunpack.c.l.b16 %v4438_v15 }
 0x8f4   : > { %v4795_v26 = vunpack.c.l.b16 %v4439_v11  ;;  %v4799_v46 = vpack.c.b16 %v4794_v47, %v4793_v54 }
 0x8f6   : > { %v11497_v45 = vpop.f32.mrf.mxu2  ;;  %v4820_v41 = vsel %vm1072_vm1, %v4799_v46, 0 }
 0x8f7   : > { %v4263_v17 = vpop.f32.mrf.mxu3 }
 0x8f8   : > { %v4264_v3 = vadd.f32 %v11252_v16, %v4263_v17  ;;  %v4386_v17 = vpack.c.bf16 %v4098_v30, %v4098_v30 }
 0x8fa   : > { %v4440_v37 = vpack.c.bf16 %v4264_v3, %v4264_v3  ;;  %v4436_v3 = vpack.c.bf16 %v4254_v10, %v4254_v10  ;;  %v4584_v39 = vunpack.c.l.b16 %v4386_v17  ;;  %v4103_v10 = vadd.f32 %v11411_v55, %v4102_v62 }
 0x8fb   : > { %8059 = vmatmul.msk.bf16.gmra.mxu2 %vm572_vm0, %v11367_v49  ;;  %v4435_v49 = vpack.c.bf16 %v4252_v4, %v4252_v4  ;;  %v11520_v4 = vpop.f32.mrf.mxu1  ;;  %v4387_v17 = vpack.c.bf16 %v4101_v27, %v4101_v27  ;;  %v4106_v27 = vadd.f32 %v11411_v55, %v11492_v6 }
 0x8fc   : > { %v4796_v22 = vunpack.c.l.b16 %v4440_v37  ;;  %v4385_v37 = vpack.c.bf16 %v4096_v31, %v4096_v31  ;;  %v4792_v23 = vunpack.c.l.b16 %v4436_v3  ;;  %13450 = vst [vmem:[#allocation38_spill] sm:$0xff] %v11520_v4  ;;  %v11525_v31 = vpop.f32.mrf.mxu0  ;;  %v9028_v4 = vld [vmem:[#allocation2 + $0x78] sm:$0xff] }
 0x8fd   : > { %v4791_v2 = vunpack.c.l.b16 %v4435_v49  ;;  %13451 = vst [vmem:[#allocation39_spill] sm:$0xff] %v11525_v31 }
 0x8fe   : > { %v11506_v29 = vpop.f32.mrf.mxu2  ;;  %v4800_v60 = vpack.c.b16 %v4796_v22, %v4795_v26  ;;  %v4583_v44 = vunpack.c.l.b16 %v4385_v37  ;;  %v4433_v22 = vpack.c.bf16 %v4247_v35, %v4247_v35  ;;  %v4585_v37 = vunpack.c.l.b16 %v4387_v17 }
 0x8ff   : > { %v4798_v26 = vpack.c.b16 %v4792_v23, %v4791_v2 }
 0x900   : > { %v4823_v11 = vsel %vm1072_vm1, %v4800_v60, 0  ;;  %v4249_v60 = vadd.f32 %v11252_v16, %v11465_v9  ;;  %v4591_v15 = vpack.c.b16 %v4584_v39, %v4583_v44  ;;  %v4388_v9 = vpack.c.bf16 %v4103_v10, %v4103_v10 }
 0x901   : > { %4829 = vmatpush.bf16.xpose.msrb.mxu1 %v4823_v11  ;;  %v4817_v47 = vsel %vm1072_vm1, %v4798_v26, 0  ;;  %v4789_v11 = vunpack.c.l.b16 %v4433_v22 }
 0x902   : > { %v4434_v30 = vpack.c.bf16 %v4249_v60, %v4249_v60  ;;  %v4586_v3 = vunpack.c.l.b16 %v4388_v9  ;;  %v11538_v60 = vld [vmem:[%s13346_s7 + $0x80] sm:$0xff] }
 0x903   : > { %v11529_v2 = vpop.f32.mrf.mxu1 }
 0x904   : > { %v4790_v16 = vunpack.c.l.b16 %v4434_v30  ;;  %13452 = vst [vmem:[#allocation40_spill] sm:$0xff] %v11529_v2  ;;  %v11531_v62 = vpop.f32.mrf.mxu0  ;;  %v4592_v44 = vpack.c.b16 %v4586_v3, %v4585_v37  ;;  %v4108_v30 = vadd.f32 %v11411_v55, %v11497_v45  ;;  %v11556_v45 = vld [vmem:[%s13346_s7 + $0x88] sm:$0xff] }
 0x905   : > { %13453 = vst [vmem:[#allocation41_spill] sm:$0xff] %v11531_v62 }
 0x906   : > { %v11513_v40 = vpop.f32.mrf.mxu2  ;;  %v4797_v49 = vpack.c.b16 %v4790_v16, %v4789_v11  ;;  %v9004_v11 = vld [vmem:[#allocation2] sm:$0xff]  ;;  %v4390_v17 = vpack.c.bf16 %v4108_v30, %v4108_v30 }
 0x908   : > { %v4814_v21 = vsel %vm1072_vm1, %v4797_v49, 0  ;;  %v4389_v49 = vpack.c.bf16 %v4106_v27, %v4106_v27 }
 0x909   : > { %4830 = vmatpush.bf16.xpose.msrb.mxu1 %v4820_v41 }
 0x90b   : > { %8130 = vmatmul.msk.bf16.vlgmr.msra.gmra.mxu2 %vm1072_vm1, %v4591_v15 }
 0x90c   : > { %v11549_v9 = vpop.f32.mrf.mxu0 }
 0x90d   : > { %13454 = vst [vmem:[#allocation42_spill] sm:$0xff] %v11549_v9 }
 0x90e   : > { %v4115_v54 = vpop.f32.mrf.mxu2 }
 0x90f   : > { %v4116_v23 = vadd.f32 %v11411_v55, %v4115_v54 }
 0x911   : > { %4831 = vmatpush.bf16.xpose.msrb.mxu1 %v4817_v47  ;;  %v4393_v39 = vpack.c.bf16 %v4116_v23, %v4116_v23 }
 0x913   : > { %v4676_v15 = vunpack.c.l.b16 %v4393_v39 }
 0x916   : > { %v4117_v46 = vpop.f32.mrf.mxu2 }
 0x917   : > { %v4118_v41 = vadd.f32 %v11411_v55, %v4117_v46  ;;  %v4588_v46 = vunpack.c.l.b16 %v4390_v17  ;;  %v4113_v17 = vadd.f32 %v11411_v55, %v11513_v40 }
 0x919   : > { %v4394_v35 = vpack.c.bf16 %v4118_v41, %v4118_v41  ;;  %4832 = vmatpush.bf16.xpose.msrb.mxu1 %v4814_v21  ;;  %v4587_v41 = vunpack.c.l.b16 %v4389_v49 }
 0x91b   : > { %v4677_v26 = vunpack.c.l.b16 %v4394_v35  ;;  %8131 = vmatmul.msk.bf16.gmra.mxu2 %vm1072_vm1, %v4592_v44  ;;  %v9005_v35 = vld [vmem:[#allocation2 + $0x8] sm:$0xff] }
 0x91c   : > { %v4555_v22 = vpop.f32.mrf.mxu1 }
 0x91d   : > { %v4684_v10 = vpack.c.b16 %v4677_v26, %v4676_v15  ;;  %v4556_v54 = vadd.f32 %v11538_v60, %v4555_v22  ;;  %v4593_v26 = vpack.c.b16 %v4588_v46, %v4587_v41  ;;  %v4111_v46 = vadd.f32 %v11411_v55, %v11506_v29 }
 0x91e   : > { %v4120_v47 = vpop.f32.mrf.mxu2  ;;  %v4392_v41 = vpack.c.bf16 %v4113_v17, %v4113_v17 }
 0x91f   : > { %8134 = vmatmul.msk.bf16.vlgmr.msra.gmra.mxu3 %vm1072_vm1, %v4684_v10  ;;  %v11547_v16 = vadd.f32 %v9004_v11, %v4556_v54  ;;  %v4121_v6 = vadd.f32 %v11411_v55, %v4120_v47  ;;  %v11568_v10 = vld [vmem:[%s13346_s7 + $0x90] sm:$0xff]  ;;  %v11570_v54 = vpop.f32.mrf.mxu0 }
 0x920   : > { %13455 = vst [vmem:[#allocation43_spill] sm:$0xff] %v11570_v54  ;;  %v9037_v54 = vld [vmem:[%s9233_s13 + $0x68] sm:$0xff] }
 0x921   : > { %v4886_v23 = vsel %vm1437_vm2, %v11547_v16, -inf  ;;  %v4395_v21 = vpack.c.bf16 %v4121_v6, %v4121_v6  ;;  %v8354_v6 = vld [vmem:[%s13342_s3 + $0x28] sm:$0xff] }
 0x922   : > { %4887 = vmax.xlane.f32.xlu2 %v4886_v23  ;;  %4294 = vmatpush.bf16.msrb.mxu0 %v8354_v6 }
 0x923   : > { %v4678_v47 = vunpack.c.l.b16 %v4395_v21  ;;  %v11589_v21 = vld [vmem:[%s13346_s7 + $0x98] sm:$0xff] }
 0x924   : > { %v4557_v3 = vpop.f32.mrf.mxu1 }
 0x925   : > { %v4558_v37 = vadd.f32 %v11556_v45, %v4557_v3 }
 0x926   : > { %v4122_v39 = vpop.f32.mrf.mxu2 }
 0x927   : > { %v4123_v44 = vadd.f32 %v11411_v55, %v4122_v39  ;;  %v11561_v15 = vadd.f32 %v9005_v35, %v4558_v37  ;;  %v9006_v37 = vld [vmem:[#allocation2 + $0x10] sm:$0xff]  ;;  %v8353_v35 = vld [vmem:[%s13342_s3 + $0x20] sm:$0xff] }
 0x928   : > { %4295 = vmatpush.bf16.msrb.mxu0 %v8353_v35 }
 0x929   : > { %v4396_v22 = vpack.c.bf16 %v4123_v44, %v4123_v44  ;;  %v4889_v30 = vsel %vm1437_vm2, %v11561_v15, -inf  ;;  %v4391_v44 = vpack.c.bf16 %v4111_v46, %v4111_v46 }
 0x92a   : > { %4890 = vmax.xlane.f32.xlu0 %v4889_v30  ;;  %v4590_v30 = vunpack.c.l.b16 %v4392_v41  ;;  %v11608_v41 = vld [vmem:[%s13346_s7 + $0xa0] sm:$0xff] }
 0x92b   : > { %v4679_v27 = vunpack.c.l.b16 %v4396_v22  ;;  %8132 = vmatmul.msk.bf16.gmra.mxu2 %vm1072_vm1, %v4593_v26  ;;  %v11595_v22 = vpop.f32.mrf.mxu0 }
 0x92c   : > { %v4560_v11 = vpop.f32.mrf.mxu1  ;;  %13456 = vst [vmem:[#allocation44_spill] sm:$0xff] %v11595_v22 }
 0x92d   : > { %v4685_v23 = vpack.c.b16 %v4679_v27, %v4678_v47  ;;  %v4561_v49 = vadd.f32 %v11568_v10, %v4560_v11  ;;  %v4589_v11 = vunpack.c.l.b16 %v4391_v44 }
 0x92e   : > { %v4125_v3 = vpop.f32.mrf.mxu2 }
 0x92f   : > { %8135 = vmatmul.msk.bf16.gmra.mxu3 %vm1072_vm1, %v4685_v23  ;;  %v11582_v39 = vadd.f32 %v9006_v37, %v4561_v49  ;;  %v4126_v29 = vadd.f32 %v11411_v55, %v4125_v3  ;;  %v9007_v49 = vld [vmem:[#allocation2 + $0x18] sm:$0xff]  ;;  %v9008_v3 = vld [vmem:[%s9233_s13] sm:$0xff]  ;;  %v4594_v46 = vpack.c.b16 %v4590_v30, %v4589_v11 }
 0x930   : > { %8102 = vmatmul.msk.bf16.vlgmr.msrb.gmra.mxu0 %vm572_vm0, %v9008_v3  ;;  %v9009_v11 = vld [vmem:[#allocation2 + $0x20] sm:$0xff] }
 0x931   : > { %v4892_v40 = vsel %vm1437_vm2, %v11582_v39, -inf  ;;  %v4397_v17 = vpack.c.bf16 %v4126_v29, %v4126_v29 }
 0x932   : > { %4893 = vmax.xlane.f32.xlu1 %v4892_v40 }
 0x933   : > { %v4680_v44 = vunpack.c.l.b16 %v4397_v17  ;;  %v11612_v30 = vpop.f32.mrf.mxu0  ;;  %v11622_v17 = vld [vmem:[%s13346_s7 + $0xa8] sm:$0xff] }
 0x934   : > { %v4562_v26 = vpop.f32.mrf.mxu1  ;;  %13457 = vst [vmem:[#allocation45_spill] sm:$0xff] %v11612_v30 }
 0x935   : > { %v4563_v47 = vadd.f32 %v11589_v21, %v4562_v26 }
 0x936   : > { %v4127_v27 = vpop.f32.mrf.mxu2 }
 0x937   : > { %v4128_v23 = vadd.f32 %v11411_v55, %v4127_v27  ;;  %v11599_v6 = vadd.f32 %v9007_v49, %v4563_v47 }
 0x939   : > { %v4398_v37 = vpack.c.bf16 %v4128_v23, %v4128_v23  ;;  %v4895_v40 = vsel %vm1437_vm2, %v11599_v6, -inf }
 0x93a   : > { %4896 = vmax.xlane.f32.xlu2 %v4895_v40 }
 0x93b   : > { %v4681_v29 = vunpack.c.l.b16 %v4398_v37  ;;  %8133 = vmatmul.msk.bf16.gmra.mxu2 %vm1072_vm1, %v4594_v46 }
 0x93c   : > { %v4565_v35 = vpop.f32.mrf.mxu1 }
 0x93d   : > { %v4686_v26 = vpack.c.b16 %v4681_v29, %v4680_v44  ;;  %v4566_v47 = vadd.f32 %v11608_v41, %v4565_v35  ;;  %v9010_v35 = vld [vmem:[#allocation2 + $0x28] sm:$0xff] }
 0x93e   : > { %v4130_v27 = vpop.f32.mrf.mxu2 }
 0x93f   : > { %8136 = vmatmul.msk.bf16.gmra.mxu3 %vm1072_vm1, %v4686_v26  ;;  %v11615_v23 = vadd.f32 %v9009_v11, %v4566_v47  ;;  %v4131_v3 = vadd.f32 %v11411_v55, %v4130_v27  ;;  %v9011_v47 = vld [vmem:[%s9233_s13 + $0x8] sm:$0xff]  ;;  %v11631_v11 = vpop.f32.mrf.mxu0  ;;  %v11638_v27 = vld [vmem:[%s13346_s7 + $0xb0] sm:$0xff] }
 0x940   : > { %8103 = vmatmul.msk.bf16.gmra.mxu0 %vm572_vm0, %v9011_v47  ;;  %13458 = vst [vmem:[#allocation46_spill] sm:$0xff] %v11631_v11 }
 0x941   : > { %v4898_v49 = vsel %vm1437_vm2, %v11615_v23, -inf  ;;  %v4399_v44 = vpack.c.bf16 %v4131_v3, %v4131_v3 }
 0x942   : > { %4899 = vmax.xlane.f32.xlu0 %v4898_v49 }
 0x943   : > { %v4682_v3 = vunpack.c.l.b16 %v4399_v44  ;;  %v11649_v44 = vld [vmem:[%s13346_s7 + $0xb8] sm:$0xff] }
 0x944   : > { %v4567_v46 = vpop.f32.mrf.mxu1 }
 0x945   : > { %v4568_v37 = vadd.f32 %v11622_v17, %v4567_v46 }
 0x946   : > { %v4132_v40 = vpop.f32.mrf.mxu2 }
 0x947   : > { %v4133_v29 = vadd.f32 %v11411_v55, %v4132_v40  ;;  %v11627_v26 = vadd.f32 %v9010_v35, %v4568_v37 }
 0x949   : > { %v4400_v49 = vpack.c.bf16 %v4133_v29, %v4133_v29  ;;  %v4901_v2 = vsel %vm1437_vm2, %v11627_v26, -inf  ;;  %v9012_v29 = vld [vmem:[#allocation2 + $0x30] sm:$0xff] }
 0x94a   : > { %4902 = vmax.xlane.f32.xlu1 %v4901_v2 }
 0x94b   : > { %v4683_v46 = vunpack.c.l.b16 %v4400_v49  ;;  %v11651_v49 = vpop.f32.mrf.mxu0 }
 0x94c   : > { %v4570_v40 = vpop.f32.mrf.mxu1  ;;  %13459 = vst [vmem:[#allocation47_spill] sm:$0xff] %v11651_v49 }
 0x94d   : > { %v4687_v37 = vpack.c.b16 %v4683_v46, %v4682_v3  ;;  %v4571_v35 = vadd.f32 %v11638_v27, %v4570_v40 }
 0x94e   : > { %v4135_v24 = vpop.f32.mrf.mxu2 }
 0x94f   : > { %8137 = vmatmul.msk.bf16.gmra.mxu3 %vm1072_vm1, %v4687_v37  ;;  %v11642_v47 = vadd.f32 %v9012_v29, %v4571_v35  ;;  %v4136_v3 = vadd.f32 %v11411_v55, %v4135_v24  ;;  %v9013_v29 = vld [vmem:[#allocation2 + $0x38] sm:$0xff] }
 0x951   : > { %v4904_v2 = vsel %vm1437_vm2, %v11642_v47, -inf  ;;  %v4401_v11 = vpack.c.bf16 %v4136_v3, %v4136_v3 }
 0x952   : > { %4905 = vmax.xlane.f32.xlu2 %v4904_v2  ;;  %v9014_v2 = vld [vmem:[%s9233_s13 + $0x10] sm:$0xff] }
 0x953   : > { %8104 = vmatmul.msk.bf16.gmra.mxu0 %vm572_vm0, %v9014_v2  ;;  %v4769_v24 = vunpack.c.l.b16 %v4401_v11  ;;  %v11662_v56 = vpop.f32.mrf.mxu0  ;;  %v9015_v2 = vld [vmem:[%s9233_s13 + $0x18] sm:$0xff] }
 0x954   : > { %v4572_v46 = vpop.f32.mrf.mxu1  ;;  %13460 = vst [vmem:[#allocation48_spill] sm:$0xff] %v11662_v56 }
 0x955   : > { %v4573_v40 = vadd.f32 %v11649_v44, %v4572_v46 }
 0x956   : > { %v4137_v37 = vpop.f32.mrf.mxu2 }
 0x957   : > { %v4138_v35 = vadd.f32 %v11411_v55, %v4137_v37  ;;  %v11656_v22 = vadd.f32 %v9013_v29, %v4573_v40 }
 0x959   : > { %v4402_v9 = vpack.c.bf16 %v4138_v35, %v4138_v35  ;;  %v4907_v31 = vsel %vm1437_vm2, %v11656_v22, -inf }
 0x95a   : > { %4908 = vmax.xlane.f32.xlu0 %v4907_v31 }
 0x95b   : > { %v4770_v63 = vunpack.c.l.b16 %v4402_v9  ;;  %v11666_v7 = vpop.f32.mrf.mxu0 }
 0x95c   : > { %13461 = vst [vmem:[#allocation49_spill] sm:$0xff] %v11666_v7  ;;  %v9033_v7 = vld [vmem:[#allocation2 + $0x70] sm:$0xff] }
 0x95d   : > { %v4777_v46 = vpack.c.b16 %v4770_v63, %v4769_v24 }
 0x95e   : > { %v4140_v3 = vpop.f32.mrf.mxu2 }
 0x95f   : > { %8138 = vmatmul.msk.bf16.vlgmr.msrb.gmra.mxu1 %vm1072_vm1, %v4777_v46  ;;  %v4141_v40 = vadd.f32 %v11411_v55, %v4140_v3 }
 0x961   : > { %v4403_v37 = vpack.c.bf16 %v4141_v40, %v4141_v40 }
 0x963   : > { %8105 = vmatmul.msk.bf16.gmra.mxu0 %vm572_vm0, %v9015_v2  ;;  %v4771_v31 = vunpack.c.l.b16 %v4403_v37  ;;  %v11672_v24 = vpop.f32.mrf.mxu0 }
 0x964   : > { %13462 = vst [vmem:[#allocation50_spill] sm:$0xff] %v11672_v24 }
 0x966   : > { %v4142_v29 = vpop.f32.mrf.mxu2 }
 0x967   : > { %v4143_v35 = vadd.f32 %v11411_v55, %v4142_v29  ;;  %v9016_v29 = vld [vmem:[%s9233_s13 + $0x20] sm:$0xff] }
 0x969   : > { %v4404_v9 = vpack.c.bf16 %v4143_v35, %v4143_v35 }
 0x96b   : > { %v4772_v11 = vunpack.c.l.b16 %v4404_v9  ;;  %v11678_v35 = vpop.f32.mrf.mxu0 }
 0x96c   : > { %13463 = vst [vmem:[#allocation51_spill] sm:$0xff] %v11678_v35 }
 0x96d   : > { %v4778_v56 = vpack.c.b16 %v4772_v11, %v4771_v31 }
 0x96e   : > { %v4145_v63 = vpop.f32.mrf.mxu2 }
 0x96f   : > { %8139 = vmatmul.msk.bf16.gmra.mxu1 %vm1072_vm1, %v4778_v56  ;;  %v4146_v46 = vadd.f32 %v11411_v55, %v4145_v63 }
 0x971   : > { %v4405_v3 = vpack.c.bf16 %v4146_v46, %v4146_v46 }
 0x973   : > { %8106 = vmatmul.msk.bf16.gmra.mxu0 %vm572_vm0, %v9016_v29  ;;  %v4773_v2 = vunpack.c.l.b16 %v4405_v3  ;;  %v11682_v63 = vpop.f32.mrf.mxu0 }
 0x974   : > { %13464 = vst [vmem:[#allocation52_spill] sm:$0xff] %v11682_v63 }
 0x976   : > { %v4147_v40 = vpop.f32.mrf.mxu2 }
 0x977   : > { %v4148_v14 = vadd.f32 %v11411_v55, %v4147_v40 }
 0x979   : > { %v4406_v37 = vpack.c.bf16 %v4148_v14, %v4148_v14 }
 0x97b   : > { %v4774_v31 = vunpack.c.l.b16 %v4406_v37 }
 0x97d   : > { %v4779_v9 = vpack.c.b16 %v4774_v31, %v4773_v2  ;;  %v11687_v31 = vpop.f32.mrf.mxu0 }
 0x97e   : > { %v4150_v11 = vpop.f32.mrf.mxu2  ;;  %13465 = vst [vmem:[#allocation53_spill] sm:$0xff] %v11687_v31  ;;  %v9031_v31 = vld [vmem:[#allocation2 + $0xc8] sm:$0xff] }
 0x97f   : > { %8140 = vmatmul.msk.bf16.gmra.mxu1 %vm1072_vm1, %v4779_v9  ;;  %v4151_v56 = vadd.f32 %v11411_v55, %v4150_v11  ;;  %v9018_v11 = vld [vmem:[#allocation2 + $0x40] sm:$0xff] }
 0x981   : > { %v4407_v46 = vpack.c.bf16 %v4151_v56, %v4151_v56 }
 0x983   : > { %8107 = vmatmul.msk.bf16.gmra.mxu0 %vm572_vm0, %v9017_v36  ;;  %v4775_v3 = vunpack.c.l.b16 %v4407_v46 }
 0x986   : > { %v4152_v24 = vpop.f32.mrf.mxu2 }
 0x987   : > { %v4153_v40 = vadd.f32 %v11411_v55, %v4152_v24 }
 0x989   : > { %v4408_v14 = vpack.c.bf16 %v4153_v40, %v4153_v40 }
 0x98b   : > { %v4776_v29 = vunpack.c.l.b16 %v4408_v14  ;;  %v11698_v14 = vpop.f32.mrf.mxu0 }
 0x98c   : > { %13466 = vst [vmem:[#allocation54_spill] sm:$0xff] %v11698_v14 }
 0x98d   : > { %v4780_v37 = vpack.c.b16 %v4776_v29, %v4775_v3  ;;  %v9019_v3 = vld [vmem:[%s9233_s13 + $0x30] sm:$0xff] }
 0x98e   : > { %v4648_v2 = vpop.f32.mrf.mxu2 }
 0x98f   : > { %v4649_v9 = vadd.f32 %v11538_v60, %v4648_v2  ;;  %8141 = vmatmul.msk.bf16.gmra.mxu1 %vm1072_vm1, %v4780_v37 }
 0x991   : > { %v11691_v56 = vadd.f32 %v9018_v11, %v4649_v9 }
 0x993   : > { %v4910_v55 = vsel %vm1437_vm2, %v11691_v56, -inf  ;;  %8108 = vmatmul.msk.bf16.gmra.mxu0 %vm572_vm0, %v9019_v3  ;;  %v9020_v3 = vld [vmem:[#allocation2 + $0x48] sm:$0xff] }
 0x994   : > { %4911 = vmax.xlane.f32.xlu0 %v4910_v55 }
 0x995   : > { %v4888_v36 = vpop.xlane.xlu2 %4887 }
 0x996   : > { %v4982_v24 = vsub.f32 %v11547_v16, %v4888_v36  ;;  %v4650_v46 = vpop.f32.mrf.mxu2  ;;  %v11706_v36 = vpop.f32.mrf.mxu0 }
 0x997   : > { %v4651_v55 = vadd.f32 %v11556_v45, %v4650_v46  ;;  %13467 = vst [vmem:[#allocation55_spill] sm:$0xff] %v11706_v36  ;;  %v9029_v36 = vld [vmem:[%s9233_s13 + $0x50] sm:$0xff] }
 0x998   : > { %v5014_v40 = vmul.f32 1.442695, %v4982_v24 }
 0x99a   : > { %8665 = vpow2.f32 %v5014_v40  ;;  %v11708_v40 = vadd.f32 %v9020_v3, %v4651_v55 }
 0x99d   : > { %v4891_v29 = vpop.xlane.xlu0 %4890 }
 0x99e   : > { %v4983_v37 = vsub.f32 %v11561_v15, %v4891_v29  ;;  %v4653_v2 = vpop.f32.mrf.mxu2  ;;  %v11720_v55 = vpop.f32.mrf.mxu0 }
 0x99f   : > { %v4654_v46 = vadd.f32 %v11568_v10, %v4653_v2  ;;  %13468 = vst [vmem:[#allocation56_spill] sm:$0xff] %v11720_v55  ;;  %v9024_v55 = vld [vmem:[%s9233_s13 + $0x40] sm:$0xff] }
 0x9a0   : > { %v11701_v9 = vpop.eup %8665  ;;  %v5016_v11 = vmul.f32 1.442695, %v4983_v37  ;;  %v9021_v37 = vld [vmem:[%s9233_s13 + $0x38] sm:$0xff] }
 0x9a1   : > { %v5078_v16 = vsel %vm1437_vm2, %v11701_v9, 0.0 }
 0x9a2   : > { %8667 = vpow2.f32 %v5016_v11  ;;  %5079 = vadd.xlane.f32.xlu1 %v5078_v16  ;;  %v4913_v16 = vsel %vm1437_vm2, %v11708_v40, -inf }
 0x9a3   : > { %8109 = vmatmul.msk.bf16.gmra.mxu0 %vm572_vm0, %v9021_v37 }
 0x9a5   : > { %v4894_v24 = vpop.xlane.xlu1 %4893 }
 0x9a6   : > { %v4984_v15 = vsub.f32 %v11582_v39, %v4894_v24  ;;  %v4655_v29 = vpop.f32.mrf.mxu2  ;;  %v9022_v24 = vld [vmem:[#allocation2 + $0x50] sm:$0xff] }
 0x9a7   : > { %v11722_v3 = vadd.f32 %v9022_v24, %v4654_v46  ;;  %v4656_v42 = vadd.f32 %v11589_v21, %v4655_v29 }
 0x9a8   : > { %v11711_v14 = vpop.eup %8667  ;;  %v5018_v63 = vmul.f32 1.442695, %v4984_v15 }
 0x9a9   : > { %v5081_v11 = vsel %vm1437_vm2, %v11711_v14, 0.0 }
 0x9aa   : > { %8669 = vpow2.f32 %v5018_v63  ;;  %5082 = vadd.xlane.f32.xlu2 %v5081_v11  ;;  %4914 = vmax.xlane.f32.xlu1 %v4913_v16  ;;  %v4916_v11 = vsel %vm1437_vm2, %v11722_v3, -inf  ;;  %v9023_v16 = vld [vmem:[#allocation2 + $0x58] sm:$0xff] }
 0x9ab   : > { %v11732_v24 = vadd.f32 %v9023_v16, %v4656_v42 }
 0x9ad   : > { %v4897_v39 = vpop.xlane.xlu2 %4896 }
 0x9ae   : > { %v4985_v15 = vsub.f32 %v11599_v6, %v4897_v39  ;;  %v4658_v0 = vpop.f32.mrf.mxu2  ;;  %v11734_v6 = vpop.f32.mrf.mxu0 }
 0x9af   : > { %v4659_v57 = vadd.f32 %v11608_v41, %v4658_v0 }
 0x9b0   : > { %v11725_v37 = vpop.eup %8669  ;;  %v5020_v2 = vmul.f32 1.442695, %v4985_v15 }
 0x9b1   : > { %v5084_v63 = vsel %vm1437_vm2, %v11725_v37, 0.0 }
 0x9b2   : > { %8671 = vpow2.f32 %v5020_v2  ;;  %5085 = vadd.xlane.f32.xlu2 %v5084_v63  ;;  %4917 = vmax.xlane.f32.xlu1 %v4916_v11  ;;  %v4919_v2 = vsel %vm1437_vm2, %v11732_v24, -inf }
 0x9b3   : > { %8110 = vmatmul.msk.bf16.gmra.mxu0 %vm572_vm0, %v9024_v55 }
 0x9b5   : > { %v4900_v46 = vpop.xlane.xlu0 %4899 }
 0x9b6   : > { %v4986_v39 = vsub.f32 %v11615_v23, %v4900_v46  ;;  %v4660_v42 = vpop.f32.mrf.mxu2  ;;  %v9025_v23 = vld [vmem:[#allocation2 + $0x60] sm:$0xff]  ;;  %v11748_v16 = vpop.f32.mrf.mxu0 }
 0x9b7   : > { %v11746_v46 = vadd.f32 %v9025_v23, %v4659_v57  ;;  %v4661_v13 = vadd.f32 %v11622_v17, %v4660_v42  ;;  %v9026_v23 = vld [vmem:[#allocation2 + $0x68] sm:$0xff] }
 0x9b8   : > { %v11737_v15 = vpop.eup %8671  ;;  %v5022_v29 = vmul.f32 1.442695, %v4986_v39 }
 0x9b9   : > { %v5087_v63 = vsel %vm1437_vm2, %v11737_v15, 0.0  ;;  %v11758_v12 = vadd.f32 %v9026_v23, %v4661_v13 }
 0x9ba   : > { %8673 = vpow2.f32 %v5022_v29  ;;  %4920 = vmax.xlane.f32.xlu2 %v4919_v2  ;;  %5088 = vadd.xlane.f32.xlu0 %v5087_v63  ;;  %v4922_v29 = vsel %vm1437_vm2, %v11746_v46, -inf }
 0x9bd   : > { %v4903_v11 = vpop.xlane.xlu1 %4902 }
 0x9be   : > { %v4987_v55 = vsub.f32 %v11627_v26, %v4903_v11  ;;  %v4663_v57 = vpop.f32.mrf.mxu2  ;;  %v11760_v26 = vpop.f32.mrf.mxu0 }
 0x9c0   : > { %v11751_v39 = vpop.eup %8673  ;;  %v5024_v0 = vmul.f32 1.442695, %v4987_v55 }
 0x9c1   : > { %v5090_v2 = vsel %vm1437_vm2, %v11751_v39, 0.0 }
 0x9c2   : > { %8675 = vpow2.f32 %v5024_v0  ;;  %4923 = vmax.xlane.f32.xlu2 %v4922_v29  ;;  %5091 = vadd.xlane.f32.xlu0 %v5090_v2  ;;  %v4925_v29 = vsel %vm1437_vm2, %v11758_v12, -inf }
 0x9c3   : > { %8111 = vmatmul.msk.bf16.gmra.mxu0 %vm572_vm0, %v9027_v25 }
 0x9c5   : > { %v4906_v63 = vpop.xlane.xlu2 %4905 }
 0x9c6   : > { %v4988_v11 = vsub.f32 %v11642_v47, %v4906_v63  ;;  %v4304_v2 = vpop.f32.mrf.mxu0  ;;  %v4665_v23 = vpop.f32.mrf.mxu2 }
 0x9c7   : > { %v4666_v25 = vadd.f32 %v11649_v44, %v4665_v23 }
 0x9c8   : > { %v11763_v55 = vpop.eup %8675  ;;  %v5026_v42 = vmul.f32 1.442695, %v4988_v11 }
 0x9c9   : > { %v5093_v0 = vsel %vm1437_vm2, %v11763_v55, 0.0 }
 0x9ca   : > { %8677 = vpow2.f32 %v5026_v42  ;;  %5094 = vadd.xlane.f32.xlu1 %v5093_v0  ;;  %4926 = vmax.xlane.f32.xlu0 %v4925_v29  ;;  %v11777_v42 = vadd.f32 %v9028_v4, %v4666_v25 }
 0x9cd   : > { %v4909_v13 = vpop.xlane.xlu0 %4908 }
 0x9ce   : > { %v4989_v47 = vsub.f32 %v11656_v22, %v4909_v13  ;;  %v4931_v13 = vsel %vm1437_vm2, %v11777_v42, -inf }
 0x9d0   : > { %v11772_v63 = vpop.eup %8677  ;;  %v5028_v11 = vmul.f32 1.442695, %v4989_v47  ;;  %v4307_v0 = vpop.f32.mrf.mxu0  ;;  %v9030_v47 = vld [vmem:[#allocation2 + $0xc0] sm:$0xff] }
 0x9d1   : > { %v5096_v43 = vsel %vm1437_vm2, %v11772_v63, 0.0 }
 0x9d2   : > { %8679 = vpow2.f32 %v5028_v11  ;;  %5097 = vadd.xlane.f32.xlu0 %v5096_v43 }
 0x9d3   : > { %8112 = vmatmul.msk.bf16.gmra.mxu0 %vm572_vm0, %v9029_v36  ;;  %v11795_v36 = vld [vmem:[%s13345_s6 + $0x2] ss:$0 sm:$0xff] }
 0x9d8   : > { %v11779_v29 = vpop.eup %8679  ;;  %v4309_v4 = vpop.f32.mrf.mxu0 }
 0x9d9   : > { %v5099_v22 = vsel %vm1437_vm2, %v11779_v29, 0.0 }
 0x9da   : > { %5100 = vadd.xlane.f32.xlu1 %v5099_v22  ;;  %4932 = vmax.xlane.f32.xlu0 %v4931_v13 }
 0x9dc   : > { %v4834_v23 = vpop.f32.mrf.mxu1 }
 0x9dd   : > { %v4835_v43 = vadd.f32 %v11538_v60, %v4834_v23 }
 0x9df   : > { %v11788_v11 = vadd.f32 %v9030_v47, %v4835_v43  ;;  %v9032_v43 = vld [vmem:[%s9233_s13 + $0x58] sm:$0xff]  ;;  %v4664_v47 = vadd.f32 %v11638_v27, %v4663_v57 }
 0x9e0   : > { %v4312_v13 = vpop.f32.mrf.mxu0 }
 0x9e1   : > { %v4958_v25 = vsel %vm1437_vm2, %v11788_v11, -inf  ;;  %v4313_v23 = vadd.f32 %v11795_v36, %v4312_v13  ;;  %v11806_v50 = vadd.f32 %v9033_v7, %v4664_v47  ;;  %v9034_v13 = vld [vmem:[#allocation2 + $0xd0] sm:$0xff] }
 0x9e2   : > { %4959 = vmax.xlane.f32.xlu1 %v4958_v25 }
 0x9e3   : > { %8113 = vmatmul.msk.bf16.gmra.mxu0 %vm572_vm0, %v9032_v43  ;;  %v4447_v5 = vpack.c.bf16 %v4313_v23, %v4313_v23  ;;  %v4928_v57 = vsel %vm1437_vm2, %v11806_v50, -inf }
 0x9e4   : > { %v4836_v8 = vpop.f32.mrf.mxu1 }
 0x9e5   : > { %v4837_v22 = vadd.f32 %v11556_v45, %v4836_v8  ;;  %v5304_v43 = vunpack.c.l.b16 %v4447_v5  ;;  %v4303_v5 = vadd.f32 %v11795_v36, %v11760_v26 }
 0x9e7   : > { %v11798_v51 = vadd.f32 %v9031_v31, %v4837_v22 }
 0x9e8   : > { %v4314_v31 = vpop.f32.mrf.mxu0 }
 0x9e9   : > { %v4961_v25 = vsel %vm1437_vm2, %v11798_v51, -inf  ;;  %v4315_v22 = vadd.f32 %v11795_v36, %v4314_v31 }
 0x9ea   : > { %4962 = vmax.xlane.f32.xlu2 %v4961_v25  ;;  %v4308_v25 = vadd.f32 %v11795_v36, %v4307_v0 }
 0x9eb   : > { %v4448_v58 = vpack.c.bf16 %v4315_v22, %v4315_v22  ;;  %v4305_v22 = vadd.f32 %v11795_v36, %v4304_v2  ;;  %v4298_v2 = vadd.f32 %v11795_v36, %v11734_v6 }
 0x9ec   : > { %v4839_v35 = vpop.f32.mrf.mxu1 }
 0x9ed   : > { %v4840_v8 = vadd.f32 %v11568_v10, %v4839_v35  ;;  %v5305_v7 = vunpack.c.l.b16 %v4448_v58  ;;  %v9036_v58 = vld [vmem:[%s9233_s13 + $0x60] sm:$0xff] }
 0x9ef   : > { %v11810_v49 = vadd.f32 %v9034_v13, %v4840_v8  ;;  %v5309_v35 = vpack.c.b16 %v5305_v7, %v5304_v43  ;;  %v4310_v8 = vadd.f32 %v11795_v36, %v4309_v4  ;;  %v9035_v13 = vld [vmem:[#allocation2 + $0xd8] sm:$0xff]  ;;  %v4445_v43 = vpack.c.bf16 %v4308_v25, %v4308_v25 }
 0x9f0   : > { %v4443_v4 = vpack.c.bf16 %v4303_v5, %v4303_v5  ;;  %v4444_v7 = vpack.c.bf16 %v4305_v22, %v4305_v22 }
 0x9f1   : > { %v4964_v23 = vsel %vm1437_vm2, %v11810_v49, -inf  ;;  %5330 = vmatpush.bf16.msrb.mxu2 %v5309_v35  ;;  %v4446_v0 = vpack.c.bf16 %v4310_v8, %v4310_v8  ;;  %v4300_v35 = vadd.f32 %v11795_v36, %v11748_v16  ;;  %v4441_v8 = vpack.c.bf16 %v4298_v2, %v4298_v2 }
 0x9f2   : > { %4929 = vmax.xlane.f32.xlu2 %v4928_v57  ;;  %4965 = vmax.xlane.f32.xlu1 %v4964_v23  ;;  %v11824_v57 = vpop.f32.mrf.mxu0 }
 0x9f3   : > { %8114 = vmatmul.msk.bf16.gmra.mxu0 %vm572_vm0, %v9036_v58  ;;  %v5303_v26 = vunpack.c.l.b16 %v4446_v0  ;;  %v4442_v1 = vpack.c.bf16 %v4300_v35, %v4300_v35  ;;  %v5298_v5 = vunpack.c.l.b16 %v4441_v8  ;;  %v9039_v8 = vld [vmem:[%s9233_s13 + $0x70] sm:$0xff] }
 0x9f4   : > { %v4841_v47 = vpop.f32.mrf.mxu1 }
 0x9f5   : > { %v4842_v31 = vadd.f32 %v11589_v21, %v4841_v47  ;;  %v5302_v47 = vunpack.c.l.b16 %v4445_v43  ;;  %v5299_v22 = vunpack.c.l.b16 %v4442_v1 }
 0x9f7   : > { %v11822_v30 = vadd.f32 %v9035_v13, %v4842_v31  ;;  %v5300_v31 = vunpack.c.l.b16 %v4443_v4  ;;  %v5301_v13 = vunpack.c.l.b16 %v4444_v7  ;;  %v5308_v58 = vpack.c.b16 %v5303_v26, %v5302_v47  ;;  %v4741_v47 = vpop.f32.mrf.mxu3 }
 0x9f8   : > { %v5306_v4 = vpack.c.b16 %v5299_v22, %v5298_v5  ;;  %v4742_v1 = vadd.f32 %v11538_v60, %v4741_v47  ;;  %v9040_v47 = vld [vmem:[#allocation2 + $0xe8] sm:$0xff] }
 0x9f9   : > { %v4967_v23 = vsel %vm1437_vm2, %v11822_v30, -inf  ;;  %5331 = vmatpush.bf16.msrb.mxu2 %v5308_v58 }
 0x9fa   : > { %4968 = vmax.xlane.f32.xlu2 %v4967_v23  ;;  %v11834_v25 = vpop.f32.mrf.mxu0  ;;  %v5307_v23 = vpack.c.b16 %v5301_v13, %v5300_v31  ;;  %v9038_v13 = vld [vmem:[#allocation2 + $0x80] sm:$0xff] }
 0x9fb   : > { %v11850_v58 = vadd.f32 %v9038_v13, %v4742_v1 }
 0x9fc   : > { %v11839_v6 = vpop.f32.mrf.mxu1 }
 0x9fd   : > { %5332 = vmatpush.bf16.msrb.mxu2 %v5307_v23  ;;  %v4934_v60 = vsel %vm1437_vm2, %v11850_v58, -inf  ;;  %v4845_v28 = vadd.f32 %v11608_v41, %v11839_v6  ;;  %v9045_v6 = vld [vmem:[#allocation2 + $0xe0] sm:$0xff] }
 0x9ff   : > { %v4743_v31 = vpop.f32.mrf.mxu3 }
 0xa01   : > { %5333 = vmatpush.bf16.msrb.mxu2 %v5306_v4 }
 0xa02   : > { %v11841_v7 = vpop.f32.mrf.mxu0 }
 0xa03   : > { %8115 = vmatmul.msk.bf16.gmra.mxu0 %vm572_vm0, %v9037_v54 }
 0xa04   : > { %v4846_v54 = vpop.f32.mrf.mxu1 }
 0xa05   : > { %v4847_v23 = vadd.f32 %v11622_v17, %v4846_v54 }
 0xa07   : > { %v4912_v43 = vpop.xlane.xlu0 %4911  ;;  %v11860_v1 = vadd.f32 %v9040_v47, %v4847_v23 }
 0xa08   : > { %v4990_v0 = vsub.f32 %v11691_v56, %v4912_v43 }
 0xa0a   : > { %v5030_v16 = vmul.f32 1.442695, %v4990_v0  ;;  %v11848_v2 = vpop.f32.mrf.mxu0 }
 0xa0c   : > { %8681 = vpow2.f32 %v5030_v16  ;;  %v11857_v16 = vpop.f32.mrf.mxu1 }
 0xa12   : > { %v11843_v26 = vpop.eup %8681  ;;  %v4327_v5 = vpop.f32.mrf.mxu0 }
 0xa13   : > { %v5102_v56 = vsel %vm1437_vm2, %v11843_v26, 0.0  ;;  %8116 = vmatmul.msk.bf16.gmra.mxu0 %vm572_vm0, %v9039_v8  ;;  %v4973_v8 = vsel %vm1437_vm2, %v11860_v1, -inf }
 0xa14   : > { %5103 = vadd.xlane.f32.xlu0 %v5102_v56  ;;  %v4746_v56 = vpop.f32.mrf.mxu3 }
 0xa15   : > { %v5080_v35 = vpop.xlane.xlu1 %5079  ;;  %v4747_v13 = vadd.f32 %v11568_v10, %v4746_v56  ;;  %v4851_v10 = vpop.f32.mrf.mxu1 }
 0xa16   : > { %8683 = vrcp.f32 %v5080_v35 }
 0xa1c   : > { %4935 = vmax.xlane.f32.xlu0 %v4934_v60  ;;  %v8684_v0 = vpop.eup %8683  ;;  %v4329_v60 = vpop.f32.mrf.mxu0 }
 0xa1d   : > { %v4915_v22 = vpop.xlane.xlu1 %4914  ;;  %v5083_v43 = vpop.xlane.xlu2 %5082  ;;  %v5206_v54 = vmul.f32 %v8684_v0, %v11701_v9 }
 0xa1e   : > { %v4991_v4 = vsub.f32 %v11708_v40, %v4915_v22  ;;  %8685 = vrcp.f32 %v5083_v43 }
 0xa1f   : > { %v5238_v62 = vpack.c.bf16 %v5206_v54, %v5206_v54 }
 0xa20   : > { %v5032_v35 = vmul.f32 1.442695, %v4991_v4  ;;  %v9041_v4 = vld [vmem:[#allocation2 + $0x90] sm:$0xff] }
 0xa21   : > { %v11868_v47 = vadd.f32 %v9041_v4, %v4747_v13 }
 0xa22   : > { %8687 = vpow2.f32 %v5032_v35  ;;  %v9042_v35 = vld [vmem:[%s9233_s13 + $0x78] sm:$0xff] }
 0xa23   : > { %8117 = vmatmul.msk.bf16.gmra.mxu0 %vm572_vm0, %v9042_v35  ;;  %v4940_v13 = vsel %vm1437_vm2, %v11868_v47, -inf }
 0xa24   : > { %v8686_v53 = vpop.eup %8685  ;;  %4974 = vmax.xlane.f32.xlu0 %v4973_v8  ;;  %v5278_v8 = vunpack.c.l.b16 %v5238_v62 }
 0xa25   : > { %v5207_v40 = vmul.f32 %v8686_v53, %v11711_v14  ;;  %v4918_v22 = vpop.xlane.xlu1 %4917  ;;  %v5086_v23 = vpop.xlane.xlu2 %5085  ;;  %v4852_v14 = vadd.f32 %v11649_v44, %v4851_v10  ;;  %v4328_v10 = vadd.f32 %v11795_v36, %v4327_v5  ;;  %v4323_v5 = vadd.f32 %v11795_v36, %v11841_v7 }
 0xa26   : > { %v4992_v43 = vsub.f32 %v11722_v3, %v4918_v22  ;;  %8689 = vrcp.f32 %v5086_v23  ;;  %v4744_v22 = vadd.f32 %v11556_v45, %v4743_v31  ;;  %v4330_v45 = vadd.f32 %v11795_v36, %v4329_v60 }
 0xa27   : > { %v5239_v9 = vpack.c.bf16 %v5207_v40, %v5207_v40  ;;  %v4332_v40 = vpop.f32.mrf.mxu0 }
 0xa28   : > { %v11870_v0 = vpop.eup %8687  ;;  %v5034_v56 = vmul.f32 1.442695, %v4992_v43 }
 0xa29   : > { %v5279_v54 = vunpack.c.l.b16 %v5239_v9  ;;  %v5105_v53 = vsel %vm1437_vm2, %v11870_v0, 0.0  ;;  %v4333_v9 = vadd.f32 %v11795_v36, %v4332_v40  ;;  %v4453_v40 = vpack.c.bf16 %v4328_v10, %v4328_v10 }
 0xa2a   : > { %8691 = vpow2.f32 %v5034_v56  ;;  %5106 = vadd.xlane.f32.xlu1 %v5105_v53  ;;  %v9043_v56 = vld [vmem:[#allocation2 + $0xf8] sm:$0xff]  ;;  %v4320_v10 = vadd.f32 %v11795_v36, %v11834_v25 }
 0xa2b   : > { %v5286_v3 = vpack.c.b16 %v5279_v54, %v5278_v8  ;;  %v11884_v35 = vadd.f32 %v9043_v56, %v4852_v14  ;;  %v4325_v14 = vadd.f32 %v11795_v36, %v11848_v2  ;;  %v5387_v20 = vunpack.c.l.b16 %v4453_v40  ;;  %v4748_v40 = vpop.f32.mrf.mxu3 }
 0xa2c   : > { %4941 = vmax.xlane.f32.xlu0 %v4940_v13  ;;  %v8690_v62 = vpop.eup %8689 }
 0xa2d   : > { %v5089_v23 = vpop.xlane.xlu0 %5088  ;;  %v4921_v43 = vpop.xlane.xlu2 %4920  ;;  %8142 = vmatmul.msk.bf16.vlgmr.msrb.gmra.mxu2 %vm1437_vm2, %v5286_v3  ;;  %v5208_v31 = vmul.f32 %v8690_v62, %v11725_v37  ;;  %v9044_v3 = vld [vmem:[#allocation2 + $0x88] sm:$0xff]  ;;  %v4979_v60 = vsel %vm1437_vm2, %v11884_v35, -inf  ;;  %v4318_v62 = vadd.f32 %v11795_v36, %v11824_v57 }
 0xa2e   : > { %8693 = vrcp.f32 %v5089_v23  ;;  %v4993_v4 = vsub.f32 %v11732_v24, %v4921_v43  ;;  %v11892_v13 = vadd.f32 %v9044_v3, %v4744_v22  ;;  %v4455_v24 = vpack.c.bf16 %v4333_v9, %v4333_v9 }
 0xa2f   : > { %v4334_v37 = vpop.f32.mrf.mxu0  ;;  %v4454_v43 = vpack.c.bf16 %v4330_v45, %v4330_v45  ;;  %v4451_v3 = vpack.c.bf16 %v4323_v5, %v4323_v5 }
 0xa30   : > { %v11886_v8 = vpop.eup %8691  ;;  %v5036_v54 = vmul.f32 1.442695, %v4993_v4  ;;  %v4335_v22 = vadd.f32 %v11795_v36, %v4334_v37  ;;  %v5240_v4 = vpack.c.bf16 %v5208_v31, %v5208_v31  ;;  %v4937_v2 = vsel %vm1437_vm2, %v11892_v13, -inf }
 0xa31   : > { %v5108_v53 = vsel %vm1437_vm2, %v11886_v8, 0.0  ;;  %v5388_v31 = vunpack.c.l.b16 %v4454_v43  ;;  %v5385_v43 = vunpack.c.l.b16 %v4451_v3 }
 0xa32   : > { %8695 = vpow2.f32 %v5036_v54  ;;  %5109 = vadd.xlane.f32.xlu1 %v5108_v53  ;;  %v5389_v53 = vunpack.c.l.b16 %v4455_v24  ;;  %v4456_v45 = vpack.c.bf16 %v4335_v22, %v4335_v22  ;;  %v5280_v38 = vunpack.c.l.b16 %v5240_v4 }
 0xa33   : > { %v4449_v24 = vpack.c.bf16 %v4318_v62, %v4318_v62  ;;  %v4450_v22 = vpack.c.bf16 %v4320_v10, %v4320_v10  ;;  %v11917_v4 = vadd.f32 %v9045_v6, %v4845_v28  ;;  %v9047_v6 = vld [vmem:[#allocation2 + $0xf0] sm:$0xff] }
 0xa34   : > { %v8694_v23 = vpop.eup %8693  ;;  %4980 = vmax.xlane.f32.xlu0 %v4979_v60  ;;  %v4452_v60 = vpack.c.bf16 %v4325_v14, %v4325_v14 }
 0xa35   : > { %v5209_v9 = vmul.f32 %v8694_v23, %v11737_v15  ;;  %v5092_v7 = vpop.xlane.xlu0 %5091  ;;  %v4924_v56 = vpop.xlane.xlu2 %4923  ;;  %v5390_v23 = vunpack.c.l.b16 %v4456_v45  ;;  %v5383_v10 = vunpack.c.l.b16 %v4449_v24  ;;  %v4970_v3 = vsel %vm1437_vm2, %v11917_v4, -inf }
 0xa36   : > { %v4994_v54 = vsub.f32 %v11746_v46, %v4924_v56  ;;  %8697 = vrcp.f32 %v5092_v7  ;;  %v5393_v7 = vpack.c.b16 %v5388_v31, %v5387_v20 }
 0xa37   : > { %v5241_v37 = vpack.c.bf16 %v5209_v9, %v5209_v9  ;;  %v5394_v25 = vpack.c.b16 %v5390_v23, %v5389_v53  ;;  %v11915_v14 = vpop.f32.mrf.mxu0  ;;  %v5386_v9 = vunpack.c.l.b16 %v4452_v60  ;;  %v5384_v53 = vunpack.c.l.b16 %v4450_v22 }
 0xa38   : > { %v11909_v57 = vpop.eup %8695  ;;  %v5038_v15 = vmul.f32 1.442695, %v4994_v54 }
 0xa39   : > { %v5281_v59 = vunpack.c.l.b16 %v5241_v37  ;;  %v5111_v46 = vsel %vm1437_vm2, %v11909_v57, 0.0  ;;  %5415 = vmatpush.bf16.msrb.mxu3 %v5394_v25  ;;  %v5392_v20 = vpack.c.b16 %v5386_v9, %v5385_v43  ;;  %v9046_v37 = vld [vmem:[#allocation2 + $0x98] sm:$0xff]  ;;  %v5391_v31 = vpack.c.b16 %v5384_v53, %v5383_v10 }
 0xa3a   : > { %8699 = vpow2.f32 %v5038_v15  ;;  %4938 = vmax.xlane.f32.xlu1 %v4937_v2  ;;  %5112 = vadd.xlane.f32.xlu2 %v5111_v46 }
 0xa3b   : > { %v5287_v5 = vpack.c.b16 %v5281_v59, %v5280_v38  ;;  %v4749_v59 = vadd.f32 %v11589_v21, %v4748_v40  ;;  %v4850_v40 = vadd.f32 %v11638_v27, %v11857_v16 }
 0xa3c   : > { %v8698_v2 = vpop.eup %8697 }
 0xa3d   : > { %v5095_v56 = vpop.xlane.xlu1 %5094  ;;  %v4927_v54 = vpop.xlane.xlu0 %4926  ;;  %8143 = vmatmul.msk.bf16.gmra.mxu2 %vm1437_vm2, %v5287_v5  ;;  %5416 = vmatpush.bf16.msrb.mxu3 %v5393_v7  ;;  %v5210_v28 = vmul.f32 %v8698_v2, %v11751_v39  ;;  %v11931_v15 = vadd.f32 %v9046_v37, %v4749_v59 }
 0xa3e   : > { %8701 = vrcp.f32 %v5095_v56  ;;  %v4995_v62 = vsub.f32 %v11758_v12, %v4927_v54  ;;  %v11944_v56 = vadd.f32 %v9047_v6, %v4850_v40 }
 0xa3f   : > { %v11929_v12 = vpop.f32.mrf.mxu0  ;;  %v5242_v23 = vpack.c.bf16 %v5210_v28, %v5210_v28  ;;  %v4943_v5 = vsel %vm1437_vm2, %v11931_v15, -inf }
 0xa40   : > { %v11922_v38 = vpop.eup %8699  ;;  %v5040_v45 = vmul.f32 1.442695, %v4995_v62  ;;  %v4751_v62 = vpop.f32.mrf.mxu3  ;;  %v4976_v59 = vsel %vm1437_vm2, %v11944_v56, -inf }
 0xa41   : > { %v5114_v60 = vsel %vm1437_vm2, %v11922_v38, 0.0  ;;  %5417 = vmatpush.bf16.msrb.mxu3 %v5392_v20  ;;  %v5282_v22 = vunpack.c.l.b16 %v5242_v23 }
 0xa42   : > { %8703 = vpow2.f32 %v5040_v45  ;;  %4971 = vmax.xlane.f32.xlu2 %v4970_v3  ;;  %5115 = vadd.xlane.f32.xlu1 %v5114_v60 }
 0xa44   : > { %v8702_v21 = vpop.eup %8701 }
 0xa45   : > { %v5211_v39 = vmul.f32 %v8702_v21, %v11763_v55  ;;  %v5098_v46 = vpop.xlane.xlu0 %5097  ;;  %5418 = vmatpush.bf16.msrb.mxu3 %v5391_v31 }
 0xa46   : > { %8705 = vrcp.f32 %v5098_v46 }
 0xa47   : > { %v5243_v25 = vpack.c.bf16 %v5211_v39, %v5211_v39  ;;  %v11942_v7 = vpop.f32.mrf.mxu0 }
 0xa48   : > { %v11934_v24 = vpop.eup %8703  ;;  %v4753_v39 = vpop.f32.mrf.mxu3 }
 0xa49   : > { %v5283_v43 = vunpack.c.l.b16 %v5243_v25  ;;  %v5117_v9 = vsel %vm1437_vm2, %v11934_v24, 0.0 }
 0xa4a   : > { %5118 = vadd.xlane.f32.xlu2 %v5117_v9  ;;  %4944 = vmax.xlane.f32.xlu1 %v4943_v5 }
 0xa4b   : > { %v5288_v55 = vpack.c.b16 %v5283_v43, %v5282_v22 }
 0xa4c   : > { %v8706_v2 = vpop.eup %8705 }
 0xa4d   : > { %v5101_v54 = vpop.xlane.xlu1 %5100  ;;  %8144 = vmatmul.msk.bf16.gmra.mxu2 %vm1437_vm2, %v5288_v55  ;;  %v5212_v16 = vmul.f32 %v8706_v2, %v11772_v63  ;;  %v4933_v28 = vpop.xlane.xlu0 %4932 }
 0xa4e   : > { %8707 = vrcp.f32 %v5101_v54  ;;  %v4997_v37 = vsub.f32 %v11777_v42, %v4933_v28 }
 0xa4f   : > { %v11950_v10 = vpop.f32.mrf.mxu0  ;;  %v5244_v45 = vpack.c.bf16 %v5212_v16, %v5212_v16 }
 0xa50   : > { %v5044_v5 = vmul.f32 1.442695, %v4997_v37  ;;  %v4756_v9 = vpop.f32.mrf.mxu3 }
 0xa51   : > { %v5284_v23 = vunpack.c.l.b16 %v5244_v45  ;;  %v4752_v45 = vadd.f32 %v11608_v41, %v4751_v62 }
 0xa52   : > { %4977 = vmax.xlane.f32.xlu2 %v4976_v59 }
 0xa54   : > { %v8708_v53 = vpop.eup %8707 }
 0xa55   : > { %v5213_v20 = vmul.f32 %v8708_v53, %v11779_v29  ;;  %v4960_v3 = vpop.xlane.xlu1 %4959 }
 0xa56   : > { %v5006_v60 = vsub.f32 %v11788_v11, %v4960_v3 }
 0xa57   : > { %v5245_v21 = vpack.c.bf16 %v5213_v20, %v5213_v20  ;;  %v4347_v25 = vpop.f32.mrf.mxu0 }
 0xa58   : > { %v5062_v31 = vmul.f32 1.442695, %v5006_v60 }
 0xa59   : > { %v5285_v63 = vunpack.c.l.b16 %v5245_v21  ;;  %v4758_v21 = vpop.f32.mrf.mxu3 }
 0xa5a   : > { %8709 = vpow2.f32 %v5062_v31 }
 0xa5b   : > { %v5289_v46 = vpack.c.b16 %v5285_v63, %v5284_v23  ;;  %8711 = vpow2.f32 %v5044_v5  ;;  %v4348_v23 = vadd.f32 %v11795_v36, %v4347_v25  ;;  %v4759_v5 = vadd.f32 %v11649_v44, %v4758_v21 }
 0xa5d   : > { %v4963_v40 = vpop.xlane.xlu2 %4962  ;;  %8145 = vmatmul.msk.bf16.gmra.mxu2 %vm1437_vm2, %v5289_v46 }
 0xa5e   : > { %v5007_v29 = vsub.f32 %v11798_v51, %v4963_v40 }
 0xa5f   : > { %v4349_v43 = vpop.f32.mrf.mxu0 }
 0xa60   : > { %v11957_v22 = vpop.eup %8709  ;;  %v5064_v11 = vmul.f32 1.442695, %v5007_v29  ;;  %v4350_v63 = vadd.f32 %v11795_v36, %v4349_v43  ;;  %v4345_v43 = vadd.f32 %v11795_v36, %v11950_v10 }
 0xa61   : > { %v5150_v42 = vsel %vm1437_vm2, %v11957_v22, 0.0  ;;  %v11961_v54 = vpop.eup %8711 }
 0xa62   : > { %8713 = vpow2.f32 %v5064_v11  ;;  %5151 = vadd.xlane.f32.xlu2 %v5150_v42  ;;  %v5123_v20 = vsel %vm1437_vm2, %v11961_v54, 0.0  ;;  %v4343_v42 = vadd.f32 %v11795_v36, %v11942_v7  ;;  %v4460_v7 = vpack.c.bf16 %v4345_v43, %v4345_v43 }
 0xa65   : > { %v4966_v55 = vpop.xlane.xlu1 %4965  ;;  %v4930_v6 = vpop.xlane.xlu2 %4929 }
 0xa66   : > { %v5008_v2 = vsub.f32 %v11810_v49, %v4966_v55  ;;  %v4996_v16 = vsub.f32 %v11806_v50, %v4930_v6  ;;  %v9048_v49 = vld [vmem:[#allocation2 + $0xa0] sm:$0xff]  ;;  %v4461_v55 = vpack.c.bf16 %v4348_v23, %v4348_v23  ;;  %v4462_v6 = vpack.c.bf16 %v4350_v63, %v4350_v63 }
 0xa67   : > { %v4352_v3 = vpop.f32.mrf.mxu0  ;;  %v11972_v60 = vadd.f32 %v9048_v49, %v4752_v45 }
 0xa68   : > { %v11965_v51 = vpop.eup %8713  ;;  %v5066_v59 = vmul.f32 1.442695, %v5008_v2  ;;  %v5042_v53 = vmul.f32 1.442695, %v4996_v16  ;;  %v4353_v41 = vadd.f32 %v11795_v36, %v4352_v3  ;;  %v9050_v16 = vld [vmem:[#allocation2 + $0xa8] sm:$0xff]  ;;  %v5472_v3 = vunpack.c.l.b16 %v4461_v55 }
 0xa69   : > { %v5153_v28 = vsel %vm1437_vm2, %v11965_v51, 0.0  ;;  %v4946_v29 = vsel %vm1437_vm2, %v11972_v60, -inf  ;;  %v5473_v49 = vunpack.c.l.b16 %v4462_v6 }
 0xa6a   : > { %8715 = vpow2.f32 %v5066_v59  ;;  %5124 = vadd.xlane.f32.xlu2 %v5123_v20  ;;  %5154 = vadd.xlane.f32.xlu0 %v5153_v28  ;;  %v4463_v11 = vpack.c.bf16 %v4353_v41, %v4353_v41  ;;  %v4459_v20 = vpack.c.bf16 %v4343_v42, %v4343_v42 }
 0xa6b   : > { %8717 = vpow2.f32 %v5042_v53 }
 0xa6c   : > { %v5474_v53 = vunpack.c.l.b16 %v4463_v11  ;;  %v5470_v63 = vunpack.c.l.b16 %v4459_v20 }
 0xa6d   : > { %v4969_v50 = vpop.xlane.xlu2 %4968 }
 0xa6e   : > { %v5009_v37 = vsub.f32 %v11822_v30, %v4969_v50  ;;  %v4754_v30 = vadd.f32 %v11622_v17, %v4753_v39  ;;  %v9049_v17 = vld [vmem:[#allocation2 + $0xb8] sm:$0xff] }
 0xa6f   : > { %v4354_v44 = vpop.f32.mrf.mxu0  ;;  %v11995_v39 = vadd.f32 %v9049_v17, %v4759_v5  ;;  %v5471_v5 = vunpack.c.l.b16 %v4460_v7 }
 0xa70   : > { %v11976_v62 = vpop.eup %8715  ;;  %v5068_v31 = vmul.f32 1.442695, %v5009_v37  ;;  %v4355_v2 = vadd.f32 %v11795_v36, %v4354_v44  ;;  %v11997_v59 = vadd.f32 %v9050_v16, %v4754_v30  ;;  %v4757_v37 = vadd.f32 %v11638_v27, %v4756_v9 }
 0xa71   : > { %v11980_v46 = vpop.eup %8717  ;;  %v5156_v40 = vsel %vm1437_vm2, %v11976_v62, 0.0  ;;  %v4955_v10 = vsel %vm1437_vm2, %v11995_v39, -inf  ;;  %v4340_v27 = vadd.f32 %v11795_v36, %v11929_v12  ;;  %v5477_v9 = vpack.c.b16 %v5471_v5, %v5470_v63 }
 0xa72   : > { %8719 = vpow2.f32 %v5068_v31  ;;  %5157 = vadd.xlane.f32.xlu2 %v5156_v40  ;;  %4947 = vmax.xlane.f32.xlu0 %v4946_v29  ;;  %v5120_v25 = vsel %vm1437_vm2, %v11980_v46, 0.0  ;;  %v4464_v45 = vpack.c.bf16 %v4355_v2, %v4355_v2  ;;  %v4949_v41 = vsel %vm1437_vm2, %v11997_v59, -inf  ;;  %v9051_v29 = vld [vmem:[#allocation2 + $0xb0] sm:$0xff] }
 0xa73   : > { %5121 = vadd.xlane.f32.xlu1 %v5120_v25  ;;  %v5478_v40 = vpack.c.b16 %v5473_v49, %v5472_v3  ;;  %v12010_v30 = vadd.f32 %v9051_v29, %v4757_v37  ;;  %v4338_v25 = vadd.f32 %v11795_v36, %v11915_v14  ;;  %v4458_v44 = vpack.c.bf16 %v4340_v27, %v4340_v27 }
 0xa74   : > { %v5475_v50 = vunpack.c.l.b16 %v4464_v45 }
 0xa75   : > { %v4952_v11 = vsel %vm1437_vm2, %v12010_v30, -inf  ;;  %v4457_v42 = vpack.c.bf16 %v4338_v25, %v4338_v25  ;;  %v5469_v6 = vunpack.c.l.b16 %v4458_v44 }
 0xa76   : > { %v5479_v31 = vpack.c.b16 %v5475_v50, %v5474_v53 }
 0xa77   : > { %v12008_v23 = vpop.f32.mrf.mxu0  ;;  %v5468_v55 = vunpack.c.l.b16 %v4457_v42 }
 0xa78   : > { %v11999_v28 = vpop.eup %8719  ;;  %5500 = vmatpush.bf16.msra.mxu1 %v5479_v31 }
 0xa79   : > { %v5159_v21 = vsel %vm1437_vm2, %v11999_v28, 0.0  ;;  %v5476_v17 = vpack.c.b16 %v5469_v6, %v5468_v55 }
 0xa7a   : > { %4956 = vmax.xlane.f32.xlu2 %v4955_v10  ;;  %5160 = vadd.xlane.f32.xlu0 %v5159_v21 }
 0xa7b   : > { %4950 = vmax.xlane.f32.xlu1 %v4949_v41 }
 0xa7c   : > { %5501 = vmatpush.bf16.msra.mxu1 %v5478_v40 }
 0xa7f   : > { %v12018_v43 = vpop.f32.mrf.mxu0 }
 0xa80   : > { %5502 = vmatpush.bf16.msra.mxu1 %v5477_v9 }
 0xa83   : > { %4953 = vmax.xlane.f32.xlu1 %v4952_v11 }
 0xa84   : > { %5503 = vmatpush.bf16.msra.mxu1 %v5476_v17 }
 0xa87   : > { %v5104_v2 = vpop.xlane.xlu0 %5103  ;;  %v4362_v16 = vpop.f32.mrf.mxu0 }
 0xa8f   : > { %v4936_v14 = vpop.xlane.xlu0 %4935  ;;  %v4364_v45 = vpop.f32.mrf.mxu0 }
 0xa90   : > { %v4998_v12 = vsub.f32 %v11850_v58, %v4936_v14 }
 0xa92   : > { %v5046_v53 = vmul.f32 1.442695, %v4998_v12 }
 0xa94   : > { %8721 = vpow2.f32 %v5046_v53 }
 0xa95   : > { %8723 = vrcp.f32 %v5104_v2 }
 0xa97   : > { %v4975_v20 = vpop.xlane.xlu0 %4974  ;;  %v4367_v10 = vpop.f32.mrf.mxu0 }
 0xa98   : > { %v5011_v7 = vsub.f32 %v11860_v1, %v4975_v20 }
 0xa9a   : > { %v12022_v3 = vpop.eup %8721  ;;  %v5072_v49 = vmul.f32 1.442695, %v5011_v7 }
 0xa9b   : > { %v5126_v50 = vsel %vm1437_vm2, %v12022_v3, 0.0  ;;  %v8724_v37 = vpop.eup %8723 }
 0xa9c   : > { %8725 = vpow2.f32 %v5072_v49  ;;  %5127 = vadd.xlane.f32.xlu2 %v5126_v50  ;;  %v5214_v41 = vmul.f32 %v8724_v37, %v11843_v26 }
 0xa9d   : > { %v5107_v21 = vpop.xlane.xlu1 %5106 }
 0xa9e   : > { %8727 = vrcp.f32 %v5107_v21  ;;  %v5246_v40 = vpack.c.bf16 %v5214_v41, %v5214_v41  ;;  %v4368_v41 = vadd.f32 %v11795_v36, %v4367_v10 }
 0xa9f   : > { %v12026_v58 = vpop.xlane.xlu0 %4941  ;;  %v4369_v63 = vpop.f32.mrf.mxu0 }
 0xaa0   : > { %v5363_v42 = vunpack.c.l.b16 %v5246_v40 }
 0xaa2   : > { %v12029_v31 = vpop.eup %8725 }
 0xaa3   : > { %v5165_v1 = vsel %vm1437_vm2, %v12029_v31, 0.0 }
 0xaa4   : > { %v8728_v5 = vpop.eup %8727  ;;  %5166 = vadd.xlane.f32.xlu1 %v5165_v1 }
 0xaa5   : > { %v5215_v29 = vmul.f32 %v8728_v5, %v11870_v0  ;;  %v5110_v25 = vpop.xlane.xlu1 %5109 }
 0xaa6   : > { %8729 = vrcp.f32 %v5110_v25 }
 0xaa7   : > { %v5247_v27 = vpack.c.bf16 %v5215_v29, %v5215_v29  ;;  %v4981_v9 = vpop.xlane.xlu0 %4980  ;;  %v4372_v6 = vpop.f32.mrf.mxu0 }
 0xaa8   : > { %v5013_v11 = vsub.f32 %v11884_v35, %v4981_v9  ;;  %v4373_v0 = vadd.f32 %v11795_v36, %v4372_v6  ;;  %v4365_v9 = vadd.f32 %v11795_v36, %v4364_v45 }
 0xaa9   : > { %v5364_v44 = vunpack.c.l.b16 %v5247_v27  ;;  %v4363_v27 = vadd.f32 %v11795_v36, %v4362_v16 }
 0xaaa   : > { %v5076_v26 = vmul.f32 1.442695, %v5013_v11  ;;  %v4471_v20 = vpack.c.bf16 %v4373_v0, %v4373_v0 }
 0xaab   : > { %v5371_v55 = vpack.c.b16 %v5364_v44, %v5363_v42 }
 0xaac   : > { %8731 = vpow2.f32 %v5076_v26  ;;  %v8730_v14 = vpop.eup %8729  ;;  %v5559_v29 = vunpack.c.l.b16 %v4471_v20  ;;  %v4360_v20 = vadd.f32 %v11795_v36, %v12018_v43 }
 0xaad   : > { %v4939_v2 = vpop.xlane.xlu1 %4938  ;;  %v5113_v17 = vpop.xlane.xlu2 %5112  ;;  %8146 = vmatmul.msk.bf16.vlgmr.msrb.gmra.mxu3 %vm1437_vm2, %v5371_v55  ;;  %v5216_v12 = vmul.f32 %v8730_v14, %v11886_v8  ;;  %v4370_v8 = vadd.f32 %v11795_v36, %v4369_v63  ;;  %v4469_v55 = vpack.c.bf16 %v4368_v41, %v4368_v41 }
 0xaae   : > { %8733 = vrcp.f32 %v5113_v17  ;;  %v4999_v42 = vsub.f32 %v11892_v13, %v4939_v2  ;;  %v4467_v17 = vpack.c.bf16 %v4363_v27, %v4363_v27  ;;  %v4358_v2 = vadd.f32 %v11795_v36, %v12008_v23 }
 0xaaf   : > { %v4374_v7 = vpop.f32.mrf.mxu0  ;;  %v5248_v21 = vpack.c.bf16 %v5216_v12, %v5216_v12  ;;  %v4470_v6 = vpack.c.bf16 %v4370_v8, %v4370_v8  ;;  %v5557_v16 = vunpack.c.l.b16 %v4469_v55  ;;  %v4466_v23 = vpack.c.bf16 %v4360_v20, %v4360_v20 }
 0xab0   : > { %v4375_v50 = vadd.f32 %v11795_v36, %v4374_v7  ;;  %v5048_v0 = vmul.f32 1.442695, %v4999_v42 }
 0xab1   : > { %v5365_v26 = vunpack.c.l.b16 %v5248_v21  ;;  %v5558_v12 = vunpack.c.l.b16 %v4470_v6 }
 0xab2   : > { %v12038_v53 = vpop.eup %8731  ;;  %v4472_v25 = vpack.c.bf16 %v4375_v50, %v4375_v50  ;;  %v5000_v50 = vsub.f32 %v11868_v47, %v12026_v58 }
 0xab3   : > { %v5171_v35 = vsel %vm1437_vm2, %v12038_v53, 0.0  ;;  %v5563_v41 = vpack.c.b16 %v5558_v12, %v5557_v16 }
 0xab4   : > { %v8734_v49 = vpop.eup %8733  ;;  %5172 = vadd.xlane.f32.xlu2 %v5171_v35  ;;  %v5555_v35 = vunpack.c.l.b16 %v4467_v17 }
 0xab5   : > { %v5217_v37 = vmul.f32 %v8734_v49, %v11909_v57  ;;  %v5116_v1 = vpop.xlane.xlu1 %5115  ;;  %v4972_v5 = vpop.xlane.xlu2 %4971  ;;  %v5560_v57 = vunpack.c.l.b16 %v4472_v25 }
 0xab6   : > { %v5010_v40 = vsub.f32 %v11917_v4, %v4972_v5  ;;  %8735 = vrcp.f32 %v5116_v1  ;;  %v4468_v4 = vpack.c.bf16 %v4365_v9, %v4365_v9  ;;  %v4465_v1 = vpack.c.bf16 %v4358_v2, %v4358_v2 }
 0xab7   : > { %v5249_v11 = vpack.c.bf16 %v5217_v37, %v5217_v37  ;;  %v5564_v63 = vpack.c.b16 %v5560_v57, %v5559_v29  ;;  %v5050_v5 = vmul.f32 1.442695, %v5000_v50 }
 0xab8   : > { %v5070_v44 = vmul.f32 1.442695, %v5010_v40  ;;  %v5556_v7 = vunpack.c.l.b16 %v4468_v4  ;;  %v5553_v58 = vunpack.c.l.b16 %v4465_v1 }
 0xab9   : > { %v5366_v10 = vunpack.c.l.b16 %v5249_v11  ;;  %5585 = vmatpush.bf16.msra.mxu2 %v5564_v63 }
 0xaba   : > { %8737 = vpow2.f32 %v5070_v44  ;;  %v5562_v36 = vpack.c.b16 %v5556_v7, %v5555_v35 }
 0xabb   : > { %v5372_v14 = vpack.c.b16 %v5366_v10, %v5365_v26 }
 0xabc   : > { %v8736_v13 = vpop.eup %8735 }
 0xabd   : > { %v5119_v45 = vpop.xlane.xlu2 %5118  ;;  %8147 = vmatmul.msk.bf16.gmra.mxu3 %vm1437_vm2, %v5372_v14  ;;  %v5218_v21 = vmul.f32 %v8736_v13, %v11922_v38  ;;  %5586 = vmatpush.bf16.msra.mxu2 %v5563_v41  ;;  %v4945_v40 = vpop.xlane.xlu1 %4944  ;;  %v5554_v38 = vunpack.c.l.b16 %v4466_v23  ;;  %v8158_v13 = vld [vmem:[%s13348_s9 + $0x8] sm:$0xf] }
 0xabe   : > { %8739 = vrcp.f32 %v5119_v45  ;;  %v5001_v11 = vsub.f32 %v11931_v15, %v4945_v40  ;;  %v5677_v2 = vsel %vm3811_vm3, %v8158_v13, 0 }
 0xabf   : > { %8741 = vpow2.f32 %v5048_v0  ;;  %v5250_v8 = vpack.c.bf16 %v5218_v21, %v5218_v21  ;;  %5686 = vmatpush.bf16.msra.mxu3 %v5677_v2 }
 0xac0   : > { %v12055_v49 = vpop.eup %8737  ;;  %8743 = vpow2.f32 %v5050_v5  ;;  %v5052_v55 = vmul.f32 1.442695, %v5001_v11 }
 0xac1   : > { %v5162_v37 = vsel %vm1437_vm2, %v12055_v49, 0.0  ;;  %5587 = vmatpush.bf16.msra.mxu2 %v5562_v36  ;;  %v5367_v44 = vunpack.c.l.b16 %v5250_v8  ;;  %v5335_v8 = vpop.f32.mrf.mxu2 }
 0xac2   : > { %5163 = vadd.xlane.f32.xlu0 %v5162_v37 }
 0xac4   : > { %v8740_v43 = vpop.eup %8739 }
 0xac5   : > { %v5219_v29 = vmul.f32 %v8740_v43, %v11934_v24  ;;  %v4978_v25 = vpop.xlane.xlu2 %4977  ;;  %v12063_v47 = vpop.eup %8741  ;;  %v5561_v24 = vpack.c.b16 %v5554_v38, %v5553_v58 }
 0xac6   : > { %v5012_v27 = vsub.f32 %v11944_v56, %v4978_v25  ;;  %v5129_v26 = vsel %vm1437_vm2, %v12063_v47, 0.0  ;;  %v12070_v56 = vpop.eup %8743 }
 0xac7   : > { %v5251_v9 = vpack.c.bf16 %v5219_v29, %v5219_v29  ;;  %5588 = vmatpush.bf16.msra.mxu2 %v5561_v24  ;;  %v5132_v15 = vsel %vm1437_vm2, %v12070_v56, 0.0 }
 0xac8   : > { %v5074_v42 = vmul.f32 1.442695, %v5012_v27 }
 0xac9   : > { %v5368_v57 = vunpack.c.l.b16 %v5251_v9 }
 0xaca   : > { %8745 = vpow2.f32 %v5074_v42  ;;  %5130 = vadd.xlane.f32.xlu0 %v5129_v26 }
 0xacb   : > { %v5373_v10 = vpack.c.b16 %v5368_v57, %v5367_v44  ;;  %8747 = vpow2.f32 %v5052_v55 }
 0xacd   : > { %8148 = vmatmul.msk.bf16.gmra.mxu3 %vm1437_vm2, %v5373_v10 }
 0xad0   : > { %v12072_v6 = vpop.eup %8745 }
 0xad1   : > { %v5168_v63 = vsel %vm1437_vm2, %v12072_v6, 0.0  ;;  %v12078_v4 = vpop.eup %8747 }
 0xad2   : > { %5133 = vadd.xlane.f32.xlu0 %v5132_v15  ;;  %5169 = vadd.xlane.f32.xlu1 %v5168_v63  ;;  %v5135_v14 = vsel %vm1437_vm2, %v12078_v4, 0.0 }
 0xad5   : > { %v5152_v17 = vpop.xlane.xlu2 %5151 }
 0xad6   : > { %8749 = vrcp.f32 %v5152_v17 }
 0xada   : > { %5136 = vadd.xlane.f32.xlu1 %v5135_v14 }
 0xadc   : > { %v8750_v12 = vpop.eup %8749 }
 0xadd   : > { %v5155_v0 = vpop.xlane.xlu0 %5154  ;;  %v5125_v16 = vpop.xlane.xlu2 %5124  ;;  %v5230_v45 = vmul.f32 %v8750_v12, %v11957_v22 }
 0xade   : > { %8751 = vrcp.f32 %v5155_v0 }
 0xadf   : > { %8753 = vrcp.f32 %v5125_v16  ;;  %v5262_v35 = vpack.c.bf16 %v5230_v45, %v5230_v45 }
 0xae1   : > { %v5533_v36 = vunpack.c.l.b16 %v5262_v35 }
 0xae4   : > { %v8752_v20 = vpop.eup %8751 }
 0xae5   : > { %v5231_v7 = vmul.f32 %v8752_v20, %v11965_v51  ;;  %v4948_v50 = vpop.xlane.xlu0 %4947  ;;  %v5158_v21 = vpop.xlane.xlu2 %5157 }
 0xae6   : > { %v5002_v37 = vsub.f32 %v11972_v60, %v4948_v50  ;;  %v5122_v41 = vpop.xlane.xlu1 %5121  ;;  %v8754_v1 = vpop.eup %8753 }
 0xae7   : > { %v5263_v23 = vpack.c.bf16 %v5231_v7, %v5231_v7  ;;  %8755 = vrcp.f32 %v5122_v41  ;;  %v5221_v5 = vmul.f32 %v8754_v1, %v11961_v54 }
 0xae8   : > { %v5054_v22 = vmul.f32 1.442695, %v5002_v37  ;;  %8757 = vrcp.f32 %v5158_v21 }
 0xae9   : > { %v5534_v43 = vunpack.c.l.b16 %v5263_v23  ;;  %v5253_v60 = vpack.c.bf16 %v5221_v5, %v5221_v5 }
 0xaea   : > { %8759 = vpow2.f32 %v5054_v22 }
 0xaeb   : > { %v5541_v40 = vpack.c.b16 %v5534_v43, %v5533_v36  ;;  %v5370_v10 = vunpack.c.l.b16 %v5253_v60 }
 0xaed   : > { %v8756_v29 = vpop.eup %8755  ;;  %v5161_v25 = vpop.xlane.xlu0 %5160  ;;  %8154 = vmatmul.msk.bf16.vlgmr.msra.gmra.mxu2 %vm1437_vm2, %v5541_v40 }
 0xaee   : > { %v4957_v51 = vpop.xlane.xlu2 %4956  ;;  %v8758_v58 = vpop.eup %8757  ;;  %v5220_v38 = vmul.f32 %v8756_v29, %v11980_v46  ;;  %8761 = vrcp.f32 %v5161_v25 }
 0xaef   : > { %v4951_v27 = vpop.xlane.xlu1 %4950  ;;  %v5005_v9 = vsub.f32 %v11995_v39, %v4957_v51  ;;  %v5232_v57 = vmul.f32 %v8758_v58, %v11976_v62  ;;  %v5337_v39 = vpop.f32.mrf.mxu2 }
 0xaf0   : > { %v5003_v11 = vsub.f32 %v11997_v59, %v4951_v27  ;;  %v12094_v42 = vpop.eup %8759  ;;  %v5252_v54 = vpack.c.bf16 %v5220_v38, %v5220_v38  ;;  %v5610_v50 = vpack.c.bf16 %v5337_v39, %v5335_v8 }
 0xaf1   : > { %v5060_v44 = vmul.f32 1.442695, %v5005_v9  ;;  %v5138_v24 = vsel %vm1437_vm2, %v12094_v42, 0.0  ;;  %v5264_v63 = vpack.c.bf16 %v5232_v57, %v5232_v57 }
 0xaf2   : > { %v5056_v26 = vmul.f32 1.442695, %v5003_v11  ;;  %v5369_v55 = vunpack.c.l.b16 %v5252_v54  ;;  %5139 = vadd.xlane.f32.xlu2 %v5138_v24  ;;  %v8358_v11 = vld [vmem:[%s13341_s2 + $0x38] sm:$0xff] }
 0xaf3   : > { %8763 = vpow2.f32 %v5060_v44  ;;  %v5535_v12 = vunpack.c.l.b16 %v5264_v63  ;;  %5939 = vmatpush.bf16.msrb.mxu2 %v8358_v11 }
 0xaf4   : > { %8765 = vpow2.f32 %v5056_v26  ;;  %v8762_v46 = vpop.eup %8761  ;;  %v5374_v15 = vpack.c.b16 %v5370_v10, %v5369_v55  ;;  %v8357_v26 = vld [vmem:[%s13341_s2 + $0x30] sm:$0xff] }
 0xaf5   : > { %v5233_v59 = vmul.f32 %v8762_v46, %v11999_v28 }
 0xaf6   : > { %8149 = vmatmul.msk.bf16.gmra.mxu3 %vm1437_vm2, %v5374_v15 }
 0xaf7   : > { %v4954_v17 = vpop.xlane.xlu1 %4953  ;;  %v5265_v14 = vpack.c.bf16 %v5233_v59, %v5233_v59  ;;  %5940 = vmatpush.bf16.msrb.mxu2 %v8357_v26 }
 0xaf8   : > { %v5004_v62 = vsub.f32 %v12010_v30, %v4954_v17  ;;  %v5340_v30 = vpop.f32.mrf.mxu2 }
 0xaf9   : > { %v12102_v0 = vpop.eup %8763  ;;  %v5536_v45 = vunpack.c.l.b16 %v5265_v14 }
 0xafa   : > { %v12104_v16 = vpop.eup %8765  ;;  %v5058_v13 = vmul.f32 1.442695, %v5004_v62  ;;  %v5147_v2 = vsel %vm1437_vm2, %v12102_v0, 0.0 }
 0xafb   : > { %v5141_v20 = vsel %vm1437_vm2, %v12104_v16, 0.0  ;;  %5148 = vadd.xlane.f32.xlu2 %v5147_v2  ;;  %v5542_v28 = vpack.c.b16 %v5536_v45, %v5535_v12 }
 0xafc   : > { %8767 = vpow2.f32 %v5058_v13  ;;  %5142 = vadd.xlane.f32.xlu0 %v5141_v20 }
 0xafd   : > { %8155 = vmatmul.msk.bf16.gmra.mxu2 %vm1437_vm2, %v5542_v28 }
 0xb00   : > { %v5342_v21 = vpop.f32.mrf.mxu2 }
 0xb01   : > { %v5611_v41 = vpack.c.bf16 %v5342_v21, %v5340_v30 }
 0xb02   : > { %v12111_v35 = vpop.eup %8767 }
 0xb03   : > { %v5144_v7 = vsel %vm1437_vm2, %v12111_v35, 0.0 }
 0xb04   : > { %5145 = vadd.xlane.f32.xlu1 %v5144_v7 }
 0xb06   : > { %8159 = vmatmul.msk.bf16.vlgmr.msra.gmra.mxu3 %vm1072_vm1, %v5610_v50 }
 0xb08   : > { %v5345_v37 = vpop.f32.mrf.mxu2 }
 0xb0f   : > { %v5128_v29 = vpop.xlane.xlu2 %5127 }
 0xb10   : > { %v5347_v1 = vpop.f32.mrf.mxu2 }
 0xb11   : > { %v5612_v23 = vpack.c.bf16 %v5347_v1, %v5345_v37 }
 0xb16   : > { %8160 = vmatmul.msk.bf16.gmra.mxu3 %vm1072_vm1, %v5611_v41 }
 0xb17   : > { %v5167_v36 = vpop.xlane.xlu1 %5166 }
 0xb18   : > { %v5350_v22 = vpop.f32.mrf.mxu2  ;;  %8769 = vrcp.f32 %v5167_v36 }
 0xb1e   : > { %v8770_v8 = vpop.eup %8769 }
 0xb1f   : > { %v5235_v51 = vmul.f32 %v8770_v8, %v12029_v31 }
 0xb20   : > { %v5352_v5 = vpop.f32.mrf.mxu2 }
 0xb21   : > { %v5613_v40 = vpack.c.bf16 %v5352_v5, %v5350_v22  ;;  %v5267_v38 = vpack.c.bf16 %v5235_v51, %v5235_v51  ;;  %v12141_v51 = vld [vmem:[%s9233_s13] sm:$0xff] }
 0xb23   : > { %v5538_v24 = vunpack.c.l.b16 %v5267_v38 }
 0xb26   : > { %8161 = vmatmul.msk.bf16.gmra.mxu3 %vm1072_vm1, %v5612_v23 }
 0xb27   : > { %v5173_v44 = vpop.xlane.xlu2 %5172 }
 0xb30   : > { %v5420_v43 = vpop.f32.mrf.mxu3 }
 0xb35   : > { %v5164_v25 = vpop.xlane.xlu0 %5163 }
 0xb36   : > { %8771 = vrcp.f32 %v5164_v25  ;;  %8162 = vmatmul.msk.bf16.gmra.mxu3 %vm1072_vm1, %v5613_v40 }
 0xb37   : > { %8773 = vrcp.f32 %v5128_v29 }
 0xb38   : > { %v5422_v58 = vpop.f32.mrf.mxu3 }
 0xb39   : > { %v5614_v15 = vpack.c.bf16 %v5422_v58, %v5420_v43 }
 0xb3c   : > { %v8772_v60 = vpop.eup %8771 }
 0xb3d   : > { %v5234_v27 = vmul.f32 %v8772_v60, %v12055_v49  ;;  %v5131_v9 = vpop.xlane.xlu0 %5130  ;;  %v8774_v54 = vpop.eup %8773 }
 0xb3e   : > { %8775 = vrcp.f32 %v5131_v9  ;;  %v5222_v31 = vmul.f32 %v8774_v54, %v12022_v3 }
 0xb3f   : > { %v5266_v57 = vpack.c.bf16 %v5234_v27, %v5234_v27  ;;  %8777 = vrcp.f32 %v5173_v44  ;;  %v12148_v44 = vld [vmem:[%s9233_s13 + $0x8] sm:$0xff] }
 0xb40   : > { %v5425_v49 = vpop.f32.mrf.mxu3  ;;  %v5254_v39 = vpack.c.bf16 %v5222_v31, %v5222_v31 }
 0xb41   : > { %v5537_v10 = vunpack.c.l.b16 %v5266_v57 }
 0xb42   : > { %v5448_v3 = vunpack.c.l.b16 %v5254_v39  ;;  %v8356_v39 = vld [vmem:[%s13340_s1 + $0x38] sm:$0xff] }
 0xb43   : > { %v5543_v55 = vpack.c.b16 %v5538_v24, %v5537_v10  ;;  %5828 = vmatpush.bf16.msrb.mxu1 %v8356_v39 }
 0xb44   : > { %v8776_v46 = vpop.eup %8775 }
 0xb45   : > { %v5223_v63 = vmul.f32 %v8776_v46, %v12063_v47  ;;  %v5134_v59 = vpop.xlane.xlu0 %5133  ;;  %v5170_v17 = vpop.xlane.xlu1 %5169  ;;  %8156 = vmatmul.msk.bf16.gmra.mxu2 %vm1437_vm2, %v5543_v55 }
 0xb46   : > { %8163 = vmatmul.msk.bf16.gmra.mxu3 %vm1072_vm1, %v5614_v15  ;;  %v8778_v14 = vpop.eup %8777  ;;  %8779 = vrcp.f32 %v5170_v17  ;;  %v12160_v17 = vld [vmem:[%s9233_s13 + $0x10] sm:$0xff] }
 0xb47   : > { %v5255_v62 = vpack.c.bf16 %v5223_v63, %v5223_v63  ;;  %8781 = vrcp.f32 %v5134_v59  ;;  %v5237_v45 = vmul.f32 %v8778_v14, %v12038_v53 }
 0xb48   : > { %v5427_v20 = vpop.f32.mrf.mxu3 }
 0xb49   : > { %v5449_v12 = vunpack.c.l.b16 %v5255_v62  ;;  %v5269_v30 = vpack.c.bf16 %v5237_v45, %v5237_v45  ;;  %v5615_v23 = vpack.c.bf16 %v5427_v20, %v5425_v49 }
 0xb4b   : > { %v5456_v13 = vpack.c.b16 %v5449_v12, %v5448_v3  ;;  %v5540_v37 = vunpack.c.l.b16 %v5269_v30  ;;  %v12190_v30 = vld [vmem:[%s9233_s13 + $0x20] sm:$0xff] }
 0xb4c   : > { %v8780_v2 = vpop.eup %8779 }
 0xb4d   : > { %v5137_v28 = vpop.xlane.xlu1 %5136  ;;  %8150 = vmatmul.msk.bf16.vlgmr.msra.gmra.mxu1 %vm1437_vm2, %v5456_v13  ;;  %v8782_v47 = vpop.eup %8781  ;;  %v5236_v7 = vmul.f32 %v8780_v2, %v12072_v6  ;;  %v12175_v2 = vld [vmem:[%s9233_s13 + $0x18] sm:$0xff] }
 0xb4e   : > { %8783 = vrcp.f32 %v5137_v28  ;;  %v5224_v21 = vmul.f32 %v8782_v47, %v12070_v56 }
 0xb4f   : > { %v5268_v50 = vpack.c.bf16 %v5236_v7, %v5236_v7  ;;  %v3975_v7 = vadd.f32 %v11263_v52, %v11267_v48  ;;  %v3980_v52 = vadd.f32 %v11287_v34, %v11295_v18  ;;  %v13470_v34 = vld [vmem:[#allocation10_spill] sm:$0xff] }
 0xb50   : > { %v5256_v22 = vpack.c.bf16 %v5224_v21, %v5224_v21  ;;  %v5430_v5 = vpop.f32.mrf.mxu3 }
 0xb51   : > { %v5539_v41 = vunpack.c.l.b16 %v5268_v50 }
 0xb52   : > { %v5450_v6 = vunpack.c.l.b16 %v5256_v22  ;;  %v12222_v22 = vld [vmem:[%s9233_s13 + $0x30] sm:$0xff] }
 0xb53   : > { %v5544_v53 = vpack.c.b16 %v5540_v37, %v5539_v41  ;;  %v12207_v41 = vld [vmem:[%s9233_s13 + $0x28] sm:$0xff] }
 0xb54   : > { %v8784_v1 = vpop.eup %8783 }
 0xb55   : > { %v5225_v36 = vmul.f32 %v8784_v1, %v12078_v4  ;;  %8157 = vmatmul.msk.bf16.gmra.mxu2 %vm1437_vm2, %v5544_v53 }
 0xb56   : > { %8164 = vmatmul.msk.bf16.gmra.mxu3 %vm1072_vm1, %v5615_v23 }
 0xb57   : > { %v5257_v43 = vpack.c.bf16 %v5225_v36, %v5225_v36 }
 0xb58   : > { %v5432_v56 = vpop.f32.mrf.mxu3 }
 0xb59   : > { %v5451_v40 = vunpack.c.l.b16 %v5257_v43  ;;  %v5616_v25 = vpack.c.bf16 %v5432_v56, %v5430_v5 }
 0xb5b   : > { %v5457_v29 = vpack.c.b16 %v5451_v40, %v5450_v6 }
 0xb5d   : > { %8151 = vmatmul.msk.bf16.gmra.mxu1 %vm1437_vm2, %v5457_v29 }
 0xb65   : > { %v5140_v8 = vpop.xlane.xlu2 %5139  ;;  %8217 = vmatmul.msk.bf16.vlgmr.msrb.gmra.mxu2 %vm572_vm0, %v12141_v51 }
 0xb66   : > { %8165 = vmatmul.msk.bf16.gmra.mxu3 %vm1072_vm1, %v5616_v25  ;;  %8785 = vrcp.f32 %v5140_v8  ;;  %v12241_v8 = vld [vmem:[%s9233_s13 + $0x38] sm:$0xff] }
 0xb6c   : > { %v8786_v58 = vpop.eup %8785 }
 0xb6d   : > { %v5226_v60 = vmul.f32 %v8786_v58, %v12094_v42 }
 0xb6e   : > { %v5149_v11 = vpop.xlane.xlu2 %5148 }
 0xb6f   : > { %v5143_v4 = vpop.xlane.xlu0 %5142  ;;  %v5258_v27 = vpack.c.bf16 %v5226_v60, %v5226_v60  ;;  %v13473_v60 = vld [vmem:[#allocation25_spill] sm:$0xff] }
 0xb70   : > { %8787 = vrcp.f32 %v5143_v4  ;;  %v12187_v47 = vpop.f32.mrf.mxu2 }
 0xb71   : > { %v5452_v31 = vunpack.c.l.b16 %v5258_v27 }
 0xb75   : > { %8218 = vmatmul.msk.bf16.gmra.mxu2 %vm572_vm0, %v12148_v44 }
 0xb76   : > { %v8788_v38 = vpop.eup %8787 }
 0xb77   : > { %v5227_v9 = vmul.f32 %v8788_v38, %v12104_v16  ;;  %v5146_v54 = vpop.xlane.xlu1 %5145 }
 0xb78   : > { %8789 = vrcp.f32 %v5146_v54  ;;  %v12198_v50 = vpop.f32.mrf.mxu2 }
 0xb79   : > { %v5259_v57 = vpack.c.bf16 %v5227_v9, %v5227_v9  ;;  %8791 = vrcp.f32 %v5149_v11  ;;  %v5435_v26 = vpop.f32.mrf.mxu3 }
 0xb7b   : > { %v5453_v24 = vunpack.c.l.b16 %v5259_v57 }
 0xb7d   : > { %v5458_v10 = vpack.c.b16 %v5453_v24, %v5452_v31  ;;  %v12260_v31 = vld [vmem:[%s9233_s13 + $0x40] sm:$0xff] }
 0xb7e   : > { %v8790_v42 = vpop.eup %8789  ;;  %v12267_v24 = vld [vmem:[%s13344_s5 + $0x3] ss:$0 sm:$0xff] }
 0xb7f   : > { %8152 = vmatmul.msk.bf16.gmra.mxu1 %vm1437_vm2, %v5458_v10  ;;  %v8792_v49 = vpop.eup %8791  ;;  %v5228_v16 = vmul.f32 %v8790_v42, %v12111_v35  ;;  %v3965_v35 = vadd.f32 %v11222_v61, %v11215_v32  ;;  %v3970_v32 = vadd.f32 %v11240_v19, %v11238_v33 }
 0xb80   : > { %v5229_v46 = vmul.f32 %v8792_v49, %v12102_v0  ;;  %v8355_v0 = vld [vmem:[%s13340_s1 + $0x30] sm:$0xff]  ;;  %v12204_v37 = vpop.f32.mrf.mxu2  ;;  %v13476_v49 = vld [vmem:[#allocation28_spill] sm:$0xff] }
 0xb81   : > { %v5437_v55 = vpop.f32.mrf.mxu3  ;;  %v5260_v63 = vpack.c.bf16 %v5228_v16, %v5228_v16  ;;  %5829 = vmatpush.bf16.msrb.mxu1 %v8355_v0 }
 0xb82   : > { %v5617_v15 = vpack.c.bf16 %v5437_v55, %v5435_v26  ;;  %v5261_v59 = vpack.c.bf16 %v5229_v46, %v5229_v46 }
 0xb83   : > { %v5454_v14 = vunpack.c.l.b16 %v5260_v63 }
 0xb84   : > { %8166 = vmatmul.msk.bf16.gmra.mxu3 %vm1072_vm1, %v5617_v15  ;;  %v5455_v3 = vunpack.c.l.b16 %v5261_v59 }
 0xb85   : > { %8219 = vmatmul.msk.bf16.gmra.mxu2 %vm572_vm0, %v12160_v17 }
 0xb86   : > { %v5459_v45 = vpack.c.b16 %v5455_v3, %v5454_v14 }
 0xb88   : > { %v12217_v23 = vpop.f32.mrf.mxu2 }
 0xb89   : > { %v5688_v62 = vpop.f32.mrf.mxu3 }
 0xb8a   : > { %v12169_v12 = vadd.f32 %v5688_v62, %v3965_v35  ;;  %v12281_v35 = vld [vmem:[%s9233_s13 + $0x48] sm:$0xff] }
 0xb8f   : > { %8153 = vmatmul.msk.bf16.gmra.mxu1 %vm1437_vm2, %v5459_v45 }
 0xb91   : > { %v12172_v13 = vpop.f32.mrf.mxu3 }
 0xb95   : > { %8220 = vmatmul.msk.bf16.gmra.mxu2 %vm572_vm0, %v12175_v2 }
 0xb99   : > { %v5693_v61 = vpop.f32.mrf.mxu3 }
 0xb9a   : > { %v12181_v20 = vadd.f32 %v5693_v61, %v3970_v32 }
 0xb9f   : > { %8188 = vmatmul.msk.bf16.vlgmr.msrb.gmra.mxu1 %vm572_vm0, %v12141_v51 }
 0xba1   : > { %v12185_v28 = vpop.f32.mrf.mxu3 }
 0xba5   : > { %8221 = vmatmul.msk.bf16.gmra.mxu2 %vm572_vm0, %v12190_v30 }
 0xba9   : > { %v5698_v33 = vpop.f32.mrf.mxu3 }
 0xbaa   : > { %v12196_v19 = vadd.f32 %v5698_v33, %v3975_v7  ;;  %v12293_v33 = vld [vmem:[%s9233_s13 + $0x50] sm:$0xff] }
 0xbaf   : > { %8189 = vmatmul.msk.bf16.gmra.mxu1 %vm572_vm0, %v12148_v44 }
 0xbb1   : > { %v12202_v21 = vpop.f32.mrf.mxu3 }
 0xbb5   : > { %8222 = vmatmul.msk.bf16.gmra.mxu2 %vm572_vm0, %v12207_v41 }
 0xbb9   : > { %v5703_v48 = vpop.f32.mrf.mxu3 }
 0xbba   : > { %v12213_v1 = vadd.f32 %v5703_v48, %v3980_v52  ;;  %v13479_v48 = vld [vmem:[#allocation31_spill] sm:$0xff] }
 0xbbf   : > { %8190 = vmatmul.msk.bf16.gmra.mxu1 %vm572_vm0, %v12160_v17 }
 0xbc1   : > { %v12219_v53 = vpop.f32.mrf.mxu3 }
 0xbc2   : > { %13469 = vst [vmem:[#allocation57_spill] sm:$0xff] %v12219_v53 }
 0xbc5   : > { %8223 = vmatmul.msk.bf16.gmra.mxu2 %vm572_vm0, %v12222_v22 }
 0xbc8   : > { %v12226_v36 = vpop.f32.mrf.mxu2 }
 0xbc9   : > { %v5708_v43 = vpop.f32.mrf.mxu3 }
 0xbca   : > { %v12229_v18 = vadd.f32 %v5708_v43, %v13470_v34  ;;  %v5505_v5 = vpop.f32.mrf.mxu1 }
 0xbcc   : > { %13471 = vst [vmem:[#allocation10_spill] sm:$0xff] %v12229_v18 }
 0xbcf   : > { %8191 = vmatmul.msk.bf16.gmra.mxu1 %vm572_vm0, %v12175_v2 }
 0xbd0   : > { %v12233_v6 = vpop.f32.mrf.mxu2 }
 0xbd1   : > { %v5624_v40 = vpack.c.bf16 %v12233_v6, %v12226_v36  ;;  %v12237_v29 = vpop.f32.mrf.mxu3  ;;  %v12370_v36 = vld [vmem:[%s13343_s4 + $0x3] ss:$0 sm:$0xff] }
 0xbd2   : > { %13472 = vst [vmem:[#allocation58_spill] sm:$0xff] %v12237_v29  ;;  %v5507_v56 = vpop.f32.mrf.mxu1 }
 0xbd3   : > { %v5618_v25 = vpack.c.bf16 %v5507_v56, %v5505_v5 }
 0xbd5   : > { %8167 = vmatmul.msk.bf16.gmra.mxu3 %vm1072_vm1, %v5618_v25  ;;  %8224 = vmatmul.msk.bf16.gmra.mxu2 %vm572_vm0, %v12241_v8 }
 0xbd8   : > { %v12245_v4 = vpop.f32.mrf.mxu2 }
 0xbd9   : > { %v5713_v58 = vpop.f32.mrf.mxu3 }
 0xbda   : > { %v12248_v38 = vadd.f32 %v5713_v58, %v13473_v60  ;;  %v5510_v27 = vpop.f32.mrf.mxu1  ;;  %v12304_v60 = vld [vmem:[%s9233_s13 + $0x58] sm:$0xff] }
 0xbdc   : > { %13474 = vst [vmem:[#allocation25_spill] sm:$0xff] %v12248_v38 }
 0xbdf   : > { %8192 = vmatmul.msk.bf16.gmra.mxu1 %vm572_vm0, %v12190_v30 }
 0xbe0   : > { %v12252_v9 = vpop.f32.mrf.mxu2 }
 0xbe1   : > { %v12254_v11 = vpop.f32.mrf.mxu3  ;;  %v5625_v54 = vpack.c.bf16 %v12252_v9, %v12245_v4 }
 0xbe2   : > { %13475 = vst [vmem:[#allocation59_spill] sm:$0xff] %v12254_v11  ;;  %v5512_v57 = vpop.f32.mrf.mxu1 }
 0xbe3   : > { %v5619_v26 = vpack.c.bf16 %v5512_v57, %v5510_v27 }
 0xbe5   : > { %8168 = vmatmul.msk.bf16.gmra.mxu3 %vm1072_vm1, %v5619_v26  ;;  %8225 = vmatmul.msk.bf16.gmra.mxu2 %vm572_vm0, %v12260_v31 }
 0xbe8   : > { %v5942_v42 = vpop.f32.mrf.mxu2 }
 0xbe9   : > { %v5718_v10 = vpop.f32.mrf.mxu3  ;;  %v5943_v55 = vadd.f32 %v12267_v24, %v5942_v42 }
 0xbea   : > { %v12270_v16 = vadd.f32 %v5718_v10, %v13476_v49 }
 0xbeb   : > { %v6165_v46 = vpack.c.bf16 %v5943_v55, %v5943_v55 }
 0xbec   : > { %13477 = vst [vmem:[#allocation28_spill] sm:$0xff] %v12270_v16 }
 0xbed   : > { %v12276_v63 = vunpack.c.l.b16 %v6165_v46 }
 0xbef   : > { %8193 = vmatmul.msk.bf16.gmra.mxu1 %vm572_vm0, %v12207_v41 }
 0xbf0   : > { %v5944_v15 = vpop.f32.mrf.mxu2 }
 0xbf1   : > { %v5945_v39 = vadd.f32 %v12267_v24, %v5944_v15  ;;  %v12289_v45 = vpop.f32.mrf.mxu3 }
 0xbf2   : > { %13478 = vst [vmem:[#allocation60_spill] sm:$0xff] %v12289_v45 }
 0xbf3   : > { %v6166_v59 = vpack.c.bf16 %v5945_v39, %v5945_v39  ;;  %v5622_v39 = vpack.c.bf16 %v12198_v50, %v12187_v47 }
 0xbf5   : > { %v12278_v0 = vunpack.c.l.b16 %v6166_v59  ;;  %8226 = vmatmul.msk.bf16.gmra.mxu2 %vm572_vm0, %v12281_v35 }
 0xbf7   : > { %v6274_v14 = vpack.c.b16 %v12278_v0, %v12276_v63 }
 0xbf8   : > { %v5947_v62 = vpop.f32.mrf.mxu2 }
 0xbfc   : > { %v5515_v3 = vpop.f32.mrf.mxu1 }
 0xbff   : > { %8194 = vmatmul.msk.bf16.gmra.mxu1 %vm572_vm0, %v12222_v22 }
 0xc00   : > { %v5949_v32 = vpop.f32.mrf.mxu2 }
 0xc04   : > { %v5517_v61 = vpop.f32.mrf.mxu1 }
 0xc05   : > { %v5620_v7 = vpack.c.bf16 %v5517_v61, %v5515_v3  ;;  %8227 = vmatmul.msk.bf16.gmra.mxu2 %vm572_vm0, %v12293_v33 }
 0xc07   : > { %8169 = vmatmul.msk.bf16.gmra.mxu3 %vm1072_vm1, %v5620_v7  ;;  %v5723_v52 = vpop.f32.mrf.mxu3 }
 0xc08   : > { %v12298_v43 = vadd.f32 %v5723_v52, %v13479_v48  ;;  %v5952_v34 = vpop.f32.mrf.mxu2  ;;  %v9064_v48 = vld [vmem:[%s9233_s13 + $0x60] sm:$0xff] }
 0xc09   : > { %v5953_v49 = vadd.f32 %v12267_v24, %v5952_v34  ;;  %v5948_v34 = vadd.f32 %v12267_v24, %v5947_v62 }
 0xc0a   : > { %13480 = vst [vmem:[#allocation31_spill] sm:$0xff] %v12298_v43 }
 0xc0b   : > { %v6169_v61 = vpack.c.bf16 %v5953_v49, %v5953_v49 }
 0xc0c   : > { %v5520_v5 = vpop.f32.mrf.mxu1 }
 0xc0f   : > { %8195 = vmatmul.msk.bf16.gmra.mxu1 %vm572_vm0, %v12241_v8  ;;  %v12365_v63 = vpop.f32.mrf.mxu3 }
 0xc10   : > { %v5954_v56 = vpop.f32.mrf.mxu2  ;;  %13481 = vst [vmem:[#allocation61_spill] sm:$0xff] %v12365_v63 }
 0xc11   : > { %v5955_v55 = vadd.f32 %v12267_v24, %v5954_v56 }
 0xc13   : > { %v6170_v7 = vpack.c.bf16 %v5955_v55, %v5955_v55 }
 0xc14   : > { %v5522_v25 = vpop.f32.mrf.mxu1 }
 0xc15   : > { %v5621_v58 = vpack.c.bf16 %v5522_v25, %v5520_v5  ;;  %8228 = vmatmul.msk.bf16.gmra.mxu2 %vm572_vm0, %v12304_v60  ;;  %v5950_v25 = vadd.f32 %v12267_v24, %v5949_v32 }
 0xc17   : > { %8170 = vmatmul.msk.bf16.gmra.mxu3 %vm1072_vm1, %v5621_v58  ;;  %v6270_v58 = vunpack.c.l.b16 %v6169_v61 }
 0xc18   : > { %v5957_v27 = vpop.f32.mrf.mxu2 }
 0xc19   : > { %v5958_v26 = vadd.f32 %v12267_v24, %v5957_v27  ;;  %v6271_v27 = vunpack.c.l.b16 %v6170_v7 }
 0xc1b   : > { %v6171_v10 = vpack.c.bf16 %v5958_v26, %v5958_v26  ;;  %v6167_v26 = vpack.c.bf16 %v5948_v34, %v5948_v34  ;;  %v12357_v34 = vld [vmem:[%s9233_s13 + $0x70] sm:$0xff] }
 0xc1c   : > { %v12308_v57 = vpop.f32.mrf.mxu1 }
 0xc1d   : > { %v6272_v59 = vunpack.c.l.b16 %v6171_v10  ;;  %v6168_v10 = vpack.c.bf16 %v5950_v25, %v5950_v25  ;;  %v6268_v62 = vunpack.c.l.b16 %v6167_v26  ;;  %v5832_v26 = vadd.f32 %v12370_v36, %v12308_v57 }
 0xc1f   : > { %8196 = vmatmul.msk.bf16.gmra.mxu1 %vm572_vm0, %v12260_v31  ;;  %v6269_v55 = vunpack.c.l.b16 %v6168_v10  ;;  %v6133_v4 = vpack.c.bf16 %v5832_v26, %v5832_v26 }
 0xc20   : > { %v5959_v42 = vpop.f32.mrf.mxu2 }
 0xc21   : > { %v5960_v46 = vadd.f32 %v12267_v24, %v5959_v42  ;;  %v6276_v42 = vpack.c.b16 %v6271_v27, %v6270_v58  ;;  %v13483_v27 = vld [vmem:[#allocation32_spill] sm:$0xff] }
 0xc23   : > { %v6172_v3 = vpack.c.bf16 %v5960_v46, %v5960_v46  ;;  %v6297_v32 = vsel %vm1072_vm1, %v6276_v42, 0 }
 0xc24   : > { %v5833_v15 = vpop.f32.mrf.mxu1 }
 0xc25   : > { %v6273_v52 = vunpack.c.l.b16 %v6172_v3  ;;  %8229 = vmatmul.msk.bf16.gmra.mxu2 %vm572_vm0, %v9064_v48  ;;  %v12337_v3 = vld [vmem:[%s9233_s13 + $0x68] sm:$0xff]  ;;  %v5834_v10 = vadd.f32 %v12370_v36, %v5833_v15 }
 0xc27   : > { %8171 = vmatmul.msk.bf16.gmra.mxu3 %vm1072_vm1, %v5622_v39  ;;  %v6277_v5 = vpack.c.b16 %v6273_v52, %v6272_v59  ;;  %v5623_v39 = vpack.c.bf16 %v12217_v23, %v12204_v37  ;;  %v6275_v59 = vpack.c.b16 %v6269_v55, %v6268_v62  ;;  %v6291_v37 = vsel %vm1072_vm1, %v6274_v14, 0  ;;  %v13482_v14 = vld [vmem:[#allocation41_spill] sm:$0xff] }
 0xc28   : > { %v12322_v56 = vpop.f32.mrf.mxu2  ;;  %v6134_v9 = vpack.c.bf16 %v5834_v10, %v5834_v10 }
 0xc29   : > { %v6300_v47 = vsel %vm1072_vm1, %v6277_v5, 0  ;;  %v6294_v7 = vsel %vm1072_vm1, %v6275_v59, 0 }
 0xc2a   : > { %6306 = vmatpush.bf16.xpose.msrb.mxu3 %v6300_v47  ;;  %v4005_v47 = vadd.f32 %v13483_v27, %v13482_v14  ;;  %v6247_v59 = vunpack.c.l.b16 %v6134_v9 }
 0xc2c   : > { %v12326_v50 = vpop.f32.mrf.mxu1 }
 0xc2f   : > { %8197 = vmatmul.msk.bf16.gmra.mxu1 %vm572_vm0, %v12281_v35 }
 0xc30   : > { %v12330_v49 = vpop.f32.mrf.mxu2 }
 0xc32   : > { %6307 = vmatpush.bf16.xpose.msrb.mxu3 %v6297_v32 }
 0xc34   : > { %v5838_v46 = vpop.f32.mrf.mxu1 }
 0xc35   : > { %8230 = vmatmul.msk.bf16.gmra.mxu2 %vm572_vm0, %v12337_v3 }
 0xc37   : > { %8172 = vmatmul.msk.bf16.gmra.mxu3 %vm1072_vm1, %v5623_v39  ;;  %v6246_v39 = vunpack.c.l.b16 %v6133_v4  ;;  %v13486_v4 = vld [vmem:[#allocation43_spill] sm:$0xff] }
 0xc38   : > { %v5967_v61 = vpop.f32.mrf.mxu2 }
 0xc3a   : > { %6308 = vmatpush.bf16.xpose.msrb.mxu3 %v6294_v7 }
 0xc3c   : > { %v12342_v52 = vpop.f32.mrf.mxu1 }
 0xc3f   : > { %8198 = vmatmul.msk.bf16.gmra.mxu1 %vm572_vm0, %v12293_v33 }
 0xc40   : > { %v5969_v5 = vpop.f32.mrf.mxu2 }
 0xc42   : > { %6309 = vmatpush.bf16.xpose.msrb.mxu3 %v6291_v37 }
 0xc44   : > { %v12350_v23 = vpop.f32.mrf.mxu1 }
 0xc45   : > { %8231 = vmatmul.msk.bf16.gmra.mxu2 %vm572_vm0, %v12357_v34 }
 0xc47   : > { %8173 = vmatmul.msk.bf16.gmra.mxu3 %vm1072_vm1, %v5624_v40  ;;  %v12379_v40 = vld [vmem:[%s9233_s13 + $0x78] sm:$0xff] }
 0xc48   : > { %v5972_v25 = vpop.f32.mrf.mxu2 }
 0xc49   : > { %v5973_v7 = vadd.f32 %v12267_v24, %v5972_v25  ;;  %v13487_v25 = vld [vmem:[#allocation18_spill] sm:$0xff] }
 0xc4a   : > { %v4010_v9 = vadd.f32 %v13487_v25, %v13486_v4 }
 0xc4b   : > { %v6177_v10 = vpack.c.bf16 %v5973_v7, %v5973_v7 }
 0xc4c   : > { %v12361_v58 = vpop.f32.mrf.mxu1 }
 0xc4f   : > { %8199 = vmatmul.msk.bf16.gmra.mxu1 %vm572_vm0, %v12304_v60 }
 0xc50   : > { %v5974_v0 = vpop.f32.mrf.mxu2 }
 0xc51   : > { %v5975_v57 = vadd.f32 %v12267_v24, %v5974_v0  ;;  %v5837_v0 = vadd.f32 %v12370_v36, %v12326_v50 }
 0xc53   : > { %v6135_v4 = vpack.c.bf16 %v5837_v0, %v5837_v0 }
 0xc54   : > { %v12372_v6 = vpop.f32.mrf.mxu1 }
 0xc55   : > { %8232 = vmatmul.msk.bf16.gmra.mxu2 %vm572_vm0, %v12379_v40 }
 0xc57   : > { %8174 = vmatmul.msk.bf16.gmra.mxu3 %vm1072_vm1, %v5625_v54 }
 0xc58   : > { %v5728_v42 = vpop.f32.mrf.mxu3  ;;  %v5977_v55 = vpop.f32.mrf.mxu2 }
 0xc59   : > { %v12388_v62 = vadd.f32 %v5728_v42, %v4005_v47  ;;  %v5978_v32 = vadd.f32 %v12267_v24, %v5977_v55  ;;  %v6254_v47 = vpack.c.b16 %v6247_v59, %v6246_v39  ;;  %v6178_v42 = vpack.c.bf16 %v5975_v57, %v5975_v57 }
 0xc5a   : > { %v5970_v39 = vadd.f32 %v12267_v24, %v5969_v5  ;;  %v6363_v59 = vunpack.c.l.b16 %v6177_v10  ;;  %v5963_v5 = vadd.f32 %v12267_v24, %v12322_v56  ;;  %v5965_v10 = vadd.f32 %v12267_v24, %v12330_v49 }
 0xc5b   : > { %13484 = vst [vmem:[#allocation41_spill] sm:$0xff] %v12388_v62  ;;  %v6179_v37 = vpack.c.bf16 %v5978_v32, %v5978_v32  ;;  %v5968_v32 = vadd.f32 %v12267_v24, %v5967_v61  ;;  %v6364_v7 = vunpack.c.l.b16 %v6178_v42  ;;  %v6248_v42 = vunpack.c.l.b16 %v6135_v4 }
 0xc5c   : > { %v12390_v54 = vpop.f32.mrf.mxu1  ;;  %v5842_v56 = vadd.f32 %v12370_v36, %v12342_v52  ;;  %v5844_v49 = vadd.f32 %v12370_v36, %v12350_v23 }
 0xc5d   : > { %v6365_v55 = vunpack.c.l.b16 %v6179_v37  ;;  %v6175_v50 = vpack.c.bf16 %v5968_v32, %v5968_v32 }
 0xc5e   : > { %v6138_v4 = vpack.c.bf16 %v5844_v49, %v5844_v49 }
 0xc5f   : > { %8200 = vmatmul.msk.bf16.gmra.mxu1 %vm572_vm0, %v9064_v48 }
 0xc60   : > { %v12396_v15 = vpop.f32.mrf.mxu3  ;;  %v5979_v14 = vpop.f32.mrf.mxu2 }
 0xc61   : > { %13485 = vst [vmem:[#allocation32_spill] sm:$0xff] %v12396_v15  ;;  %v5980_v27 = vadd.f32 %v12267_v24, %v5979_v14  ;;  %v5839_v14 = vadd.f32 %v12370_v36, %v5838_v46  ;;  %v6176_v15 = vpack.c.bf16 %v5970_v39, %v5970_v39  ;;  %v6369_v46 = vpack.c.b16 %v6364_v7, %v6363_v59 }
 0xc62   : > { %v6174_v39 = vpack.c.bf16 %v5965_v10, %v5965_v10  ;;  %v6251_v10 = vunpack.c.l.b16 %v6138_v4 }
 0xc63   : > { %v6180_v62 = vpack.c.bf16 %v5980_v27, %v5980_v27  ;;  %v6136_v61 = vpack.c.bf16 %v5839_v14, %v5839_v14  ;;  %v6390_v0 = vsel %vm1072_vm1, %v6369_v46, 0  ;;  %v6173_v14 = vpack.c.bf16 %v5963_v5, %v5963_v5 }
 0xc64   : > { %v12399_v26 = vpop.f32.mrf.mxu1 }
 0xc65   : > { %v6366_v48 = vunpack.c.l.b16 %v6180_v62  ;;  %v6359_v7 = vunpack.c.l.b16 %v6173_v14  ;;  %v13490_v14 = vld [vmem:[#allocation45_spill] sm:$0xff] }
 0xc67   : > { %8270 = vmatmul.msk.bf16.vlgmr.msrb.gmra.mxu3 %vm1072_vm1, %v6254_v47  ;;  %v6370_v57 = vpack.c.b16 %v6366_v48, %v6365_v55  ;;  %v6361_v55 = vunpack.c.l.b16 %v6175_v50  ;;  %v6249_v48 = vunpack.c.l.b16 %v6136_v61 }
 0xc68   : > { %v5733_v37 = vpop.f32.mrf.mxu3  ;;  %v12412_v47 = vpop.f32.mrf.mxu2 }
 0xc69   : > { %v12409_v27 = vadd.f32 %v5733_v37, %v4010_v9  ;;  %v6393_v62 = vsel %vm1072_vm1, %v6370_v57, 0  ;;  %v6362_v9 = vunpack.c.l.b16 %v6176_v15  ;;  %v6255_v59 = vpack.c.b16 %v6249_v48, %v6248_v42 }
 0xc6a   : > { %6399 = vmatpush.bf16.xpose.msra.mxu1 %v6393_v62  ;;  %v6360_v15 = vunpack.c.l.b16 %v6174_v39  ;;  %v6137_v62 = vpack.c.bf16 %v5842_v56, %v5842_v56 }
 0xc6b   : > { %13488 = vst [vmem:[#allocation43_spill] sm:$0xff] %v12409_v27 }
 0xc6c   : > { %v12414_v25 = vpop.f32.mrf.mxu1  ;;  %v6367_v46 = vpack.c.b16 %v6360_v15, %v6359_v7  ;;  %v6250_v5 = vunpack.c.l.b16 %v6137_v62 }
 0xc6e   : > { %v6384_v52 = vsel %vm1072_vm1, %v6367_v46, 0  ;;  %v6256_v42 = vpack.c.b16 %v6251_v10, %v6250_v5 }
 0xc6f   : > { %8201 = vmatmul.msk.bf16.gmra.mxu1 %vm572_vm0, %v12337_v3  ;;  %v6368_v3 = vpack.c.b16 %v6362_v9, %v6361_v55  ;;  %v5847_v9 = vadd.f32 %v12370_v36, %v12361_v58  ;;  %v5852_v58 = vadd.f32 %v12370_v36, %v12390_v54  ;;  %v13495_v54 = vld [vmem:[#allocation21_spill] sm:$0xff] }
 0xc70   : > { %v12423_v57 = vpop.f32.mrf.mxu2  ;;  %v12438_v23 = vpop.f32.mrf.mxu3 }
 0xc71   : > { %v6387_v37 = vsel %vm1072_vm1, %v6368_v3, 0  ;;  %13489 = vst [vmem:[#allocation18_spill] sm:$0xff] %v12438_v23  ;;  %v6139_v3 = vpack.c.bf16 %v5847_v9, %v5847_v9  ;;  %v6141_v5 = vpack.c.bf16 %v5852_v58, %v5852_v58 }
 0xc72   : > { %6400 = vmatpush.bf16.xpose.msra.mxu1 %v6390_v0  ;;  %v5849_v0 = vadd.f32 %v12370_v36, %v12372_v6  ;;  %v5854_v6 = vadd.f32 %v12370_v36, %v12399_v26 }
 0xc73   : > { %v6339_v9 = vunpack.c.l.b16 %v6141_v5 }
 0xc74   : > { %v5858_v32 = vpop.f32.mrf.mxu1  ;;  %v6140_v56 = vpack.c.bf16 %v5849_v0, %v5849_v0  ;;  %v6142_v10 = vpack.c.bf16 %v5854_v6, %v5854_v6 }
 0xc76   : > { %v6253_v62 = vunpack.c.l.b16 %v6140_v56  ;;  %v6340_v0 = vunpack.c.l.b16 %v6142_v10  ;;  %v5857_v56 = vadd.f32 %v12370_v36, %v12414_v25 }
 0xc77   : > { %8271 = vmatmul.msk.bf16.gmra.mxu3 %vm1072_vm1, %v6255_v59 }
 0xc78   : > { %v12431_v50 = vpop.f32.mrf.mxu2  ;;  %v6347_v26 = vpack.c.b16 %v6340_v0, %v6339_v9  ;;  %v6143_v58 = vpack.c.bf16 %v5857_v56, %v5857_v56 }
 0xc7a   : > { %6401 = vmatpush.bf16.xpose.msra.mxu1 %v6387_v37  ;;  %v6252_v37 = vunpack.c.l.b16 %v6139_v3 }
 0xc7c   : > { %v12433_v61 = vpop.f32.mrf.mxu1  ;;  %v6257_v46 = vpack.c.b16 %v6253_v62, %v6252_v37  ;;  %v5859_v37 = vadd.f32 %v12370_v36, %v5858_v32 }
 0xc7e   : > { %v6144_v6 = vpack.c.bf16 %v5859_v37, %v5859_v37 }
 0xc7f   : > { %8202 = vmatmul.msk.bf16.gmra.mxu1 %vm572_vm0, %v12357_v34  ;;  %v13491_v34 = vld [vmem:[#allocation20_spill] sm:$0xff] }
 0xc80   : > { %v12440_v55 = vpop.f32.mrf.mxu2  ;;  %v4015_v39 = vadd.f32 %v13491_v34, %v13490_v14  ;;  %v13494_v14 = vld [vmem:[#allocation47_spill] sm:$0xff]  ;;  %v6342_v32 = vunpack.c.l.b16 %v6144_v6 }
 0xc81   : > { %v4020_v34 = vadd.f32 %v13495_v54, %v13494_v14 }
 0xc82   : > { %6402 = vmatpush.bf16.xpose.msra.mxu1 %v6384_v52 }
 0xc84   : > { %v12442_v48 = vpop.f32.mrf.mxu1 }
 0xc87   : > { %8272 = vmatmul.msk.bf16.gmra.mxu3 %vm1072_vm1, %v6256_v42 }
 0xc88   : > { %v5992_v7 = vpop.f32.mrf.mxu2 }
 0xc89   : > { %v5993_v0 = vadd.f32 %v12267_v24, %v5992_v7 }
 0xc8a   : > { %v5738_v59 = vpop.f32.mrf.mxu3 }
 0xc8b   : > { %v12451_v49 = vadd.f32 %v5738_v59, %v4015_v39 }
 0xc8c   : > { %v12453_v15 = vpop.f32.mrf.mxu1 }
 0xc8d   : > { %13492 = vst [vmem:[#allocation45_spill] sm:$0xff] %v12451_v49 }
 0xc8f   : > { %8203 = vmatmul.msk.bf16.gmra.mxu1 %vm572_vm0, %v12379_v40 }
 0xc90   : > { %v5994_v52 = vpop.f32.mrf.mxu2 }
 0xc91   : > { %v5995_v14 = vadd.f32 %v12267_v24, %v5994_v52 }
 0xc92   : > { %v12461_v4 = vpop.f32.mrf.mxu3 }
 0xc93   : > { %13493 = vst [vmem:[#allocation20_spill] sm:$0xff] %v12461_v4  ;;  %v6185_v4 = vpack.c.bf16 %v5993_v0, %v5993_v0  ;;  %v6186_v49 = vpack.c.bf16 %v5995_v14, %v5995_v14 }
 0xc94   : > { %v12463_v42 = vpop.f32.mrf.mxu1 }
 0xc95   : > { %v6457_v6 = vunpack.c.l.b16 %v6186_v49 }
 0xc97   : > { %8273 = vmatmul.msk.bf16.gmra.mxu3 %vm1072_vm1, %v6257_v46 }
 0xc98   : > { %v5997_v40 = vpop.f32.mrf.mxu2 }
 0xc99   : > { %v5998_v10 = vadd.f32 %v12267_v24, %v5997_v40 }
 0xc9a   : > { %v5743_v39 = vpop.f32.mrf.mxu3 }
 0xc9b   : > { %v12468_v59 = vadd.f32 %v5743_v39, %v4020_v34  ;;  %v6187_v54 = vpack.c.bf16 %v5998_v10, %v5998_v10  ;;  %v6341_v34 = vunpack.c.l.b16 %v6143_v58  ;;  %v5988_v58 = vadd.f32 %v12267_v24, %v12431_v50 }
 0xc9c   : > { %v5871_v3 = vpop.f32.mrf.mxu1  ;;  %v5862_v10 = vadd.f32 %v12370_v36, %v12433_v61  ;;  %v5983_v61 = vadd.f32 %v12267_v24, %v12412_v47 }
 0xc9d   : > { %13496 = vst [vmem:[#allocation47_spill] sm:$0xff] %v12468_v59  ;;  %v6458_v39 = vunpack.c.l.b16 %v6187_v54  ;;  %v13498_v59 = vld [vmem:[#allocation49_spill] sm:$0xff]  ;;  %v6348_v40 = vpack.c.b16 %v6342_v32, %v6341_v34  ;;  %v6183_v0 = vpack.c.bf16 %v5988_v58, %v5988_v58  ;;  %v5872_v47 = vadd.f32 %v12370_v36, %v5871_v3 }
 0xc9f   : > { %8274 = vmatmul.msk.bf16.vlgmr.msra.gmra.mxu1 %vm1072_vm1, %v6347_v26 }
 0xca0   : > { %v5999_v46 = vpop.f32.mrf.mxu2 }
 0xca1   : > { %v6000_v9 = vadd.f32 %v12267_v24, %v5999_v46 }
 0xca2   : > { %v12474_v62 = vpop.f32.mrf.mxu3 }
 0xca3   : > { %13497 = vst [vmem:[#allocation21_spill] sm:$0xff] %v12474_v62  ;;  %v6188_v25 = vpack.c.bf16 %v6000_v9, %v6000_v9  ;;  %v13499_v62 = vld [vmem:[#allocation23_spill] sm:$0xff]  ;;  %v5864_v9 = vadd.f32 %v12370_v36, %v12442_v48  ;;  %v5985_v48 = vadd.f32 %v12267_v24, %v12423_v57 }
 0xca4   : > { %v5873_v5 = vpop.f32.mrf.mxu1  ;;  %v4025_v56 = vadd.f32 %v13499_v62, %v13498_v59  ;;  %v5990_v59 = vadd.f32 %v12267_v24, %v12440_v55  ;;  %v6456_v62 = vunpack.c.l.b16 %v6185_v4  ;;  %v6454_v4 = vunpack.c.l.b16 %v6183_v0 }
 0xca5   : > { %v6459_v26 = vunpack.c.l.b16 %v6188_v25  ;;  %v6145_v25 = vpack.c.bf16 %v5862_v10, %v5862_v10  ;;  %v6146_v50 = vpack.c.bf16 %v5864_v9, %v5864_v9  ;;  %v6182_v58 = vpack.c.bf16 %v5985_v48, %v5985_v48 }
 0xca6   : > { %v6462_v54 = vpack.c.b16 %v6457_v6, %v6456_v62  ;;  %v5874_v57 = vadd.f32 %v12370_v36, %v5873_v5 }
 0xca7   : > { %v6463_v23 = vpack.c.b16 %v6459_v26, %v6458_v39  ;;  %v6343_v39 = vunpack.c.l.b16 %v6145_v25  ;;  %v6344_v26 = vunpack.c.l.b16 %v6146_v50  ;;  %v6453_v25 = vunpack.c.l.b16 %v6182_v58  ;;  %v13506_v58 = vld [vmem:[#allocation53_spill] sm:$0xff] }
 0xca8   : > { %v12484_v46 = vpop.f32.mrf.mxu2  ;;  %v6483_v49 = vsel %vm1072_vm1, %v6462_v54, 0  ;;  %v5867_v50 = vadd.f32 %v12370_v36, %v12453_v15  ;;  %v6150_v48 = vpack.c.bf16 %v5874_v57, %v5874_v57 }
 0xca9   : > { %v6486_v52 = vsel %vm1072_vm1, %v6463_v23, 0  ;;  %v6184_v23 = vpack.c.bf16 %v5990_v59, %v5990_v59  ;;  %v6349_v6 = vpack.c.b16 %v6344_v26, %v6343_v39 }
 0xcaa   : > { %v5748_v37 = vpop.f32.mrf.mxu3  ;;  %6492 = vmatpush.bf16.xpose.msra.mxu2 %v6486_v52  ;;  %v6181_v52 = vpack.c.bf16 %v5983_v61, %v5983_v61  ;;  %v6149_v61 = vpack.c.bf16 %v5872_v47, %v5872_v47  ;;  %v6147_v5 = vpack.c.bf16 %v5867_v50, %v5867_v50 }
 0xcab   : > { %v12482_v27 = vadd.f32 %v5748_v37, %v4025_v56  ;;  %v6455_v32 = vunpack.c.l.b16 %v6184_v23  ;;  %v13502_v56 = vld [vmem:[#allocation51_spill] sm:$0xff]  ;;  %v13503_v37 = vld [vmem:[#allocation34_spill] sm:$0xff] }
 0xcac   : > { %v12486_v7 = vpop.f32.mrf.mxu1  ;;  %v6452_v54 = vunpack.c.l.b16 %v6181_v52  ;;  %v6432_v26 = vunpack.c.l.b16 %v6149_v61  ;;  %v6345_v15 = vunpack.c.l.b16 %v6147_v5 }
 0xcad   : > { %13500 = vst [vmem:[#allocation49_spill] sm:$0xff] %v12482_v27  ;;  %v6461_v62 = vpack.c.b16 %v6455_v32, %v6454_v4 }
 0xcae   : > { %v6460_v3 = vpack.c.b16 %v6453_v25, %v6452_v54  ;;  %v5877_v54 = vadd.f32 %v12370_v36, %v12486_v7  ;;  %v8359_v7 = vld [vmem:[%s13342_s3 + $0x30] sm:$0xff] }
 0xcaf   : > { %8275 = vmatmul.msk.bf16.gmra.mxu1 %vm1072_vm1, %v6348_v40  ;;  %v4030_v40 = vadd.f32 %v13503_v37, %v13502_v56  ;;  %v6480_v23 = vsel %vm1072_vm1, %v6461_v62, 0  ;;  %v6433_v56 = vunpack.c.l.b16 %v6150_v48 }
 0xcb0   : > { %v12500_v34 = vpop.f32.mrf.mxu2 }
 0xcb2   : > { %v12498_v14 = vpop.f32.mrf.mxu3  ;;  %6493 = vmatpush.bf16.xpose.msra.mxu2 %v6483_v49  ;;  %v5869_v49 = vadd.f32 %v12370_v36, %v12463_v42  ;;  %v6440_v42 = vpack.c.b16 %v6433_v56, %v6432_v26 }
 0xcb3   : > { %13501 = vst [vmem:[#allocation23_spill] sm:$0xff] %v12498_v14  ;;  %v9088_v14 = vld [vmem:[#allocation2 + $0x90] sm:$0xff] }
 0xcb4   : > { %v5878_v55 = vpop.f32.mrf.mxu1  ;;  %v6148_v32 = vpack.c.bf16 %v5869_v49, %v5869_v49  ;;  %v6151_v49 = vpack.c.bf16 %v5877_v54, %v5877_v54 }
 0xcb5   : > { %v5879_v25 = vadd.f32 %v12370_v36, %v5878_v55 }
 0xcb6   : > { %v6346_v52 = vunpack.c.l.b16 %v6148_v32  ;;  %v6434_v32 = vunpack.c.l.b16 %v6151_v49 }
 0xcb7   : > { %v6152_v61 = vpack.c.bf16 %v5879_v25, %v5879_v25 }
 0xcb8   : > { %v12511_v9 = vpop.f32.mrf.mxu2  ;;  %v6350_v47 = vpack.c.b16 %v6346_v52, %v6345_v15  ;;  %v13511_v15 = vld [vmem:[#allocation38_spill] sm:$0xff] }
 0xcb9   : > { %v6435_v26 = vunpack.c.l.b16 %v6152_v61 }
 0xcba   : > { %v5753_v59 = vpop.f32.mrf.mxu3  ;;  %6494 = vmatpush.bf16.xpose.msra.mxu2 %v6480_v23 }
 0xcbb   : > { %v12509_v10 = vadd.f32 %v5753_v59, %v4030_v40  ;;  %v6477_v40 = vsel %vm1072_vm1, %v6460_v3, 0  ;;  %v13507_v59 = vld [vmem:[#allocation36_spill] sm:$0xff]  ;;  %v6441_v55 = vpack.c.b16 %v6435_v26, %v6434_v32 }
 0xcbc   : > { %v5881_v0 = vpop.f32.mrf.mxu1  ;;  %v4035_v62 = vadd.f32 %v13507_v59, %v13506_v58  ;;  %v8360_v3 = vld [vmem:[%s13342_s3 + $0x38] sm:$0xff] }
 0xcbd   : > { %13504 = vst [vmem:[#allocation51_spill] sm:$0xff] %v12509_v10  ;;  %6050 = vmatpush.bf16.msra.mxu0 %v8360_v3 }
 0xcbf   : > { %8276 = vmatmul.msk.bf16.gmra.mxu1 %vm1072_vm1, %v6349_v6 }
 0xcc0   : > { %v12523_v39 = vpop.f32.mrf.mxu2 }
 0xcc1   : > { %6051 = vmatpush.bf16.msra.mxu0 %v8359_v7 }
 0xcc2   : > { %v12521_v4 = vpop.f32.mrf.mxu3  ;;  %6495 = vmatpush.bf16.xpose.msra.mxu2 %v6477_v40  ;;  %v13510_v40 = vld [vmem:[#allocation55_spill] sm:$0xff] }
 0xcc3   : > { %13505 = vst [vmem:[#allocation34_spill] sm:$0xff] %v12521_v4  ;;  %v4040_v52 = vadd.f32 %v13511_v15, %v13510_v40 }
 0xcc4   : > { %v5883_v37 = vpop.f32.mrf.mxu1  ;;  %8246 = vmatmul.msk.bf16.vlgmr.msra.gmra.mxu0 %vm572_vm0, %v12141_v51  ;;  %v12561_v51 = vld [vmem:[%s13346_s7 + $0xc0] sm:$0xff] }
 0xcc8   : > { %v6012_v23 = vpop.f32.mrf.mxu2 }
 0xcc9   : > { %8278 = vmatmul.msk.bf16.vlgmr.msra.gmra.mxu2 %vm1072_vm1, %v6440_v42 }
 0xcca   : > { %v5758_v6 = vpop.f32.mrf.mxu3 }
 0xccb   : > { %v12528_v57 = vadd.f32 %v5758_v6, %v4035_v62  ;;  %v5882_v62 = vadd.f32 %v12370_v36, %v5881_v0  ;;  %v5884_v6 = vadd.f32 %v12370_v36, %v5883_v37 }
 0xccc   : > { %v5886_v50 = vpop.f32.mrf.mxu1 }
 0xccd   : > { %13508 = vst [vmem:[#allocation53_spill] sm:$0xff] %v12528_v57  ;;  %v6153_v54 = vpack.c.bf16 %v5882_v62, %v5882_v62  ;;  %v6154_v25 = vpack.c.bf16 %v5884_v6, %v5884_v6  ;;  %v5887_v6 = vadd.f32 %v12370_v36, %v5886_v50 }
 0xccf   : > { %8277 = vmatmul.msk.bf16.gmra.mxu1 %vm1072_vm1, %v6350_v47  ;;  %v6436_v3 = vunpack.c.l.b16 %v6153_v54  ;;  %v6437_v32 = vunpack.c.l.b16 %v6154_v25 }
 0xcd0   : > { %v6014_v5 = vpop.f32.mrf.mxu2 }
 0xcd1   : > { %v6442_v15 = vpack.c.b16 %v6437_v32, %v6436_v3  ;;  %v6015_v3 = vadd.f32 %v12267_v24, %v6014_v5 }
 0xcd2   : > { %v12535_v48 = vpop.f32.mrf.mxu3 }
 0xcd3   : > { %13509 = vst [vmem:[#allocation36_spill] sm:$0xff] %v12535_v48 }
 0xcd4   : > { %v5888_v56 = vpop.f32.mrf.mxu1  ;;  %8247 = vmatmul.msk.bf16.gmra.mxu0 %vm572_vm0, %v12148_v44  ;;  %v12581_v44 = vld [vmem:[%s13346_s7 + $0xc8] sm:$0xff] }
 0xcd8   : > { %v6017_v59 = vpop.f32.mrf.mxu2 }
 0xcd9   : > { %8279 = vmatmul.msk.bf16.gmra.mxu2 %vm1072_vm1, %v6441_v55  ;;  %v6018_v7 = vadd.f32 %v12267_v24, %v6017_v59  ;;  %v5889_v59 = vadd.f32 %v12370_v36, %v5888_v56  ;;  %v6155_v56 = vpack.c.bf16 %v5887_v6, %v5887_v6  ;;  %v6008_v6 = vadd.f32 %v12267_v24, %v12511_v9  ;;  %v12596_v9 = vld [vmem:[%s13346_s7 + $0xd0] sm:$0xff] }
 0xcda   : > { %v5763_v42 = vpop.f32.mrf.mxu3 }
 0xcdb   : > { %v12545_v58 = vadd.f32 %v5763_v42, %v4040_v52  ;;  %v6195_v37 = vpack.c.bf16 %v6018_v7, %v6018_v7  ;;  %v9068_v7 = vld [vmem:[#allocation2] sm:$0xff] }
 0xcdc   : > { %v12549_v47 = vpop.f32.mrf.mxu1 }
 0xcdd   : > { %13512 = vst [vmem:[#allocation55_spill] sm:$0xff] %v12545_v58  ;;  %v6551_v55 = vunpack.c.l.b16 %v6195_v37  ;;  %v6194_v37 = vpack.c.bf16 %v6015_v3, %v6015_v3 }
 0xcdf   : > { %v6550_v5 = vunpack.c.l.b16 %v6194_v37 }
 0xce0   : > { %v6019_v61 = vpop.f32.mrf.mxu2 }
 0xce1   : > { %v6020_v0 = vadd.f32 %v12267_v24, %v6019_v61  ;;  %v6013_v61 = vadd.f32 %v12267_v24, %v6012_v23 }
 0xce2   : > { %v12554_v49 = vpop.f32.mrf.mxu3 }
 0xce3   : > { %13513 = vst [vmem:[#allocation38_spill] sm:$0xff] %v12554_v49  ;;  %v6196_v40 = vpack.c.bf16 %v6020_v0, %v6020_v0  ;;  %v6193_v50 = vpack.c.bf16 %v6013_v61, %v6013_v61 }
 0xce4   : > { %v5893_v26 = vpop.f32.mrf.mxu1  ;;  %8248 = vmatmul.msk.bf16.gmra.mxu0 %vm572_vm0, %v12160_v17 }
 0xce5   : > { %v6552_v52 = vunpack.c.l.b16 %v6196_v40  ;;  %v6549_v23 = vunpack.c.l.b16 %v6193_v50  ;;  %v6191_v50 = vpack.c.bf16 %v6008_v6, %v6008_v6 }
 0xce7   : > { %v6556_v62 = vpack.c.b16 %v6552_v52, %v6551_v55  ;;  %v6156_v55 = vpack.c.bf16 %v5889_v59, %v5889_v59  ;;  %v6555_v52 = vpack.c.b16 %v6550_v5, %v6549_v23  ;;  %v6010_v59 = vadd.f32 %v12267_v24, %v12523_v39 }
 0xce9   : > { %8280 = vmatmul.msk.bf16.gmra.mxu2 %vm1072_vm1, %v6442_v15  ;;  %v6579_v32 = vsel %vm1072_vm1, %v6556_v62, 0  ;;  %v6576_v3 = vsel %vm1072_vm1, %v6555_v52, 0  ;;  %v6192_v37 = vpack.c.bf16 %v6010_v59, %v6010_v59 }
 0xcea   : > { %v6311_v42 = vpop.f32.mrf.mxu3  ;;  %6585 = vmatpush.bf16.xpose.msra.mxu3 %v6579_v32  ;;  %v9069_v32 = vld [vmem:[#allocation2 + $0x8] sm:$0xff] }
 0xceb   : > { %v6312_v54 = vadd.f32 %v12561_v51, %v6311_v42  ;;  %v6438_v42 = vunpack.c.l.b16 %v6155_v56  ;;  %v6548_v39 = vunpack.c.l.b16 %v6192_v37 }
 0xcec   : > { %v12566_v25 = vpop.f32.mrf.mxu1 }
 0xced   : > { %v12574_v0 = vadd.f32 %v9068_v7, %v6312_v54  ;;  %v6439_v54 = vunpack.c.l.b16 %v6156_v55  ;;  %v6547_v55 = vunpack.c.l.b16 %v6191_v50 }
 0xcef   : > { %v6642_v40 = vsel %vm1437_vm2, %v12574_v0, -inf  ;;  %v6554_v5 = vpack.c.b16 %v6548_v39, %v6547_v55 }
 0xcf0   : > { %6643 = vmax.xlane.f32.xlu0 %v6642_v40  ;;  %v6443_v40 = vpack.c.b16 %v6439_v54, %v6438_v42  ;;  %v6003_v42 = vadd.f32 %v12267_v24, %v12484_v46  ;;  %v6005_v54 = vadd.f32 %v12267_v24, %v12500_v34  ;;  %v12617_v24 = vld [vmem:[%s13346_s7 + $0xd8] sm:$0xff] }
 0xcf1   : > { %v6573_v59 = vsel %vm1072_vm1, %v6554_v5, 0 }
 0xcf2   : > { %v6313_v15 = vpop.f32.mrf.mxu3  ;;  %6586 = vmatpush.bf16.xpose.msra.mxu3 %v6576_v3  ;;  %v9070_v3 = vld [vmem:[#allocation2 + $0x10] sm:$0xff] }
 0xcf3   : > { %v6314_v62 = vadd.f32 %v12581_v44, %v6313_v15  ;;  %v5892_v15 = vadd.f32 %v12370_v36, %v12549_v47 }
 0xcf4   : > { %v5898_v61 = vpop.f32.mrf.mxu1  ;;  %8249 = vmatmul.msk.bf16.gmra.mxu0 %vm572_vm0, %v12175_v2 }
 0xcf5   : > { %v12589_v7 = vadd.f32 %v9069_v32, %v6314_v62  ;;  %v5894_v62 = vadd.f32 %v12370_v36, %v5893_v26  ;;  %v6189_v32 = vpack.c.bf16 %v6003_v42, %v6003_v42  ;;  %v6190_v26 = vpack.c.bf16 %v6005_v54, %v6005_v54 }
 0xcf6   : > { %v6157_v17 = vpack.c.bf16 %v5892_v15, %v5892_v15 }
 0xcf7   : > { %v6645_v56 = vsel %vm1437_vm2, %v12589_v7, -inf  ;;  %v6158_v37 = vpack.c.bf16 %v5894_v62, %v5894_v62  ;;  %v6545_v46 = vunpack.c.l.b16 %v6189_v32  ;;  %v6546_v34 = vunpack.c.l.b16 %v6190_v26 }
 0xcf8   : > { %6646 = vmax.xlane.f32.xlu1 %v6645_v56  ;;  %v6525_v39 = vunpack.c.l.b16 %v6157_v17  ;;  %v5897_v26 = vadd.f32 %v12370_v36, %v12566_v25  ;;  %v9072_v17 = vld [vmem:[#allocation2 + $0x20] sm:$0xff]  ;;  %v12644_v25 = vld [vmem:[%s13346_s7 + $0xe8] sm:$0xff] }
 0xcf9   : > { %8281 = vmatmul.msk.bf16.gmra.mxu2 %vm1072_vm1, %v6443_v40  ;;  %v6553_v40 = vpack.c.b16 %v6546_v34, %v6545_v46 }
 0xcfa   : > { %v6316_v23 = vpop.f32.mrf.mxu3  ;;  %6587 = vmatpush.bf16.xpose.msra.mxu3 %v6573_v59  ;;  %v12628_v59 = vld [vmem:[%s13346_s7 + $0xe0] sm:$0xff]  ;;  %v6159_v34 = vpack.c.bf16 %v5897_v26, %v5897_v26 }
 0xcfb   : > { %v6317_v52 = vadd.f32 %v12596_v9, %v6316_v23  ;;  %v6526_v23 = vunpack.c.l.b16 %v6158_v37  ;;  %v6570_v5 = vsel %vm1072_vm1, %v6553_v40, 0 }
 0xcfc   : > { %v5901_v6 = vpop.f32.mrf.mxu1 }
 0xcfd   : > { %v12610_v47 = vadd.f32 %v9070_v3, %v6317_v52  ;;  %v9071_v52 = vld [vmem:[#allocation2 + $0x18] sm:$0xff]  ;;  %v6533_v54 = vpack.c.b16 %v6526_v23, %v6525_v39  ;;  %v9073_v23 = vld [vmem:[#allocation2 + $0x28] sm:$0xff] }
 0xcff   : > { %v6648_v50 = vsel %vm1437_vm2, %v12610_v47, -inf }
 0xd00   : > { %6649 = vmax.xlane.f32.xlu2 %v6648_v50  ;;  %v5899_v50 = vadd.f32 %v12370_v36, %v5898_v61 }
 0xd02   : > { %v6318_v56 = vpop.f32.mrf.mxu3  ;;  %6588 = vmatpush.bf16.xpose.msra.mxu3 %v6570_v5 }
 0xd03   : > { %v6319_v55 = vadd.f32 %v12617_v24, %v6318_v56  ;;  %v6160_v56 = vpack.c.bf16 %v5899_v50, %v5899_v50  ;;  %v5902_v50 = vadd.f32 %v12370_v36, %v5901_v6  ;;  %v12669_v6 = vld [vmem:[%s13346_s7 + $0xf8] sm:$0xff] }
 0xd04   : > { %v5903_v15 = vpop.f32.mrf.mxu1  ;;  %8250 = vmatmul.msk.bf16.gmra.mxu0 %vm572_vm0, %v12190_v30 }
 0xd05   : > { %v12621_v42 = vadd.f32 %v9071_v52, %v6319_v55  ;;  %v6527_v55 = vunpack.c.l.b16 %v6159_v34  ;;  %v6528_v39 = vunpack.c.l.b16 %v6160_v56 }
 0xd07   : > { %v6651_v62 = vsel %vm1437_vm2, %v12621_v42, -inf }
 0xd08   : > { %6652 = vmax.xlane.f32.xlu0 %v6651_v62  ;;  %v6534_v62 = vpack.c.b16 %v6528_v39, %v6527_v55 }
 0xd09   : > { %8282 = vmatmul.msk.bf16.vlgmr.msra.gmra.mxu3 %vm1072_vm1, %v6533_v54  ;;  %v12654_v54 = vld [vmem:[%s13346_s7 + $0xf0] sm:$0xff] }
 0xd0a   : > { %v6321_v3 = vpop.f32.mrf.mxu3 }
 0xd0b   : > { %v6322_v32 = vadd.f32 %v12628_v59, %v6321_v3 }
 0xd0c   : > { %v5906_v61 = vpop.f32.mrf.mxu1 }
 0xd0d   : > { %v12637_v37 = vadd.f32 %v9072_v17, %v6322_v32  ;;  %v5904_v17 = vadd.f32 %v12370_v36, %v5903_v15 }
 0xd0f   : > { %v6654_v46 = vsel %vm1437_vm2, %v12637_v37, -inf }
 0xd10   : > { %6655 = vmax.xlane.f32.xlu1 %v6654_v46  ;;  %v9074_v46 = vld [vmem:[#allocation2 + $0x30] sm:$0xff] }
 0xd12   : > { %v6323_v40 = vpop.f32.mrf.mxu3 }
 0xd13   : > { %v6324_v2 = vadd.f32 %v12644_v25, %v6323_v40  ;;  %v6161_v40 = vpack.c.bf16 %v5902_v50, %v5902_v50 }
 0xd14   : > { %v5908_v32 = vpop.f32.mrf.mxu1  ;;  %8251 = vmatmul.msk.bf16.gmra.mxu0 %vm572_vm0, %v12207_v41 }
 0xd15   : > { %v12647_v5 = vadd.f32 %v9073_v23, %v6324_v2  ;;  %v6162_v2 = vpack.c.bf16 %v5904_v17, %v5904_v17  ;;  %v6529_v30 = vunpack.c.l.b16 %v6161_v40  ;;  %v9076_v17 = vld [vmem:[#allocation2 + $0x40] sm:$0xff] }
 0xd17   : > { %v6657_v52 = vsel %vm1437_vm2, %v12647_v5, -inf  ;;  %v6530_v39 = vunpack.c.l.b16 %v6162_v2 }
 0xd18   : > { %6658 = vmax.xlane.f32.xlu2 %v6657_v52  ;;  %v9075_v52 = vld [vmem:[#allocation2 + $0x38] sm:$0xff] }
 0xd19   : > { %8283 = vmatmul.msk.bf16.gmra.mxu3 %vm1072_vm1, %v6534_v62  ;;  %v6535_v50 = vpack.c.b16 %v6530_v39, %v6529_v30 }
 0xd1a   : > { %v6326_v3 = vpop.f32.mrf.mxu3 }
 0xd1b   : > { %v6327_v26 = vadd.f32 %v12654_v54, %v6326_v3 }
 0xd1c   : > { %v6404_v23 = vpop.f32.mrf.mxu1 }
 0xd1d   : > { %v12662_v34 = vadd.f32 %v9074_v46, %v6327_v26  ;;  %v6405_v3 = vadd.f32 %v12561_v51, %v6404_v23 }
 0xd1f   : > { %v6660_v56 = vsel %vm1437_vm2, %v12662_v34, -inf  ;;  %v12677_v46 = vadd.f32 %v9076_v17, %v6405_v3 }
 0xd20   : > { %6661 = vmax.xlane.f32.xlu0 %v6660_v56  ;;  %v5907_v56 = vadd.f32 %v12370_v36, %v5906_v61 }
 0xd21   : > { %v6666_v40 = vsel %vm1437_vm2, %v12677_v46, -inf }
 0xd22   : > { %v6328_v15 = vpop.f32.mrf.mxu3  ;;  %v6163_v2 = vpack.c.bf16 %v5907_v56, %v5907_v56 }
 0xd23   : > { %v6329_v55 = vadd.f32 %v12669_v6, %v6328_v15  ;;  %v5909_v15 = vadd.f32 %v12370_v36, %v5908_v32 }
 0xd24   : > { %v6531_v30 = vunpack.c.l.b16 %v6163_v2  ;;  %8252 = vmatmul.msk.bf16.gmra.mxu0 %vm572_vm0, %v12222_v22  ;;  %v6406_v36 = vpop.f32.mrf.mxu1 }
 0xd25   : > { %v12672_v62 = vadd.f32 %v9075_v52, %v6329_v55  ;;  %v6164_v55 = vpack.c.bf16 %v5909_v15, %v5909_v15  ;;  %v6407_v15 = vadd.f32 %v12581_v44, %v6406_v36 }
 0xd27   : > { %v6663_v26 = vsel %vm1437_vm2, %v12672_v62, -inf  ;;  %v6532_v39 = vunpack.c.l.b16 %v6164_v55 }
 0xd28   : > { %6664 = vmax.xlane.f32.xlu1 %v6663_v26 }
 0xd29   : > { %8284 = vmatmul.msk.bf16.gmra.mxu3 %vm1072_vm1, %v6535_v50  ;;  %v6536_v23 = vpack.c.b16 %v6532_v39, %v6531_v30 }
 0xd2c   : > { %v6409_v22 = vpop.f32.mrf.mxu1 }
 0xd30   : > { %6667 = vmax.xlane.f32.xlu1 %v6666_v40  ;;  %v9077_v40 = vld [vmem:[#allocation2 + $0x48] sm:$0xff] }
 0xd31   : > { %v12710_v2 = vadd.f32 %v9077_v40, %v6407_v15 }
 0xd33   : > { %v6669_v36 = vsel %vm1437_vm2, %v12710_v2, -inf }
 0xd34   : > { %8253 = vmatmul.msk.bf16.gmra.mxu0 %vm572_vm0, %v12241_v8  ;;  %v6411_v30 = vpop.f32.mrf.mxu1 }
 0xd39   : > { %8285 = vmatmul.msk.bf16.gmra.mxu3 %vm1072_vm1, %v6536_v23 }
 0xd3c   : > { %v6414_v15 = vpop.f32.mrf.mxu1 }
 0xd41   : > { %v12691_v41 = vpop.f32.mrf.mxu0 }
 0xd44   : > { %8254 = vmatmul.msk.bf16.gmra.mxu0 %vm572_vm0, %v12260_v31 }
 0xd49   : > { %v12695_v61 = vpop.f32.mrf.mxu0 }
 0xd51   : > { %v12698_v26 = vpop.f32.mrf.mxu0 }
 0xd54   : > { %8255 = vmatmul.msk.bf16.gmra.mxu0 %vm572_vm0, %v12281_v35 }
 0xd63   : > { %v6644_v32 = vpop.xlane.xlu0 %6643 }
 0xd64   : > { %v6738_v52 = vsub.f32 %v12574_v0, %v6644_v32  ;;  %v12708_v0 = vpop.f32.mrf.mxu0  ;;  %v6410_v32 = vadd.f32 %v12596_v9, %v6409_v22  ;;  %8256 = vmatmul.msk.bf16.gmra.mxu0 %vm572_vm0, %v12293_v33 }
 0xd66   : > { %v6770_v3 = vmul.f32 1.442695, %v6738_v52 }
 0xd68   : > { %8793 = vpow2.f32 %v6770_v3  ;;  %v9078_v3 = vld [vmem:[#allocation2 + $0x50] sm:$0xff] }
 0xd6b   : > { %v6647_v50 = vpop.xlane.xlu1 %6646 }
 0xd6c   : > { %v6739_v17 = vsub.f32 %v12589_v7, %v6647_v50  ;;  %v12720_v52 = vpop.f32.mrf.mxu0  ;;  %v12722_v50 = vadd.f32 %v9078_v3, %v6410_v32 }
 0xd6e   : > { %v12703_v8 = vpop.eup %8793  ;;  %v6772_v31 = vmul.f32 1.442695, %v6739_v17  ;;  %v6672_v40 = vsel %vm1437_vm2, %v12722_v50, -inf }
 0xd6f   : > { %v6834_v56 = vsel %vm1437_vm2, %v12703_v8, 0.0 }
 0xd70   : > { %8795 = vpow2.f32 %v6772_v31  ;;  %6835 = vadd.xlane.f32.xlu2 %v6834_v56 }
 0xd73   : > { %v6650_v55 = vpop.xlane.xlu2 %6649 }
 0xd74   : > { %v6740_v7 = vsub.f32 %v12610_v47, %v6650_v55  ;;  %v6412_v55 = vadd.f32 %v12617_v24, %v6411_v30  ;;  %8257 = vmatmul.msk.bf16.gmra.mxu0 %vm572_vm0, %v12304_v60  ;;  %v9081_v60 = vld [vmem:[#allocation2 + $0x68] sm:$0xff] }
 0xd76   : > { %v12713_v35 = vpop.eup %8795  ;;  %v6774_v39 = vmul.f32 1.442695, %v6740_v7  ;;  %v12734_v7 = vpop.f32.mrf.mxu0 }
 0xd77   : > { %v6837_v23 = vsel %vm1437_vm2, %v12713_v35, 0.0 }
 0xd78   : > { %8797 = vpow2.f32 %v6774_v39  ;;  %6838 = vadd.xlane.f32.xlu0 %v6837_v23  ;;  %6670 = vmax.xlane.f32.xlu2 %v6669_v36 }
 0xd7b   : > { %v6653_v47 = vpop.xlane.xlu0 %6652 }
 0xd7c   : > { %v6741_v17 = vsub.f32 %v12621_v42, %v6653_v47  ;;  %v9079_v42 = vld [vmem:[#allocation2 + $0x58] sm:$0xff]  ;;  %v6415_v47 = vadd.f32 %v12628_v59, %v6414_v15 }
 0xd7d   : > { %v12736_v39 = vadd.f32 %v9079_v42, %v6412_v55 }
 0xd7e   : > { %v12727_v31 = vpop.eup %8797  ;;  %v6776_v56 = vmul.f32 1.442695, %v6741_v17  ;;  %v12749_v17 = vld [vmem:[%s13345_s6 + $0x3] ss:$0 sm:$0xff] }
 0xd7f   : > { %v6840_v22 = vsel %vm1437_vm2, %v12727_v31, 0.0  ;;  %v6675_v3 = vsel %vm1437_vm2, %v12736_v39, -inf  ;;  %v6056_v63 = vadd.f32 %v12749_v17, %v12695_v61 }
 0xd80   : > { %8799 = vpow2.f32 %v6776_v56  ;;  %6841 = vadd.xlane.f32.xlu0 %v6840_v22  ;;  %6673 = vmax.xlane.f32.xlu2 %v6672_v40  ;;  %v6068_v56 = vpop.f32.mrf.mxu0  ;;  %v9080_v22 = vld [vmem:[#allocation2 + $0x60] sm:$0xff] }
 0xd81   : > { %v12751_v40 = vadd.f32 %v9080_v22, %v6415_v47  ;;  %v6198_v11 = vpack.c.bf16 %v6056_v63, %v6056_v63 }
 0xd83   : > { %v6656_v33 = vpop.xlane.xlu1 %6655  ;;  %v7055_v18 = vunpack.c.l.b16 %v6198_v11 }
 0xd84   : > { %v6742_v23 = vsub.f32 %v12637_v37, %v6656_v33  ;;  %v6416_v37 = vpop.f32.mrf.mxu1  ;;  %v6069_v33 = vadd.f32 %v12749_v17, %v6068_v56 }
 0xd86   : > { %v12739_v36 = vpop.eup %8799  ;;  %v6778_v32 = vmul.f32 1.442695, %v6742_v23 }
 0xd87   : > { %v6843_v30 = vsel %vm1437_vm2, %v12739_v36, 0.0 }
 0xd88   : > { %8801 = vpow2.f32 %v6778_v32  ;;  %6676 = vmax.xlane.f32.xlu0 %v6675_v3  ;;  %6844 = vadd.xlane.f32.xlu1 %v6843_v30  ;;  %v6678_v32 = vsel %vm1437_vm2, %v12751_v40, -inf  ;;  %v6417_v30 = vadd.f32 %v12644_v25, %v6416_v37  ;;  %v6070_v47 = vpop.f32.mrf.mxu0 }
 0xd89   : > { %v6071_v22 = vadd.f32 %v12749_v17, %v6070_v47 }
 0xd8b   : > { %v6659_v55 = vpop.xlane.xlu2 %6658  ;;  %v6204_v48 = vpack.c.bf16 %v6071_v22, %v6071_v22  ;;  %v9083_v22 = vld [vmem:[%s9233_s13 + $0x60] sm:$0xff] }
 0xd8c   : > { %v6743_v42 = vsub.f32 %v12647_v5, %v6659_v55  ;;  %v6203_v5 = vpack.c.bf16 %v6069_v33, %v6069_v33  ;;  %v6419_v56 = vpop.f32.mrf.mxu1  ;;  %v12765_v55 = vadd.f32 %v9081_v60, %v6417_v30  ;;  %v9082_v30 = vld [vmem:[#allocation2 + $0x70] sm:$0xff]  ;;  %8258 = vmatmul.msk.bf16.gmra.mxu0 %vm572_vm0, %v9083_v22 }
 0xd8d   : > { %v7061_v37 = vunpack.c.l.b16 %v6204_v48 }
 0xd8e   : > { %v12757_v15 = vpop.eup %8801  ;;  %v6780_v23 = vmul.f32 1.442695, %v6743_v42  ;;  %v7060_v58 = vunpack.c.l.b16 %v6203_v5 }
 0xd8f   : > { %v6846_v3 = vsel %vm1437_vm2, %v12757_v15, 0.0 }
 0xd90   : > { %8803 = vpow2.f32 %v6780_v23  ;;  %6679 = vmax.xlane.f32.xlu0 %v6678_v32  ;;  %6847 = vadd.xlane.f32.xlu1 %v6846_v3  ;;  %v6681_v23 = vsel %vm1437_vm2, %v12765_v55, -inf  ;;  %v6420_v32 = vadd.f32 %v12654_v54, %v6419_v56  ;;  %v7065_v3 = vpack.c.b16 %v7061_v37, %v7060_v58 }
 0xd92   : > { %7086 = vmatpush.bf16.msrb.mxu0 %v7065_v3  ;;  %v12777_v5 = vadd.f32 %v9082_v30, %v6420_v32 }
 0xd93   : > { %v6662_v42 = vpop.xlane.xlu0 %6661 }
 0xd94   : > { %v6744_v49 = vsub.f32 %v12662_v34, %v6662_v42  ;;  %v12775_v34 = vpop.f32.mrf.mxu0  ;;  %v6421_v47 = vpop.f32.mrf.mxu1 }
 0xd95   : > { %v6422_v42 = vadd.f32 %v12669_v6, %v6421_v47 }
 0xd96   : > { %v12768_v57 = vpop.eup %8803  ;;  %v6782_v4 = vmul.f32 1.442695, %v6744_v49 }
 0xd97   : > { %v6849_v33 = vsel %vm1437_vm2, %v12768_v57, 0.0 }
 0xd98   : > { %8805 = vpow2.f32 %v6782_v4  ;;  %6850 = vadd.xlane.f32.xlu2 %v6849_v33  ;;  %6682 = vmax.xlane.f32.xlu1 %v6681_v23  ;;  %v6684_v4 = vsel %vm1437_vm2, %v12777_v5, -inf  ;;  %v9084_v33 = vld [vmem:[#allocation2 + $0x78] sm:$0xff] }
 0xd99   : > { %v12791_v23 = vadd.f32 %v9084_v33, %v6422_v42  ;;  %v9086_v42 = vld [vmem:[%s9233_s13 + $0x68] sm:$0xff] }
 0xd9b   : > { %v6665_v49 = vpop.xlane.xlu1 %6664  ;;  %v6687_v47 = vsel %vm1437_vm2, %v12791_v23, -inf }
 0xd9c   : > { %v6745_v48 = vsub.f32 %v12672_v62, %v6665_v49  ;;  %v12789_v37 = vpop.f32.mrf.mxu0  ;;  %v6497_v62 = vpop.f32.mrf.mxu2  ;;  %8259 = vmatmul.msk.bf16.gmra.mxu0 %vm572_vm0, %v9086_v42 }
 0xd9d   : > { %v6498_v22 = vadd.f32 %v12561_v51, %v6497_v62 }
 0xd9e   : > { %v12782_v60 = vpop.eup %8805  ;;  %v6784_v56 = vmul.f32 1.442695, %v6745_v48 }
 0xd9f   : > { %v6852_v58 = vsel %vm1437_vm2, %v12782_v60, 0.0 }
 0xda0   : > { %8807 = vpow2.f32 %v6784_v56  ;;  %6685 = vmax.xlane.f32.xlu1 %v6684_v4  ;;  %6853 = vadd.xlane.f32.xlu2 %v6852_v58  ;;  %v9085_v4 = vld [vmem:[#allocation2 + $0x80] sm:$0xff] }
 0xda1   : > { %v12803_v58 = vadd.f32 %v9085_v4, %v6498_v22 }
 0xda3   : > { %v6668_v32 = vpop.xlane.xlu1 %6667  ;;  %v6690_v62 = vsel %vm1437_vm2, %v12803_v58, -inf }
 0xda4   : > { %v6746_v3 = vsub.f32 %v12677_v46, %v6668_v32  ;;  %v12801_v56 = vpop.f32.mrf.mxu0  ;;  %v6499_v46 = vpop.f32.mrf.mxu2 }
 0xda6   : > { %v12794_v30 = vpop.eup %8807  ;;  %v6786_v49 = vmul.f32 1.442695, %v6746_v3  ;;  %v6500_v3 = vadd.f32 %v12581_v44, %v6499_v46  ;;  %v9089_v46 = vld [vmem:[%s9233_s13 + $0x70] sm:$0xff] }
 0xda7   : > { %v6855_v48 = vsel %vm1437_vm2, %v12794_v30, 0.0 }
 0xda8   : > { %8809 = vpow2.f32 %v6786_v49  ;;  %6856 = vadd.xlane.f32.xlu0 %v6855_v48  ;;  %6688 = vmax.xlane.f32.xlu2 %v6687_v47  ;;  %v9087_v48 = vld [vmem:[#allocation2 + $0x88] sm:$0xff] }
 0xda9   : > { %v12816_v47 = vadd.f32 %v9087_v48, %v6500_v3  ;;  %v6064_v3 = vadd.f32 %v12749_v17, %v12720_v52  ;;  %v6066_v48 = vadd.f32 %v12749_v17, %v12734_v7  ;;  %v9090_v7 = vld [vmem:[%s9233_s13 + $0x78] sm:$0xff] }
 0xdab   : > { %v6693_v4 = vsel %vm1437_vm2, %v12816_v47, -inf }
 0xdac   : > { %v12814_v49 = vpop.f32.mrf.mxu0  ;;  %v6502_v22 = vpop.f32.mrf.mxu2  ;;  %8260 = vmatmul.msk.bf16.gmra.mxu0 %vm572_vm0, %v9089_v46 }
 0xdad   : > { %v6503_v42 = vadd.f32 %v12596_v9, %v6502_v22  ;;  %v6061_v22 = vadd.f32 %v12749_v17, %v12708_v0 }
 0xdae   : > { %v12807_v33 = vpop.eup %8809 }
 0xdaf   : > { %v6858_v32 = vsel %vm1437_vm2, %v12807_v33, 0.0  ;;  %v12823_v27 = vadd.f32 %v9088_v14, %v6503_v42  ;;  %v6059_v14 = vadd.f32 %v12749_v17, %v12698_v26  ;;  %v6202_v42 = vpack.c.bf16 %v6066_v48, %v6066_v48 }
 0xdb0   : > { %6859 = vadd.xlane.f32.xlu0 %v6858_v32  ;;  %6691 = vmax.xlane.f32.xlu2 %v6690_v62  ;;  %v6200_v52 = vpack.c.bf16 %v6061_v22, %v6061_v22 }
 0xdb1   : > { %v6696_v32 = vsel %vm1437_vm2, %v12823_v27, -inf  ;;  %v6199_v43 = vpack.c.bf16 %v6059_v14, %v6059_v14  ;;  %v7059_v16 = vunpack.c.l.b16 %v6202_v42 }
 0xdb2   : > { %v7057_v0 = vunpack.c.l.b16 %v6200_v52 }
 0xdb3   : > { %v7056_v38 = vunpack.c.l.b16 %v6199_v43 }
 0xdb4   : > { %v12821_v10 = vpop.f32.mrf.mxu0 }
 0xdb5   : > { %v7063_v53 = vpack.c.b16 %v7057_v0, %v7056_v38  ;;  %v6504_v0 = vpop.f32.mrf.mxu2 }
 0xdb8   : > { %6694 = vmax.xlane.f32.xlu0 %v6693_v4  ;;  %v6201_v4 = vpack.c.bf16 %v6064_v3, %v6064_v3 }
 0xdba   : > { %v7058_v45 = vunpack.c.l.b16 %v6201_v4 }
 0xdbc   : > { %v12829_v62 = vpop.f32.mrf.mxu0  ;;  %8261 = vmatmul.msk.bf16.gmra.mxu0 %vm572_vm0, %v9090_v7  ;;  %v7064_v3 = vpack.c.b16 %v7059_v16, %v7058_v45 }
 0xdbe   : > { %7087 = vmatpush.bf16.msrb.mxu0 %v7064_v3 }
 0xdc0   : > { %6697 = vmax.xlane.f32.xlu0 %v6696_v32  ;;  %v6054_v32 = vadd.f32 %v12749_v17, %v12691_v41 }
 0xdc2   : > { %v6197_v26 = vpack.c.bf16 %v6054_v32, %v6054_v32  ;;  %7088 = vmatpush.bf16.msrb.mxu0 %v7063_v53 }
 0xdc4   : > { %v6088_v46 = vpop.f32.mrf.mxu0  ;;  %v7054_v29 = vunpack.c.l.b16 %v6197_v26 }
 0xdc5   : > { %v6089_v41 = vadd.f32 %v12749_v17, %v6088_v46 }
 0xdc6   : > { %v7062_v14 = vpack.c.b16 %v7055_v18, %v7054_v29 }
 0xdc7   : > { %v6211_v61 = vpack.c.bf16 %v6089_v41, %v6089_v41 }
 0xdc8   : > { %7089 = vmatpush.bf16.msrb.mxu0 %v7062_v14 }
 0xdc9   : > { %v7145_v42 = vunpack.c.l.b16 %v6211_v61 }
 0xdcc   : > { %v6090_v48 = vpop.f32.mrf.mxu0 }
 0xdcd   : > { %v6091_v22 = vadd.f32 %v12749_v17, %v6090_v48 }
 0xdcf   : > { %v6212_v63 = vpack.c.bf16 %v6091_v22, %v6091_v22 }
 0xdd1   : > { %v7146_v43 = vunpack.c.l.b16 %v6212_v63 }
 0xdd3   : > { %v7150_v32 = vpack.c.b16 %v7146_v43, %v7145_v42 }
 0xdd4   : > { %v12847_v4 = vpop.f32.mrf.mxu0 }
 0xdd5   : > { %7171 = vmatpush.bf16.msrb.mxu1 %v7150_v32 }
 0xddc   : > { %v12849_v16 = vpop.f32.mrf.mxu0 }
 0xde3   : > { %v6836_v45 = vpop.xlane.xlu2 %6835 }
 0xde4   : > { %8811 = vrcp.f32 %v6836_v45  ;;  %v12851_v11 = vpop.f32.mrf.mxu0 }
 0xdea   : > { %v8812_v46 = vpop.eup %8811 }
 0xdeb   : > { %v6671_v38 = vpop.xlane.xlu2 %6670  ;;  %v6839_v53 = vpop.xlane.xlu0 %6838  ;;  %v6962_v52 = vmul.f32 %v8812_v46, %v12703_v8 }
 0xdec   : > { %v6747_v18 = vsub.f32 %v12710_v2, %v6671_v38  ;;  %8813 = vrcp.f32 %v6839_v53  ;;  %v12855_v7 = vpop.f32.mrf.mxu0  ;;  %v6507_v46 = vpop.f32.mrf.mxu2 }
 0xded   : > { %v6994_v3 = vpack.c.bf16 %v6962_v52, %v6962_v52  ;;  %v6505_v52 = vadd.f32 %v12617_v24, %v6504_v0 }
 0xdee   : > { %v6788_v29 = vmul.f32 1.442695, %v6747_v18 }
 0xdef   : > { %v7034_v63 = vunpack.c.l.b16 %v6994_v3 }
 0xdf0   : > { %8815 = vpow2.f32 %v6788_v29 }
 0xdf2   : > { %v8814_v26 = vpop.eup %8813 }
 0xdf3   : > { %v6963_v48 = vmul.f32 %v8814_v26, %v12713_v35  ;;  %v6674_v41 = vpop.xlane.xlu2 %6673  ;;  %v6842_v61 = vpop.xlane.xlu0 %6841 }
 0xdf4   : > { %v6748_v14 = vsub.f32 %v12722_v50, %v6674_v41  ;;  %8817 = vrcp.f32 %v6842_v61  ;;  %v12863_v45 = vpop.f32.mrf.mxu0  ;;  %v9091_v61 = vld [vmem:[#allocation2 + $0x98] sm:$0xff] }
 0xdf5   : > { %v6995_v22 = vpack.c.bf16 %v6963_v48, %v6963_v48 }
 0xdf6   : > { %v12859_v42 = vpop.eup %8815  ;;  %v6790_v2 = vmul.f32 1.442695, %v6748_v14  ;;  %v12875_v14 = vadd.f32 %v9091_v61, %v6505_v52  ;;  %v9092_v52 = vld [vmem:[#allocation2 + $0xa0] sm:$0xff] }
 0xdf7   : > { %v7035_v43 = vunpack.c.l.b16 %v6995_v22  ;;  %v6861_v8 = vsel %vm1437_vm2, %v12859_v42, 0.0 }
 0xdf8   : > { %8819 = vpow2.f32 %v6790_v2  ;;  %6862 = vadd.xlane.f32.xlu1 %v6861_v8 }
 0xdf9   : > { %v7042_v32 = vpack.c.b16 %v7035_v43, %v7034_v63 }
 0xdfa   : > { %v8818_v50 = vpop.eup %8817 }
 0xdfb   : > { %v6845_v35 = vpop.xlane.xlu1 %6844  ;;  %8286 = vmatmul.msk.bf16.vlgmr.msrb.gmra.mxu0 %vm1437_vm2, %v7042_v32  ;;  %v6677_v38 = vpop.xlane.xlu0 %6676  ;;  %v6964_v26 = vmul.f32 %v8818_v50, %v12727_v31  ;;  %v6699_v32 = vsel %vm1437_vm2, %v12875_v14, -inf }
 0xdfc   : > { %8821 = vrcp.f32 %v6845_v35  ;;  %v6749_v53 = vsub.f32 %v12736_v39, %v6677_v38  ;;  %v12873_v48 = vpop.f32.mrf.mxu0  ;;  %v6509_v35 = vpop.f32.mrf.mxu2 }
 0xdfd   : > { %v6996_v39 = vpack.c.bf16 %v6964_v26, %v6964_v26 }
 0xdfe   : > { %v12867_v18 = vpop.eup %8819  ;;  %v6792_v29 = vmul.f32 1.442695, %v6749_v53 }
 0xdff   : > { %v6864_v3 = vsel %vm1437_vm2, %v12867_v18, 0.0  ;;  %v7036_v38 = vunpack.c.l.b16 %v6996_v39 }
 0xe00   : > { %8823 = vpow2.f32 %v6792_v29  ;;  %6865 = vadd.xlane.f32.xlu1 %v6864_v3 }
 0xe02   : > { %v8822_v41 = vpop.eup %8821 }
 0xe03   : > { %v6965_v22 = vmul.f32 %v8822_v41, %v12739_v36  ;;  %v6848_v2 = vpop.xlane.xlu1 %6847  ;;  %v6680_v63 = vpop.xlane.xlu0 %6679  ;;  %v6508_v36 = vadd.f32 %v12628_v59, %v6507_v46  ;;  %v6510_v46 = vadd.f32 %v12644_v25, %v6509_v35 }
 0xe04   : > { %v6750_v0 = vsub.f32 %v12751_v40, %v6680_v63  ;;  %8825 = vrcp.f32 %v6848_v2  ;;  %v6108_v29 = vpop.f32.mrf.mxu0 }
 0xe05   : > { %v6997_v43 = vpack.c.bf16 %v6965_v22, %v6965_v22  ;;  %v12886_v26 = vadd.f32 %v9092_v52, %v6508_v36 }
 0xe06   : > { %v12879_v31 = vpop.eup %8823  ;;  %v6794_v8 = vmul.f32 1.442695, %v6750_v0 }
 0xe07   : > { %v7037_v50 = vunpack.c.l.b16 %v6997_v43  ;;  %v6867_v53 = vsel %vm1437_vm2, %v12879_v31, 0.0  ;;  %v6702_v0 = vsel %vm1437_vm2, %v12886_v26, -inf }
 0xe08   : > { %8827 = vpow2.f32 %v6794_v8  ;;  %6700 = vmax.xlane.f32.xlu1 %v6699_v32  ;;  %6868 = vadd.xlane.f32.xlu2 %v6867_v53  ;;  %v6109_v8 = vadd.f32 %v12749_v17, %v6108_v29  ;;  %v6512_v32 = vpop.f32.mrf.mxu2  ;;  %v9093_v53 = vld [vmem:[#allocation2 + $0xa8] sm:$0xff] }
 0xe09   : > { %v7043_v40 = vpack.c.b16 %v7037_v50, %v7036_v38  ;;  %v12899_v36 = vadd.f32 %v9093_v53, %v6510_v46  ;;  %v9094_v53 = vld [vmem:[#allocation2 + $0xb0] sm:$0xff] }
 0xe0a   : > { %v8826_v61 = vpop.eup %8825 }
 0xe0b   : > { %v6851_v3 = vpop.xlane.xlu2 %6850  ;;  %v6683_v41 = vpop.xlane.xlu1 %6682  ;;  %8287 = vmatmul.msk.bf16.gmra.mxu0 %vm1437_vm2, %v7043_v40  ;;  %v6966_v63 = vmul.f32 %v8826_v61, %v12757_v15  ;;  %v6705_v46 = vsel %vm1437_vm2, %v12899_v36, -inf }
 0xe0c   : > { %8829 = vrcp.f32 %v6851_v3  ;;  %v6751_v39 = vsub.f32 %v12765_v55, %v6683_v41  ;;  %v6219_v55 = vpack.c.bf16 %v6109_v8, %v6109_v8  ;;  %v6110_v38 = vpop.f32.mrf.mxu0 }
 0xe0d   : > { %v6111_v25 = vadd.f32 %v12749_v17, %v6110_v38  ;;  %v6998_v15 = vpack.c.bf16 %v6966_v63, %v6966_v63  ;;  %v6513_v63 = vadd.f32 %v12654_v54, %v6512_v32  ;;  %v6590_v54 = vpop.f32.mrf.mxu3 }
 0xe0e   : > { %v12890_v22 = vpop.eup %8827  ;;  %v6796_v2 = vmul.f32 1.442695, %v6751_v39  ;;  %v7230_v29 = vunpack.c.l.b16 %v6219_v55 }
 0xe0f   : > { %v6870_v43 = vsel %vm1437_vm2, %v12890_v22, 0.0  ;;  %v6220_v41 = vpack.c.bf16 %v6111_v25, %v6111_v25  ;;  %v12913_v25 = vadd.f32 %v9094_v53, %v6513_v63 }
 0xe10   : > { %8831 = vpow2.f32 %v6796_v2  ;;  %6703 = vmax.xlane.f32.xlu1 %v6702_v0  ;;  %6871 = vadd.xlane.f32.xlu2 %v6870_v43  ;;  %v7038_v43 = vunpack.c.l.b16 %v6998_v15 }
 0xe11   : > { %v7231_v0 = vunpack.c.l.b16 %v6220_v41 }
 0xe12   : > { %v8830_v50 = vpop.eup %8829 }
 0xe13   : > { %v6967_v35 = vmul.f32 %v8830_v50, %v12768_v57  ;;  %v6686_v40 = vpop.xlane.xlu1 %6685  ;;  %v6854_v52 = vpop.xlane.xlu2 %6853 }
 0xe14   : > { %v6752_v3 = vsub.f32 %v12777_v5, %v6686_v40  ;;  %8833 = vrcp.f32 %v6854_v52  ;;  %v7235_v5 = vpack.c.b16 %v7231_v0, %v7230_v29  ;;  %v12911_v38 = vpop.f32.mrf.mxu0  ;;  %v6514_v50 = vpop.f32.mrf.mxu2  ;;  %v9095_v0 = vld [vmem:[#allocation2 + $0xb8] sm:$0xff] }
 0xe15   : > { %v6999_v61 = vpack.c.bf16 %v6967_v35, %v6967_v35  ;;  %v6515_v29 = vadd.f32 %v12669_v6, %v6514_v50 }
 0xe16   : > { %v12904_v39 = vpop.eup %8831  ;;  %v6798_v2 = vmul.f32 1.442695, %v6752_v3  ;;  %7256 = vmatpush.bf16.msrb.mxu2 %v7235_v5 }
 0xe17   : > { %v7039_v8 = vunpack.c.l.b16 %v6999_v61  ;;  %v6873_v57 = vsel %vm1437_vm2, %v12904_v39, 0.0 }
 0xe18   : > { %8835 = vpow2.f32 %v6798_v2  ;;  %6874 = vadd.xlane.f32.xlu0 %v6873_v57  ;;  %6706 = vmax.xlane.f32.xlu2 %v6705_v46  ;;  %v6708_v2 = vsel %vm1437_vm2, %v12913_v25, -inf }
 0xe19   : > { %v7044_v55 = vpack.c.b16 %v7039_v8, %v7038_v43  ;;  %v12927_v43 = vadd.f32 %v9095_v0, %v6515_v29  ;;  %v9096_v29 = vld [vmem:[#allocation2 + $0xc0] sm:$0xff] }
 0xe1a   : > { %v8834_v40 = vpop.eup %8833 }
 0xe1b   : > { %v6689_v35 = vpop.xlane.xlu2 %6688  ;;  %8288 = vmatmul.msk.bf16.gmra.mxu0 %vm1437_vm2, %v7044_v55  ;;  %v6857_v15 = vpop.xlane.xlu0 %6856  ;;  %v6968_v41 = vmul.f32 %v8834_v40, %v12782_v60  ;;  %v6711_v53 = vsel %vm1437_vm2, %v12927_v43, -inf }
 0xe1c   : > { %v6753_v52 = vsub.f32 %v12791_v23, %v6689_v35  ;;  %8837 = vrcp.f32 %v6857_v15  ;;  %v12925_v46 = vpop.f32.mrf.mxu0 }
 0xe1d   : > { %v7000_v8 = vpack.c.bf16 %v6968_v41, %v6968_v41 }
 0xe1e   : > { %v12917_v32 = vpop.eup %8835  ;;  %v6800_v3 = vmul.f32 1.442695, %v6753_v52  ;;  %v6591_v52 = vadd.f32 %v12561_v51, %v6590_v54 }
 0xe1f   : > { %v6876_v61 = vsel %vm1437_vm2, %v12917_v32, 0.0  ;;  %v7040_v35 = vunpack.c.l.b16 %v7000_v8 }
 0xe20   : > { %8839 = vpow2.f32 %v6800_v3  ;;  %6877 = vadd.xlane.f32.xlu0 %v6876_v61  ;;  %6709 = vmax.xlane.f32.xlu2 %v6708_v2  ;;  %v12942_v41 = vadd.f32 %v9096_v29, %v6591_v52 }
 0xe22   : > { %v8838_v23 = vpop.eup %8837  ;;  %v6714_v51 = vsel %vm1437_vm2, %v12942_v41, -inf }
 0xe23   : > { %v6969_v6 = vmul.f32 %v8838_v23, %v12794_v30  ;;  %v6692_v57 = vpop.xlane.xlu2 %6691  ;;  %v12930_v60 = vpop.xlane.xlu0 %6859 }
 0xe24   : > { %v6754_v63 = vsub.f32 %v12803_v58, %v6692_v57  ;;  %v6592_v30 = vpop.f32.mrf.mxu3  ;;  %v12940_v58 = vpop.f32.mrf.mxu0 }
 0xe25   : > { %v7001_v5 = vpack.c.bf16 %v6969_v6, %v6969_v6  ;;  %v6593_v8 = vadd.f32 %v12581_v44, %v6592_v30  ;;  %v9098_v30 = vld [vmem:[#allocation2 + $0xd0] sm:$0xff] }
 0xe26   : > { %v12933_v55 = vpop.eup %8839  ;;  %v6802_v50 = vmul.f32 1.442695, %v6754_v63  ;;  %v9097_v63 = vld [vmem:[#allocation2 + $0xc8] sm:$0xff] }
 0xe27   : > { %v7041_v15 = vunpack.c.l.b16 %v7001_v5  ;;  %v6879_v40 = vsel %vm1437_vm2, %v12933_v55, 0.0  ;;  %v12955_v5 = vadd.f32 %v9097_v63, %v6593_v8  ;;  %v6086_v8 = vadd.f32 %v12749_v17, %v12829_v62 }
 0xe28   : > { %8841 = vpow2.f32 %v6802_v50  ;;  %6712 = vmax.xlane.f32.xlu0 %v6711_v53  ;;  %6880 = vadd.xlane.f32.xlu1 %v6879_v40  ;;  %v6076_v62 = vadd.f32 %v12749_v17, %v12789_v37 }
 0xe29   : > { %v7045_v3 = vpack.c.b16 %v7041_v15, %v7040_v35  ;;  %v6717_v15 = vsel %vm1437_vm2, %v12955_v5, -inf }
 0xe2b   : > { %8289 = vmatmul.msk.bf16.gmra.mxu0 %vm1437_vm2, %v7045_v3  ;;  %v6695_v61 = vpop.xlane.xlu0 %6694 }
 0xe2c   : > { %v6755_v2 = vsub.f32 %v12816_v47, %v6695_v61  ;;  %v6595_v6 = vpop.f32.mrf.mxu3  ;;  %v12953_v57 = vpop.f32.mrf.mxu0 }
 0xe2d   : > { %v6596_v40 = vadd.f32 %v12596_v9, %v6595_v6  ;;  %v9099_v9 = vld [vmem:[#allocation2 + $0xd8] sm:$0xff] }
 0xe2e   : > { %v12946_v23 = vpop.eup %8841  ;;  %v6804_v0 = vmul.f32 1.442695, %v6755_v2 }
 0xe2f   : > { %v6882_v54 = vsel %vm1437_vm2, %v12946_v23, 0.0  ;;  %v12967_v3 = vadd.f32 %v9098_v30, %v6596_v40 }
 0xe30   : > { %8843 = vpow2.f32 %v6804_v0  ;;  %6715 = vmax.xlane.f32.xlu0 %v6714_v51  ;;  %6883 = vadd.xlane.f32.xlu1 %v6882_v54  ;;  %v6084_v54 = vadd.f32 %v12749_v17, %v12821_v10  ;;  %v6074_v10 = vadd.f32 %v12749_v17, %v12775_v34 }
 0xe31   : > { %v6720_v2 = vsel %vm1437_vm2, %v12967_v3, -inf }
 0xe33   : > { %v6698_v47 = vpop.xlane.xlu0 %6697 }
 0xe34   : > { %v6756_v50 = vsub.f32 %v12823_v27, %v6698_v47  ;;  %v12965_v52 = vpop.f32.mrf.mxu0  ;;  %v6597_v27 = vpop.f32.mrf.mxu3 }
 0xe35   : > { %v6598_v61 = vadd.f32 %v12617_v24, %v6597_v27  ;;  %v6079_v24 = vadd.f32 %v12749_v17, %v12801_v56 }
 0xe36   : > { %v12958_v53 = vpop.eup %8843  ;;  %v6806_v35 = vmul.f32 1.442695, %v6756_v50  ;;  %v6081_v50 = vadd.f32 %v12749_v17, %v12814_v49  ;;  %v6206_v49 = vpack.c.bf16 %v6076_v62, %v6076_v62 }
 0xe37   : > { %v6885_v44 = vsel %vm1437_vm2, %v12958_v53, 0.0  ;;  %v12976_v51 = vadd.f32 %v9099_v9, %v6598_v61  ;;  %v6207_v40 = vpack.c.bf16 %v6079_v24, %v6079_v24  ;;  %v9100_v61 = vld [vmem:[#allocation2 + $0xe0] sm:$0xff] }
 0xe38   : > { %8845 = vpow2.f32 %v6806_v35  ;;  %6718 = vmax.xlane.f32.xlu1 %v6717_v15  ;;  %6886 = vadd.xlane.f32.xlu2 %v6885_v44  ;;  %v6209_v35 = vpack.c.bf16 %v6084_v54, %v6084_v54  ;;  %v6210_v15 = vpack.c.bf16 %v6086_v8, %v6086_v8  ;;  %v6208_v56 = vpack.c.bf16 %v6081_v50, %v6081_v50 }
 0xe39   : > { %v6723_v63 = vsel %vm1437_vm2, %v12976_v51, -inf  ;;  %v7141_v54 = vunpack.c.l.b16 %v6207_v40  ;;  %v7140_v37 = vunpack.c.l.b16 %v6206_v49  ;;  %8847 = vrcp.f32 %v12930_v60 }
 0xe3a   : > { %v7143_v30 = vunpack.c.l.b16 %v6209_v35  ;;  %v7144_v27 = vunpack.c.l.b16 %v6210_v15  ;;  %v7142_v8 = vunpack.c.l.b16 %v6208_v56 }
 0xe3c   : > { %v12982_v6 = vpop.f32.mrf.mxu0  ;;  %v6600_v47 = vpop.f32.mrf.mxu3 }
 0xe3d   : > { %v6601_v44 = vadd.f32 %v12628_v59, %v6600_v47  ;;  %v7148_v47 = vpack.c.b16 %v7142_v8, %v7141_v54 }
 0xe3e   : > { %v12969_v29 = vpop.eup %8845 }
 0xe3f   : > { %v6888_v0 = vsel %vm1437_vm2, %v12969_v29, 0.0 }
 0xe40   : > { %6721 = vmax.xlane.f32.xlu1 %v6720_v2  ;;  %6889 = vadd.xlane.f32.xlu2 %v6888_v0  ;;  %v12995_v2 = vadd.f32 %v9100_v61, %v6601_v44  ;;  %v6205_v0 = vpack.c.bf16 %v6074_v10, %v6074_v10 }
 0xe42   : > { %v6726_v59 = vsel %vm1437_vm2, %v12995_v2, -inf  ;;  %v7139_v34 = vunpack.c.l.b16 %v6205_v0  ;;  %v8848_v0 = vpop.eup %8847 }
 0xe43   : > { %v6970_v49 = vmul.f32 %v8848_v0, %v12807_v33 }
 0xe44   : > { %v6128_v9 = vpop.f32.mrf.mxu0  ;;  %v7147_v35 = vpack.c.b16 %v7140_v37, %v7139_v34 }
 0xe45   : > { %v6129_v24 = vadd.f32 %v12749_v17, %v6128_v9  ;;  %v7002_v54 = vpack.c.bf16 %v6970_v49, %v6970_v49 }
 0xe47   : > { %v6227_v50 = vpack.c.bf16 %v6129_v24, %v6129_v24  ;;  %v7119_v34 = vunpack.c.l.b16 %v7002_v54 }
 0xe48   : > { %6724 = vmax.xlane.f32.xlu2 %v6723_v63  ;;  %v7149_v63 = vpack.c.b16 %v7144_v27, %v7143_v30  ;;  %v8302_v30 = vld [vmem:[%s13348_s9 + $0xc] sm:$0xf] }
 0xe49   : > { %v7315_v10 = vunpack.c.l.b16 %v6227_v50  ;;  %v7433_v27 = vsel %vm3811_vm3, %v8302_v30, 0 }
 0xe4a   : > { %7172 = vmatpush.bf16.msrb.mxu1 %v7149_v63  ;;  %7442 = vmatpush.bf16.msra.mxu0 %v7433_v27 }
 0xe4c   : > { %v6130_v15 = vpop.f32.mrf.mxu0 }
 0xe4d   : > { %v6131_v44 = vadd.f32 %v12749_v17, %v6130_v15 }
 0xe4e   : > { %7173 = vmatpush.bf16.msrb.mxu1 %v7148_v47 }
 0xe4f   : > { %v6228_v62 = vpack.c.bf16 %v6131_v44, %v6131_v44 }
 0xe50   : > { %6727 = vmax.xlane.f32.xlu2 %v6726_v59 }
 0xe51   : > { %v7316_v40 = vunpack.c.l.b16 %v6228_v62 }
 0xe52   : > { %7174 = vmatpush.bf16.msrb.mxu1 %v7147_v35 }
 0xe53   : > { %v7320_v56 = vpack.c.b16 %v7316_v40, %v7315_v10  ;;  %v6104_v40 = vadd.f32 %v12749_v17, %v12863_v45  ;;  %v6101_v45 = vadd.f32 %v12749_v17, %v12855_v7  ;;  %v6096_v7 = vadd.f32 %v12749_v17, %v12849_v16 }
 0xe55   : > { %7341 = vmatpush.bf16.msrb.mxu3 %v7320_v56  ;;  %v6106_v56 = vadd.f32 %v12749_v17, %v12873_v48  ;;  %v6217_v54 = vpack.c.bf16 %v6104_v40, %v6104_v40  ;;  %v6214_v16 = vpack.c.bf16 %v6096_v7, %v6096_v7 }
 0xe6b   : > { %v6863_v61 = vpop.xlane.xlu1 %6862 }
 0xe6c   : > { %8849 = vrcp.f32 %v6863_v61 }
 0xe72   : > { %v8850_v9 = vpop.eup %8849 }
 0xe73   : > { %v6971_v8 = vmul.f32 %v8850_v9, %v12859_v42  ;;  %v6866_v59 = vpop.xlane.xlu1 %6865 }
 0xe74   : > { %8851 = vrcp.f32 %v6866_v59 }
 0xe75   : > { %v7003_v63 = vpack.c.bf16 %v6971_v8, %v6971_v8  ;;  %v6218_v8 = vpack.c.bf16 %v6106_v56, %v6106_v56 }
 0xe77   : > { %v7120_v37 = vunpack.c.l.b16 %v7003_v63 }
 0xe78   : > { %v7091_v24 = vpop.f32.mrf.mxu0 }
 0xe79   : > { %v7127_v47 = vpack.c.b16 %v7120_v37, %v7119_v34  ;;  %v6602_v34 = vpop.f32.mrf.mxu3  ;;  %v6094_v37 = vadd.f32 %v12749_v17, %v12847_v4 }
 0xe7a   : > { %v8852_v60 = vpop.eup %8851 }
 0xe7b   : > { %v6701_v50 = vpop.xlane.xlu1 %6700  ;;  %v6869_v35 = vpop.xlane.xlu2 %6868  ;;  %8290 = vmatmul.msk.bf16.vlgmr.msrb.gmra.mxu1 %vm1437_vm2, %v7127_v47  ;;  %v6972_v44 = vmul.f32 %v8852_v60, %v12867_v18  ;;  %v6099_v18 = vadd.f32 %v12749_v17, %v12851_v11  ;;  %v6216_v47 = vpack.c.bf16 %v6101_v45, %v6101_v45  ;;  %v6213_v17 = vpack.c.bf16 %v6094_v37, %v6094_v37 }
 0xe7c   : > { %v6757_v15 = vsub.f32 %v12875_v14, %v6701_v50  ;;  %8853 = vrcp.f32 %v6869_v35  ;;  %v7228_v50 = vunpack.c.l.b16 %v6217_v54  ;;  %v7229_v35 = vunpack.c.l.b16 %v6218_v8 }
 0xe7d   : > { %v7004_v30 = vpack.c.bf16 %v6972_v44, %v6972_v44  ;;  %v7227_v56 = vunpack.c.l.b16 %v6216_v47 }
 0xe7e   : > { %v6808_v33 = vmul.f32 1.442695, %v6757_v15 }
 0xe80   : > { %8855 = vpow2.f32 %v6808_v33  ;;  %v7093_v42 = vpop.f32.mrf.mxu0 }
 0xe81   : > { %v7366_v10 = vpack.c.bf16 %v7093_v42, %v7091_v24  ;;  %v6215_v24 = vpack.c.bf16 %v6099_v18, %v6099_v18  ;;  %v9101_v42 = vld [vmem:[%s13346_s7 + $0xe8] sm:$0xff]  ;;  %v7224_v18 = vunpack.c.l.b16 %v6213_v17  ;;  %v6605_v54 = vpop.f32.mrf.mxu3 }
 0xe82   : > { %v8854_v62 = vpop.eup %8853  ;;  %v6603_v4 = vadd.f32 %v9101_v42, %v6602_v34 }
 0xe83   : > { %v6973_v27 = vmul.f32 %v8854_v62, %v12879_v31  ;;  %v6704_v61 = vpop.xlane.xlu1 %6703  ;;  %v6872_v0 = vpop.xlane.xlu2 %6871  ;;  %8303 = vmatmul.msk.bf16.vlgmr.msra.gmra.mxu0 %vm1072_vm1, %v7366_v10  ;;  %v7121_v31 = vunpack.c.l.b16 %v7004_v30  ;;  %v7226_v62 = vunpack.c.l.b16 %v6215_v24 }
 0xe84   : > { %v6758_v14 = vsub.f32 %v12886_v26, %v6704_v61  ;;  %8857 = vrcp.f32 %v6872_v0  ;;  %v7234_v61 = vpack.c.b16 %v7229_v35, %v7228_v50 }
 0xe85   : > { %v7005_v49 = vpack.c.bf16 %v6973_v27, %v6973_v27 }
 0xe86   : > { %v13020_v9 = vpop.eup %8855  ;;  %v6810_v48 = vmul.f32 1.442695, %v6758_v14  ;;  %7257 = vmatpush.bf16.msrb.mxu2 %v7234_v61 }
 0xe87   : > { %v7122_v59 = vunpack.c.l.b16 %v7005_v49  ;;  %v6891_v63 = vsel %vm1437_vm2, %v13020_v9, 0.0  ;;  %v9102_v49 = vld [vmem:[#allocation2 + $0xe8] sm:$0xff] }
 0xe88   : > { %8859 = vpow2.f32 %v6810_v48  ;;  %6892 = vadd.xlane.f32.xlu0 %v6891_v63  ;;  %v7096_v26 = vpop.f32.mrf.mxu0  ;;  %v13040_v45 = vadd.f32 %v9102_v49, %v6603_v4  ;;  %v7225_v48 = vunpack.c.l.b16 %v6214_v16  ;;  %v7233_v63 = vpack.c.b16 %v7227_v56, %v7226_v62 }
 0xe89   : > { %v7128_v11 = vpack.c.b16 %v7122_v59, %v7121_v31  ;;  %v6607_v62 = vpop.f32.mrf.mxu3 }
 0xe8a   : > { %v8858_v33 = vpop.eup %8857  ;;  %7258 = vmatpush.bf16.msrb.mxu2 %v7233_v63  ;;  %v6729_v7 = vsel %vm1437_vm2, %v13040_v45, -inf }
 0xe8b   : > { %v6707_v60 = vpop.xlane.xlu2 %6706  ;;  %8291 = vmatmul.msk.bf16.gmra.mxu1 %vm1437_vm2, %v7128_v11  ;;  %v6875_v15 = vpop.xlane.xlu0 %6874  ;;  %v6974_v30 = vmul.f32 %v8858_v33, %v12890_v22  ;;  %v9104_v33 = vld [vmem:[#allocation2 + $0xf0] sm:$0xff] }
 0xe8c   : > { %v6759_v44 = vsub.f32 %v12899_v36, %v6707_v60  ;;  %8861 = vrcp.f32 %v6875_v15 }
 0xe8d   : > { %v7006_v8 = vpack.c.bf16 %v6974_v30, %v6974_v30 }
 0xe8e   : > { %v13035_v10 = vpop.eup %8859  ;;  %v6812_v40 = vmul.f32 1.442695, %v6759_v44 }
 0xe8f   : > { %v6894_v27 = vsel %vm1437_vm2, %v13035_v10, 0.0  ;;  %v7123_v47 = vunpack.c.l.b16 %v7006_v8 }
 0xe90   : > { %8863 = vpow2.f32 %v6812_v40  ;;  %6895 = vadd.xlane.f32.xlu0 %v6894_v27  ;;  %v7098_v36 = vpop.f32.mrf.mxu0 }
 0xe91   : > { %v7367_v0 = vpack.c.bf16 %v7098_v36, %v7096_v26  ;;  %v9105_v36 = vld [vmem:[%s13346_s7 + $0xf8] sm:$0xff] }
 0xe92   : > { %v8862_v14 = vpop.eup %8861 }
 0xe93   : > { %v6975_v31 = vmul.f32 %v8862_v14, %v12904_v39  ;;  %v6710_v22 = vpop.xlane.xlu2 %6709  ;;  %8304 = vmatmul.msk.bf16.gmra.mxu0 %vm1072_vm1, %v7367_v0  ;;  %v6878_v59 = vpop.xlane.xlu0 %6877  ;;  %v9103_v39 = vld [vmem:[%s13346_s7 + $0xf0] sm:$0xff]  ;;  %v6608_v0 = vadd.f32 %v9105_v36, %v6607_v62 }
 0xe94   : > { %v6760_v34 = vsub.f32 %v12913_v25, %v6710_v22  ;;  %8865 = vrcp.f32 %v6878_v59  ;;  %v6606_v24 = vadd.f32 %v9103_v39, %v6605_v54  ;;  %v7232_v25 = vpack.c.b16 %v7225_v48, %v7224_v18  ;;  %v9106_v54 = vld [vmem:[#allocation2 + $0xf8] sm:$0xff] }
 0xe95   : > { %v7007_v11 = vpack.c.bf16 %v6975_v31, %v6975_v31  ;;  %v13069_v48 = vadd.f32 %v9106_v54, %v6608_v0 }
 0xe96   : > { %v13045_v26 = vpop.eup %8863  ;;  %v6814_v37 = vmul.f32 1.442695, %v6760_v34  ;;  %7259 = vmatpush.bf16.msrb.mxu2 %v7232_v25  ;;  %v13054_v44 = vadd.f32 %v9104_v33, %v6606_v24 }
 0xe97   : > { %v7124_v50 = vunpack.c.l.b16 %v7007_v11  ;;  %v6897_v35 = vsel %vm1437_vm2, %v13045_v26, 0.0 }
 0xe98   : > { %8867 = vpow2.f32 %v6814_v37  ;;  %6730 = vmax.xlane.f32.xlu0 %v6729_v7  ;;  %v7101_v60 = vpop.f32.mrf.mxu0  ;;  %6898 = vadd.xlane.f32.xlu1 %v6897_v35  ;;  %v6732_v27 = vsel %vm1437_vm2, %v13054_v44, -inf  ;;  %v6735_v7 = vsel %vm1437_vm2, %v13069_v48, -inf }
 0xe99   : > { %v7129_v15 = vpack.c.b16 %v7124_v50, %v7123_v47 }
 0xe9a   : > { %v8866_v17 = vpop.eup %8865 }
 0xe9b   : > { %v6881_v42 = vpop.xlane.xlu1 %6880  ;;  %8292 = vmatmul.msk.bf16.gmra.mxu1 %vm1437_vm2, %v7129_v15  ;;  %v6713_v4 = vpop.xlane.xlu0 %6712  ;;  %v6976_v30 = vmul.f32 %v8866_v17, %v12917_v32 }
 0xe9c   : > { %8869 = vrcp.f32 %v6881_v42  ;;  %v6761_v16 = vsub.f32 %v12927_v43, %v6713_v4 }
 0xe9d   : > { %v7008_v49 = vpack.c.bf16 %v6976_v30, %v6976_v30 }
 0xe9e   : > { %v13058_v40 = vpop.eup %8867  ;;  %v6816_v56 = vmul.f32 1.442695, %v6761_v16 }
 0xe9f   : > { %v6900_v61 = vsel %vm1437_vm2, %v13058_v40, 0.0  ;;  %v7125_v11 = vunpack.c.l.b16 %v7008_v49 }
 0xea0   : > { %8871 = vpow2.f32 %v6816_v56  ;;  %6733 = vmax.xlane.f32.xlu0 %v6732_v27  ;;  %v7103_v43 = vpop.f32.mrf.mxu0  ;;  %6901 = vadd.xlane.f32.xlu1 %v6900_v61 }
 0xea1   : > { %v7368_v14 = vpack.c.bf16 %v7103_v43, %v7101_v60 }
 0xea2   : > { %v8870_v18 = vpop.eup %8869 }
 0xea3   : > { %v6977_v32 = vmul.f32 %v8870_v18, %v12933_v55  ;;  %v6884_v8 = vpop.xlane.xlu1 %6883  ;;  %8305 = vmatmul.msk.bf16.gmra.mxu0 %vm1072_vm1, %v7368_v14  ;;  %v6716_v31 = vpop.xlane.xlu0 %6715 }
 0xea4   : > { %v6762_v22 = vsub.f32 %v12942_v41, %v6716_v31  ;;  %8873 = vrcp.f32 %v6884_v8 }
 0xea5   : > { %v7009_v59 = vpack.c.bf16 %v6977_v32, %v6977_v32 }
 0xea6   : > { %v13073_v63 = vpop.eup %8871  ;;  %v6818_v34 = vmul.f32 1.442695, %v6762_v22 }
 0xea7   : > { %v7126_v37 = vunpack.c.l.b16 %v7009_v59  ;;  %v6903_v55 = vsel %vm1437_vm2, %v13073_v63, 0.0 }
 0xea8   : > { %8875 = vpow2.f32 %v6818_v34  ;;  %6736 = vmax.xlane.f32.xlu1 %v6735_v7  ;;  %v7106_v39 = vpop.f32.mrf.mxu0  ;;  %6904 = vadd.xlane.f32.xlu2 %v6903_v55 }
 0xea9   : > { %v7130_v24 = vpack.c.b16 %v7126_v37, %v7125_v11  ;;  %v9107_v11 = vld [vmem:[%s13345_s6 + $0x3] ss:$0 sm:$0xff] }
 0xeaa   : > { %v8874_v50 = vpop.eup %8873  ;;  %v6126_v37 = vadd.f32 %v9107_v11, %v12982_v6  ;;  %v6119_v7 = vadd.f32 %v9107_v11, %v12940_v58  ;;  %v6121_v55 = vadd.f32 %v9107_v11, %v12953_v57 }
 0xeab   : > { %v6719_v47 = vpop.xlane.xlu1 %6718  ;;  %v6887_v41 = vpop.xlane.xlu2 %6886  ;;  %8293 = vmatmul.msk.bf16.gmra.mxu1 %vm1437_vm2, %v7130_v24  ;;  %v6978_v15 = vmul.f32 %v8874_v50, %v12946_v23 }
 0xeac   : > { %v6763_v35 = vsub.f32 %v12955_v5, %v6719_v47  ;;  %8877 = vrcp.f32 %v6887_v41  ;;  %v6226_v24 = vpack.c.bf16 %v6126_v37, %v6126_v37  ;;  %v6114_v47 = vadd.f32 %v9107_v11, %v12911_v38 }
 0xead   : > { %v7010_v16 = vpack.c.bf16 %v6978_v15, %v6978_v15  ;;  %v6116_v41 = vadd.f32 %v9107_v11, %v12925_v46  ;;  %v6223_v50 = vpack.c.bf16 %v6119_v7, %v6119_v7 }
 0xeae   : > { %v13081_v25 = vpop.eup %8875  ;;  %v6820_v60 = vmul.f32 1.442695, %v6763_v35  ;;  %v6224_v35 = vpack.c.bf16 %v6121_v55, %v6121_v55  ;;  %v7314_v15 = vunpack.c.l.b16 %v6226_v24 }
 0xeaf   : > { %v6906_v33 = vsel %vm1437_vm2, %v13081_v25, 0.0  ;;  %v7204_v36 = vunpack.c.l.b16 %v7010_v16 }
 0xeb0   : > { %8879 = vpow2.f32 %v6820_v60  ;;  %v7108_v42 = vpop.f32.mrf.mxu0  ;;  %6907 = vadd.xlane.f32.xlu2 %v6906_v33  ;;  %v6221_v33 = vpack.c.bf16 %v6114_v47, %v6114_v47 }
 0xeb1   : > { %v7369_v4 = vpack.c.bf16 %v7108_v42, %v7106_v39  ;;  %v6222_v42 = vpack.c.bf16 %v6116_v41, %v6116_v41 }
 0xeb2   : > { %v8878_v17 = vpop.eup %8877  ;;  %v7309_v58 = vunpack.c.l.b16 %v6221_v33 }
 0xeb3   : > { %v6979_v62 = vmul.f32 %v8878_v17, %v12958_v53  ;;  %v6722_v56 = vpop.xlane.xlu1 %6721  ;;  %8306 = vmatmul.msk.bf16.gmra.mxu0 %vm1072_vm1, %v7369_v4  ;;  %v6890_v5 = vpop.xlane.xlu2 %6889  ;;  %v7311_v4 = vunpack.c.l.b16 %v6223_v50  ;;  %v7310_v17 = vunpack.c.l.b16 %v6222_v42 }
 0xeb4   : > { %v6764_v30 = vsub.f32 %v12967_v3, %v6722_v56 }
 0xeb5   : > { %v7011_v27 = vpack.c.bf16 %v6979_v62, %v6979_v62  ;;  %v7317_v16 = vpack.c.b16 %v7310_v17, %v7309_v58 }
 0xeb6   : > { %v13089_v61 = vpop.eup %8879  ;;  %v6822_v23 = vmul.f32 1.442695, %v6764_v30  ;;  %v13122_v30 = vld [vmem:[%s13349_s10] ss:$0 sm:$0xff] }
 0xeb7   : > { %v7205_v0 = vunpack.c.l.b16 %v7011_v27  ;;  %v6909_v43 = vsel %vm1437_vm2, %v13089_v61, 0.0 }
 0xeb8   : > { %8881 = vpow2.f32 %v6822_v23  ;;  %6910 = vadd.xlane.f32.xlu0 %v6909_v43 }
 0xeb9   : > { %v7212_v14 = vpack.c.b16 %v7205_v0, %v7204_v36 }
 0xebb   : > { %8294 = vmatmul.msk.bf16.vlgmr.msrb.gmra.mxu2 %vm1437_vm2, %v7212_v14  ;;  %v6725_v53 = vpop.xlane.xlu2 %6724 }
 0xebc   : > { %v6765_v18 = vsub.f32 %v12976_v51, %v6725_v53 }
 0xebe   : > { %v13095_v49 = vpop.eup %8881  ;;  %v6824_v3 = vmul.f32 1.442695, %v6765_v18  ;;  %v13514_v18 = vld [vmem:[#allocation11_spill] sm:$0xff] }
 0xebf   : > { %v6912_v32 = vsel %vm1437_vm2, %v13095_v49, 0.0 }
 0xec0   : > { %8883 = vpow2.f32 %v6824_v3  ;;  %6913 = vadd.xlane.f32.xlu1 %v6912_v32  ;;  %v13515_v3 = vld [vmem:[#allocation12_spill] sm:$0xff] }
 0xec1   : > { %v3967_v32 = vadd.f32 %v13515_v3, %v13514_v18 }
 0xec3   : > { %v6728_v54 = vpop.xlane.xlu2 %6727 }
 0xec4   : > { %v6766_v8 = vsub.f32 %v12995_v2, %v6728_v54  ;;  %v6124_v2 = vadd.f32 %v9107_v11, %v12965_v52  ;;  %v7312_v52 = vunpack.c.l.b16 %v6224_v35 }
 0xec6   : > { %v13100_v31 = vpop.eup %8883  ;;  %v6826_v22 = vmul.f32 1.442695, %v6766_v8  ;;  %v6225_v39 = vpack.c.bf16 %v6124_v2, %v6124_v2  ;;  %v7318_v57 = vpack.c.b16 %v7312_v52, %v7311_v4 }
 0xec7   : > { %v6915_v59 = vsel %vm1437_vm2, %v13100_v31, 0.0 }
 0xec8   : > { %8885 = vpow2.f32 %v6826_v22  ;;  %6916 = vadd.xlane.f32.xlu2 %v6915_v59  ;;  %v7313_v60 = vunpack.c.l.b16 %v6225_v39 }
 0xec9   : > { %8887 = vrcp.f32 %v6890_v5 }
 0xeca   : > { %v7319_v6 = vpack.c.b16 %v7314_v15, %v7313_v60 }
 0xecc   : > { %7342 = vmatpush.bf16.msrb.mxu3 %v7319_v6  ;;  %v13517_v6 = vld [vmem:[#allocation14_spill] sm:$0xff] }
 0xece   : > { %v13104_v51 = vpop.eup %8885 }
 0xecf   : > { %v6918_v34 = vsel %vm1437_vm2, %v13104_v51, 0.0  ;;  %v8888_v62 = vpop.eup %8887 }
 0xed0   : > { %6919 = vadd.xlane.f32.xlu0 %v6918_v34  ;;  %7343 = vmatpush.bf16.msrb.mxu3 %v7318_v57  ;;  %v6980_v56 = vmul.f32 %v8888_v62, %v12969_v29 }
 0xed2   : > { %v7012_v5 = vpack.c.bf16 %v6980_v56, %v6980_v56 }
 0xed4   : > { %7344 = vmatpush.bf16.msrb.mxu3 %v7317_v16  ;;  %v7206_v8 = vunpack.c.l.b16 %v7012_v5 }
 0xef8   : > { %v7176_v38 = vpop.f32.mrf.mxu1 }
 0xefb   : > { %v6893_v46 = vpop.xlane.xlu0 %6892 }
 0xefc   : > { %8889 = vrcp.f32 %v6893_v46 }
 0xf00   : > { %v7178_v27 = vpop.f32.mrf.mxu1  ;;  %v7444_v23 = vpop.f32.mrf.mxu0 }
 0xf01   : > { %v7370_v36 = vpack.c.bf16 %v7178_v27, %v7176_v38  ;;  %v7524_v0 = vadd.f32 %v7444_v23, %v12169_v12  ;;  %v5769_v12 = vadd.f32 %v12172_v13, %v3967_v32 }
 0xf02   : > { %v8890_v43 = vpop.eup %8889 }
 0xf03   : > { %v6981_v29 = vmul.f32 %v8890_v43, %v13020_v9  ;;  %v7560_v14 = vadd.f32 %v13122_v30, %v7524_v0  ;;  %8307 = vmatmul.msk.bf16.gmra.mxu0 %vm1072_vm1, %v7370_v36  ;;  %v6896_v53 = vpop.xlane.xlu0 %6895 }
 0xf04   : > { %8891 = vrcp.f32 %v6896_v53 }
 0xf05   : > { %v7013_v54 = vpack.c.bf16 %v6981_v29, %v6981_v29  ;;  %7592 = vst.msk [vmem:[%s13128_s14] sm:$0xff] %vm572_vm0, %v7560_v14 }
 0xf07   : > { %v7207_v22 = vunpack.c.l.b16 %v7013_v54 }
 0xf08   : > { %v7181_v59 = vpop.f32.mrf.mxu1  ;;  %v7446_v34 = vpop.f32.mrf.mxu0 }
 0xf09   : > { %v7525_v9 = vadd.f32 %v7446_v34, %v5769_v12  ;;  %v7213_v11 = vpack.c.b16 %v7207_v22, %v7206_v8  ;;  %v13519_v34 = vld [vmem:[#allocation5_spill] sm:$0xff] }
 0xf0a   : > { %v8892_v55 = vpop.eup %8891 }
 0xf0b   : > { %v7561_v2 = vadd.f32 %v13122_v30, %v7525_v9  ;;  %v6899_v37 = vpop.xlane.xlu1 %6898  ;;  %8295 = vmatmul.msk.bf16.gmra.mxu2 %vm1437_vm2, %v7213_v11  ;;  %v6731_v7 = vpop.xlane.xlu0 %6730  ;;  %v6982_v13 = vmul.f32 %v8892_v55, %v13035_v10  ;;  %v13516_v10 = vld [vmem:[#allocation13_spill] sm:$0xff] }
 0xf0c   : > { %8893 = vrcp.f32 %v6899_v37  ;;  %v6767_v39 = vsub.f32 %v13040_v45, %v6731_v7  ;;  %v3972_v58 = vadd.f32 %v13517_v6, %v13516_v10  ;;  %v13520_v6 = vld [vmem:[#allocation8_spill] sm:$0xff] }
 0xf0d   : > { %7593 = vst.msk [vmem:[%s13128_s14 + $0x8] sm:$0xff] %vm572_vm0, %v7561_v2  ;;  %v7014_v15 = vpack.c.bf16 %v6982_v13, %v6982_v13 }
 0xf0e   : > { %v6828_v24 = vmul.f32 1.442695, %v6767_v39 }
 0xf0f   : > { %v7208_v16 = vunpack.c.l.b16 %v7014_v15 }
 0xf10   : > { %8895 = vpow2.f32 %v6828_v24  ;;  %v7183_v47 = vpop.f32.mrf.mxu1  ;;  %v7449_v41 = vpop.f32.mrf.mxu0 }
 0xf11   : > { %v7371_v50 = vpack.c.bf16 %v7183_v47, %v7181_v59  ;;  %v7526_v35 = vadd.f32 %v7449_v41, %v12181_v20  ;;  %v13518_v59 = vld [vmem:[#allocation6_spill] sm:$0xff] }
 0xf12   : > { %v8894_v60 = vpop.eup %8893  ;;  %v3977_v9 = vadd.f32 %v13519_v34, %v13518_v59 }
 0xf13   : > { %v6983_v33 = vmul.f32 %v8894_v60, %v13045_v26  ;;  %v7562_v42 = vadd.f32 %v13122_v30, %v7526_v35  ;;  %v6902_v4 = vpop.xlane.xlu1 %6901  ;;  %8308 = vmatmul.msk.bf16.gmra.mxu0 %vm1072_vm1, %v7371_v50  ;;  %v6734_v45 = vpop.xlane.xlu0 %6733  ;;  %v5771_v26 = vadd.f32 %v12185_v28, %v3972_v58  ;;  %v13521_v58 = vld [vmem:[#allocation7_spill] sm:$0xff] }
 0xf14   : > { %v6768_v52 = vsub.f32 %v13054_v44, %v6734_v45  ;;  %8897 = vrcp.f32 %v6902_v4 }
 0xf15   : > { %v7015_v17 = vpack.c.bf16 %v6983_v33, %v6983_v33  ;;  %7594 = vst.msk [vmem:[%s13128_s14 + $0x10] sm:$0xff] %vm572_vm0, %v7562_v42 }
 0xf16   : > { %v13153_v57 = vpop.eup %8895  ;;  %v6830_v20 = vmul.f32 1.442695, %v6768_v52 }
 0xf17   : > { %v7209_v38 = vunpack.c.l.b16 %v7015_v17  ;;  %v6921_v46 = vsel %vm1437_vm2, %v13153_v57, 0.0  ;;  %v3982_v17 = vadd.f32 %v13521_v58, %v13520_v6 }
 0xf18   : > { %8899 = vpow2.f32 %v6830_v20  ;;  %v7186_v44 = vpop.f32.mrf.mxu1  ;;  %v7451_v62 = vpop.f32.mrf.mxu0  ;;  %6922 = vadd.xlane.f32.xlu1 %v6921_v46 }
 0xf19   : > { %v7527_v56 = vadd.f32 %v7451_v62, %v5771_v26  ;;  %v7214_v27 = vpack.c.b16 %v7209_v38, %v7208_v16 }
 0xf1a   : > { %v8898_v43 = vpop.eup %8897 }
 0xf1b   : > { %v7563_v23 = vadd.f32 %v13122_v30, %v7527_v56  ;;  %v6737_v36 = vpop.xlane.xlu1 %6736  ;;  %v6905_v0 = vpop.xlane.xlu2 %6904  ;;  %8296 = vmatmul.msk.bf16.gmra.mxu2 %vm1437_vm2, %v7214_v27  ;;  %v6984_v14 = vmul.f32 %v8898_v43, %v13058_v40 }
 0xf1c   : > { %v6769_v28 = vsub.f32 %v13069_v48, %v6737_v36  ;;  %8901 = vrcp.f32 %v6905_v0 }
 0xf1d   : > { %7595 = vst.msk [vmem:[%s13128_s14 + $0x18] sm:$0xff] %vm572_vm0, %v7563_v23  ;;  %v7016_v12 = vpack.c.bf16 %v6984_v14, %v6984_v14 }
 0xf1e   : > { %v13163_v5 = vpop.eup %8899  ;;  %v6832_v29 = vmul.f32 1.442695, %v6769_v28 }
 0xf1f   : > { %v6924_v53 = vsel %vm1437_vm2, %v13163_v5, 0.0  ;;  %v7210_v37 = vunpack.c.l.b16 %v7016_v12 }
 0xf20   : > { %8903 = vpow2.f32 %v6832_v29  ;;  %v7188_v18 = vpop.f32.mrf.mxu1  ;;  %v7454_v3 = vpop.f32.mrf.mxu0  ;;  %6925 = vadd.xlane.f32.xlu2 %v6924_v53 }
 0xf21   : > { %v7372_v32 = vpack.c.bf16 %v7188_v18, %v7186_v44  ;;  %v7528_v54 = vadd.f32 %v7454_v3, %v12196_v19  ;;  %v5773_v19 = vadd.f32 %v12202_v21, %v3977_v9 }
 0xf22   : > { %v8902_v48 = vpop.eup %8901 }
 0xf23   : > { %v6985_v8 = vmul.f32 %v8902_v48, %v13073_v63  ;;  %v7564_v22 = vadd.f32 %v13122_v30, %v7528_v54  ;;  %8309 = vmatmul.msk.bf16.gmra.mxu0 %vm1072_vm1, %v7372_v32  ;;  %v6908_v40 = vpop.xlane.xlu2 %6907  ;;  %v13523_v54 = vld [vmem:[#allocation10_spill] sm:$0xff] }
 0xf24   : > { %8905 = vrcp.f32 %v6908_v40  ;;  %v13526_v40 = vld [vmem:[#allocation58_spill] sm:$0xff] }
 0xf25   : > { %v7017_v11 = vpack.c.bf16 %v6985_v8, %v6985_v8  ;;  %7596 = vst.msk [vmem:[%s13128_s14 + $0x20] sm:$0xff] %vm572_vm0, %v7564_v22  ;;  %v13524_v8 = vld [vmem:[#allocation15_spill] sm:$0xff]  ;;  %v13525_v22 = vld [vmem:[#allocation9_spill] sm:$0xff] }
 0xf26   : > { %v13176_v2 = vpop.eup %8903 }
 0xf27   : > { %v7211_v7 = vunpack.c.l.b16 %v7017_v11  ;;  %v6927_v63 = vsel %vm1437_vm2, %v13176_v2, 0.0 }
 0xf28   : > { %v7456_v55 = vpop.f32.mrf.mxu0  ;;  %6928 = vadd.xlane.f32.xlu0 %v6927_v63  ;;  %v7191_v39 = vpop.f32.mrf.mxu1 }
 0xf29   : > { %v7529_v24 = vadd.f32 %v7456_v55, %v5773_v19  ;;  %v7215_v13 = vpack.c.b16 %v7211_v7, %v7210_v37 }
 0xf2a   : > { %v8906_v50 = vpop.eup %8905 }
 0xf2b   : > { %v7565_v47 = vadd.f32 %v13122_v30, %v7529_v24  ;;  %8297 = vmatmul.msk.bf16.gmra.mxu2 %vm1437_vm2, %v7215_v13  ;;  %v6911_v41 = vpop.xlane.xlu0 %6910  ;;  %v6986_v21 = vmul.f32 %v8906_v50, %v13081_v25  ;;  %v13522_v25 = vld [vmem:[#allocation57_spill] sm:$0xff] }
 0xf2c   : > { %8907 = vrcp.f32 %v6911_v41  ;;  %v5775_v26 = vadd.f32 %v13522_v25, %v3982_v17 }
 0xf2d   : > { %7597 = vst.msk [vmem:[%s13128_s14 + $0x28] sm:$0xff] %vm572_vm0, %v7565_v47  ;;  %v7018_v4 = vpack.c.bf16 %v6986_v21, %v6986_v21 }
 0xf30   : > { %v7193_v35 = vpop.f32.mrf.mxu1  ;;  %v7459_v60 = vpop.f32.mrf.mxu0 }
 0xf31   : > { %v7373_v15 = vpack.c.bf16 %v7193_v35, %v7191_v39  ;;  %v7530_v33 = vadd.f32 %v7459_v60, %v12213_v1  ;;  %v7289_v1 = vunpack.c.l.b16 %v7018_v4  ;;  %v13527_v39 = vld [vmem:[#allocation25_spill] sm:$0xff]  ;;  %v13528_v35 = vld [vmem:[#allocation26_spill] sm:$0xff]  ;;  %v13529_v60 = vld [vmem:[#allocation16_spill] sm:$0xff] }
 0xf32   : > { %v8908_v42 = vpop.eup %8907 }
 0xf33   : > { %v6987_v45 = vmul.f32 %v8908_v42, %v13089_v61  ;;  %v7566_v52 = vadd.f32 %v13122_v30, %v7530_v33  ;;  %v6914_v10 = vpop.xlane.xlu1 %6913  ;;  %8310 = vmatmul.msk.bf16.gmra.mxu0 %vm1072_vm1, %v7373_v15  ;;  %v3992_v15 = vadd.f32 %v13529_v60, %v13528_v35  ;;  %v13542_v60 = vld [vmem:[#allocation32_spill] sm:$0xff] }
 0xf34   : > { %8909 = vrcp.f32 %v6914_v10 }
 0xf35   : > { %v7019_v20 = vpack.c.bf16 %v6987_v45, %v6987_v45  ;;  %7598 = vst.msk [vmem:[%s13128_s14 + $0x30] sm:$0xff] %vm572_vm0, %v7566_v52 }
 0xf37   : > { %v7290_v16 = vunpack.c.l.b16 %v7019_v20 }
 0xf38   : > { %v7461_v38 = vpop.f32.mrf.mxu0 }
 0xf39   : > { %v7297_v46 = vpack.c.b16 %v7290_v16, %v7289_v1  ;;  %v7531_v61 = vadd.f32 %v7461_v38, %v5775_v26  ;;  %v13531_v38 = vld [vmem:[#allocation28_spill] sm:$0xff] }
 0xf3a   : > { %v8910_v56 = vpop.eup %8909 }
 0xf3b   : > { %v7567_v44 = vadd.f32 %v13122_v30, %v7531_v61  ;;  %v6917_v62 = vpop.xlane.xlu2 %6916  ;;  %8298 = vmatmul.msk.bf16.vlgmr.msrb.gmra.mxu3 %vm1437_vm2, %v7297_v46  ;;  %v6988_v23 = vmul.f32 %v8910_v56, %v13095_v49 }
 0xf3c   : > { %8911 = vrcp.f32 %v6917_v62 }
 0xf3d   : > { %7599 = vst.msk [vmem:[%s13128_s14 + $0x38] sm:$0xff] %vm572_vm0, %v7567_v44  ;;  %v7020_v0 = vpack.c.bf16 %v6988_v23, %v6988_v23  ;;  %v13533_v23 = vld [vmem:[#allocation27_spill] sm:$0xff] }
 0xf3e   : > { %v7261_v27 = vpop.f32.mrf.mxu2 }
 0xf3f   : > { %v7291_v14 = vunpack.c.l.b16 %v7020_v0 }
 0xf42   : > { %v8912_v36 = vpop.eup %8911 }
 0xf43   : > { %v6989_v43 = vmul.f32 %v8912_v36, %v13100_v31  ;;  %v6920_v49 = vpop.xlane.xlu0 %6919  ;;  %v3987_v31 = vadd.f32 %v13525_v22, %v13524_v8  ;;  %v13536_v22 = vld [vmem:[#allocation39_spill] sm:$0xff] }
 0xf44   : > { %8913 = vrcp.f32 %v6920_v49  ;;  %v13535_v49 = vld [vmem:[#allocation31_spill] sm:$0xff] }
 0xf45   : > { %v7021_v28 = vpack.c.bf16 %v6989_v43, %v6989_v43  ;;  %v5777_v59 = vadd.f32 %v13526_v40, %v3987_v31  ;;  %v13537_v31 = vld [vmem:[#allocation30_spill] sm:$0xff] }
 0xf46   : > { %v7263_v29 = vpop.f32.mrf.mxu2  ;;  %v4002_v40 = vadd.f32 %v13537_v31, %v13536_v22  ;;  %v13553_v22 = vld [vmem:[#allocation24_spill] sm:$0xff] }
 0xf47   : > { %v7292_v53 = vunpack.c.l.b16 %v7021_v28  ;;  %v7374_v18 = vpack.c.bf16 %v7263_v29, %v7261_v27  ;;  %v13532_v27 = vld [vmem:[#allocation29_spill] sm:$0xff]  ;;  %v13534_v28 = vld [vmem:[#allocation60_spill] sm:$0xff] }
 0xf48   : > { %v3997_v36 = vadd.f32 %v13533_v23, %v13532_v27  ;;  %v13547_v27 = vld [vmem:[#allocation45_spill] sm:$0xff] }
 0xf49   : > { %8311 = vmatmul.msk.bf16.gmra.mxu0 %vm1072_vm1, %v7374_v18  ;;  %v7298_v3 = vpack.c.b16 %v7292_v53, %v7291_v14 }
 0xf4a   : > { %v8914_v37 = vpop.eup %8913  ;;  %v5781_v29 = vadd.f32 %v13534_v28, %v3997_v36 }
 0xf4b   : > { %8299 = vmatmul.msk.bf16.gmra.mxu3 %vm1437_vm2, %v7298_v3  ;;  %v6990_v63 = vmul.f32 %v8914_v37, %v13104_v51  ;;  %v13530_v51 = vld [vmem:[#allocation59_spill] sm:$0xff] }
 0xf4c   : > { %v5779_v4 = vadd.f32 %v13530_v51, %v3992_v15 }
 0xf4d   : > { %v7022_v47 = vpack.c.bf16 %v6990_v63, %v6990_v63 }
 0xf4f   : > { %v7293_v45 = vunpack.c.l.b16 %v7022_v47 }
 0xf80   : > { %v7464_v32 = vpop.f32.mrf.mxu0 }
 0xf81   : > { %v7532_v48 = vadd.f32 %v7464_v32, %v13523_v54 }
 0xf83   : > { %v7568_v12 = vadd.f32 %v13122_v30, %v7532_v48 }
 0xf85   : > { %7600 = vst.msk [vmem:[%s13128_s14 + $0x40] sm:$0xff] %vm572_vm0, %v7568_v12 }
 0xf88   : > { %v7466_v34 = vpop.f32.mrf.mxu0 }
 0xf89   : > { %v7533_v9 = vadd.f32 %v7466_v34, %v5777_v59  ;;  %v13538_v34 = vld [vmem:[#allocation61_spill] sm:$0xff] }
 0xf8b   : > { %v7569_v11 = vadd.f32 %v13122_v30, %v7533_v9  ;;  %v6923_v19 = vpop.xlane.xlu1 %6922  ;;  %v5783_v9 = vadd.f32 %v13538_v34, %v4002_v40  ;;  %v13554_v40 = vld [vmem:[#allocation21_spill] sm:$0xff] }
 0xf8c   : > { %8915 = vrcp.f32 %v6923_v19 }
 0xf8d   : > { %7601 = vst.msk [vmem:[%s13128_s14 + $0x48] sm:$0xff] %vm572_vm0, %v7569_v11 }
 0xf8e   : > { %v7266_v7 = vpop.f32.mrf.mxu2 }
 0xf90   : > { %v7469_v55 = vpop.f32.mrf.mxu0 }
 0xf91   : > { %v7534_v24 = vadd.f32 %v7469_v55, %v13527_v39 }
 0xf92   : > { %v8916_v13 = vpop.eup %8915 }
 0xf93   : > { %v6991_v41 = vmul.f32 %v8916_v13, %v13153_v57  ;;  %v7570_v50 = vadd.f32 %v13122_v30, %v7534_v24  ;;  %v6926_v21 = vpop.xlane.xlu2 %6925  ;;  %v13539_v13 = vld [vmem:[#allocation41_spill] sm:$0xff] }
 0xf94   : > { %8917 = vrcp.f32 %v6926_v21  ;;  %v13541_v21 = vld [vmem:[#allocation17_spill] sm:$0xff] }
 0xf95   : > { %v7023_v33 = vpack.c.bf16 %v6991_v41, %v6991_v41  ;;  %7602 = vst.msk [vmem:[%s13128_s14 + $0x50] sm:$0xff] %vm572_vm0, %v7570_v50  ;;  %v13540_v50 = vld [vmem:[#allocation42_spill] sm:$0xff] }
 0xf96   : > { %v7268_v42 = vpop.f32.mrf.mxu2  ;;  %v4007_v35 = vadd.f32 %v13541_v21, %v13540_v50 }
 0xf97   : > { %v7294_v52 = vunpack.c.l.b16 %v7023_v33  ;;  %v7375_v10 = vpack.c.bf16 %v7268_v42, %v7266_v7 }
 0xf98   : > { %v7471_v6 = vpop.f32.mrf.mxu0  ;;  %v5785_v15 = vadd.f32 %v13542_v60, %v4007_v35  ;;  %v13559_v60 = vld [vmem:[#allocation51_spill] sm:$0xff] }
 0xf99   : > { %v7535_v58 = vadd.f32 %v7471_v6, %v5779_v4  ;;  %8312 = vmatmul.msk.bf16.gmra.mxu0 %vm1072_vm1, %v7375_v10  ;;  %v7299_v57 = vpack.c.b16 %v7294_v52, %v7293_v45  ;;  %v13543_v6 = vld [vmem:[#allocation43_spill] sm:$0xff] }
 0xf9a   : > { %v8918_v25 = vpop.eup %8917 }
 0xf9b   : > { %v7571_v17 = vadd.f32 %v13122_v30, %v7535_v58  ;;  %8300 = vmatmul.msk.bf16.gmra.mxu3 %vm1437_vm2, %v7299_v57  ;;  %v6929_v20 = vpop.xlane.xlu0 %6928  ;;  %v6992_v1 = vmul.f32 %v8918_v25, %v13163_v5 }
 0xf9c   : > { %8919 = vrcp.f32 %v6929_v20  ;;  %v13545_v20 = vld [vmem:[#allocation19_spill] sm:$0xff] }
 0xf9d   : > { %7603 = vst.msk [vmem:[%s13128_s14 + $0x58] sm:$0xff] %vm572_vm0, %v7571_v17  ;;  %v7024_v44 = vpack.c.bf16 %v6992_v1, %v6992_v1  ;;  %v13544_v17 = vld [vmem:[#allocation44_spill] sm:$0xff] }
 0xf9e   : > { %v7271_v26 = vpop.f32.mrf.mxu2  ;;  %v4012_v25 = vadd.f32 %v13545_v20, %v13544_v17  ;;  %v13563_v17 = vld [vmem:[#allocation53_spill] sm:$0xff] }
 0xf9f   : > { %v7295_v5 = vunpack.c.l.b16 %v7024_v44 }
 0xfa0   : > { %v7474_v16 = vpop.f32.mrf.mxu0 }
 0xfa1   : > { %v7536_v46 = vadd.f32 %v7474_v16, %v13531_v38 }
 0xfa2   : > { %v8920_v61 = vpop.eup %8919 }
 0xfa3   : > { %v6993_v62 = vmul.f32 %v8920_v61, %v13176_v2  ;;  %v7572_v56 = vadd.f32 %v13122_v30, %v7536_v46 }
 0xfa5   : > { %v7025_v0 = vpack.c.bf16 %v6993_v62, %v6993_v62  ;;  %7604 = vst.msk [vmem:[%s13128_s14 + $0x60] sm:$0xff] %vm572_vm0, %v7572_v56 }
 0xfa6   : > { %v7273_v43 = vpop.f32.mrf.mxu2 }
 0xfa7   : > { %v7296_v14 = vunpack.c.l.b16 %v7025_v0  ;;  %v7376_v53 = vpack.c.bf16 %v7273_v43, %v7271_v26  ;;  %v13546_v26 = vld [vmem:[#allocation18_spill] sm:$0xff] }
 0xfa8   : > { %v7476_v18 = vpop.f32.mrf.mxu0  ;;  %v5787_v1 = vadd.f32 %v13546_v26, %v4012_v25  ;;  %v13548_v0 = vld [vmem:[#allocation46_spill] sm:$0xff] }
 0xfa9   : > { %v7537_v3 = vadd.f32 %v7476_v18, %v5781_v29  ;;  %8313 = vmatmul.msk.bf16.gmra.mxu0 %vm1072_vm1, %v7376_v53  ;;  %v7300_v2 = vpack.c.b16 %v7296_v14, %v7295_v5  ;;  %v13549_v43 = vld [vmem:[#allocation22_spill] sm:$0xff]  ;;  %v13550_v29 = vld [vmem:[#allocation20_spill] sm:$0xff] }
 0xfaa   : > { %v4017_v28 = vadd.f32 %v13549_v43, %v13548_v0  ;;  %v13564_v26 = vld [vmem:[#allocation54_spill] sm:$0xff]  ;;  %v13568_v0 = vld [vmem:[#allocation56_spill] sm:$0xff] }
 0xfab   : > { %v7573_v32 = vadd.f32 %v13122_v30, %v7537_v3  ;;  %8301 = vmatmul.msk.bf16.gmra.mxu3 %vm1437_vm2, %v7300_v2  ;;  %v13569_v43 = vld [vmem:[#allocation40_spill] sm:$0xff] }
 0xfac   : > { %v5789_v5 = vadd.f32 %v13550_v29, %v4017_v28  ;;  %v4042_v28 = vadd.f32 %v13569_v43, %v13568_v0  ;;  %v13570_v29 = vld [vmem:[#allocation38_spill] sm:$0xff] }
 0xfad   : > { %7605 = vst.msk [vmem:[%s13128_s14 + $0x68] sm:$0xff] %vm572_vm0, %v7573_v32 }
 0xfae   : > { %v7276_v54 = vpop.f32.mrf.mxu2 }
 0xfb0   : > { %v7479_v48 = vpop.f32.mrf.mxu0 }
 0xfb1   : > { %v7538_v12 = vadd.f32 %v7479_v48, %v13535_v49  ;;  %v13551_v48 = vld [vmem:[#allocation47_spill] sm:$0xff] }
 0xfb3   : > { %v7574_v8 = vadd.f32 %v13122_v30, %v7538_v12 }
 0xfb5   : > { %7606 = vst.msk [vmem:[%s13128_s14 + $0x70] sm:$0xff] %vm572_vm0, %v7574_v8  ;;  %v13552_v8 = vld [vmem:[#allocation48_spill] sm:$0xff] }
 0xfb6   : > { %v7278_v59 = vpop.f32.mrf.mxu2  ;;  %v4022_v31 = vadd.f32 %v13553_v22, %v13552_v8 }
 0xfb7   : > { %v7377_v11 = vpack.c.bf16 %v7278_v59, %v7276_v54 }
 0xfb8   : > { %v7481_v19 = vpop.f32.mrf.mxu0  ;;  %v5791_v59 = vadd.f32 %v13554_v40, %v4022_v31 }
 0xfb9   : > { %v7539_v37 = vadd.f32 %v7481_v19, %v5783_v9  ;;  %8314 = vmatmul.msk.bf16.gmra.mxu0 %vm1072_vm1, %v7377_v11 }
 0xfbb   : > { %v7575_v7 = vadd.f32 %v13122_v30, %v7539_v37  ;;  %v13555_v37 = vld [vmem:[#allocation49_spill] sm:$0xff] }
 0xfbd   : > { %7607 = vst.msk [vmem:[%s13128_s14 + $0x78] sm:$0xff] %vm572_vm0, %v7575_v7 }
 0xfbe   : > { %v7346_v63 = vpop.f32.mrf.mxu3 }
 0xfc6   : > { %v7348_v55 = vpop.f32.mrf.mxu3  ;;  %v7484_v39 = vpop.f32.mrf.mxu0 }
 0xfc7   : > { %v7378_v24 = vpack.c.bf16 %v7348_v55, %v7346_v63  ;;  %v7540_v47 = vadd.f32 %v7484_v39, %v13539_v13  ;;  %v13556_v55 = vld [vmem:[#allocation50_spill] sm:$0xff]  ;;  %v13557_v39 = vld [vmem:[#allocation33_spill] sm:$0xff]  ;;  %v13558_v13 = vld [vmem:[#allocation23_spill] sm:$0xff] }
 0xfc9   : > { %v7576_v41 = vadd.f32 %v13122_v30, %v7540_v47  ;;  %8315 = vmatmul.msk.bf16.gmra.mxu0 %vm1072_vm1, %v7378_v24  ;;  %v4027_v24 = vadd.f32 %v13557_v39, %v13556_v55 }
 0xfcb   : > { %7608 = vst.msk [vmem:[%s13128_s14 + $0x80] sm:$0xff] %vm572_vm0, %v7576_v41  ;;  %v5793_v47 = vadd.f32 %v13558_v13, %v4027_v24 }
 0xfce   : > { %v7351_v33 = vpop.f32.mrf.mxu3  ;;  %v7486_v42 = vpop.f32.mrf.mxu0 }
 0xfcf   : > { %v7541_v51 = vadd.f32 %v7486_v42, %v5785_v15  ;;  %v13560_v42 = vld [vmem:[#allocation52_spill] sm:$0xff] }
 0xfd1   : > { %v7577_v4 = vadd.f32 %v13122_v30, %v7541_v51  ;;  %v13561_v51 = vld [vmem:[#allocation35_spill] sm:$0xff] }
 0xfd3   : > { %7609 = vst.msk [vmem:[%s13128_s14 + $0x88] sm:$0xff] %vm572_vm0, %v7577_v4  ;;  %v4032_v4 = vadd.f32 %v13561_v51, %v13560_v42 }
 0xfd6   : > { %v7353_v45 = vpop.f32.mrf.mxu3 }
 0xfd7   : > { %v7379_v52 = vpack.c.bf16 %v7353_v45, %v7351_v33  ;;  %v13562_v45 = vld [vmem:[#allocation34_spill] sm:$0xff] }
 0xfd9   : > { %8316 = vmatmul.msk.bf16.gmra.mxu0 %vm1072_vm1, %v7379_v52  ;;  %v5795_v52 = vadd.f32 %v13562_v45, %v4032_v4 }
0x1016   : > { %v7489_v10 = vpop.f32.mrf.mxu0 }
0x1017   : > { %v7542_v58 = vadd.f32 %v7489_v10, %v13543_v6 }
0x1019   : > { %v7578_v57 = vadd.f32 %v13122_v30, %v7542_v58 }
0x101b   : > { %7610 = vst.msk [vmem:[%s13128_s14 + $0x90] sm:$0xff] %vm572_vm0, %v7578_v57 }
0x101e   : > { %v7356_v16 = vpop.f32.mrf.mxu3  ;;  %v7491_v38 = vpop.f32.mrf.mxu0 }
0x101f   : > { %v7543_v46 = vadd.f32 %v7491_v38, %v5787_v1  ;;  %v13565_v1 = vld [vmem:[#allocation37_spill] sm:$0xff]  ;;  %v13566_v38 = vld [vmem:[#allocation36_spill] sm:$0xff] }
0x1021   : > { %v7579_v61 = vadd.f32 %v13122_v30, %v7543_v46 }
0x1023   : > { %7611 = vst.msk [vmem:[%s13128_s14 + $0x98] sm:$0xff] %vm572_vm0, %v7579_v61 }
0x1026   : > { %v7358_v44 = vpop.f32.mrf.mxu3  ;;  %v7494_v62 = vpop.f32.mrf.mxu0 }
0x1027   : > { %v7380_v56 = vpack.c.bf16 %v7358_v44, %v7356_v16  ;;  %v7544_v23 = vadd.f32 %v7494_v62, %v13547_v27  ;;  %v4037_v16 = vadd.f32 %v13565_v1, %v13564_v26  ;;  %v13567_v27 = vld [vmem:[#allocation55_spill] sm:$0xff] }
0x1029   : > { %v7580_v36 = vadd.f32 %v13122_v30, %v7544_v23  ;;  %8317 = vmatmul.msk.bf16.gmra.mxu0 %vm1072_vm1, %v7380_v56  ;;  %v5797_v46 = vadd.f32 %v13566_v38, %v4037_v16 }
0x102b   : > { %7612 = vst.msk [vmem:[%s13128_s14 + $0xa0] sm:$0xff] %vm572_vm0, %v7580_v36 }
0x102e   : > { %v7361_v14 = vpop.f32.mrf.mxu3  ;;  %v7496_v53 = vpop.f32.mrf.mxu0 }
0x102f   : > { %v7545_v18 = vadd.f32 %v7496_v53, %v5789_v5  ;;  %v5799_v5 = vadd.f32 %v13570_v29, %v4042_v28 }
0x1031   : > { %v7581_v3 = vadd.f32 %v13122_v30, %v7545_v18 }
0x1033   : > { %7613 = vst.msk [vmem:[%s13128_s14 + $0xa8] sm:$0xff] %vm572_vm0, %v7581_v3 }
0x1036   : > { %v7363_v2 = vpop.f32.mrf.mxu3  ;;  %v7499_v32 = vpop.f32.mrf.mxu0 }
0x1037   : > { %v7381_v54 = vpack.c.bf16 %v7363_v2, %v7361_v14  ;;  %v7546_v49 = vadd.f32 %v7499_v32, %v13551_v48 }
0x1039   : > { %v7582_v12 = vadd.f32 %v13122_v30, %v7546_v49  ;;  %8318 = vmatmul.msk.bf16.gmra.mxu0 %vm1072_vm1, %v7381_v54 }
0x103b   : > { %7614 = vst.msk [vmem:[%s13128_s14 + $0xb0] sm:$0xff] %vm572_vm0, %v7582_v12 }
0x103e   : > { %v7501_v34 = vpop.f32.mrf.mxu0 }
0x103f   : > { %v7547_v9 = vadd.f32 %v7501_v34, %v5791_v59 }
0x1041   : > { %v7583_v11 = vadd.f32 %v13122_v30, %v7547_v9 }
0x1043   : > { %7615 = vst.msk [vmem:[%s13128_s14 + $0xb8] sm:$0xff] %vm572_vm0, %v7583_v11 }
0x1046   : > { %v7504_v19 = vpop.f32.mrf.mxu0 }
0x1047   : > { %v7548_v7 = vadd.f32 %v7504_v19, %v13555_v37 }
0x1049   : > { %v7584_v63 = vadd.f32 %v13122_v30, %v7548_v7 }
0x104b   : > { %7616 = vst.msk [vmem:[%s13128_s14 + $0xc0] sm:$0xff] %vm572_vm0, %v7584_v63 }
0x104e   : > { %v7506_v41 = vpop.f32.mrf.mxu0 }
0x104f   : > { %v7549_v50 = vadd.f32 %v7506_v41, %v5793_v47 }
0x1051   : > { %v7585_v21 = vadd.f32 %v13122_v30, %v7549_v50 }
0x1053   : > { %7617 = vst.msk [vmem:[%s13128_s14 + $0xc8] sm:$0xff] %vm572_vm0, %v7585_v21 }
0x1056   : > { %v7509_v35 = vpop.f32.mrf.mxu0 }
0x1057   : > { %v7550_v15 = vadd.f32 %v7509_v35, %v13559_v60 }
0x1059   : > { %v7586_v33 = vadd.f32 %v13122_v30, %v7550_v15 }
0x105b   : > { %7618 = vst.msk [vmem:[%s13128_s14 + $0xd0] sm:$0xff] %vm572_vm0, %v7586_v33 }
0x105e   : > { %v7511_v10 = vpop.f32.mrf.mxu0 }
0x105f   : > { %v7551_v6 = vadd.f32 %v7511_v10, %v5795_v52 }
0x1061   : > { %v7587_v58 = vadd.f32 %v13122_v30, %v7551_v6 }
0x1063   : > { %7619 = vst.msk [vmem:[%s13128_s14 + $0xd8] sm:$0xff] %vm572_vm0, %v7587_v58 }
0x10a6   : > { %v7514_v57 = vpop.f32.mrf.mxu0 }
0x10a7   : > { %v7552_v20 = vadd.f32 %v7514_v57, %v13563_v17 }
0x10a9   : > { %v7588_v25 = vadd.f32 %v13122_v30, %v7552_v20 }
0x10ab   : > { %7620 = vst.msk [vmem:[%s13128_s14 + $0xe0] sm:$0xff] %vm572_vm0, %v7588_v25 }
0x10ae   : > { %v7516_v61 = vpop.f32.mrf.mxu0 }
0x10af   : > { %v7553_v44 = vadd.f32 %v7516_v61, %v5797_v46 }
0x10b1   : > { %v7589_v62 = vadd.f32 %v13122_v30, %v7553_v44 }
0x10b3   : > { %7621 = vst.msk [vmem:[%s13128_s14 + $0xe8] sm:$0xff] %vm572_vm0, %v7589_v62 }
0x10b6   : > { %v7519_v56 = vpop.f32.mrf.mxu0 }
0x10b7   : > { %v7554_v23 = vadd.f32 %v7519_v56, %v13567_v27 }
0x10b9   : > { %v7590_v36 = vadd.f32 %v13122_v30, %v7554_v23 }
0x10bb   : > { %7622 = vst.msk [vmem:[%s13128_s14 + $0xf0] sm:$0xff] %vm572_vm0, %v7590_v36 }
0x10be   : > { %v7521_v14 = vpop.f32.mrf.mxu0 }
0x10bf   : > { %v7555_v53 = vadd.f32 %v7521_v14, %v5799_v5 }
0x10c1   : > { %v7591_v18 = vadd.f32 %v13122_v30, %v7555_v53 }
0x10c3   : > { %7623 = vst.msk [vmem:[%s13128_s14 + $0xf8] sm:$0xff] %vm572_vm0, %v7591_v18 }
0x10c4 PF: > { %s22_s17 = sadd.s32 1, %s9148_s17  }
0x10c5   : > { %p19_p7 = scmp.ge.s32.totalorder %s22_s17, 4  }
0x10c7   :  { %21 = sbr.rel (!%p19_p7) target bundleno = 1 (0x1), region = 123 }
0x10cc   :  { %7646 = vsyncpa [#allocation3], 1 }
0x10cd   :  { %7648 = vsyncpa [#allocation3 + $0x1], 1 }

</bundles_post_ra>
